<compile_context>
chip_gen: v7x
topology: tpu7x:2x2x1
jax: 0.10.0
libtpu: 0.0.40
codegen_flags: <defaults>
</compile_context>

<pallas_src>
import jax
import jax.numpy as jnp
from jax import lax
from jax.experimental import pallas as pl
from jax.experimental.pallas import tpu as pltpu

_PAD = 8            # spatial halo = max dilation (covers dilations 1, 4, 8)
_LRELU_SLOPE = 0.1  # nn.LeakyReLU(0.1) in the PyTorch module (NOT the 0.01 default)
_BN_EPS = 1e-5      # nn.BatchNorm2d default


# ---------------------------------------------------------------------------
# Fused Pallas kernel
# ---------------------------------------------------------------------------
def _make_er_kernel(C, Wp, L):
    """Build the fused ER kernel; static shapes are closed over."""
    dilations = (1, 4, 8)

    def kernel(xp_ref, mask_ref, wbr_ref, bbr_ref, wb1_ref, bb1_ref,
               wr_ref, br_ref, o_ref):
        # xp_ref  : (1, C, L)    bf16  zero-padded image, channel-major, flat spatial
        # mask_ref: (1, L)       f32   1.0 on interior pixels, 0.0 on the halo
        # wbr_ref : (3, 9, C, C) bf16  branch conv weights (BN scale folded), [b, tap, co, ci]
        # bbr_ref : (3, C, 1)    f32   branch BN biases
        # wb1_ref : (3, 9, C, C) bf16  bottleneck conv weights, Cin split per branch
        # bb1_ref : (C, 1)       f32   bottleneck BN bias
        # wr_ref  : (C, C)       bf16  1x1 residual conv (BN scale folded)
        # br_ref  : (C, 1)       f32   residual BN bias
        # o_ref   : (1, C, L)    f32   padded output frame (interior sliced in glue)
        xb = xp_ref[0]                          # (C, L) bf16
        xf = xb.astype(jnp.float32)             # rolled in f32 (robust layout)
        mask = mask_ref[...]                    # (1, L)

        def tap(src_f32, delta):
            # tap[:, i] == src[:, i + delta]  (valid for every interior column;
            # wrapped halo columns are masked / sliced away later)
            if delta == 0:
                t = src_f32
            else:
                t = pltpu.roll(src_f32, (-delta) % L, axis=1)
            return t.astype(jnp.bfloat16)

        # ---- three dilated 3x3 conv branches (shift-and-matmul) ----------
        cat_parts = []
        for b, d in enumerate(dilations):
            acc = jnp.zeros((C, L), jnp.float32)
            for ky in range(3):
                for kx in range(3):
                    delta = (ky - 1) * d * Wp + (kx - 1) * d
                    acc = acc + jnp.dot(wbr_ref[b, 3 * ky + kx],
                                        tap(xf, delta),
                                        preferred_element_type=jnp.float32)
            y = acc + bbr_ref[b]                                  # folded BN bias
            y = jnp.where(y > 0, y, _LRELU_SLOPE * y)             # LeakyReLU(0.1)
            # zero the halo: acts as the zero padding of the b_1 3x3 conv
            cat_parts.append(y * mask)

        # ---- 3x3 bottleneck conv over the (virtual) channel-concat -------
        b1 = jnp.zeros((C, L), jnp.float32)
        for b in range(3):
            for ky in range(3):
                for kx in range(3):
                    delta = (ky - 1) * Wp + (kx - 1)
                    b1 = b1 + jnp.dot(wb1_ref[b, 3 * ky + kx],
                                      tap(cat_parts[b], delta),
                                      preferred_element_type=jnp.float32)
        b1 = b1 + bb1_ref[...]

        # ---- 1x1 residual conv + final ReLU -------------------------------
        res = jnp.dot(wr_ref[...], xb,
                      preferred_element_type=jnp.float32) + br_ref[...]
        o_ref[0] = jnp.maximum(b1 + res, 0.0)

    return kernel


# ---------------------------------------------------------------------------
# Host-side parameter folding helpers
# ---------------------------------------------------------------------------
def _fold_bn_into_conv(w_oihw, bn):
    gamma, beta, mean, var = bn
    scale = gamma / jnp.sqrt(var + _BN_EPS)
    bias = (beta - mean * scale).reshape(-1, 1)
    return w_oihw * scale[:, None, None, None], bias


def _taps_cout_cin(w_oihw):
    """(Cout, Cin, 3, 3) -> (9, Cout, Cin) with tap index t = 3*ky + kx."""
    cout, cin = w_oihw.shape[0], w_oihw.shape[1]
    return jnp.transpose(w_oihw, (2, 3, 0, 1)).reshape(9, cout, cin)


# ---------------------------------------------------------------------------
# ER forward (Pallas)
# ---------------------------------------------------------------------------
@jax.jit
def er_forward_pallas(x_nchw, params):
    N, C, H, W = x_nchw.shape
    P = _PAD
    Hp, Wp = H + 2 * P, W + 2 * P
    L = Hp * Wp

    # --- fold BN into weights, build bf16 weight tensors -------------------
    wbr, bbr = [], []
    for wk, bk in (("w1", "bn1"), ("w2", "bn2"), ("w3", "bn3")):
        w, b = _fold_bn_into_conv(params[wk], params[bk])
        wbr.append(_taps_cout_cin(w))
        bbr.append(b)
    wbr = jnp.stack(wbr, 0).astype(jnp.bfloat16)          # (3, 9, C, C)
    bbr = jnp.stack(bbr, 0)                                # (3, C, 1) f32

    wb, bb1 = _fold_bn_into_conv(params["wb"], params["bnb"])    # (C, 3C, 3, 3)
    wb1 = jnp.stack([_taps_cout_cin(wb[:, b * C:(b + 1) * C])
                     for b in range(3)], 0).astype(jnp.bfloat16)  # (3, 9, C, C)

    wr, br = _fold_bn_into_conv(params["wr"], params["bnr"])      # (C, C, 1, 1)
    wr = wr[:, :, 0, 0].astype(jnp.bfloat16)               # (Cout, Cin)

    # --- input layout: channel-major, flattened zero-padded spatial --------
    xp = jnp.pad(x_nchw.astype(jnp.float32),
                 ((0, 0), (0, 0), (P, P), (P, P)))
    xp = xp.reshape(N, C, L).astype(jnp.bfloat16)

    hh = jnp.arange(Hp)
    ww = jnp.arange(Wp)
    interior = (((hh >= P) & (hh < P + H))[:, None]
                & ((ww >= P) & (ww < P + W))[None, :])
    mask = interior.astype(jnp.float32).reshape(1, L)

    kernel = _make_er_kernel(C, Wp, L)
    out_flat = pl.pallas_call(
        kernel,
        out_shape=jax.ShapeDtypeStruct((N, C, L), jnp.float32),
        grid_spec=pltpu.PrefetchScalarGridSpec(
            num_scalar_prefetch=0,
            grid=(N,),
            in_specs=[
                pl.BlockSpec((1, C, L), lambda n: (n, 0, 0)),         # xp
                pl.BlockSpec((1, L), lambda n: (0, 0)),               # mask
                pl.BlockSpec((3, 9, C, C), lambda n: (0, 0, 0, 0)),   # wbr
                pl.BlockSpec((3, C, 1), lambda n: (0, 0, 0)),         # bbr
                pl.BlockSpec((3, 9, C, C), lambda n: (0, 0, 0, 0)),   # wb1
                pl.BlockSpec((C, 1), lambda n: (0, 0)),               # bb1
                pl.BlockSpec((C, C), lambda n: (0, 0)),               # wr
                pl.BlockSpec((C, 1), lambda n: (0, 0)),               # br
            ],
            out_specs=pl.BlockSpec((1, C, L), lambda n: (n, 0, 0)),
        ),
        compiler_params=pltpu.CompilerParams(
            dimension_semantics=("parallel",)),
    )(xp, mask, wbr, bbr, wb1, bb1, wr, br)

    # strip the padded frame (layout plumbing only) -> NCHW output
    out = out_flat.reshape(N, C, Hp, Wp)[:, :, P:P + H, P:P + W]
    return out


# ---------------------------------------------------------------------------
# Pure-JAX f32 reference (matches the PyTorch module semantics)
# ---------------------------------------------------------------------------
def er_forward_ref(x_nchw, params):
    x = x_nchw.astype(jnp.float32)

    def conv(xin, w, pad, dil):
        return lax.conv_general_dilated(
            xin, w, (1, 1), [(pad, pad), (pad, pad)],
            rhs_dilation=(dil, dil),
            dimension_numbers=("NCHW", "OIHW", "NCHW"))

    def bn(y, p):
        gamma, beta, mean, var = p
        s = gamma / jnp.sqrt(var + _BN_EPS)
        b = beta - mean * s
        return y * s[None, :, None, None] + b[None, :, None, None]

    def lrelu(y):
        return jnp.where(y > 0, y, _LRELU_SLOPE * y)

    b1 = lrelu(bn(conv(x, params["w1"], 1, 1), params["bn1"]))
    b2 = lrelu(bn(conv(x, params["w2"], 4, 4), params["bn2"]))
    b3 = lrelu(bn(conv(x, params["w3"], 8, 8), params["bn3"]))
    cat = jnp.concatenate([b1, b2, b3], axis=1)
    bcat = bn(conv(cat, params["wb"], 1, 1), params["bnb"])
    res = bn(conv(x, params["wr"], 0, 1), params["bnr"])
    return jnp.maximum(bcat + res, 0.0)


# ---------------------------------------------------------------------------
# Deterministic synthetic parameters (matches ER.__init__ shapes)
# ---------------------------------------------------------------------------
def init_params(key, C):
    ks = jax.random.split(key, 10)

    def conv_w(k, cout, cin, kh, kw):
        return 0.1 * jax.random.normal(k, (cout, cin, kh, kw), jnp.float32)

    def bn(k, c):
        k1, k2, k3, k4 = jax.random.split(k, 4)
        gamma = 0.5 + jax.random.uniform(k1, (c,), jnp.float32)
        beta = 0.1 * jax.random.normal(k2, (c,), jnp.float32)
        mean = 0.1 * jax.random.normal(k3, (c,), jnp.float32)
        var = 0.5 + jax.random.uniform(k4, (c,), jnp.float32)
        return gamma, beta, mean, var

    return {
        "w1": conv_w(ks[0], C, C, 3, 3), "bn1": bn(ks[1], C),
        "w2": conv_w(ks[2], C, C, 3, 3), "bn2": bn(ks[3], C),
        "w3": conv_w(ks[4], C, C, 3, 3), "bn3": bn(ks[5], C),
        "wb": conv_w(ks[6], C, 3 * C, 3, 3), "bnb": bn(ks[7], C),
        "wr": conv_w(ks[8], C, C, 1, 1), "bnr": bn(ks[9], C),
    }


# ---------------------------------------------------------------------------
if __name__ == "__main__":
    key = jax.random.PRNGKey(0)
    k_x, k_p = jax.random.split(key)

    N, C, H, W = 2, 4, 16, 16
    x = jax.random.normal(k_x, (N, C, H, W), jnp.float32)
    params = init_params(k_p, C)

    out = jax.block_until_ready(er_forward_pallas(x, params))
    ref = jax.block_until_ready(er_forward_ref(x, params))

    assert out.shape == (N, C, H, W)
    # bf16 MXU operands (f32 accumulation) vs. full-f32 reference -> scale-aware
    # tolerance; a semantic bug (wrong tap / weight / shift) gives errors on the
    # order of the output magnitude, far above this bound.
    err = float(jnp.max(jnp.abs(out - ref)))
    ref_scale = float(jnp.max(jnp.abs(ref)))
    tol = 1e-2 + 2e-2 * max(1.0, ref_scale)
    assert err < tol, f"max abs err = {err} (tol = {tol})"

    print("KERNEL_OK")
</pallas_src>

<mosaic_0001>
module attributes {stable_mosaic.version = 11 : i64} {
  func.func @kernel(%arg0: i32, %arg1: memref<1x4x1024xbf16, #tpu.memory_space<vmem>>, %arg2: memref<1x1024xf32, #tpu.memory_space<vmem>>, %arg3: memref<3x9x4x4xbf16, #tpu.memory_space<vmem>>, %arg4: memref<3x4x1xf32, #tpu.memory_space<vmem>>, %arg5: memref<3x9x4x4xbf16, #tpu.memory_space<vmem>>, %arg6: memref<4x1xf32, #tpu.memory_space<vmem>>, %arg7: memref<4x4xbf16, #tpu.memory_space<vmem>>, %arg8: memref<4x1xf32, #tpu.memory_space<vmem>>, %arg9: memref<1x4x1024xf32, #tpu.memory_space<vmem>>) attributes {dimension_semantics = [#tpu.dimension_semantics<parallel>], iteration_bounds = array<i64: 2>, scalar_prefetch = 0 : i64, scratch_operands = 0 : i64, tpu.core_type = #tpu.core_type<tc>, window_params = [{transform_indices = @transform_0, window_bounds = array<i64: 1, 4, 1024>}, {pipeline_mode = #tpu.pipeline_mode<synchronous>, transform_indices = @transform_1, window_bounds = array<i64: 1, 1024>}, {pipeline_mode = #tpu.pipeline_mode<synchronous>, transform_indices = @transform_2, window_bounds = array<i64: 3, 9, 4, 4>}, {pipeline_mode = #tpu.pipeline_mode<synchronous>, transform_indices = @transform_3, window_bounds = array<i64: 3, 4, 1>}, {pipeline_mode = #tpu.pipeline_mode<synchronous>, transform_indices = @transform_4, window_bounds = array<i64: 3, 9, 4, 4>}, {pipeline_mode = #tpu.pipeline_mode<synchronous>, transform_indices = @transform_5, window_bounds = array<i64: 4, 1>}, {pipeline_mode = #tpu.pipeline_mode<synchronous>, transform_indices = @transform_6, window_bounds = array<i64: 4, 4>}, {pipeline_mode = #tpu.pipeline_mode<synchronous>, transform_indices = @transform_7, window_bounds = array<i64: 4, 1>}, {transform_indices = @transform_8, window_bounds = array<i64: 1, 4, 1024>}]} {
    %c0 = arith.constant 0 : index
    %c0_0 = arith.constant 0 : index
    %c0_1 = arith.constant 0 : index
    %0 = vector.load %arg1[%c0, %c0_0, %c0_1] : memref<1x4x1024xbf16, #tpu.memory_space<vmem>>, vector<1x4x1024xbf16>
    %1 = vector.shape_cast %0 : vector<1x4x1024xbf16> to vector<4x1024xbf16>
    %2 = arith.extf %1 : vector<4x1024xbf16> to vector<4x1024xf32>
    %c0_2 = arith.constant 0 : index
    %c0_3 = arith.constant 0 : index
    %3 = vector.load %arg2[%c0_2, %c0_3] : memref<1x1024xf32, #tpu.memory_space<vmem>>, vector<1x1024xf32>
    %cst = arith.constant 0.000000e+00 : f32
    %4 = vector.broadcast %cst : f32 to vector<4x1024xf32>
    %c0_4 = arith.constant 0 : index
    %c0_5 = arith.constant 0 : index
    %c0_6 = arith.constant 0 : index
    %c0_7 = arith.constant 0 : index
    %5 = vector.load %arg3[%c0_4, %c0_5, %c0_6, %c0_7] : memref<3x9x4x4xbf16, #tpu.memory_space<vmem>>, vector<1x1x4x4xbf16>
    %6 = vector.shape_cast %5 : vector<1x1x4x4xbf16> to vector<4x4xbf16>
    %c33_i32 = arith.constant 33 : i32
    %7 = tpu.dynamic_rotate %2 by %c33_i32 dim 1 : vector<4x1024xf32>, i32 -> vector<4x1024xf32>
    %8 = arith.truncf %7 : vector<4x1024xf32> to vector<4x1024xbf16>
    %cst_8 = arith.constant dense<0.000000e+00> : vector<4x1024xf32>
    %9 = tpu.matmul %6, %8, %cst_8 {dimension_numbers = #tpu.dot_dimension_numbers<[1], [0], [0], [1], [0, 0, 1, 1], [], []>} : vector<4x4xbf16>, vector<4x1024xbf16>, vector<4x1024xf32> -> vector<4x1024xf32>
    %10 = arith.addf %4, %9 : vector<4x1024xf32>
    %c0_9 = arith.constant 0 : index
    %c1 = arith.constant 1 : index
    %c0_10 = arith.constant 0 : index
    %c0_11 = arith.constant 0 : index
    %11 = vector.load %arg3[%c0_9, %c1, %c0_10, %c0_11] : memref<3x9x4x4xbf16, #tpu.memory_space<vmem>>, vector<1x1x4x4xbf16>
    %12 = vector.shape_cast %11 : vector<1x1x4x4xbf16> to vector<4x4xbf16>
    %c32_i32 = arith.constant 32 : i32
    %13 = tpu.dynamic_rotate %2 by %c32_i32 dim 1 : vector<4x1024xf32>, i32 -> vector<4x1024xf32>
    %14 = arith.truncf %13 : vector<4x1024xf32> to vector<4x1024xbf16>
    %cst_12 = arith.constant dense<0.000000e+00> : vector<4x1024xf32>
    %15 = tpu.matmul %12, %14, %cst_12 {dimension_numbers = #tpu.dot_dimension_numbers<[1], [0], [0], [1], [0, 0, 1, 1], [], []>} : vector<4x4xbf16>, vector<4x1024xbf16>, vector<4x1024xf32> -> vector<4x1024xf32>
    %16 = arith.addf %10, %15 : vector<4x1024xf32>
    %c0_13 = arith.constant 0 : index
    %c2 = arith.constant 2 : index
    %c0_14 = arith.constant 0 : index
    %c0_15 = arith.constant 0 : index
    %17 = vector.load %arg3[%c0_13, %c2, %c0_14, %c0_15] : memref<3x9x4x4xbf16, #tpu.memory_space<vmem>>, vector<1x1x4x4xbf16>
    %18 = vector.shape_cast %17 : vector<1x1x4x4xbf16> to vector<4x4xbf16>
    %c31_i32 = arith.constant 31 : i32
    %19 = tpu.dynamic_rotate %2 by %c31_i32 dim 1 : vector<4x1024xf32>, i32 -> vector<4x1024xf32>
    %20 = arith.truncf %19 : vector<4x1024xf32> to vector<4x1024xbf16>
    %cst_16 = arith.constant dense<0.000000e+00> : vector<4x1024xf32>
    %21 = tpu.matmul %18, %20, %cst_16 {dimension_numbers = #tpu.dot_dimension_numbers<[1], [0], [0], [1], [0, 0, 1, 1], [], []>} : vector<4x4xbf16>, vector<4x1024xbf16>, vector<4x1024xf32> -> vector<4x1024xf32>
    %22 = arith.addf %16, %21 : vector<4x1024xf32>
    %c0_17 = arith.constant 0 : index
    %c3 = arith.constant 3 : index
    %c0_18 = arith.constant 0 : index
    %c0_19 = arith.constant 0 : index
    %23 = vector.load %arg3[%c0_17, %c3, %c0_18, %c0_19] : memref<3x9x4x4xbf16, #tpu.memory_space<vmem>>, vector<1x1x4x4xbf16>
    %24 = vector.shape_cast %23 : vector<1x1x4x4xbf16> to vector<4x4xbf16>
    %c1_i32 = arith.constant 1 : i32
    %25 = tpu.dynamic_rotate %2 by %c1_i32 dim 1 : vector<4x1024xf32>, i32 -> vector<4x1024xf32>
    %26 = arith.truncf %25 : vector<4x1024xf32> to vector<4x1024xbf16>
    %cst_20 = arith.constant dense<0.000000e+00> : vector<4x1024xf32>
    %27 = tpu.matmul %24, %26, %cst_20 {dimension_numbers = #tpu.dot_dimension_numbers<[1], [0], [0], [1], [0, 0, 1, 1], [], []>} : vector<4x4xbf16>, vector<4x1024xbf16>, vector<4x1024xf32> -> vector<4x1024xf32>
    %28 = arith.addf %22, %27 : vector<4x1024xf32>
    %c0_21 = arith.constant 0 : index
    %c4 = arith.constant 4 : index
    %c0_22 = arith.constant 0 : index
    %c0_23 = arith.constant 0 : index
    %29 = vector.load %arg3[%c0_21, %c4, %c0_22, %c0_23] : memref<3x9x4x4xbf16, #tpu.memory_space<vmem>>, vector<1x1x4x4xbf16>
    %30 = vector.shape_cast %29 : vector<1x1x4x4xbf16> to vector<4x4xbf16>
    %31 = arith.truncf %2 : vector<4x1024xf32> to vector<4x1024xbf16>
    %cst_24 = arith.constant dense<0.000000e+00> : vector<4x1024xf32>
    %32 = tpu.matmul %30, %31, %cst_24 {dimension_numbers = #tpu.dot_dimension_numbers<[1], [0], [0], [1], [0, 0, 1, 1], [], []>} : vector<4x4xbf16>, vector<4x1024xbf16>, vector<4x1024xf32> -> vector<4x1024xf32>
    %33 = arith.addf %28, %32 : vector<4x1024xf32>
    %c0_25 = arith.constant 0 : index
    %c5 = arith.constant 5 : index
    %c0_26 = arith.constant 0 : index
    %c0_27 = arith.constant 0 : index
    %34 = vector.load %arg3[%c0_25, %c5, %c0_26, %c0_27] : memref<3x9x4x4xbf16, #tpu.memory_space<vmem>>, vector<1x1x4x4xbf16>
    %35 = vector.shape_cast %34 : vector<1x1x4x4xbf16> to vector<4x4xbf16>
    %c1023_i32 = arith.constant 1023 : i32
    %36 = tpu.dynamic_rotate %2 by %c1023_i32 dim 1 : vector<4x1024xf32>, i32 -> vector<4x1024xf32>
    %37 = arith.truncf %36 : vector<4x1024xf32> to vector<4x1024xbf16>
    %cst_28 = arith.constant dense<0.000000e+00> : vector<4x1024xf32>
    %38 = tpu.matmul %35, %37, %cst_28 {dimension_numbers = #tpu.dot_dimension_numbers<[1], [0], [0], [1], [0, 0, 1, 1], [], []>} : vector<4x4xbf16>, vector<4x1024xbf16>, vector<4x1024xf32> -> vector<4x1024xf32>
    %39 = arith.addf %33, %38 : vector<4x1024xf32>
    %c0_29 = arith.constant 0 : index
    %c6 = arith.constant 6 : index
    %c0_30 = arith.constant 0 : index
    %c0_31 = arith.constant 0 : index
    %40 = vector.load %arg3[%c0_29, %c6, %c0_30, %c0_31] : memref<3x9x4x4xbf16, #tpu.memory_space<vmem>>, vector<1x1x4x4xbf16>
    %41 = vector.shape_cast %40 : vector<1x1x4x4xbf16> to vector<4x4xbf16>
    %c993_i32 = arith.constant 993 : i32
    %42 = tpu.dynamic_rotate %2 by %c993_i32 dim 1 : vector<4x1024xf32>, i32 -> vector<4x1024xf32>
    %43 = arith.truncf %42 : vector<4x1024xf32> to vector<4x1024xbf16>
    %cst_32 = arith.constant dense<0.000000e+00> : vector<4x1024xf32>
    %44 = tpu.matmul %41, %43, %cst_32 {dimension_numbers = #tpu.dot_dimension_numbers<[1], [0], [0], [1], [0, 0, 1, 1], [], []>} : vector<4x4xbf16>, vector<4x1024xbf16>, vector<4x1024xf32> -> vector<4x1024xf32>
    %45 = arith.addf %39, %44 : vector<4x1024xf32>
    %c0_33 = arith.constant 0 : index
    %c7 = arith.constant 7 : index
    %c0_34 = arith.constant 0 : index
    %c0_35 = arith.constant 0 : index
    %46 = vector.load %arg3[%c0_33, %c7, %c0_34, %c0_35] : memref<3x9x4x4xbf16, #tpu.memory_space<vmem>>, vector<1x1x4x4xbf16>
    %47 = vector.shape_cast %46 : vector<1x1x4x4xbf16> to vector<4x4xbf16>
    %c992_i32 = arith.constant 992 : i32
    %48 = tpu.dynamic_rotate %2 by %c992_i32 dim 1 : vector<4x1024xf32>, i32 -> vector<4x1024xf32>
    %49 = arith.truncf %48 : vector<4x1024xf32> to vector<4x1024xbf16>
    %cst_36 = arith.constant dense<0.000000e+00> : vector<4x1024xf32>
    %50 = tpu.matmul %47, %49, %cst_36 {dimension_numbers = #tpu.dot_dimension_numbers<[1], [0], [0], [1], [0, 0, 1, 1], [], []>} : vector<4x4xbf16>, vector<4x1024xbf16>, vector<4x1024xf32> -> vector<4x1024xf32>
    %51 = arith.addf %45, %50 : vector<4x1024xf32>
    %c0_37 = arith.constant 0 : index
    %c8 = arith.constant 8 : index
    %c0_38 = arith.constant 0 : index
    %c0_39 = arith.constant 0 : index
    %52 = vector.load %arg3[%c0_37, %c8, %c0_38, %c0_39] : memref<3x9x4x4xbf16, #tpu.memory_space<vmem>>, vector<1x1x4x4xbf16>
    %53 = vector.shape_cast %52 : vector<1x1x4x4xbf16> to vector<4x4xbf16>
    %c991_i32 = arith.constant 991 : i32
    %54 = tpu.dynamic_rotate %2 by %c991_i32 dim 1 : vector<4x1024xf32>, i32 -> vector<4x1024xf32>
    %55 = arith.truncf %54 : vector<4x1024xf32> to vector<4x1024xbf16>
    %cst_40 = arith.constant dense<0.000000e+00> : vector<4x1024xf32>
    %56 = tpu.matmul %53, %55, %cst_40 {dimension_numbers = #tpu.dot_dimension_numbers<[1], [0], [0], [1], [0, 0, 1, 1], [], []>} : vector<4x4xbf16>, vector<4x1024xbf16>, vector<4x1024xf32> -> vector<4x1024xf32>
    %57 = arith.addf %51, %56 : vector<4x1024xf32>
    %c0_41 = arith.constant 0 : index
    %c0_42 = arith.constant 0 : index
    %c0_43 = arith.constant 0 : index
    %58 = vector.load %arg4[%c0_41, %c0_42, %c0_43] : memref<3x4x1xf32, #tpu.memory_space<vmem>>, vector<1x4x1xf32>
    %59 = vector.shape_cast %58 : vector<1x4x1xf32> to vector<4x1xf32>
    %60 = vector.broadcast %59 : vector<4x1xf32> to vector<4x1024xf32>
    %61 = arith.addf %57, %60 : vector<4x1024xf32>
    %cst_44 = arith.constant 0.000000e+00 : f32
    %62 = vector.broadcast %cst_44 : f32 to vector<4x1024xf32>
    %63 = arith.cmpf ogt, %61, %62 : vector<4x1024xf32>
    %cst_45 = arith.constant 1.000000e-01 : f32
    %64 = vector.broadcast %cst_45 : f32 to vector<4x1024xf32>
    %65 = arith.mulf %64, %61 : vector<4x1024xf32>
    %66 = arith.select %63, %61, %65 : vector<4x1024xi1>, vector<4x1024xf32>
    %67 = vector.broadcast %3 : vector<1x1024xf32> to vector<4x1024xf32>
    %68 = arith.mulf %66, %67 : vector<4x1024xf32>
    %cst_46 = arith.constant 0.000000e+00 : f32
    %69 = vector.broadcast %cst_46 : f32 to vector<4x1024xf32>
    %c1_47 = arith.constant 1 : index
    %c0_48 = arith.constant 0 : index
    %c0_49 = arith.constant 0 : index
    %c0_50 = arith.constant 0 : index
    %70 = vector.load %arg3[%c1_47, %c0_48, %c0_49, %c0_50] : memref<3x9x4x4xbf16, #tpu.memory_space<vmem>>, vector<1x1x4x4xbf16>
    %71 = vector.shape_cast %70 : vector<1x1x4x4xbf16> to vector<4x4xbf16>
    %c132_i32 = arith.constant 132 : i32
    %72 = tpu.dynamic_rotate %2 by %c132_i32 dim 1 : vector<4x1024xf32>, i32 -> vector<4x1024xf32>
    %73 = arith.truncf %72 : vector<4x1024xf32> to vector<4x1024xbf16>
    %cst_51 = arith.constant dense<0.000000e+00> : vector<4x1024xf32>
    %74 = tpu.matmul %71, %73, %cst_51 {dimension_numbers = #tpu.dot_dimension_numbers<[1], [0], [0], [1], [0, 0, 1, 1], [], []>} : vector<4x4xbf16>, vector<4x1024xbf16>, vector<4x1024xf32> -> vector<4x1024xf32>
    %75 = arith.addf %69, %74 : vector<4x1024xf32>
    %c1_52 = arith.constant 1 : index
    %c1_53 = arith.constant 1 : index
    %c0_54 = arith.constant 0 : index
    %c0_55 = arith.constant 0 : index
    %76 = vector.load %arg3[%c1_52, %c1_53, %c0_54, %c0_55] : memref<3x9x4x4xbf16, #tpu.memory_space<vmem>>, vector<1x1x4x4xbf16>
    %77 = vector.shape_cast %76 : vector<1x1x4x4xbf16> to vector<4x4xbf16>
    %c128_i32 = arith.constant 128 : i32
    %78 = tpu.dynamic_rotate %2 by %c128_i32 dim 1 : vector<4x1024xf32>, i32 -> vector<4x1024xf32>
    %79 = arith.truncf %78 : vector<4x1024xf32> to vector<4x1024xbf16>
    %cst_56 = arith.constant dense<0.000000e+00> : vector<4x1024xf32>
    %80 = tpu.matmul %77, %79, %cst_56 {dimension_numbers = #tpu.dot_dimension_numbers<[1], [0], [0], [1], [0, 0, 1, 1], [], []>} : vector<4x4xbf16>, vector<4x1024xbf16>, vector<4x1024xf32> -> vector<4x1024xf32>
    %81 = arith.addf %75, %80 : vector<4x1024xf32>
    %c1_57 = arith.constant 1 : index
    %c2_58 = arith.constant 2 : index
    %c0_59 = arith.constant 0 : index
    %c0_60 = arith.constant 0 : index
    %82 = vector.load %arg3[%c1_57, %c2_58, %c0_59, %c0_60] : memref<3x9x4x4xbf16, #tpu.memory_space<vmem>>, vector<1x1x4x4xbf16>
    %83 = vector.shape_cast %82 : vector<1x1x4x4xbf16> to vector<4x4xbf16>
    %c124_i32 = arith.constant 124 : i32
    %84 = tpu.dynamic_rotate %2 by %c124_i32 dim 1 : vector<4x1024xf32>, i32 -> vector<4x1024xf32>
    %85 = arith.truncf %84 : vector<4x1024xf32> to vector<4x1024xbf16>
    %cst_61 = arith.constant dense<0.000000e+00> : vector<4x1024xf32>
    %86 = tpu.matmul %83, %85, %cst_61 {dimension_numbers = #tpu.dot_dimension_numbers<[1], [0], [0], [1], [0, 0, 1, 1], [], []>} : vector<4x4xbf16>, vector<4x1024xbf16>, vector<4x1024xf32> -> vector<4x1024xf32>
    %87 = arith.addf %81, %86 : vector<4x1024xf32>
    %c1_62 = arith.constant 1 : index
    %c3_63 = arith.constant 3 : index
    %c0_64 = arith.constant 0 : index
    %c0_65 = arith.constant 0 : index
    %88 = vector.load %arg3[%c1_62, %c3_63, %c0_64, %c0_65] : memref<3x9x4x4xbf16, #tpu.memory_space<vmem>>, vector<1x1x4x4xbf16>
    %89 = vector.shape_cast %88 : vector<1x1x4x4xbf16> to vector<4x4xbf16>
    %c4_i32 = arith.constant 4 : i32
    %90 = tpu.dynamic_rotate %2 by %c4_i32 dim 1 : vector<4x1024xf32>, i32 -> vector<4x1024xf32>
    %91 = arith.truncf %90 : vector<4x1024xf32> to vector<4x1024xbf16>
    %cst_66 = arith.constant dense<0.000000e+00> : vector<4x1024xf32>
    %92 = tpu.matmul %89, %91, %cst_66 {dimension_numbers = #tpu.dot_dimension_numbers<[1], [0], [0], [1], [0, 0, 1, 1], [], []>} : vector<4x4xbf16>, vector<4x1024xbf16>, vector<4x1024xf32> -> vector<4x1024xf32>
    %93 = arith.addf %87, %92 : vector<4x1024xf32>
    %c1_67 = arith.constant 1 : index
    %c4_68 = arith.constant 4 : index
    %c0_69 = arith.constant 0 : index
    %c0_70 = arith.constant 0 : index
    %94 = vector.load %arg3[%c1_67, %c4_68, %c0_69, %c0_70] : memref<3x9x4x4xbf16, #tpu.memory_space<vmem>>, vector<1x1x4x4xbf16>
    %95 = vector.shape_cast %94 : vector<1x1x4x4xbf16> to vector<4x4xbf16>
    %96 = arith.truncf %2 : vector<4x1024xf32> to vector<4x1024xbf16>
    %cst_71 = arith.constant dense<0.000000e+00> : vector<4x1024xf32>
    %97 = tpu.matmul %95, %96, %cst_71 {dimension_numbers = #tpu.dot_dimension_numbers<[1], [0], [0], [1], [0, 0, 1, 1], [], []>} : vector<4x4xbf16>, vector<4x1024xbf16>, vector<4x1024xf32> -> vector<4x1024xf32>
    %98 = arith.addf %93, %97 : vector<4x1024xf32>
    %c1_72 = arith.constant 1 : index
    %c5_73 = arith.constant 5 : index
    %c0_74 = arith.constant 0 : index
    %c0_75 = arith.constant 0 : index
    %99 = vector.load %arg3[%c1_72, %c5_73, %c0_74, %c0_75] : memref<3x9x4x4xbf16, #tpu.memory_space<vmem>>, vector<1x1x4x4xbf16>
    %100 = vector.shape_cast %99 : vector<1x1x4x4xbf16> to vector<4x4xbf16>
    %c1020_i32 = arith.constant 1020 : i32
    %101 = tpu.dynamic_rotate %2 by %c1020_i32 dim 1 : vector<4x1024xf32>, i32 -> vector<4x1024xf32>
    %102 = arith.truncf %101 : vector<4x1024xf32> to vector<4x1024xbf16>
    %cst_76 = arith.constant dense<0.000000e+00> : vector<4x1024xf32>
    %103 = tpu.matmul %100, %102, %cst_76 {dimension_numbers = #tpu.dot_dimension_numbers<[1], [0], [0], [1], [0, 0, 1, 1], [], []>} : vector<4x4xbf16>, vector<4x1024xbf16>, vector<4x1024xf32> -> vector<4x1024xf32>
    %104 = arith.addf %98, %103 : vector<4x1024xf32>
    %c1_77 = arith.constant 1 : index
    %c6_78 = arith.constant 6 : index
    %c0_79 = arith.constant 0 : index
    %c0_80 = arith.constant 0 : index
    %105 = vector.load %arg3[%c1_77, %c6_78, %c0_79, %c0_80] : memref<3x9x4x4xbf16, #tpu.memory_space<vmem>>, vector<1x1x4x4xbf16>
    %106 = vector.shape_cast %105 : vector<1x1x4x4xbf16> to vector<4x4xbf16>
    %c900_i32 = arith.constant 900 : i32
    %107 = tpu.dynamic_rotate %2 by %c900_i32 dim 1 : vector<4x1024xf32>, i32 -> vector<4x1024xf32>
    %108 = arith.truncf %107 : vector<4x1024xf32> to vector<4x1024xbf16>
    %cst_81 = arith.constant dense<0.000000e+00> : vector<4x1024xf32>
    %109 = tpu.matmul %106, %108, %cst_81 {dimension_numbers = #tpu.dot_dimension_numbers<[1], [0], [0], [1], [0, 0, 1, 1], [], []>} : vector<4x4xbf16>, vector<4x1024xbf16>, vector<4x1024xf32> -> vector<4x1024xf32>
    %110 = arith.addf %104, %109 : vector<4x1024xf32>
    %c1_82 = arith.constant 1 : index
    %c7_83 = arith.constant 7 : index
    %c0_84 = arith.constant 0 : index
    %c0_85 = arith.constant 0 : index
    %111 = vector.load %arg3[%c1_82, %c7_83, %c0_84, %c0_85] : memref<3x9x4x4xbf16, #tpu.memory_space<vmem>>, vector<1x1x4x4xbf16>
    %112 = vector.shape_cast %111 : vector<1x1x4x4xbf16> to vector<4x4xbf16>
    %c896_i32 = arith.constant 896 : i32
    %113 = tpu.dynamic_rotate %2 by %c896_i32 dim 1 : vector<4x1024xf32>, i32 -> vector<4x1024xf32>
    %114 = arith.truncf %113 : vector<4x1024xf32> to vector<4x1024xbf16>
    %cst_86 = arith.constant dense<0.000000e+00> : vector<4x1024xf32>
    %115 = tpu.matmul %112, %114, %cst_86 {dimension_numbers = #tpu.dot_dimension_numbers<[1], [0], [0], [1], [0, 0, 1, 1], [], []>} : vector<4x4xbf16>, vector<4x1024xbf16>, vector<4x1024xf32> -> vector<4x1024xf32>
    %116 = arith.addf %110, %115 : vector<4x1024xf32>
    %c1_87 = arith.constant 1 : index
    %c8_88 = arith.constant 8 : index
    %c0_89 = arith.constant 0 : index
    %c0_90 = arith.constant 0 : index
    %117 = vector.load %arg3[%c1_87, %c8_88, %c0_89, %c0_90] : memref<3x9x4x4xbf16, #tpu.memory_space<vmem>>, vector<1x1x4x4xbf16>
    %118 = vector.shape_cast %117 : vector<1x1x4x4xbf16> to vector<4x4xbf16>
    %c892_i32 = arith.constant 892 : i32
    %119 = tpu.dynamic_rotate %2 by %c892_i32 dim 1 : vector<4x1024xf32>, i32 -> vector<4x1024xf32>
    %120 = arith.truncf %119 : vector<4x1024xf32> to vector<4x1024xbf16>
    %cst_91 = arith.constant dense<0.000000e+00> : vector<4x1024xf32>
    %121 = tpu.matmul %118, %120, %cst_91 {dimension_numbers = #tpu.dot_dimension_numbers<[1], [0], [0], [1], [0, 0, 1, 1], [], []>} : vector<4x4xbf16>, vector<4x1024xbf16>, vector<4x1024xf32> -> vector<4x1024xf32>
    %122 = arith.addf %116, %121 : vector<4x1024xf32>
    %c1_92 = arith.constant 1 : index
    %c0_93 = arith.constant 0 : index
    %c0_94 = arith.constant 0 : index
    %123 = vector.load %arg4[%c1_92, %c0_93, %c0_94] : memref<3x4x1xf32, #tpu.memory_space<vmem>>, vector<1x4x1xf32>
    %124 = vector.shape_cast %123 : vector<1x4x1xf32> to vector<4x1xf32>
    %125 = vector.broadcast %124 : vector<4x1xf32> to vector<4x1024xf32>
    %126 = arith.addf %122, %125 : vector<4x1024xf32>
    %cst_95 = arith.constant 0.000000e+00 : f32
    %127 = vector.broadcast %cst_95 : f32 to vector<4x1024xf32>
    %128 = arith.cmpf ogt, %126, %127 : vector<4x1024xf32>
    %cst_96 = arith.constant 1.000000e-01 : f32
    %129 = vector.broadcast %cst_96 : f32 to vector<4x1024xf32>
    %130 = arith.mulf %129, %126 : vector<4x1024xf32>
    %131 = arith.select %128, %126, %130 : vector<4x1024xi1>, vector<4x1024xf32>
    %132 = vector.broadcast %3 : vector<1x1024xf32> to vector<4x1024xf32>
    %133 = arith.mulf %131, %132 : vector<4x1024xf32>
    %cst_97 = arith.constant 0.000000e+00 : f32
    %134 = vector.broadcast %cst_97 : f32 to vector<4x1024xf32>
    %c2_98 = arith.constant 2 : index
    %c0_99 = arith.constant 0 : index
    %c0_100 = arith.constant 0 : index
    %c0_101 = arith.constant 0 : index
    %135 = vector.load %arg3[%c2_98, %c0_99, %c0_100, %c0_101] : memref<3x9x4x4xbf16, #tpu.memory_space<vmem>>, vector<1x1x4x4xbf16>
    %136 = vector.shape_cast %135 : vector<1x1x4x4xbf16> to vector<4x4xbf16>
    %c264_i32 = arith.constant 264 : i32
    %137 = tpu.dynamic_rotate %2 by %c264_i32 dim 1 : vector<4x1024xf32>, i32 -> vector<4x1024xf32>
    %138 = arith.truncf %137 : vector<4x1024xf32> to vector<4x1024xbf16>
    %cst_102 = arith.constant dense<0.000000e+00> : vector<4x1024xf32>
    %139 = tpu.matmul %136, %138, %cst_102 {dimension_numbers = #tpu.dot_dimension_numbers<[1], [0], [0], [1], [0, 0, 1, 1], [], []>} : vector<4x4xbf16>, vector<4x1024xbf16>, vector<4x1024xf32> -> vector<4x1024xf32>
    %140 = arith.addf %134, %139 : vector<4x1024xf32>
    %c2_103 = arith.constant 2 : index
    %c1_104 = arith.constant 1 : index
    %c0_105 = arith.constant 0 : index
    %c0_106 = arith.constant 0 : index
    %141 = vector.load %arg3[%c2_103, %c1_104, %c0_105, %c0_106] : memref<3x9x4x4xbf16, #tpu.memory_space<vmem>>, vector<1x1x4x4xbf16>
    %142 = vector.shape_cast %141 : vector<1x1x4x4xbf16> to vector<4x4xbf16>
    %c256_i32 = arith.constant 256 : i32
    %143 = tpu.dynamic_rotate %2 by %c256_i32 dim 1 : vector<4x1024xf32>, i32 -> vector<4x1024xf32>
    %144 = arith.truncf %143 : vector<4x1024xf32> to vector<4x1024xbf16>
    %cst_107 = arith.constant dense<0.000000e+00> : vector<4x1024xf32>
    %145 = tpu.matmul %142, %144, %cst_107 {dimension_numbers = #tpu.dot_dimension_numbers<[1], [0], [0], [1], [0, 0, 1, 1], [], []>} : vector<4x4xbf16>, vector<4x1024xbf16>, vector<4x1024xf32> -> vector<4x1024xf32>
    %146 = arith.addf %140, %145 : vector<4x1024xf32>
    %c2_108 = arith.constant 2 : index
    %c2_109 = arith.constant 2 : index
    %c0_110 = arith.constant 0 : index
    %c0_111 = arith.constant 0 : index
    %147 = vector.load %arg3[%c2_108, %c2_109, %c0_110, %c0_111] : memref<3x9x4x4xbf16, #tpu.memory_space<vmem>>, vector<1x1x4x4xbf16>
    %148 = vector.shape_cast %147 : vector<1x1x4x4xbf16> to vector<4x4xbf16>
    %c248_i32 = arith.constant 248 : i32
    %149 = tpu.dynamic_rotate %2 by %c248_i32 dim 1 : vector<4x1024xf32>, i32 -> vector<4x1024xf32>
    %150 = arith.truncf %149 : vector<4x1024xf32> to vector<4x1024xbf16>
    %cst_112 = arith.constant dense<0.000000e+00> : vector<4x1024xf32>
    %151 = tpu.matmul %148, %150, %cst_112 {dimension_numbers = #tpu.dot_dimension_numbers<[1], [0], [0], [1], [0, 0, 1, 1], [], []>} : vector<4x4xbf16>, vector<4x1024xbf16>, vector<4x1024xf32> -> vector<4x1024xf32>
    %152 = arith.addf %146, %151 : vector<4x1024xf32>
    %c2_113 = arith.constant 2 : index
    %c3_114 = arith.constant 3 : index
    %c0_115 = arith.constant 0 : index
    %c0_116 = arith.constant 0 : index
    %153 = vector.load %arg3[%c2_113, %c3_114, %c0_115, %c0_116] : memref<3x9x4x4xbf16, #tpu.memory_space<vmem>>, vector<1x1x4x4xbf16>
    %154 = vector.shape_cast %153 : vector<1x1x4x4xbf16> to vector<4x4xbf16>
    %c8_i32 = arith.constant 8 : i32
    %155 = tpu.dynamic_rotate %2 by %c8_i32 dim 1 : vector<4x1024xf32>, i32 -> vector<4x1024xf32>
    %156 = arith.truncf %155 : vector<4x1024xf32> to vector<4x1024xbf16>
    %cst_117 = arith.constant dense<0.000000e+00> : vector<4x1024xf32>
    %157 = tpu.matmul %154, %156, %cst_117 {dimension_numbers = #tpu.dot_dimension_numbers<[1], [0], [0], [1], [0, 0, 1, 1], [], []>} : vector<4x4xbf16>, vector<4x1024xbf16>, vector<4x1024xf32> -> vector<4x1024xf32>
    %158 = arith.addf %152, %157 : vector<4x1024xf32>
    %c2_118 = arith.constant 2 : index
    %c4_119 = arith.constant 4 : index
    %c0_120 = arith.constant 0 : index
    %c0_121 = arith.constant 0 : index
    %159 = vector.load %arg3[%c2_118, %c4_119, %c0_120, %c0_121] : memref<3x9x4x4xbf16, #tpu.memory_space<vmem>>, vector<1x1x4x4xbf16>
    %160 = vector.shape_cast %159 : vector<1x1x4x4xbf16> to vector<4x4xbf16>
    %161 = arith.truncf %2 : vector<4x1024xf32> to vector<4x1024xbf16>
    %cst_122 = arith.constant dense<0.000000e+00> : vector<4x1024xf32>
    %162 = tpu.matmul %160, %161, %cst_122 {dimension_numbers = #tpu.dot_dimension_numbers<[1], [0], [0], [1], [0, 0, 1, 1], [], []>} : vector<4x4xbf16>, vector<4x1024xbf16>, vector<4x1024xf32> -> vector<4x1024xf32>
    %163 = arith.addf %158, %162 : vector<4x1024xf32>
    %c2_123 = arith.constant 2 : index
    %c5_124 = arith.constant 5 : index
    %c0_125 = arith.constant 0 : index
    %c0_126 = arith.constant 0 : index
    %164 = vector.load %arg3[%c2_123, %c5_124, %c0_125, %c0_126] : memref<3x9x4x4xbf16, #tpu.memory_space<vmem>>, vector<1x1x4x4xbf16>
    %165 = vector.shape_cast %164 : vector<1x1x4x4xbf16> to vector<4x4xbf16>
    %c1016_i32 = arith.constant 1016 : i32
    %166 = tpu.dynamic_rotate %2 by %c1016_i32 dim 1 : vector<4x1024xf32>, i32 -> vector<4x1024xf32>
    %167 = arith.truncf %166 : vector<4x1024xf32> to vector<4x1024xbf16>
    %cst_127 = arith.constant dense<0.000000e+00> : vector<4x1024xf32>
    %168 = tpu.matmul %165, %167, %cst_127 {dimension_numbers = #tpu.dot_dimension_numbers<[1], [0], [0], [1], [0, 0, 1, 1], [], []>} : vector<4x4xbf16>, vector<4x1024xbf16>, vector<4x1024xf32> -> vector<4x1024xf32>
    %169 = arith.addf %163, %168 : vector<4x1024xf32>
    %c2_128 = arith.constant 2 : index
    %c6_129 = arith.constant 6 : index
    %c0_130 = arith.constant 0 : index
    %c0_131 = arith.constant 0 : index
    %170 = vector.load %arg3[%c2_128, %c6_129, %c0_130, %c0_131] : memref<3x9x4x4xbf16, #tpu.memory_space<vmem>>, vector<1x1x4x4xbf16>
    %171 = vector.shape_cast %170 : vector<1x1x4x4xbf16> to vector<4x4xbf16>
    %c776_i32 = arith.constant 776 : i32
    %172 = tpu.dynamic_rotate %2 by %c776_i32 dim 1 : vector<4x1024xf32>, i32 -> vector<4x1024xf32>
    %173 = arith.truncf %172 : vector<4x1024xf32> to vector<4x1024xbf16>
    %cst_132 = arith.constant dense<0.000000e+00> : vector<4x1024xf32>
    %174 = tpu.matmul %171, %173, %cst_132 {dimension_numbers = #tpu.dot_dimension_numbers<[1], [0], [0], [1], [0, 0, 1, 1], [], []>} : vector<4x4xbf16>, vector<4x1024xbf16>, vector<4x1024xf32> -> vector<4x1024xf32>
    %175 = arith.addf %169, %174 : vector<4x1024xf32>
    %c2_133 = arith.constant 2 : index
    %c7_134 = arith.constant 7 : index
    %c0_135 = arith.constant 0 : index
    %c0_136 = arith.constant 0 : index
    %176 = vector.load %arg3[%c2_133, %c7_134, %c0_135, %c0_136] : memref<3x9x4x4xbf16, #tpu.memory_space<vmem>>, vector<1x1x4x4xbf16>
    %177 = vector.shape_cast %176 : vector<1x1x4x4xbf16> to vector<4x4xbf16>
    %c768_i32 = arith.constant 768 : i32
    %178 = tpu.dynamic_rotate %2 by %c768_i32 dim 1 : vector<4x1024xf32>, i32 -> vector<4x1024xf32>
    %179 = arith.truncf %178 : vector<4x1024xf32> to vector<4x1024xbf16>
    %cst_137 = arith.constant dense<0.000000e+00> : vector<4x1024xf32>
    %180 = tpu.matmul %177, %179, %cst_137 {dimension_numbers = #tpu.dot_dimension_numbers<[1], [0], [0], [1], [0, 0, 1, 1], [], []>} : vector<4x4xbf16>, vector<4x1024xbf16>, vector<4x1024xf32> -> vector<4x1024xf32>
    %181 = arith.addf %175, %180 : vector<4x1024xf32>
    %c2_138 = arith.constant 2 : index
    %c8_139 = arith.constant 8 : index
    %c0_140 = arith.constant 0 : index
    %c0_141 = arith.constant 0 : index
    %182 = vector.load %arg3[%c2_138, %c8_139, %c0_140, %c0_141] : memref<3x9x4x4xbf16, #tpu.memory_space<vmem>>, vector<1x1x4x4xbf16>
    %183 = vector.shape_cast %182 : vector<1x1x4x4xbf16> to vector<4x4xbf16>
    %c760_i32 = arith.constant 760 : i32
    %184 = tpu.dynamic_rotate %2 by %c760_i32 dim 1 : vector<4x1024xf32>, i32 -> vector<4x1024xf32>
    %185 = arith.truncf %184 : vector<4x1024xf32> to vector<4x1024xbf16>
    %cst_142 = arith.constant dense<0.000000e+00> : vector<4x1024xf32>
    %186 = tpu.matmul %183, %185, %cst_142 {dimension_numbers = #tpu.dot_dimension_numbers<[1], [0], [0], [1], [0, 0, 1, 1], [], []>} : vector<4x4xbf16>, vector<4x1024xbf16>, vector<4x1024xf32> -> vector<4x1024xf32>
    %187 = arith.addf %181, %186 : vector<4x1024xf32>
    %c2_143 = arith.constant 2 : index
    %c0_144 = arith.constant 0 : index
    %c0_145 = arith.constant 0 : index
    %188 = vector.load %arg4[%c2_143, %c0_144, %c0_145] : memref<3x4x1xf32, #tpu.memory_space<vmem>>, vector<1x4x1xf32>
    %189 = vector.shape_cast %188 : vector<1x4x1xf32> to vector<4x1xf32>
    %190 = vector.broadcast %189 : vector<4x1xf32> to vector<4x1024xf32>
    %191 = arith.addf %187, %190 : vector<4x1024xf32>
    %cst_146 = arith.constant 0.000000e+00 : f32
    %192 = vector.broadcast %cst_146 : f32 to vector<4x1024xf32>
    %193 = arith.cmpf ogt, %191, %192 : vector<4x1024xf32>
    %cst_147 = arith.constant 1.000000e-01 : f32
    %194 = vector.broadcast %cst_147 : f32 to vector<4x1024xf32>
    %195 = arith.mulf %194, %191 : vector<4x1024xf32>
    %196 = arith.select %193, %191, %195 : vector<4x1024xi1>, vector<4x1024xf32>
    %197 = vector.broadcast %3 : vector<1x1024xf32> to vector<4x1024xf32>
    %198 = arith.mulf %196, %197 : vector<4x1024xf32>
    %cst_148 = arith.constant 0.000000e+00 : f32
    %199 = vector.broadcast %cst_148 : f32 to vector<4x1024xf32>
    %c0_149 = arith.constant 0 : index
    %c0_150 = arith.constant 0 : index
    %c0_151 = arith.constant 0 : index
    %c0_152 = arith.constant 0 : index
    %200 = vector.load %arg5[%c0_149, %c0_150, %c0_151, %c0_152] : memref<3x9x4x4xbf16, #tpu.memory_space<vmem>>, vector<1x1x4x4xbf16>
    %201 = vector.shape_cast %200 : vector<1x1x4x4xbf16> to vector<4x4xbf16>
    %c33_i32_153 = arith.constant 33 : i32
    %202 = tpu.dynamic_rotate %68 by %c33_i32_153 dim 1 : vector<4x1024xf32>, i32 -> vector<4x1024xf32>
    %203 = arith.truncf %202 : vector<4x1024xf32> to vector<4x1024xbf16>
    %cst_154 = arith.constant dense<0.000000e+00> : vector<4x1024xf32>
    %204 = tpu.matmul %201, %203, %cst_154 {dimension_numbers = #tpu.dot_dimension_numbers<[1], [0], [0], [1], [0, 0, 1, 1], [], []>} : vector<4x4xbf16>, vector<4x1024xbf16>, vector<4x1024xf32> -> vector<4x1024xf32>
    %205 = arith.addf %199, %204 : vector<4x1024xf32>
    %c0_155 = arith.constant 0 : index
    %c1_156 = arith.constant 1 : index
    %c0_157 = arith.constant 0 : index
    %c0_158 = arith.constant 0 : index
    %206 = vector.load %arg5[%c0_155, %c1_156, %c0_157, %c0_158] : memref<3x9x4x4xbf16, #tpu.memory_space<vmem>>, vector<1x1x4x4xbf16>
    %207 = vector.shape_cast %206 : vector<1x1x4x4xbf16> to vector<4x4xbf16>
    %c32_i32_159 = arith.constant 32 : i32
    %208 = tpu.dynamic_rotate %68 by %c32_i32_159 dim 1 : vector<4x1024xf32>, i32 -> vector<4x1024xf32>
    %209 = arith.truncf %208 : vector<4x1024xf32> to vector<4x1024xbf16>
    %cst_160 = arith.constant dense<0.000000e+00> : vector<4x1024xf32>
    %210 = tpu.matmul %207, %209, %cst_160 {dimension_numbers = #tpu.dot_dimension_numbers<[1], [0], [0], [1], [0, 0, 1, 1], [], []>} : vector<4x4xbf16>, vector<4x1024xbf16>, vector<4x1024xf32> -> vector<4x1024xf32>
    %211 = arith.addf %205, %210 : vector<4x1024xf32>
    %c0_161 = arith.constant 0 : index
    %c2_162 = arith.constant 2 : index
    %c0_163 = arith.constant 0 : index
    %c0_164 = arith.constant 0 : index
    %212 = vector.load %arg5[%c0_161, %c2_162, %c0_163, %c0_164] : memref<3x9x4x4xbf16, #tpu.memory_space<vmem>>, vector<1x1x4x4xbf16>
    %213 = vector.shape_cast %212 : vector<1x1x4x4xbf16> to vector<4x4xbf16>
    %c31_i32_165 = arith.constant 31 : i32
    %214 = tpu.dynamic_rotate %68 by %c31_i32_165 dim 1 : vector<4x1024xf32>, i32 -> vector<4x1024xf32>
    %215 = arith.truncf %214 : vector<4x1024xf32> to vector<4x1024xbf16>
    %cst_166 = arith.constant dense<0.000000e+00> : vector<4x1024xf32>
    %216 = tpu.matmul %213, %215, %cst_166 {dimension_numbers = #tpu.dot_dimension_numbers<[1], [0], [0], [1], [0, 0, 1, 1], [], []>} : vector<4x4xbf16>, vector<4x1024xbf16>, vector<4x1024xf32> -> vector<4x1024xf32>
    %217 = arith.addf %211, %216 : vector<4x1024xf32>
    %c0_167 = arith.constant 0 : index
    %c3_168 = arith.constant 3 : index
    %c0_169 = arith.constant 0 : index
    %c0_170 = arith.constant 0 : index
    %218 = vector.load %arg5[%c0_167, %c3_168, %c0_169, %c0_170] : memref<3x9x4x4xbf16, #tpu.memory_space<vmem>>, vector<1x1x4x4xbf16>
    %219 = vector.shape_cast %218 : vector<1x1x4x4xbf16> to vector<4x4xbf16>
    %c1_i32_171 = arith.constant 1 : i32
    %220 = tpu.dynamic_rotate %68 by %c1_i32_171 dim 1 : vector<4x1024xf32>, i32 -> vector<4x1024xf32>
    %221 = arith.truncf %220 : vector<4x1024xf32> to vector<4x1024xbf16>
    %cst_172 = arith.constant dense<0.000000e+00> : vector<4x1024xf32>
    %222 = tpu.matmul %219, %221, %cst_172 {dimension_numbers = #tpu.dot_dimension_numbers<[1], [0], [0], [1], [0, 0, 1, 1], [], []>} : vector<4x4xbf16>, vector<4x1024xbf16>, vector<4x1024xf32> -> vector<4x1024xf32>
    %223 = arith.addf %217, %222 : vector<4x1024xf32>
    %c0_173 = arith.constant 0 : index
    %c4_174 = arith.constant 4 : index
    %c0_175 = arith.constant 0 : index
    %c0_176 = arith.constant 0 : index
    %224 = vector.load %arg5[%c0_173, %c4_174, %c0_175, %c0_176] : memref<3x9x4x4xbf16, #tpu.memory_space<vmem>>, vector<1x1x4x4xbf16>
    %225 = vector.shape_cast %224 : vector<1x1x4x4xbf16> to vector<4x4xbf16>
    %226 = arith.truncf %68 : vector<4x1024xf32> to vector<4x1024xbf16>
    %cst_177 = arith.constant dense<0.000000e+00> : vector<4x1024xf32>
    %227 = tpu.matmul %225, %226, %cst_177 {dimension_numbers = #tpu.dot_dimension_numbers<[1], [0], [0], [1], [0, 0, 1, 1], [], []>} : vector<4x4xbf16>, vector<4x1024xbf16>, vector<4x1024xf32> -> vector<4x1024xf32>
    %228 = arith.addf %223, %227 : vector<4x1024xf32>
    %c0_178 = arith.constant 0 : index
    %c5_179 = arith.constant 5 : index
    %c0_180 = arith.constant 0 : index
    %c0_181 = arith.constant 0 : index
    %229 = vector.load %arg5[%c0_178, %c5_179, %c0_180, %c0_181] : memref<3x9x4x4xbf16, #tpu.memory_space<vmem>>, vector<1x1x4x4xbf16>
    %230 = vector.shape_cast %229 : vector<1x1x4x4xbf16> to vector<4x4xbf16>
    %c1023_i32_182 = arith.constant 1023 : i32
    %231 = tpu.dynamic_rotate %68 by %c1023_i32_182 dim 1 : vector<4x1024xf32>, i32 -> vector<4x1024xf32>
    %232 = arith.truncf %231 : vector<4x1024xf32> to vector<4x1024xbf16>
    %cst_183 = arith.constant dense<0.000000e+00> : vector<4x1024xf32>
    %233 = tpu.matmul %230, %232, %cst_183 {dimension_numbers = #tpu.dot_dimension_numbers<[1], [0], [0], [1], [0, 0, 1, 1], [], []>} : vector<4x4xbf16>, vector<4x1024xbf16>, vector<4x1024xf32> -> vector<4x1024xf32>
    %234 = arith.addf %228, %233 : vector<4x1024xf32>
    %c0_184 = arith.constant 0 : index
    %c6_185 = arith.constant 6 : index
    %c0_186 = arith.constant 0 : index
    %c0_187 = arith.constant 0 : index
    %235 = vector.load %arg5[%c0_184, %c6_185, %c0_186, %c0_187] : memref<3x9x4x4xbf16, #tpu.memory_space<vmem>>, vector<1x1x4x4xbf16>
    %236 = vector.shape_cast %235 : vector<1x1x4x4xbf16> to vector<4x4xbf16>
    %c993_i32_188 = arith.constant 993 : i32
    %237 = tpu.dynamic_rotate %68 by %c993_i32_188 dim 1 : vector<4x1024xf32>, i32 -> vector<4x1024xf32>
    %238 = arith.truncf %237 : vector<4x1024xf32> to vector<4x1024xbf16>
    %cst_189 = arith.constant dense<0.000000e+00> : vector<4x1024xf32>
    %239 = tpu.matmul %236, %238, %cst_189 {dimension_numbers = #tpu.dot_dimension_numbers<[1], [0], [0], [1], [0, 0, 1, 1], [], []>} : vector<4x4xbf16>, vector<4x1024xbf16>, vector<4x1024xf32> -> vector<4x1024xf32>
    %240 = arith.addf %234, %239 : vector<4x1024xf32>
    %c0_190 = arith.constant 0 : index
    %c7_191 = arith.constant 7 : index
    %c0_192 = arith.constant 0 : index
    %c0_193 = arith.constant 0 : index
    %241 = vector.load %arg5[%c0_190, %c7_191, %c0_192, %c0_193] : memref<3x9x4x4xbf16, #tpu.memory_space<vmem>>, vector<1x1x4x4xbf16>
    %242 = vector.shape_cast %241 : vector<1x1x4x4xbf16> to vector<4x4xbf16>
    %c992_i32_194 = arith.constant 992 : i32
    %243 = tpu.dynamic_rotate %68 by %c992_i32_194 dim 1 : vector<4x1024xf32>, i32 -> vector<4x1024xf32>
    %244 = arith.truncf %243 : vector<4x1024xf32> to vector<4x1024xbf16>
    %cst_195 = arith.constant dense<0.000000e+00> : vector<4x1024xf32>
    %245 = tpu.matmul %242, %244, %cst_195 {dimension_numbers = #tpu.dot_dimension_numbers<[1], [0], [0], [1], [0, 0, 1, 1], [], []>} : vector<4x4xbf16>, vector<4x1024xbf16>, vector<4x1024xf32> -> vector<4x1024xf32>
    %246 = arith.addf %240, %245 : vector<4x1024xf32>
    %c0_196 = arith.constant 0 : index
    %c8_197 = arith.constant 8 : index
    %c0_198 = arith.constant 0 : index
    %c0_199 = arith.constant 0 : index
    %247 = vector.load %arg5[%c0_196, %c8_197, %c0_198, %c0_199] : memref<3x9x4x4xbf16, #tpu.memory_space<vmem>>, vector<1x1x4x4xbf16>
    %248 = vector.shape_cast %247 : vector<1x1x4x4xbf16> to vector<4x4xbf16>
    %c991_i32_200 = arith.constant 991 : i32
    %249 = tpu.dynamic_rotate %68 by %c991_i32_200 dim 1 : vector<4x1024xf32>, i32 -> vector<4x1024xf32>
    %250 = arith.truncf %249 : vector<4x1024xf32> to vector<4x1024xbf16>
    %cst_201 = arith.constant dense<0.000000e+00> : vector<4x1024xf32>
    %251 = tpu.matmul %248, %250, %cst_201 {dimension_numbers = #tpu.dot_dimension_numbers<[1], [0], [0], [1], [0, 0, 1, 1], [], []>} : vector<4x4xbf16>, vector<4x1024xbf16>, vector<4x1024xf32> -> vector<4x1024xf32>
    %252 = arith.addf %246, %251 : vector<4x1024xf32>
    %c1_202 = arith.constant 1 : index
    %c0_203 = arith.constant 0 : index
    %c0_204 = arith.constant 0 : index
    %c0_205 = arith.constant 0 : index
    %253 = vector.load %arg5[%c1_202, %c0_203, %c0_204, %c0_205] : memref<3x9x4x4xbf16, #tpu.memory_space<vmem>>, vector<1x1x4x4xbf16>
    %254 = vector.shape_cast %253 : vector<1x1x4x4xbf16> to vector<4x4xbf16>
    %c33_i32_206 = arith.constant 33 : i32
    %255 = tpu.dynamic_rotate %133 by %c33_i32_206 dim 1 : vector<4x1024xf32>, i32 -> vector<4x1024xf32>
    %256 = arith.truncf %255 : vector<4x1024xf32> to vector<4x1024xbf16>
    %cst_207 = arith.constant dense<0.000000e+00> : vector<4x1024xf32>
    %257 = tpu.matmul %254, %256, %cst_207 {dimension_numbers = #tpu.dot_dimension_numbers<[1], [0], [0], [1], [0, 0, 1, 1], [], []>} : vector<4x4xbf16>, vector<4x1024xbf16>, vector<4x1024xf32> -> vector<4x1024xf32>
    %258 = arith.addf %252, %257 : vector<4x1024xf32>
    %c1_208 = arith.constant 1 : index
    %c1_209 = arith.constant 1 : index
    %c0_210 = arith.constant 0 : index
    %c0_211 = arith.constant 0 : index
    %259 = vector.load %arg5[%c1_208, %c1_209, %c0_210, %c0_211] : memref<3x9x4x4xbf16, #tpu.memory_space<vmem>>, vector<1x1x4x4xbf16>
    %260 = vector.shape_cast %259 : vector<1x1x4x4xbf16> to vector<4x4xbf16>
    %c32_i32_212 = arith.constant 32 : i32
    %261 = tpu.dynamic_rotate %133 by %c32_i32_212 dim 1 : vector<4x1024xf32>, i32 -> vector<4x1024xf32>
    %262 = arith.truncf %261 : vector<4x1024xf32> to vector<4x1024xbf16>
    %cst_213 = arith.constant dense<0.000000e+00> : vector<4x1024xf32>
    %263 = tpu.matmul %260, %262, %cst_213 {dimension_numbers = #tpu.dot_dimension_numbers<[1], [0], [0], [1], [0, 0, 1, 1], [], []>} : vector<4x4xbf16>, vector<4x1024xbf16>, vector<4x1024xf32> -> vector<4x1024xf32>
    %264 = arith.addf %258, %263 : vector<4x1024xf32>
    %c1_214 = arith.constant 1 : index
    %c2_215 = arith.constant 2 : index
    %c0_216 = arith.constant 0 : index
    %c0_217 = arith.constant 0 : index
    %265 = vector.load %arg5[%c1_214, %c2_215, %c0_216, %c0_217] : memref<3x9x4x4xbf16, #tpu.memory_space<vmem>>, vector<1x1x4x4xbf16>
    %266 = vector.shape_cast %265 : vector<1x1x4x4xbf16> to vector<4x4xbf16>
    %c31_i32_218 = arith.constant 31 : i32
    %267 = tpu.dynamic_rotate %133 by %c31_i32_218 dim 1 : vector<4x1024xf32>, i32 -> vector<4x1024xf32>
    %268 = arith.truncf %267 : vector<4x1024xf32> to vector<4x1024xbf16>
    %cst_219 = arith.constant dense<0.000000e+00> : vector<4x1024xf32>
    %269 = tpu.matmul %266, %268, %cst_219 {dimension_numbers = #tpu.dot_dimension_numbers<[1], [0], [0], [1], [0, 0, 1, 1], [], []>} : vector<4x4xbf16>, vector<4x1024xbf16>, vector<4x1024xf32> -> vector<4x1024xf32>
    %270 = arith.addf %264, %269 : vector<4x1024xf32>
    %c1_220 = arith.constant 1 : index
    %c3_221 = arith.constant 3 : index
    %c0_222 = arith.constant 0 : index
    %c0_223 = arith.constant 0 : index
    %271 = vector.load %arg5[%c1_220, %c3_221, %c0_222, %c0_223] : memref<3x9x4x4xbf16, #tpu.memory_space<vmem>>, vector<1x1x4x4xbf16>
    %272 = vector.shape_cast %271 : vector<1x1x4x4xbf16> to vector<4x4xbf16>
    %c1_i32_224 = arith.constant 1 : i32
    %273 = tpu.dynamic_rotate %133 by %c1_i32_224 dim 1 : vector<4x1024xf32>, i32 -> vector<4x1024xf32>
    %274 = arith.truncf %273 : vector<4x1024xf32> to vector<4x1024xbf16>
    %cst_225 = arith.constant dense<0.000000e+00> : vector<4x1024xf32>
    %275 = tpu.matmul %272, %274, %cst_225 {dimension_numbers = #tpu.dot_dimension_numbers<[1], [0], [0], [1], [0, 0, 1, 1], [], []>} : vector<4x4xbf16>, vector<4x1024xbf16>, vector<4x1024xf32> -> vector<4x1024xf32>
    %276 = arith.addf %270, %275 : vector<4x1024xf32>
    %c1_226 = arith.constant 1 : index
    %c4_227 = arith.constant 4 : index
    %c0_228 = arith.constant 0 : index
    %c0_229 = arith.constant 0 : index
    %277 = vector.load %arg5[%c1_226, %c4_227, %c0_228, %c0_229] : memref<3x9x4x4xbf16, #tpu.memory_space<vmem>>, vector<1x1x4x4xbf16>
    %278 = vector.shape_cast %277 : vector<1x1x4x4xbf16> to vector<4x4xbf16>
    %279 = arith.truncf %133 : vector<4x1024xf32> to vector<4x1024xbf16>
    %cst_230 = arith.constant dense<0.000000e+00> : vector<4x1024xf32>
    %280 = tpu.matmul %278, %279, %cst_230 {dimension_numbers = #tpu.dot_dimension_numbers<[1], [0], [0], [1], [0, 0, 1, 1], [], []>} : vector<4x4xbf16>, vector<4x1024xbf16>, vector<4x1024xf32> -> vector<4x1024xf32>
    %281 = arith.addf %276, %280 : vector<4x1024xf32>
    %c1_231 = arith.constant 1 : index
    %c5_232 = arith.constant 5 : index
    %c0_233 = arith.constant 0 : index
    %c0_234 = arith.constant 0 : index
    %282 = vector.load %arg5[%c1_231, %c5_232, %c0_233, %c0_234] : memref<3x9x4x4xbf16, #tpu.memory_space<vmem>>, vector<1x1x4x4xbf16>
    %283 = vector.shape_cast %282 : vector<1x1x4x4xbf16> to vector<4x4xbf16>
    %c1023_i32_235 = arith.constant 1023 : i32
    %284 = tpu.dynamic_rotate %133 by %c1023_i32_235 dim 1 : vector<4x1024xf32>, i32 -> vector<4x1024xf32>
    %285 = arith.truncf %284 : vector<4x1024xf32> to vector<4x1024xbf16>
    %cst_236 = arith.constant dense<0.000000e+00> : vector<4x1024xf32>
    %286 = tpu.matmul %283, %285, %cst_236 {dimension_numbers = #tpu.dot_dimension_numbers<[1], [0], [0], [1], [0, 0, 1, 1], [], []>} : vector<4x4xbf16>, vector<4x1024xbf16>, vector<4x1024xf32> -> vector<4x1024xf32>
    %287 = arith.addf %281, %286 : vector<4x1024xf32>
    %c1_237 = arith.constant 1 : index
    %c6_238 = arith.constant 6 : index
    %c0_239 = arith.constant 0 : index
    %c0_240 = arith.constant 0 : index
    %288 = vector.load %arg5[%c1_237, %c6_238, %c0_239, %c0_240] : memref<3x9x4x4xbf16, #tpu.memory_space<vmem>>, vector<1x1x4x4xbf16>
    %289 = vector.shape_cast %288 : vector<1x1x4x4xbf16> to vector<4x4xbf16>
    %c993_i32_241 = arith.constant 993 : i32
    %290 = tpu.dynamic_rotate %133 by %c993_i32_241 dim 1 : vector<4x1024xf32>, i32 -> vector<4x1024xf32>
    %291 = arith.truncf %290 : vector<4x1024xf32> to vector<4x1024xbf16>
    %cst_242 = arith.constant dense<0.000000e+00> : vector<4x1024xf32>
    %292 = tpu.matmul %289, %291, %cst_242 {dimension_numbers = #tpu.dot_dimension_numbers<[1], [0], [0], [1], [0, 0, 1, 1], [], []>} : vector<4x4xbf16>, vector<4x1024xbf16>, vector<4x1024xf32> -> vector<4x1024xf32>
    %293 = arith.addf %287, %292 : vector<4x1024xf32>
    %c1_243 = arith.constant 1 : index
    %c7_244 = arith.constant 7 : index
    %c0_245 = arith.constant 0 : index
    %c0_246 = arith.constant 0 : index
    %294 = vector.load %arg5[%c1_243, %c7_244, %c0_245, %c0_246] : memref<3x9x4x4xbf16, #tpu.memory_space<vmem>>, vector<1x1x4x4xbf16>
    %295 = vector.shape_cast %294 : vector<1x1x4x4xbf16> to vector<4x4xbf16>
    %c992_i32_247 = arith.constant 992 : i32
    %296 = tpu.dynamic_rotate %133 by %c992_i32_247 dim 1 : vector<4x1024xf32>, i32 -> vector<4x1024xf32>
    %297 = arith.truncf %296 : vector<4x1024xf32> to vector<4x1024xbf16>
    %cst_248 = arith.constant dense<0.000000e+00> : vector<4x1024xf32>
    %298 = tpu.matmul %295, %297, %cst_248 {dimension_numbers = #tpu.dot_dimension_numbers<[1], [0], [0], [1], [0, 0, 1, 1], [], []>} : vector<4x4xbf16>, vector<4x1024xbf16>, vector<4x1024xf32> -> vector<4x1024xf32>
    %299 = arith.addf %293, %298 : vector<4x1024xf32>
    %c1_249 = arith.constant 1 : index
    %c8_250 = arith.constant 8 : index
    %c0_251 = arith.constant 0 : index
    %c0_252 = arith.constant 0 : index
    %300 = vector.load %arg5[%c1_249, %c8_250, %c0_251, %c0_252] : memref<3x9x4x4xbf16, #tpu.memory_space<vmem>>, vector<1x1x4x4xbf16>
    %301 = vector.shape_cast %300 : vector<1x1x4x4xbf16> to vector<4x4xbf16>
    %c991_i32_253 = arith.constant 991 : i32
    %302 = tpu.dynamic_rotate %133 by %c991_i32_253 dim 1 : vector<4x1024xf32>, i32 -> vector<4x1024xf32>
    %303 = arith.truncf %302 : vector<4x1024xf32> to vector<4x1024xbf16>
    %cst_254 = arith.constant dense<0.000000e+00> : vector<4x1024xf32>
    %304 = tpu.matmul %301, %303, %cst_254 {dimension_numbers = #tpu.dot_dimension_numbers<[1], [0], [0], [1], [0, 0, 1, 1], [], []>} : vector<4x4xbf16>, vector<4x1024xbf16>, vector<4x1024xf32> -> vector<4x1024xf32>
    %305 = arith.addf %299, %304 : vector<4x1024xf32>
    %c2_255 = arith.constant 2 : index
    %c0_256 = arith.constant 0 : index
    %c0_257 = arith.constant 0 : index
    %c0_258 = arith.constant 0 : index
    %306 = vector.load %arg5[%c2_255, %c0_256, %c0_257, %c0_258] : memref<3x9x4x4xbf16, #tpu.memory_space<vmem>>, vector<1x1x4x4xbf16>
    %307 = vector.shape_cast %306 : vector<1x1x4x4xbf16> to vector<4x4xbf16>
    %c33_i32_259 = arith.constant 33 : i32
    %308 = tpu.dynamic_rotate %198 by %c33_i32_259 dim 1 : vector<4x1024xf32>, i32 -> vector<4x1024xf32>
    %309 = arith.truncf %308 : vector<4x1024xf32> to vector<4x1024xbf16>
    %cst_260 = arith.constant dense<0.000000e+00> : vector<4x1024xf32>
    %310 = tpu.matmul %307, %309, %cst_260 {dimension_numbers = #tpu.dot_dimension_numbers<[1], [0], [0], [1], [0, 0, 1, 1], [], []>} : vector<4x4xbf16>, vector<4x1024xbf16>, vector<4x1024xf32> -> vector<4x1024xf32>
    %311 = arith.addf %305, %310 : vector<4x1024xf32>
    %c2_261 = arith.constant 2 : index
    %c1_262 = arith.constant 1 : index
    %c0_263 = arith.constant 0 : index
    %c0_264 = arith.constant 0 : index
    %312 = vector.load %arg5[%c2_261, %c1_262, %c0_263, %c0_264] : memref<3x9x4x4xbf16, #tpu.memory_space<vmem>>, vector<1x1x4x4xbf16>
    %313 = vector.shape_cast %312 : vector<1x1x4x4xbf16> to vector<4x4xbf16>
    %c32_i32_265 = arith.constant 32 : i32
    %314 = tpu.dynamic_rotate %198 by %c32_i32_265 dim 1 : vector<4x1024xf32>, i32 -> vector<4x1024xf32>
    %315 = arith.truncf %314 : vector<4x1024xf32> to vector<4x1024xbf16>
    %cst_266 = arith.constant dense<0.000000e+00> : vector<4x1024xf32>
    %316 = tpu.matmul %313, %315, %cst_266 {dimension_numbers = #tpu.dot_dimension_numbers<[1], [0], [0], [1], [0, 0, 1, 1], [], []>} : vector<4x4xbf16>, vector<4x1024xbf16>, vector<4x1024xf32> -> vector<4x1024xf32>
    %317 = arith.addf %311, %316 : vector<4x1024xf32>
    %c2_267 = arith.constant 2 : index
    %c2_268 = arith.constant 2 : index
    %c0_269 = arith.constant 0 : index
    %c0_270 = arith.constant 0 : index
    %318 = vector.load %arg5[%c2_267, %c2_268, %c0_269, %c0_270] : memref<3x9x4x4xbf16, #tpu.memory_space<vmem>>, vector<1x1x4x4xbf16>
    %319 = vector.shape_cast %318 : vector<1x1x4x4xbf16> to vector<4x4xbf16>
    %c31_i32_271 = arith.constant 31 : i32
    %320 = tpu.dynamic_rotate %198 by %c31_i32_271 dim 1 : vector<4x1024xf32>, i32 -> vector<4x1024xf32>
    %321 = arith.truncf %320 : vector<4x1024xf32> to vector<4x1024xbf16>
    %cst_272 = arith.constant dense<0.000000e+00> : vector<4x1024xf32>
    %322 = tpu.matmul %319, %321, %cst_272 {dimension_numbers = #tpu.dot_dimension_numbers<[1], [0], [0], [1], [0, 0, 1, 1], [], []>} : vector<4x4xbf16>, vector<4x1024xbf16>, vector<4x1024xf32> -> vector<4x1024xf32>
    %323 = arith.addf %317, %322 : vector<4x1024xf32>
    %c2_273 = arith.constant 2 : index
    %c3_274 = arith.constant 3 : index
    %c0_275 = arith.constant 0 : index
    %c0_276 = arith.constant 0 : index
    %324 = vector.load %arg5[%c2_273, %c3_274, %c0_275, %c0_276] : memref<3x9x4x4xbf16, #tpu.memory_space<vmem>>, vector<1x1x4x4xbf16>
    %325 = vector.shape_cast %324 : vector<1x1x4x4xbf16> to vector<4x4xbf16>
    %c1_i32_277 = arith.constant 1 : i32
    %326 = tpu.dynamic_rotate %198 by %c1_i32_277 dim 1 : vector<4x1024xf32>, i32 -> vector<4x1024xf32>
    %327 = arith.truncf %326 : vector<4x1024xf32> to vector<4x1024xbf16>
    %cst_278 = arith.constant dense<0.000000e+00> : vector<4x1024xf32>
    %328 = tpu.matmul %325, %327, %cst_278 {dimension_numbers = #tpu.dot_dimension_numbers<[1], [0], [0], [1], [0, 0, 1, 1], [], []>} : vector<4x4xbf16>, vector<4x1024xbf16>, vector<4x1024xf32> -> vector<4x1024xf32>
    %329 = arith.addf %323, %328 : vector<4x1024xf32>
    %c2_279 = arith.constant 2 : index
    %c4_280 = arith.constant 4 : index
    %c0_281 = arith.constant 0 : index
    %c0_282 = arith.constant 0 : index
    %330 = vector.load %arg5[%c2_279, %c4_280, %c0_281, %c0_282] : memref<3x9x4x4xbf16, #tpu.memory_space<vmem>>, vector<1x1x4x4xbf16>
    %331 = vector.shape_cast %330 : vector<1x1x4x4xbf16> to vector<4x4xbf16>
    %332 = arith.truncf %198 : vector<4x1024xf32> to vector<4x1024xbf16>
    %cst_283 = arith.constant dense<0.000000e+00> : vector<4x1024xf32>
    %333 = tpu.matmul %331, %332, %cst_283 {dimension_numbers = #tpu.dot_dimension_numbers<[1], [0], [0], [1], [0, 0, 1, 1], [], []>} : vector<4x4xbf16>, vector<4x1024xbf16>, vector<4x1024xf32> -> vector<4x1024xf32>
    %334 = arith.addf %329, %333 : vector<4x1024xf32>
    %c2_284 = arith.constant 2 : index
    %c5_285 = arith.constant 5 : index
    %c0_286 = arith.constant 0 : index
    %c0_287 = arith.constant 0 : index
    %335 = vector.load %arg5[%c2_284, %c5_285, %c0_286, %c0_287] : memref<3x9x4x4xbf16, #tpu.memory_space<vmem>>, vector<1x1x4x4xbf16>
    %336 = vector.shape_cast %335 : vector<1x1x4x4xbf16> to vector<4x4xbf16>
    %c1023_i32_288 = arith.constant 1023 : i32
    %337 = tpu.dynamic_rotate %198 by %c1023_i32_288 dim 1 : vector<4x1024xf32>, i32 -> vector<4x1024xf32>
    %338 = arith.truncf %337 : vector<4x1024xf32> to vector<4x1024xbf16>
    %cst_289 = arith.constant dense<0.000000e+00> : vector<4x1024xf32>
    %339 = tpu.matmul %336, %338, %cst_289 {dimension_numbers = #tpu.dot_dimension_numbers<[1], [0], [0], [1], [0, 0, 1, 1], [], []>} : vector<4x4xbf16>, vector<4x1024xbf16>, vector<4x1024xf32> -> vector<4x1024xf32>
    %340 = arith.addf %334, %339 : vector<4x1024xf32>
    %c2_290 = arith.constant 2 : index
    %c6_291 = arith.constant 6 : index
    %c0_292 = arith.constant 0 : index
    %c0_293 = arith.constant 0 : index
    %341 = vector.load %arg5[%c2_290, %c6_291, %c0_292, %c0_293] : memref<3x9x4x4xbf16, #tpu.memory_space<vmem>>, vector<1x1x4x4xbf16>
    %342 = vector.shape_cast %341 : vector<1x1x4x4xbf16> to vector<4x4xbf16>
    %c993_i32_294 = arith.constant 993 : i32
    %343 = tpu.dynamic_rotate %198 by %c993_i32_294 dim 1 : vector<4x1024xf32>, i32 -> vector<4x1024xf32>
    %344 = arith.truncf %343 : vector<4x1024xf32> to vector<4x1024xbf16>
    %cst_295 = arith.constant dense<0.000000e+00> : vector<4x1024xf32>
    %345 = tpu.matmul %342, %344, %cst_295 {dimension_numbers = #tpu.dot_dimension_numbers<[1], [0], [0], [1], [0, 0, 1, 1], [], []>} : vector<4x4xbf16>, vector<4x1024xbf16>, vector<4x1024xf32> -> vector<4x1024xf32>
    %346 = arith.addf %340, %345 : vector<4x1024xf32>
    %c2_296 = arith.constant 2 : index
    %c7_297 = arith.constant 7 : index
    %c0_298 = arith.constant 0 : index
    %c0_299 = arith.constant 0 : index
    %347 = vector.load %arg5[%c2_296, %c7_297, %c0_298, %c0_299] : memref<3x9x4x4xbf16, #tpu.memory_space<vmem>>, vector<1x1x4x4xbf16>
    %348 = vector.shape_cast %347 : vector<1x1x4x4xbf16> to vector<4x4xbf16>
    %c992_i32_300 = arith.constant 992 : i32
    %349 = tpu.dynamic_rotate %198 by %c992_i32_300 dim 1 : vector<4x1024xf32>, i32 -> vector<4x1024xf32>
    %350 = arith.truncf %349 : vector<4x1024xf32> to vector<4x1024xbf16>
    %cst_301 = arith.constant dense<0.000000e+00> : vector<4x1024xf32>
    %351 = tpu.matmul %348, %350, %cst_301 {dimension_numbers = #tpu.dot_dimension_numbers<[1], [0], [0], [1], [0, 0, 1, 1], [], []>} : vector<4x4xbf16>, vector<4x1024xbf16>, vector<4x1024xf32> -> vector<4x1024xf32>
    %352 = arith.addf %346, %351 : vector<4x1024xf32>
    %c2_302 = arith.constant 2 : index
    %c8_303 = arith.constant 8 : index
    %c0_304 = arith.constant 0 : index
    %c0_305 = arith.constant 0 : index
    %353 = vector.load %arg5[%c2_302, %c8_303, %c0_304, %c0_305] : memref<3x9x4x4xbf16, #tpu.memory_space<vmem>>, vector<1x1x4x4xbf16>
    %354 = vector.shape_cast %353 : vector<1x1x4x4xbf16> to vector<4x4xbf16>
    %c991_i32_306 = arith.constant 991 : i32
    %355 = tpu.dynamic_rotate %198 by %c991_i32_306 dim 1 : vector<4x1024xf32>, i32 -> vector<4x1024xf32>
    %356 = arith.truncf %355 : vector<4x1024xf32> to vector<4x1024xbf16>
    %cst_307 = arith.constant dense<0.000000e+00> : vector<4x1024xf32>
    %357 = tpu.matmul %354, %356, %cst_307 {dimension_numbers = #tpu.dot_dimension_numbers<[1], [0], [0], [1], [0, 0, 1, 1], [], []>} : vector<4x4xbf16>, vector<4x1024xbf16>, vector<4x1024xf32> -> vector<4x1024xf32>
    %358 = arith.addf %352, %357 : vector<4x1024xf32>
    %c0_308 = arith.constant 0 : index
    %c0_309 = arith.constant 0 : index
    %359 = vector.load %arg6[%c0_308, %c0_309] : memref<4x1xf32, #tpu.memory_space<vmem>>, vector<4x1xf32>
    %360 = vector.broadcast %359 : vector<4x1xf32> to vector<4x1024xf32>
    %361 = arith.addf %358, %360 : vector<4x1024xf32>
    %c0_310 = arith.constant 0 : index
    %c0_311 = arith.constant 0 : index
    %362 = vector.load %arg7[%c0_310, %c0_311] : memref<4x4xbf16, #tpu.memory_space<vmem>>, vector<4x4xbf16>
    %cst_312 = arith.constant dense<0.000000e+00> : vector<4x1024xf32>
    %363 = tpu.matmul %362, %1, %cst_312 {dimension_numbers = #tpu.dot_dimension_numbers<[1], [0], [0], [1], [0, 0, 1, 1], [], []>} : vector<4x4xbf16>, vector<4x1024xbf16>, vector<4x1024xf32> -> vector<4x1024xf32>
    %c0_313 = arith.constant 0 : index
    %c0_314 = arith.constant 0 : index
    %364 = vector.load %arg8[%c0_313, %c0_314] : memref<4x1xf32, #tpu.memory_space<vmem>>, vector<4x1xf32>
    %365 = vector.broadcast %364 : vector<4x1xf32> to vector<4x1024xf32>
    %366 = arith.addf %363, %365 : vector<4x1024xf32>
    %367 = arith.addf %361, %366 : vector<4x1024xf32>
    %cst_315 = arith.constant 0.000000e+00 : f32
    %368 = vector.broadcast %cst_315 : f32 to vector<4x1024xf32>
    %369 = arith.maximumf %367, %368 : vector<4x1024xf32>
    %c0_316 = arith.constant 0 : index
    %c0_317 = arith.constant 0 : index
    %c0_318 = arith.constant 0 : index
    %370 = vector.load %arg9[%c0_316, %c0_317, %c0_318] : memref<1x4x1024xf32, #tpu.memory_space<vmem>>, vector<1x4x1024xf32>
    %371 = vector.shape_cast %370 : vector<1x4x1024xf32> to vector<4x1024xf32>
    %372 = vector.shape_cast %369 : vector<4x1024xf32> to vector<1x4x1024xf32>
    tpu.vector_store %arg9[%c0_316, %c0_317, %c0_318], %372 {strides = array<i32>} : memref<1x4x1024xf32, #tpu.memory_space<vmem>>, vector<1x4x1024xf32>,
    return
  }
  func.func @transform_0(%arg0: i32) -> (i32, i32, i32) {
    %c0_i32 = arith.constant 0 : i32
    %c0_i32_0 = arith.constant 0 : i32
    %c0_i32_1 = arith.constant 0 : i32
    return %arg0, %c0_i32, %c0_i32_0 : i32, i32, i32
  }
  func.func @transform_1(%arg0: i32) -> (i32, i32) {
    %c0_i32 = arith.constant 0 : i32
    %c0_i32_0 = arith.constant 0 : i32
    %c0_i32_1 = arith.constant 0 : i32
    return %c0_i32, %c0_i32_0 : i32, i32
  }
  func.func @transform_2(%arg0: i32) -> (i32, i32, i32, i32) {
    %c0_i32 = arith.constant 0 : i32
    %c0_i32_0 = arith.constant 0 : i32
    %c0_i32_1 = arith.constant 0 : i32
    %c0_i32_2 = arith.constant 0 : i32
    %c0_i32_3 = arith.constant 0 : i32
    return %c0_i32, %c0_i32_0, %c0_i32_1, %c0_i32_2 : i32, i32, i32, i32
  }
  func.func @transform_3(%arg0: i32) -> (i32, i32, i32) {
    %c0_i32 = arith.constant 0 : i32
    %c0_i32_0 = arith.constant 0 : i32
    %c0_i32_1 = arith.constant 0 : i32
    %c0_i32_2 = arith.constant 0 : i32
    return %c0_i32, %c0_i32_0, %c0_i32_1 : i32, i32, i32
  }
  func.func @transform_4(%arg0: i32) -> (i32, i32, i32, i32) {
    %c0_i32 = arith.constant 0 : i32
    %c0_i32_0 = arith.constant 0 : i32
    %c0_i32_1 = arith.constant 0 : i32
    %c0_i32_2 = arith.constant 0 : i32
    %c0_i32_3 = arith.constant 0 : i32
    return %c0_i32, %c0_i32_0, %c0_i32_1, %c0_i32_2 : i32, i32, i32, i32
  }
  func.func @transform_5(%arg0: i32) -> (i32, i32) {
    %c0_i32 = arith.constant 0 : i32
    %c0_i32_0 = arith.constant 0 : i32
    %c0_i32_1 = arith.constant 0 : i32
    return %c0_i32, %c0_i32_0 : i32, i32
  }
  func.func @transform_6(%arg0: i32) -> (i32, i32) {
    %c0_i32 = arith.constant 0 : i32
    %c0_i32_0 = arith.constant 0 : i32
    %c0_i32_1 = arith.constant 0 : i32
    return %c0_i32, %c0_i32_0 : i32, i32
  }
  func.func @transform_7(%arg0: i32) -> (i32, i32) {
    %c0_i32 = arith.constant 0 : i32
    %c0_i32_0 = arith.constant 0 : i32
    %c0_i32_1 = arith.constant 0 : i32
    return %c0_i32, %c0_i32_0 : i32, i32
  }
  func.func @transform_8(%arg0: i32) -> (i32, i32, i32) {
    %c0_i32 = arith.constant 0 : i32
    %c0_i32_0 = arith.constant 0 : i32
    %c0_i32_1 = arith.constant 0 : i32
    return %arg0, %c0_i32, %c0_i32_0 : i32, i32, i32
  }
}

</mosaic_0001>

<bundles_post_ra>
// kernel: er_forward_pallas.1
= control target key start
LH: loop header
LB: loop body
LE: loop exit
PB: predicated region body
PF: predicated region fallthrough
CT: control target
= control target key end

     0   :  { %s14094_s27 = smov 0   ;;  %s17066_s0 = inlined_call_operand.vmem [shape: bf16[2,4,1024], index: 0, kind: input, shape index: {}]   ;;  %s17067_s1 = inlined_call_operand.vmem [shape: f32[1,1024], index: 1, kind: input, shape index: {}]   ;;  %s17068_s2 = inlined_call_operand.vmem [shape: bf16[3,9,4,4], index: 2, kind: input, shape index: {}]   ;;  %s17069_s3 = inlined_call_operand.vmem [shape: f32[3,4,1], index: 3, kind: input, shape index: {}]   ;;  %s17070_s4 = inlined_call_operand.vmem [shape: bf16[3,9,4,4], index: 4, kind: input, shape index: {}]   ;;  %s17071_s5 = inlined_call_operand.vmem [shape: f32[4,1], index: 5, kind: input, shape index: {}]   ;;  %s17072_s6 = inlined_call_operand.vmem [shape: bf16[4,4], index: 6, kind: input, shape index: {}]   ;;  %s17073_s7 = inlined_call_operand.vmem [shape: f32[4,1], index: 7, kind: input, shape index: {}]   ;;  %s17074_s8 = inlined_call_operand.vmem [shape: f32[2,4,1024], index: 8, kind: output, shape index: {}]  }
   0x1 LB: > { %s12498_s28 = sadd.s32 4294967295, %s14033_s27   ;;  %p12502_p0 = scmp.ge.s32.totalorder %s14033_s27, 1  ;;  %s14033_s27 = sphi %s14094_s27, %s18_s27  }
   0x2   : > { %p262_p1 = scmp.lt.s32.totalorder %s14033_s27, 3 }
   0x4   : > { %p263_p2 = pnand %p12502_p0, %p262_p1 }
   0x6   : > { %266 = sbr.rel (%p263_p2) target bundleno = 1368 (0x558), region = 52 }
   0xd   : > { %p296_p3 = scmp.lt.s32.totalorder %s12498_s28, 1  ;;  %v17076_v10 = vmov 0   ;;  %s14036_s11 = smov 32   ;;  %v343_v17 = vlaneseq  ;;  %vm401_vm1 = vcmask 1041408   ;;  %vm397_vm2 = vcmask 31744  }
   0xe   : > { %458 = vmatprep.mubr.bf16.mxu0 %v17076_v10  ;;  %499 = vmatprep.mubr.bf16.mxu1 %v17076_v10  ;;  %s14037_s12 = smov 33   ;;  %s14038_s13 = smov 31   ;;  %v14260_v37 = vld [vmem:[%s17068_s2 + $0x2] sm:$0x3] }
   0xf   : > { %s17094_s28 = smov (!%p296_p3, %s12498_s28), 1  ;;  %13659 = vset.pattern.permute.xlu0 %v17076_v10  ;;  %13840 = vset.pattern.permute.xlu1 %v17076_v10  ;;  %s14039_s14 = smov 1   ;;  %v14245_v18 = vand.u32 127, %v343_v17 }
  0x10   : > { %s13007_s29 = sshll.u32 %s17094_s28, 4  ;;  %s14040_s15 = smov 127  }
  0x11   : > { %s14108_s10 = scalar_lea.vmem %s17066_s0, %s13007_s29  ;;  %s14041_s16 = smov 97   ;;  %vm380_vm0 = vcmp.lt.s32.totalorder %v14245_v18, 32  ;;  %vm345_vm3 = vcmp.lt.s32.totalorder %v14245_v18, 33  ;;  %vm799_vm4 = vcmp.lt.s32.totalorder %v14245_v18, 31  ;;  %vm1033_vm5 = vcmp.lt.s32.totalorder %v14245_v18, 1 }
  0x12   : > { %v14111_v0 = vld [vmem:[%s14108_s10 + $0x8] sm:$0xff]  ;;  %v14114_v1 = vld [vmem:[%s14108_s10] sm:$0xff]  ;;  %s14042_s17 = smov 96   ;;  %s14043_s18 = smov 95   ;;  %vm1504_vm6 = vcmp.lt.s32.totalorder %v14245_v18, 127  ;;  %vm1738_vm7 = vcmp.lt.s32.totalorder %v14245_v18, 97 }
  0x13   : > { %v14117_v2 = vunpack.c.h.bf16 %v14111_v0  ;;  %v309_v3 = vunpack.c.l.bf16 %v14114_v1  ;;  %v14121_v4 = vunpack.c.l.bf16 %v14111_v0  ;;  %v310_v5 = vunpack.c.h.bf16 %v14114_v1  ;;  %s14044_s19 = smov 4   ;;  %s14045_s20 = smov 124  }
  0x14   : > { %s14047_s9 = smov 8   ;;  %s14048_s21 = smov 120   ;;  %vm1972_vm8 = vcmp.lt.s32.totalorder %v14245_v18, 96  ;;  %vm2206_vm9 = vcmp.lt.s32.totalorder %v14245_v18, 95  ;;  %vm2527_vm10 = vcmp.lt.s32.totalorder %v14245_v18, 4  ;;  %vm2954_vm11 = vcmp.lt.s32.totalorder %v14245_v18, 124 }
  0x15   : > { %v14126_v6 = vcombine.high %v14117_v2, %v14117_v2  ;;  %v14128_v7 = vcombine.high %v309_v3, %v309_v3  ;;  %v14132_v8 = vcombine.high %v14121_v4, %v14121_v4  ;;  %v14134_v9 = vcombine.high %v310_v5, %v310_v5 }
  0x16   : > { %v14227_v15 = vpack.i.bf16 %v14117_v2, %v310_v5  ;;  %vm4297_vm12 = vcmp.lt.s32.totalorder %v14245_v18, 8  ;;  %vm4692_vm13 = vcmp.lt.s32.totalorder %v14245_v18, 120 }
  0x17   : > { %378 = vrot.lane.b32.xlu1 %v14126_v6, %s14036_s11  ;;  %v14142_v11 = vpack.i.bf16 %v14128_v7, %v309_v3  ;;  %v13489_v12 = vpack.i.bf16 %v14132_v8, %v14121_v4  ;;  %v14150_v13 = vpack.i.bf16 %v14134_v9, %v310_v5  ;;  %v14188_v14 = vpack.i.bf16 %v14117_v2, %v14132_v8 }
  0x18   : > { %v14234_v16 = vpack.i.bf16 %v14121_v4, %v14134_v9 }
  0x19   : > { %13480 = vrot.lane.b32.xlu0 %v14142_v11, %s14036_s11 }
  0x1b   : > { %13490 = vrot.lane.b32.xlu1 %v13489_v12, %s14036_s11 }
  0x1d   : > { %13485 = vrot.lane.b32.xlu0 %v14150_v13, %s14036_s11 }
  0x1f   : > { %13495 = vrot.lane.b32.xlu1 %v14142_v11, %s14037_s12 }
  0x21   : > { %376 = vrot.lane.b32.xlu0 %v14117_v2, %s14036_s11 }
  0x23   : > { %341 = vrot.lane.b32.xlu1 %v14126_v6, %s14037_s12 }
  0x25   : > { %13500 = vrot.lane.b32.xlu0 %v14150_v13, %s14037_s12 }
  0x27   : > { %339 = vrot.lane.b32.xlu1 %v14117_v2, %s14037_s12 }
  0x29   : > { %13505 = vrot.lane.b32.xlu0 %v13489_v12, %s14037_s12 }
  0x2b   : > { %13515 = vrot.lane.b32.xlu1 %v14150_v13, %s14038_s13 }
  0x2d   : > { %13510 = vrot.lane.b32.xlu0 %v14142_v11, %s14038_s13 }
  0x2f   : > { %13520 = vrot.lane.b32.xlu1 %v13489_v12, %s14038_s13 }
  0x31   : > { %797 = vrot.lane.b32.xlu0 %v14126_v6, %s14038_s13 }
  0x33   : > { %13525 = vrot.lane.b32.xlu1 %v14142_v11, %s14039_s14 }
  0x35   : > { %795 = vrot.lane.b32.xlu0 %v14117_v2, %s14038_s13 }
  0x37   : > { %1031 = vrot.lane.b32.xlu1 %v14126_v6, %s14039_s14 }
  0x39   : > { %13530 = vrot.lane.b32.xlu0 %v14150_v13, %s14039_s14 }
  0x3b   : > { %1029 = vrot.lane.b32.xlu1 %v14117_v2, %s14039_s14 }
  0x3d   : > { %13535 = vrot.lane.b32.xlu0 %v13489_v12, %s14039_s14 }
  0x3f   : > { %13545 = vrot.lane.b32.xlu1 %v14150_v13, %s14040_s15 }
  0x41   : > { %13540 = vrot.lane.b32.xlu0 %v14142_v11, %s14040_s15 }
  0x43   : > { %13550 = vrot.lane.b32.xlu1 %v14188_v14, %s14040_s15 }
  0x45   : > { %1496 = vrot.lane.b32.xlu0 %v14121_v4, %s14040_s15 }
  0x47   : > { %13555 = vrot.lane.b32.xlu1 %v14142_v11, %s14041_s16 }
  0x49   : > { %1502 = vrot.lane.b32.xlu0 %v14126_v6, %s14040_s15 }
  0x4b   : > { %1730 = vrot.lane.b32.xlu1 %v14121_v4, %s14041_s16 }
  0x4d   : > { %13560 = vrot.lane.b32.xlu0 %v14150_v13, %s14041_s16 }
  0x4f   : > { %1736 = vrot.lane.b32.xlu1 %v14126_v6, %s14041_s16 }
  0x51   : > { %13565 = vrot.lane.b32.xlu0 %v14188_v14, %s14041_s16 }
  0x53   : > { %13575 = vrot.lane.b32.xlu1 %v14150_v13, %s14042_s17 }
  0x55   : > { %13570 = vrot.lane.b32.xlu0 %v14142_v11, %s14042_s17 }
  0x57   : > { %13580 = vrot.lane.b32.xlu1 %v14188_v14, %s14042_s17 }
  0x59   : > { %1964 = vrot.lane.b32.xlu0 %v14121_v4, %s14042_s17 }
  0x5b   : > { %13585 = vrot.lane.b32.xlu1 %v14142_v11, %s14043_s18 }
  0x5d   : > { %1970 = vrot.lane.b32.xlu0 %v14126_v6, %s14042_s17 }
  0x5f   : > { %2198 = vrot.lane.b32.xlu1 %v14121_v4, %s14043_s18 }
  0x61   : > { %13590 = vrot.lane.b32.xlu0 %v14150_v13, %s14043_s18 }
  0x63   : > { %2204 = vrot.lane.b32.xlu1 %v14126_v6, %s14043_s18 }
  0x65   : > { %13595 = vrot.lane.b32.xlu0 %v14188_v14, %s14043_s18 }
  0x67   : > { %13605 = vrot.lane.b32.xlu1 %v14227_v15, %s14044_s19 }
  0x69   : > { %13600 = vrot.lane.b32.xlu0 %v14142_v11, %s14044_s19 }
  0x6b   : > { %13610 = vrot.lane.b32.xlu1 %v14234_v16, %s14044_s19 }
  0x6d   : > { %2525 = vrot.lane.b32.xlu0 %v14126_v6, %s14044_s19 }
  0x6f   : > { %13615 = vrot.lane.b32.xlu1 %v14142_v11, %s14045_s20 }
  0x71   : > { %2521 = vrot.lane.b32.xlu0 %v14132_v8, %s14044_s19 }
  0x73   : > { %2952 = vrot.lane.b32.xlu1 %v14126_v6, %s14045_s20 }
  0x75   : > { %13620 = vrot.lane.b32.xlu0 %v14150_v13, %s14045_s20 }
  0x77   : > { %2950 = vrot.lane.b32.xlu1 %v14117_v2, %s14045_s20 }
  0x79   : > { %13625 = vrot.lane.b32.xlu0 %v13489_v12, %s14045_s20 }
  0x7b   : > { %13635 = vrot.lane.b32.xlu1 %v14188_v14, %s14047_s9 }
  0x7d   : > { %13630 = vrot.lane.b32.xlu0 %v14142_v11, %s14047_s9 }
  0x7f   : > { %13640 = vrot.lane.b32.xlu1 %v14150_v13, %s14047_s9 }
  0x81   : > { %4295 = vrot.lane.b32.xlu0 %v14126_v6, %s14047_s9 }
  0x83   : > { %13645 = vrot.lane.b32.xlu1 %v14142_v11, %s14048_s21 }
  0x85   : > { %4289 = vrot.lane.b32.xlu0 %v14121_v4, %s14047_s9 }
  0x87   : > { %4690 = vrot.lane.b32.xlu1 %v14126_v6, %s14048_s21 }
  0x89   : > { %v379_v19 = vpop.permute.xlu1 %378  ;;  %13650 = vrot.lane.b32.xlu0 %v14227_v15, %s14048_s21 }
  0x8b   : > { %v13481_v20 = vpop.permute.xlu0 %13480  ;;  %4686 = vrot.lane.b32.xlu1 %v14132_v8, %s14048_s21 }
  0x8c   : > { %v13483_v21 = vunpack.i.h.bf16 %v13481_v20  ;;  %v13482_v22 = vunpack.i.l.bf16 %v13481_v20 }
  0x8d   : > { %v13491_v23 = vpop.permute.xlu1 %13490  ;;  %13655 = vrot.lane.b32.xlu0 %v14234_v16, %s14048_s21  ;;  %v12551_v16 = vld [vmem:[%s17068_s2 + $0xa] sm:$0x3] }
  0x8e   : > { %v13493_v24 = vunpack.i.h.bf16 %v13491_v23  ;;  %v13492_v25 = vunpack.i.l.bf16 %v13491_v23  ;;  %v387_v26 = vsel %vm380_vm0, %v13482_v22, %v13483_v21  ;;  %v388_v27 = vsel %vm380_vm0, %v379_v19, %v13482_v22 }
  0x8f   : > { %v13486_v28 = vpop.permute.xlu0 %13485  ;;  %v390_v29 = vpack.c.bf16 %v387_v26, %v387_v26  ;;  %v389_v30 = vpack.c.bf16 %v388_v27, %v388_v27 }
  0x90   : > { %v13488_v31 = vunpack.i.h.bf16 %v13486_v28  ;;  %v13487_v32 = vunpack.i.l.bf16 %v13486_v28  ;;  %v383_v33 = vsel %vm380_vm0, %v13492_v25, %v13493_v24 }
  0x91   : > { %12508 = vmatprep.subr.msk.bf16.mxu0 %vm401_vm1, %v390_v29  ;;  %v403_v34 = vsel %vm401_vm1, %v389_v30, 0  ;;  %v394_v35 = vpack.c.bf16 %v383_v33, %v383_v33  ;;  %v13496_v36 = vpop.permute.xlu1 %13495 }
  0x92   : > { %427 = vmatpush1.bf16.msra.mxu0 %v403_v34  ;;  %v385_v38 = vsel %vm380_vm0, %v13487_v32, %v13488_v31  ;;  %v386_v39 = vsel %vm380_vm0, %v13483_v21, %v13487_v32  ;;  %v384_v40 = vsel %vm380_vm0, %v13488_v31, %v13492_v25  ;;  %v13498_v41 = vunpack.i.h.bf16 %v13496_v36 }
  0x93   : > { %v377_v42 = vpop.permute.xlu0 %376  ;;  %v392_v43 = vpack.c.bf16 %v385_v38, %v385_v38  ;;  %12512 = vmatprep.subr.msk.bf16.mxu0 %vm401_vm1, %v394_v35  ;;  %v391_v44 = vpack.c.bf16 %v386_v39, %v386_v39  ;;  %v393_v45 = vpack.c.bf16 %v384_v40, %v384_v40  ;;  %v13497_v46 = vunpack.i.l.bf16 %v13496_v36  ;;  %v314_v38 = vld [vmem:[%s17068_s2] sm:$0x3] }
  0x94   : > { %v381_v47 = vsel %vm380_vm0, %v377_v42, %v379_v19  ;;  %v382_v48 = vsel %vm380_vm0, %v13493_v24, %v377_v42 }
  0x95   : > { %v395_v49 = vpack.c.bf16 %v382_v48, %v382_v48  ;;  %v396_v50 = vpack.c.bf16 %v381_v47, %v381_v47  ;;  %12509 = vmatmul.mubr.msk.bf16.vlgmr.msra.gmra.mrb[0].mxu0 %vm397_vm2, %v14260_v37  ;;  %12510 = vmatprep.subr.msk.bf16.mxu1 %vm401_vm1, %v392_v43  ;;  %v409_v51 = vsel %vm401_vm1, %v391_v44, 0  ;;  %v415_v52 = vsel %vm401_vm1, %v393_v45, 0  ;;  %v342_v53 = vpop.permute.xlu1 %341 }
  0x96   : > { %468 = vmatpush1.bf16.msra.mxu1 %v409_v51  ;;  %509 = vmatpush1.bf16.msra.mxu0 %v415_v52  ;;  %v353_v54 = vsel %vm345_vm3, %v342_v53, %v13497_v46  ;;  %v352_v55 = vsel %vm345_vm3, %v13497_v46, %v13498_v41 }
  0x97   : > { %12514 = vmatprep.subr.msk.bf16.mxu1 %vm401_vm1, %v396_v50  ;;  %v13501_v56 = vpop.permute.xlu0 %13500  ;;  %540 = vmatprep.mubr.bf16.mxu0 %v17076_v10  ;;  %v354_v57 = vpack.c.bf16 %v353_v54, %v353_v54  ;;  %v421_v58 = vsel %vm401_vm1, %v395_v49, 0  ;;  %v355_v59 = vpack.c.bf16 %v352_v55, %v352_v55 }
  0x98   : > { %v13503_v60 = vunpack.i.h.bf16 %v13501_v56  ;;  %v13502_v61 = vunpack.i.l.bf16 %v13501_v56 }
  0x99   : > { %12511 = vmatmul.mubr.msk.bf16.vlgmr.msra.gmra.mrb[0].mxu1 %vm397_vm2, %v14260_v37  ;;  %12516 = vmatprep.subr.msk.bf16.mxu0 %vm401_vm1, %v355_v59  ;;  %v340_v62 = vpop.permute.xlu1 %339  ;;  %v594_v5 = vsel %vm401_vm1, %v354_v57, 0 }
  0x9a   : > { %550 = vmatpush1.bf16.msra.mxu1 %v421_v58  ;;  %581 = vmatprep.mubr.bf16.mxu1 %v17076_v10  ;;  %v350_v63 = vsel %vm345_vm3, %v13502_v61, %v13503_v60  ;;  %v351_v2 = vsel %vm345_vm3, %v13498_v41, %v13502_v61  ;;  %v346_v12 = vsel %vm345_vm3, %v340_v62, %v342_v53 }
  0x9b   : > { %v13506_v3 = vpop.permute.xlu0 %13505  ;;  %v357_v19 = vpack.c.bf16 %v350_v63, %v350_v63  ;;  %v356_v20 = vpack.c.bf16 %v351_v2, %v351_v2  ;;  %v361_v24 = vpack.c.bf16 %v346_v12, %v346_v12 }
  0x9c   : > { %v13508_v21 = vunpack.i.h.bf16 %v13506_v3  ;;  %v13507_v22 = vunpack.i.l.bf16 %v13506_v3 }
  0x9d   : > { %12513 = vmatmul.mubr.msk.bf16.vlgmr.msra.gmra.mrb[4].mxu0 %vm397_vm2, %v14260_v37  ;;  %12518 = vmatprep.subr.msk.bf16.mxu1 %vm401_vm1, %v357_v19  ;;  %v13516_v23 = vpop.permute.xlu1 %13515  ;;  %v600_v29 = vsel %vm401_vm1, %v356_v20, 0 }
  0x9e   : > { %618 = vmatpush1.bf16.msra.mxu0 %v594_v5  ;;  %649 = vmatprep.mubr.bf16.mxu0 %v17076_v10  ;;  %v348_v25 = vsel %vm345_vm3, %v13507_v22, %v13508_v21  ;;  %v349_v26 = vsel %vm345_vm3, %v13503_v60, %v13507_v22  ;;  %v347_v27 = vsel %vm345_vm3, %v13508_v21, %v340_v62  ;;  %v13518_v34 = vunpack.i.h.bf16 %v13516_v23  ;;  %v12524_v22 = vld [vmem:[%s17068_s2 + $0x4] sm:$0x3] }
  0x9f   : > { %v359_v28 = vpack.c.bf16 %v348_v25, %v348_v25  ;;  %v358_v30 = vpack.c.bf16 %v349_v26, %v349_v26  ;;  %v13511_v31 = vpop.permute.xlu0 %13510  ;;  %v13517_v35 = vunpack.i.l.bf16 %v13516_v23  ;;  %v360_v40 = vpack.c.bf16 %v347_v27, %v347_v27 }
  0xa0   : > { %v13513_v32 = vunpack.i.h.bf16 %v13511_v31  ;;  %v13512_v33 = vunpack.i.l.bf16 %v13511_v31  ;;  %v14046_v23 = vmov 1983009808  }
  0xa1   : > { %12515 = vmatmul.mubr.msk.bf16.vlgmr.msra.gmra.mrb[4].mxu1 %vm397_vm2, %v14260_v37  ;;  %12520 = vmatprep.subr.msk.bf16.mxu0 %vm401_vm1, %v359_v28  ;;  %v13521_v36 = vpop.permute.xlu1 %13520  ;;  %v606_v41 = vsel %vm401_vm1, %v358_v30, 0  ;;  %v804_v46 = vsel %vm799_vm4, %v13517_v35, %v13518_v34  ;;  %v612_v48 = vsel %vm401_vm1, %v360_v40, 0 }
  0xa2   : > { %659 = vmatpush1.bf16.msra.mxu1 %v600_v29  ;;  %690 = vmatprep.mubr.bf16.mxu1 %v17076_v10  ;;  %v806_v39 = vsel %vm799_vm4, %v13512_v33, %v13513_v32  ;;  %v13523_v44 = vunpack.i.h.bf16 %v13521_v36  ;;  %v13522_v45 = vunpack.i.l.bf16 %v13521_v36  ;;  %v811_v50 = vpack.c.bf16 %v804_v46, %v804_v46 }
  0xa3   : > { %12522 = vmatprep.subr.msk.bf16.mxu1 %vm401_vm1, %v361_v24  ;;  %v798_v42 = vpop.permute.xlu0 %797  ;;  %v809_v37 = vpack.c.bf16 %v806_v39, %v806_v39  ;;  %v805_v52 = vsel %vm799_vm4, %v13513_v32, %v13517_v35  ;;  %v1255_v24 = vunpack.c.l.s4 %v14046_v23 }
  0xa4   : > { %v807_v43 = vsel %vm799_vm4, %v798_v42, %v13512_v33  ;;  %v802_v51 = vsel %vm799_vm4, %v13522_v45, %v13523_v44  ;;  %v810_v55 = vpack.c.bf16 %v805_v52, %v805_v52  ;;  %v803_v59 = vsel %vm799_vm4, %v13518_v34, %v13522_v45 }
  0xa5   : > { %12517 = vmatmul.mubr.msk.bf16.vlgmr.msra.gmra.mrb[8].mxu0 %vm397_vm2, %v314_v38  ;;  %v808_v47 = vpack.c.bf16 %v807_v43, %v807_v43  ;;  %v813_v54 = vpack.c.bf16 %v802_v51, %v802_v51  ;;  %v13526_v56 = vpop.permute.xlu1 %13525  ;;  %v812_v2 = vpack.c.bf16 %v803_v59, %v803_v59  ;;  %v1256_v32 = vunpack.c.0.s8 %v1255_v24  ;;  %v12533_v51 = vld [vmem:[%s17068_s2 + $0x6] sm:$0x3] }
  0xa6   : > { %700 = vmatpush1.bf16.msra.mxu0 %v606_v41  ;;  %731 = vmatprep.mubr.bf16.mxu0 %v17076_v10  ;;  %v13528_v60 = vunpack.i.h.bf16 %v13526_v56  ;;  %v13527_v61 = vunpack.i.l.bf16 %v13526_v56  ;;  %v826_v63 = vsel %vm401_vm1, %v810_v55, 0  ;;  %v14362_v33 = vshrl.u32 %v343_v17, 7 }
  0xa7   : > { %12525 = vmatprep.subr.msk.bf16.mxu0 %vm401_vm1, %v809_v37  ;;  %v796_v49 = vpop.permute.xlu0 %795  ;;  %v820_v53 = vsel %vm401_vm1, %v808_v47, 0  ;;  %v832_v26 = vsel %vm401_vm1, %v812_v2, 0 }
  0xa8   : > { %v800_v58 = vsel %vm799_vm4, %v796_v49, %v798_v42  ;;  %v801_v3 = vsel %vm799_vm4, %v13523_v44, %v796_v49  ;;  %v1040_v19 = vsel %vm1033_vm5, %v13527_v61, %v13528_v60  ;;  %v1259_v17 = vsub.s32 %v1256_v32, %v14362_v33 }
  0xa9   : > { %12519 = vmatmul.mubr.msk.bf16.vlgmr.msra.gmra.mrb[8].mxu1 %vm397_vm2, %v314_v38  ;;  %v815_v62 = vpack.c.bf16 %v800_v58, %v800_v58  ;;  %v1032_v20 = vpop.permute.xlu1 %1031  ;;  %v814_v25 = vpack.c.bf16 %v801_v3, %v801_v3  ;;  %v1043_v27 = vpack.c.bf16 %v1040_v19, %v1040_v19  ;;  %v14386_v49 = vcombine.high %v14114_v1, %v14114_v1 }
  0xaa   : > { %741 = vmatpush1.bf16.msra.mxu1 %v612_v48  ;;  %772 = vmatprep.mubr.bf16.mxu1 %v17076_v10  ;;  %v1041_v28 = vsel %vm1033_vm5, %v1032_v20, %v13527_v61  ;;  %v1260_v45 = vrot.slane %v14114_v1, %v1259_v17  ;;  %v14410_v58 = vcombine.high %v14111_v0, %v14111_v0 }
  0xab   : > { %12527 = vmatprep.subr.msk.bf16.mxu1 %vm401_vm1, %v811_v50  ;;  %v13531_v57 = vpop.permute.xlu0 %13530  ;;  %v1042_v34 = vpack.c.bf16 %v1041_v28, %v1041_v28  ;;  %v838_v35 = vsel %vm401_vm1, %v814_v25, 0  ;;  %v1267_v1 = vrot.slane %v14386_v49, %v1259_v17 }
  0xac   : > { %v13533_v5 = vunpack.i.h.bf16 %v13531_v57  ;;  %v13532_v12 = vunpack.i.l.bf16 %v13531_v57  ;;  %v1277_v57 = vrot.slane %v14111_v0, %v1259_v17  ;;  %v14417_v61 = vsel %vm401_vm1, %v1260_v45, 0 }
  0xad   : > { %12521 = vmatmul.mubr.msk.bf16.vlgmr.msra.gmra.mrb[12].mxu0 %vm397_vm2, %v314_v38  ;;  %v1030_v40 = vpop.permute.xlu1 %1029  ;;  %v1054_v41 = vsel %vm401_vm1, %v1042_v34, 0  ;;  %v14405_v56 = vcombine.high %v1267_v1, %v1267_v1  ;;  %17083 = vst [vmem:[#allocation3_spill] sm:$0xff] %v14417_v61  ;;  %v14430_v2 = vsel %vm401_vm1, %v1267_v1, 0 }
  0xae   : > { %844 = vmatpush1.bf16.msra.mxu0 %v820_v53  ;;  %875 = vmatprep.mubr.bf16.mxu0 %v17076_v10  ;;  %v1038_v31 = vsel %vm1033_vm5, %v13532_v12, %v13533_v5  ;;  %v1039_v39 = vsel %vm1033_vm5, %v13528_v60, %v13532_v12  ;;  %v1034_v43 = vsel %vm1033_vm5, %v1030_v40, %v1032_v20  ;;  %v14447_v4 = vsel %vm401_vm1, %v1277_v57, 0 }
  0xaf   : > { %12529 = vmatprep.subr.msk.bf16.mxu0 %vm401_vm1, %v813_v54  ;;  %v13536_v21 = vpop.permute.xlu0 %13535  ;;  %v1045_v36 = vpack.c.bf16 %v1038_v31, %v1038_v31  ;;  %v1044_v37 = vpack.c.bf16 %v1039_v39, %v1039_v39  ;;  %v1049_v46 = vpack.c.bf16 %v1034_v43, %v1034_v43  ;;  %v14397_v54 = vcombine.high %v1260_v45, %v1260_v45 }
  0xb0   : > { %v13538_v29 = vunpack.i.h.bf16 %v13536_v21  ;;  %v13537_v30 = vunpack.i.l.bf16 %v13536_v21  ;;  %v14421_v0 = vcombine.high %v1277_v57, %v1277_v57  ;;  %17085 = vst [vmem:[#allocation5_spill] sm:$0xff] %v14447_v4 }
  0xb1   : > { %12523 = vmatmul.mubr.msk.bf16.vlgmr.msra.gmra.mrb[12].mxu1 %vm397_vm2, %v314_v38  ;;  %v1060_v47 = vsel %vm401_vm1, %v1044_v37, 0  ;;  %17082 = vst [vmem:[#allocation2_spill] sm:$0xff] %v14397_v54  ;;  %v13546_v60 = vpop.permute.xlu1 %13545 }
  0xb2   : > { %885 = vmatpush1.bf16.msra.mxu1 %v826_v63  ;;  %916 = vmatprep.mubr.bf16.mxu1 %v17076_v10  ;;  %v1036_v38 = vsel %vm1033_vm5, %v13537_v30, %v13538_v29  ;;  %v1037_v44 = vsel %vm1033_vm5, %v13533_v5, %v13537_v30  ;;  %v1035_v50 = vsel %vm1033_vm5, %v13538_v29, %v1030_v40  ;;  %v13547_v63 = vunpack.i.l.bf16 %v13546_v60 }
  0xb3   : > { %12531 = vmatprep.subr.msk.bf16.mxu1 %vm401_vm1, %v815_v62  ;;  %v1047_v42 = vpack.c.bf16 %v1036_v38, %v1036_v38  ;;  %v1046_v48 = vpack.c.bf16 %v1037_v44, %v1037_v44  ;;  %v1048_v52 = vpack.c.bf16 %v1035_v50, %v1035_v50  ;;  %v13541_v59 = vpop.permute.xlu0 %13540  ;;  %17084 = vst [vmem:[#allocation4_spill] sm:$0xff] %v14421_v0  ;;  %v13548_v19 = vunpack.i.h.bf16 %v13546_v60 }
  0xb4   : > { %v1284_v62 = vrot.slane %v14410_v58, %v1259_v17  ;;  %v13543_v14 = vunpack.i.h.bf16 %v13541_v59  ;;  %v13542_v12 = vunpack.i.l.bf16 %v13541_v59 }
  0xb5   : > { %12526 = vmatmul.mubr.msk.bf16.vlgmr.msra.gmra.mrb[16].mxu0 %vm397_vm2, %v12524_v22  ;;  %v1066_v53 = vsel %vm401_vm1, %v1046_v48, 0  ;;  %v1072_v55 = vsel %vm401_vm1, %v1048_v52, 0  ;;  %v13551_v21 = vpop.permute.xlu1 %13550  ;;  %v1509_v31 = vsel %vm1504_vm6, %v13547_v63, %v13548_v19 }
  0xb6   : > { %926 = vmatpush1.bf16.msra.mxu0 %v832_v26  ;;  %957 = vmatprep.mubr.bf16.mxu0 %v17076_v10  ;;  %v14434_v5 = vcombine.high %v1284_v62, %v1284_v62  ;;  %v1510_v20 = vsel %vm1504_vm6, %v13543_v14, %v13547_v63  ;;  %v13553_v24 = vunpack.i.h.bf16 %v13551_v21  ;;  %v13552_v25 = vunpack.i.l.bf16 %v13551_v21 }
  0xb7   : > { %12534 = vmatprep.subr.msk.bf16.mxu0 %vm401_vm1, %v1043_v27  ;;  %v1497_v3 = vpop.permute.xlu0 %1496  ;;  %v1514_v23 = vpack.c.bf16 %v1510_v20, %v1510_v20  ;;  %v1511_v26 = vsel %vm1504_vm6, %v13542_v12, %v13543_v14  ;;  %v14459_v29 = vsel %vm401_vm1, %v1284_v62, 0  ;;  %v1515_v38 = vpack.c.bf16 %v1509_v31, %v1509_v31 }
  0xb8   : > { %v1508_v13 = vsel %vm1504_vm6, %v13548_v19, %v1497_v3  ;;  %17086 = vst [vmem:[#allocation6_spill] sm:$0xff] %v14459_v29  ;;  %v1513_v30 = vpack.c.bf16 %v1511_v26, %v1511_v26  ;;  %v1506_v32 = vsel %vm1504_vm6, %v13552_v25, %v13553_v24  ;;  %v1507_v15 = vsel %vm1504_vm6, %v1497_v3, %v13552_v25 }
  0xb9   : > { %12528 = vmatmul.mubr.msk.bf16.vlgmr.msra.gmra.mrb[16].mxu1 %vm397_vm2, %v12524_v22  ;;  %v1516_v28 = vpack.c.bf16 %v1508_v13, %v1508_v13  ;;  %v14471_v34 = vpop.permute.xlu1 %13555  ;;  %v1518_v39 = vpack.c.bf16 %v1506_v32, %v1506_v32  ;;  %v1517_v37 = vpack.c.bf16 %v1507_v15, %v1507_v15 }
  0xba   : > { %967 = vmatpush1.bf16.msra.mxu1 %v838_v35  ;;  %998 = vmatprep.mubr.bf16.mxu1 %v17076_v10  ;;  %v13558_v40 = vunpack.i.h.bf16 %v14471_v34  ;;  %v13557_v45 = vunpack.i.l.bf16 %v14471_v34 }
  0xbb   : > { %12536 = vmatprep.subr.msk.bf16.mxu1 %vm401_vm1, %v1045_v36  ;;  %v1503_v27 = vpop.permute.xlu0 %1502  ;;  %v1525_v36 = vsel %vm401_vm1, %v1513_v30, 0 }
  0xbc   : > { %v1512_v11 = vsel %vm1504_vm6, %v1503_v27, %v13542_v12  ;;  %v1505_v44 = vsel %vm1504_vm6, %v13553_v24, %v1503_v27  ;;  %v1745_v57 = vsel %vm1738_vm7, %v13557_v45, %v13558_v40 }
  0xbd   : > { %12530 = vmatmul.mubr.msk.bf16.vlgmr.msra.gmra.mrb[20].mxu0 %vm397_vm2, %v12524_v22  ;;  %v1731_v43 = vpop.permute.xlu1 %1730  ;;  %v1519_v50 = vpack.c.bf16 %v1505_v44, %v1505_v44  ;;  %v1747_v14 = vpack.c.bf16 %v1745_v57, %v1745_v57 }
  0xbe   : > { %1078 = vmatpush1.bf16.msra.mxu0 %v1054_v41  ;;  %1109 = vmatprep.mubr.bf16.mxu0 %v17076_v10  ;;  %v1520_v41 = vpack.c.bf16 %v1512_v11, %v1512_v11 }
  0xbf   : > { %12538 = vmatprep.subr.msk.bf16.mxu0 %vm401_vm1, %v1047_v42  ;;  %v13561_v35 = vpop.permute.xlu0 %13560  ;;  %v1531_v42 = vsel %vm401_vm1, %v1515_v38, 0  ;;  %v1543_v60 = vsel %vm401_vm1, %v1519_v50, 0  ;;  %v1759_v20 = vsel %vm401_vm1, %v1747_v14, 0 }
  0xc0   : > { %v13562_v17 = vunpack.i.l.bf16 %v13561_v35 }
  0xc1   : > { %12532 = vmatmul.mubr.msk.bf16.vlgmr.msra.gmra.mrb[20].mxu1 %vm397_vm2, %v12524_v22  ;;  %v12542_v22 = vld [vmem:[%s17068_s2 + $0x8] sm:$0x3]  ;;  %v1737_v59 = vpop.permute.xlu1 %1736 }
  0xc2   : > { %1119 = vmatpush1.bf16.msra.mxu1 %v1060_v47  ;;  %1150 = vmatprep.mubr.bf16.mxu1 %v17076_v10  ;;  %v1744_v47 = vsel %vm1738_vm7, %v13558_v40, %v13562_v17  ;;  %v1746_v13 = vsel %vm1738_vm7, %v1737_v59, %v13557_v45 }
  0xc3   : > { %12540 = vmatprep.subr.msk.bf16.mxu1 %vm401_vm1, %v1049_v46  ;;  %v13563_v46 = vunpack.i.h.bf16 %v13561_v35  ;;  %v13566_v48 = vpop.permute.xlu0 %13565  ;;  %v1748_v52 = vpack.c.bf16 %v1744_v47, %v1744_v47  ;;  %v1754_v27 = vpack.c.bf16 %v1746_v13, %v1746_v13 }
  0xc4   : > { %v13567_v1 = vunpack.i.l.bf16 %v13566_v48 }
  0xc5   : > { %12535 = vmatmul.mubr.msk.bf16.vlgmr.msra.gmra.mrb[24].mxu0 %vm397_vm2, %v12533_v51  ;;  %v1743_v63 = vsel %vm1738_vm7, %v13562_v17, %v13563_v46  ;;  %v13576_v19 = vpop.permute.xlu1 %13575 }
  0xc6   : > { %1160 = vmatpush1.bf16.msra.mxu0 %v1066_v53  ;;  %1191 = vmatprep.mubr.bf16.mxu0 %v17076_v10  ;;  %v13568_v53 = vunpack.i.h.bf16 %v13566_v48  ;;  %v1749_v21 = vpack.c.bf16 %v1743_v63, %v1743_v63  ;;  %v1741_v24 = vsel %vm1738_vm7, %v1731_v43, %v13567_v1  ;;  %v13577_v26 = vunpack.i.l.bf16 %v13576_v19 }
  0xc7   : > { %12543 = vmatprep.subr.msk.bf16.mxu0 %vm401_vm1, %v14397_v54  ;;  %v13571_v12 = vpop.permute.xlu0 %13570  ;;  %v1751_v30 = vpack.c.bf16 %v1741_v24, %v1741_v24  ;;  %v13578_v34 = vunpack.i.h.bf16 %v13576_v19 }
  0xc8   : > { %v1740_v3 = vsel %vm1738_vm7, %v13567_v1, %v13568_v53  ;;  %v13573_v25 = vunpack.i.h.bf16 %v13571_v12  ;;  %v13572_v32 = vunpack.i.l.bf16 %v13571_v12  ;;  %v1739_v35 = vsel %vm1738_vm7, %v13568_v53, %v1737_v59 }
  0xc9   : > { %12537 = vmatmul.mubr.msk.bf16.vlgmr.msra.gmra.mrb[24].mxu1 %vm397_vm2, %v12533_v51  ;;  %v13581_v38 = vpop.permute.xlu1 %13580  ;;  %v1771_v11 = vsel %vm401_vm1, %v1751_v30, 0  ;;  %v1753_v15 = vpack.c.bf16 %v1739_v35, %v1739_v35  ;;  %v1977_v47 = vsel %vm1972_vm8, %v13577_v26, %v13578_v34 }
  0xca   : > { %1201 = vmatpush1.bf16.msra.mxu1 %v1072_v55  ;;  %1232 = vmatprep.mubr.bf16.mxu1 %v17076_v10  ;;  %v1742_v55 = vsel %vm1738_vm7, %v13563_v46, %v1731_v43 }
  0xcb   : > { %12545 = vmatprep.subr.msk.bf16.mxu1 %vm401_vm1, %v14405_v56  ;;  %v1750_v62 = vpack.c.bf16 %v1742_v55, %v1742_v55  ;;  %v1965_v31 = vpop.permute.xlu0 %1964  ;;  %v1777_v45 = vsel %vm401_vm1, %v1753_v15, 0 }
  0xcc   : > { %v1976_v17 = vsel %vm1972_vm8, %v13578_v34, %v1965_v31 }
  0xcd   : > { %12539 = vmatmul.mubr.msk.bf16.vlgmr.msra.gmra.mrb[28].mxu0 %vm397_vm2, %v12533_v51  ;;  %v1984_v44 = vpack.c.bf16 %v1976_v17, %v1976_v17  ;;  %v13586_v53 = vpop.permute.xlu1 %13585 }
  0xce   : > { %1315 = vmatpush1.bf16.msra.mxu0 %v14417_v61  ;;  %1346 = vmatprep.mubr.bf16.mxu0 %v17076_v10  ;;  %v13588_v57 = vunpack.i.h.bf16 %v13586_v53 }
  0xcf   : > { %12547 = vmatprep.subr.msk.bf16.mxu0 %vm401_vm1, %v14421_v0  ;;  %v1971_v43 = vpop.permute.xlu0 %1970 }
  0xd0   : > { %v1980_v1 = vsel %vm1972_vm8, %v1971_v43, %v13572_v32 }
  0xd1   : > { %12541 = vmatmul.mubr.msk.bf16.vlgmr.msra.gmra.mrb[28].mxu1 %vm397_vm2, %v12533_v51  ;;  %v1537_v51 = vsel %vm401_vm1, %v1517_v37, 0  ;;  %v1979_v37 = vsel %vm1972_vm8, %v13572_v32, %v13573_v25  ;;  %v2199_v13 = vpop.permute.xlu1 %2198 }
  0xd2   : > { %1356 = vmatpush1.bf16.msra.mxu1 %v14430_v2  ;;  %1387 = vmatprep.mubr.bf16.mxu1 %v17076_v10  ;;  %v1981_v46 = vpack.c.bf16 %v1979_v37, %v1979_v37 }
  0xd3   : > { %12549 = vmatprep.subr.msk.bf16.mxu1 %vm401_vm1, %v14434_v5 }
  0xd4   : > { %v1993_v50 = vsel %vm401_vm1, %v1981_v46, 0  ;;  %v14025_v46 = vld [vmem:[%s14108_s10] sm:$0xff] }
  0xd5   : > { %12544 = vmatmul.mubr.msk.bf16.vlgmr.msra.gmra.mrb[32].mxu0 %vm397_vm2, %v12542_v22 }
  0xd6   : > { %1397 = vmatpush1.bf16.msra.mxu0 %v14447_v4  ;;  %1428 = vmatprep.mubr.bf16.mxu0 %v17076_v10 }
  0xd7   : > { %12552 = vmatprep.subr.msk.bf16.mxu0 %vm401_vm1, %v1514_v23  ;;  %v2422_v23 = vld [vmem:[%s17069_s3] sm:$0xf] }
  0xd8   : > { %2425 = vperm.xlu0 %13659, %v2422_v23  }
  0xd9   : > { %12546 = vmatmul.mubr.msk.bf16.vlgmr.msra.gmra.mrb[32].mxu1 %vm397_vm2, %v12542_v22 }
  0xda   : > { %1438 = vmatpush1.bf16.msra.mxu1 %v14459_v29  ;;  %1469 = vmatprep.mubr.bf16.mxu1 %v17076_v10 }
  0xdb   : > { %12554 = vmatprep.subr.msk.bf16.mxu1 %vm401_vm1, %v1516_v28  ;;  %v1765_v28 = vsel %vm401_vm1, %v1749_v21, 0  ;;  %v12569_v21 = vld [vmem:[%s17068_s2 + $0xe] sm:$0x3] }
  0xdd   : > { %12548 = vmatmul.mubr.msk.bf16.vlgmr.msra.gmra.mrb[36].mxu0 %vm397_vm2, %v12542_v22 }
  0xde   : > { %1549 = vmatpush1.bf16.msra.mxu0 %v1525_v36  ;;  %1580 = vmatprep.mubr.bf16.mxu0 %v17076_v10  ;;  %v1978_v36 = vsel %vm1972_vm8, %v13573_v25, %v13577_v26 }
  0xdf   : > { %12556 = vmatprep.subr.msk.bf16.mxu0 %vm401_vm1, %v1518_v39  ;;  %v12560_v39 = vld [vmem:[%s17068_s2 + $0xc] sm:$0x3]  ;;  %v1982_v40 = vpack.c.bf16 %v1978_v36, %v1978_v36  ;;  %v2205_v36 = vpop.permute.xlu1 %2204 }
  0xe1   : > { %12550 = vmatmul.mubr.msk.bf16.vlgmr.msra.gmra.mrb[36].mxu1 %vm397_vm2, %v12542_v22  ;;  %v1752_v22 = vpack.c.bf16 %v1740_v3, %v1740_v3  ;;  %v13587_v3 = vunpack.i.l.bf16 %v13586_v53  ;;  %v14026_v53 = vld [vmem:[%s14108_s10 + $0x8] sm:$0xff] }
  0xe2   : > { %1590 = vmatpush1.bf16.msra.mxu1 %v1531_v42  ;;  %1621 = vmatprep.mubr.bf16.mxu1 %v17076_v10  ;;  %v13582_v42 = vunpack.i.l.bf16 %v13581_v38 }
  0xe3   : > { %12558 = vmatprep.subr.msk.bf16.mxu1 %vm401_vm1, %v1520_v41  ;;  %v13583_v41 = vunpack.i.h.bf16 %v13581_v38  ;;  %v2214_v15 = vsel %vm2206_vm9, %v2205_v36, %v13587_v3 }
  0xe4   : > { %v1975_v55 = vsel %vm1972_vm8, %v1965_v31, %v13582_v42  ;;  %v2222_v17 = vpack.c.bf16 %v2214_v15, %v2214_v15 }
  0xe5   : > { %12553 = vmatmul.mubr.msk.bf16.vlgmr.msra.gmra.mrb[40].mxu0 %vm397_vm2, %v12551_v16  ;;  %v1974_v48 = vsel %vm1972_vm8, %v13582_v42, %v13583_v41  ;;  %v1985_v14 = vpack.c.bf16 %v1975_v55, %v1975_v55  ;;  %v1973_v63 = vsel %vm1972_vm8, %v13583_v41, %v1971_v43  ;;  %v12578_v43 = vld [vmem:[%s17068_s2 + $0x10] sm:$0x3]  ;;  %v13606_v55 = vpop.permute.xlu1 %13605 }
  0xe6   : > { %1631 = vmatpush1.bf16.msra.mxu0 %v1537_v51  ;;  %1662 = vmatprep.mubr.bf16.mxu0 %v17076_v10  ;;  %v1983_v51 = vpack.c.bf16 %v1977_v47, %v1977_v47  ;;  %v14614_v47 = vcombine.low %v14025_v46, %v14025_v46  ;;  %v12587_v46 = vld [vmem:[%s17068_s2 + $0x12] sm:$0x3] }
  0xe7   : > { %12561 = vmatprep.subr.msk.bf16.mxu0 %vm401_vm1, %v1748_v52  ;;  %v1986_v52 = vpack.c.bf16 %v1974_v48, %v1974_v48  ;;  %v2005_v23 = vsel %vm401_vm1, %v1985_v14, 0  ;;  %v13607_v14 = vunpack.i.l.bf16 %v13606_v55 }
  0xe9   : > { %12555 = vmatmul.mubr.msk.bf16.vlgmr.msra.gmra.mrb[40].mxu1 %vm397_vm2, %v12551_v16 }
  0xea   : > { %1672 = vmatpush1.bf16.msra.mxu1 %v1543_v60  ;;  %1703 = vmatprep.mubr.bf16.mxu1 %v17076_v10  ;;  %v1988_v60 = vpack.c.bf16 %v1980_v1, %v1980_v1 }
  0xeb   : > { %12563 = vmatprep.subr.msk.bf16.mxu1 %vm401_vm1, %v1750_v62  ;;  %v1999_v62 = vsel %vm401_vm1, %v1983_v51, 0 }
  0xed   : > { %12557 = vmatmul.mubr.msk.bf16.vlgmr.msra.gmra.mrb[44].mxu0 %vm397_vm2, %v12551_v16 }
  0xee   : > { %1783 = vmatpush1.bf16.msra.mxu0 %v1759_v20  ;;  %1814 = vmatprep.mubr.bf16.mxu0 %v17076_v10 }
  0xef   : > { %12565 = vmatprep.subr.msk.bf16.mxu0 %vm401_vm1, %v1752_v22  ;;  %v1987_v22 = vpack.c.bf16 %v1973_v63, %v1973_v63 }
  0xf1   : > { %12559 = vmatmul.mubr.msk.bf16.vlgmr.msra.gmra.mrb[44].mxu1 %vm397_vm2, %v12551_v16  ;;  %v13591_v16 = vpop.permute.xlu0 %13590  ;;  %v2011_v30 = vsel %vm401_vm1, %v1987_v22, 0 }
  0xf2   : > { %1824 = vmatpush1.bf16.msra.mxu1 %v1765_v28  ;;  %1855 = vmatprep.mubr.bf16.mxu1 %v17076_v10  ;;  %v13592_v59 = vunpack.i.l.bf16 %v13591_v16  ;;  %v13593_v12 = vunpack.i.h.bf16 %v13591_v16  ;;  %v2213_v28 = vsel %vm2206_vm9, %v13587_v3, %v13588_v57  ;;  %v14623_v16 = vpack.c.bf16 %v14126_v6, %v14126_v6  ;;  %v13611_v3 = vpop.permute.xlu1 %13610 }
  0xf3   : > { %12567 = vmatprep.subr.msk.bf16.mxu1 %vm401_vm1, %v1754_v27  ;;  %v2215_v32 = vpack.c.bf16 %v2213_v28, %v2213_v28  ;;  %v14638_v6 = vcombine.low %v14026_v53, %v14026_v53  ;;  %v13613_v22 = vunpack.i.h.bf16 %v13611_v3 }
  0xf4   : > { %v2212_v19 = vsel %vm2206_vm9, %v13588_v57, %v13592_v59  ;;  %v2210_v27 = vsel %vm2206_vm9, %v13593_v12, %v2199_v13  ;;  %v2211_v34 = vsel %vm2206_vm9, %v13592_v59, %v13593_v12  ;;  %v14629_v51 = vsel %vm401_vm1, %v14623_v16, 0  ;;  %v12588_v12 = vld [vmem:[%s17068_s2 + $0x14] sm:$0x3] }
  0xf5   : > { %12562 = vmatmul.mubr.msk.bf16.vlgmr.msra.gmra.mrb[48].mxu0 %vm397_vm2, %v12560_v39  ;;  %v13596_v20 = vpop.permute.xlu0 %13595  ;;  %v2216_v24 = vpack.c.bf16 %v2212_v19, %v2212_v19  ;;  %v2218_v31 = vpack.c.bf16 %v2210_v27, %v2210_v27  ;;  %v2227_v38 = vsel %vm401_vm1, %v2215_v32, 0 }
  0xf6   : > { %1865 = vmatpush1.bf16.msra.mxu0 %v1771_v11  ;;  %1896 = vmatprep.mubr.bf16.mxu0 %v17076_v10  ;;  %v13598_v25 = vunpack.i.h.bf16 %v13596_v20  ;;  %v13597_v26 = vunpack.i.l.bf16 %v13596_v20  ;;  %v14672_v20 = vpack.c.bf16 %v14132_v8, %v14132_v8  ;;  %v13616_v32 = vpop.permute.xlu1 %13615 }
  0xf7   : > { %12570 = vmatprep.subr.msk.bf16.mxu0 %vm401_vm1, %v1982_v40 }
  0xf8   : > { %v2208_v35 = vsel %vm2206_vm9, %v13597_v26, %v13598_v25  ;;  %v2209_v40 = vsel %vm2206_vm9, %v2199_v13, %v13597_v26  ;;  %v2207_v37 = vsel %vm2206_vm9, %v13598_v25, %v2205_v36  ;;  %v14685_v8 = vsel %vm401_vm1, %v14672_v20, 0 }
  0xf9   : > { %12564 = vmatmul.mubr.msk.bf16.vlgmr.msra.gmra.mrb[48].mxu1 %vm397_vm2, %v12560_v39  ;;  %v2220_v11 = vpack.c.bf16 %v2208_v35, %v2208_v35  ;;  %v2219_v42 = vpack.c.bf16 %v2209_v40, %v2209_v40  ;;  %v13618_v36 = vunpack.i.h.bf16 %v13616_v32 }
  0xfa   : > { %1906 = vmatpush1.bf16.msra.mxu1 %v1777_v45  ;;  %1937 = vmatprep.mubr.bf16.mxu1 %v17076_v10  ;;  %v2221_v45 = vpack.c.bf16 %v2207_v37, %v2207_v37 }
  0xfb   : > { %12572 = vmatprep.subr.msk.bf16.mxu1 %vm401_vm1, %v1984_v44  ;;  %v2239_v44 = vsel %vm401_vm1, %v2219_v42, 0 }
  0xfc   : > { %v2245_v48 = vsel %vm401_vm1, %v2221_v45, 0 }
  0xfd   : > { %12566 = vmatmul.mubr.msk.bf16.vlgmr.msra.gmra.mrb[52].mxu0 %vm397_vm2, %v12560_v39 }
  0xfe   : > { %2017 = vmatpush1.bf16.msra.mxu0 %v1993_v50  ;;  %2048 = vmatprep.mubr.bf16.mxu0 %v17076_v10  ;;  %v13601_v50 = vpop.permute.xlu0 %13600 }
  0xff   : > { %12574 = vmatprep.subr.msk.bf16.mxu0 %vm401_vm1, %v1986_v52  ;;  %v14635_v52 = vpack.c.bf16 %v14128_v7, %v14128_v7  ;;  %v13602_v1 = vunpack.i.l.bf16 %v13601_v50  ;;  %v14652_v7 = vpack.c.bf16 %v14134_v9, %v14134_v9 }
 0x101   : > { %12568 = vmatmul.mubr.msk.bf16.vlgmr.msra.gmra.mrb[52].mxu1 %vm397_vm2, %v12560_v39  ;;  %v2217_v39 = vpack.c.bf16 %v2211_v34, %v2211_v34  ;;  %v14646_v59 = vsel %vm401_vm1, %v14635_v52, 0  ;;  %v14664_v9 = vsel %vm401_vm1, %v14652_v7, 0 }
 0x102   : > { %2058 = vmatpush1.bf16.msra.mxu1 %v1999_v62  ;;  %2089 = vmatprep.mubr.bf16.mxu1 %v17076_v10  ;;  %v2526_v57 = vpop.permute.xlu0 %2525  ;;  %v13608_v62 = vunpack.i.h.bf16 %v13606_v55 }
 0x103   : > { %12576 = vmatprep.subr.msk.bf16.mxu1 %vm401_vm1, %v1988_v60  ;;  %v2233_v41 = vsel %vm401_vm1, %v2217_v39, 0  ;;  %v13603_v60 = vunpack.i.h.bf16 %v13601_v50  ;;  %v2535_v63 = vsel %vm2527_vm10, %v2526_v57, %v13602_v1 }
 0x104   : > { %v14666_v19 = vpack.c.bf16 %v2535_v63, %v2535_v63 }
 0x105   : > { %12571 = vmatmul.mubr.msk.bf16.vlgmr.msra.gmra.mrb[56].mxu0 %vm397_vm2, %v12569_v21  ;;  %v2533_v13 = vsel %vm2527_vm10, %v13603_v60, %v13607_v14  ;;  %v2534_v27 = vsel %vm2527_vm10, %v13602_v1, %v13603_v60 }
 0x106   : > { %2099 = vmatpush1.bf16.msra.mxu0 %v2005_v23  ;;  %2130 = vmatprep.mubr.bf16.mxu0 %v17076_v10  ;;  %v13612_v23 = vunpack.i.l.bf16 %v13611_v3  ;;  %v14689_v25 = vpack.c.bf16 %v2533_v13, %v2533_v13  ;;  %v2522_v26 = vpop.permute.xlu0 %2521 }
 0x107   : > { %12579 = vmatprep.subr.msk.bf16.mxu0 %vm401_vm1, %v2216_v24  ;;  %v2529_v39 = vsel %vm2527_vm10, %v2522_v26, %v13608_v62 }
 0x108   : > { %v2531_v28 = vsel %vm2527_vm10, %v13612_v23, %v13613_v22  ;;  %v14720_v40 = vpack.c.bf16 %v2529_v39, %v2529_v39 }
 0x109   : > { %12573 = vmatmul.mubr.msk.bf16.vlgmr.msra.gmra.mrb[56].mxu1 %vm397_vm2, %v12569_v21  ;;  %v14706_v34 = vpack.c.bf16 %v2531_v28, %v2531_v28 }
 0x10a   : > { %2140 = vmatpush1.bf16.msra.mxu1 %v2011_v30  ;;  %2171 = vmatprep.mubr.bf16.mxu1 %v17076_v10  ;;  %v13621_v35 = vpop.permute.xlu0 %13620 }
 0x10b   : > { %12581 = vmatprep.subr.msk.bf16.mxu1 %vm401_vm1, %v2218_v31  ;;  %v14704_v31 = vpack.c.bf16 %v2534_v27, %v2534_v27  ;;  %v13623_v42 = vunpack.i.h.bf16 %v13621_v35  ;;  %v13622_v37 = vunpack.i.l.bf16 %v13621_v35 }
 0x10d   : > { %12575 = vmatmul.mubr.msk.bf16.vlgmr.msra.gmra.mrb[60].mxu0 %vm397_vm2, %v12569_v21  ;;  %v14718_v15 = vsel %vm401_vm1, %v14704_v31, 0  ;;  %v2959_v60 = vsel %vm2954_vm11, %v13622_v37, %v13623_v42  ;;  %v2960_v3 = vsel %vm2954_vm11, %v13618_v36, %v13622_v37  ;;  %v2758_v37 = vsel %vm401_vm1, %v14689_v25, 0 }
 0x10e   : > { %2251 = vmatpush1.bf16.msra.mxu0 %v2227_v38  ;;  %2282 = vmatprep.mubr.bf16.mxu0 %v17076_v10  ;;  %v13617_v38 = vunpack.i.l.bf16 %v13616_v32  ;;  %v13626_v45 = vpop.permute.xlu0 %13625  ;;  %v14755_v63 = vpack.c.bf16 %v2959_v60, %v2959_v60 }
 0x10f   : > { %12583 = vmatprep.subr.msk.bf16.mxu0 %vm401_vm1, %v2220_v11  ;;  %v2532_v11 = vsel %vm2527_vm10, %v13607_v14, %v13612_v23  ;;  %v13628_v55 = vunpack.i.h.bf16 %v13626_v45  ;;  %v2965_v23 = vpack.c.bf16 %v2960_v3, %v2960_v3 }
 0x111   : > { %12577 = vmatmul.mubr.msk.bf16.vlgmr.msra.gmra.mrb[60].mxu1 %vm397_vm2, %v12569_v21  ;;  %v2528_v21 = vsel %vm2527_vm10, %v13608_v62, %v2526_v57  ;;  %v13627_v57 = vunpack.i.l.bf16 %v13626_v45  ;;  %v14780_v28 = vsel %vm401_vm1, %v2965_v23, 0 }
 0x112   : > { %2292 = vmatpush1.bf16.msra.mxu1 %v2233_v41  ;;  %2323 = vmatprep.mubr.bf16.mxu1 %v17076_v10  ;;  %v14681_v24 = vpack.c.bf16 %v2528_v21, %v2528_v21  ;;  %v2530_v41 = vsel %vm2527_vm10, %v13613_v22, %v2522_v26 }
 0x113   : > { %12585 = vmatprep.subr.msk.bf16.mxu1 %vm401_vm1, %v2222_v17  ;;  %v2540_v17 = vpack.c.bf16 %v2532_v11, %v2532_v11  ;;  %v2958_v27 = vsel %vm2954_vm11, %v13623_v42, %v13627_v57  ;;  %v2752_v42 = vsel %vm401_vm1, %v14666_v19, 0 }
 0x114   : > { %v14700_v30 = vsel %vm401_vm1, %v14681_v24, 0  ;;  %v2967_v35 = vpack.c.bf16 %v2958_v27, %v2958_v27 }
 0x115   : > { %12580 = vmatmul.mubr.msk.bf16.vlgmr.msra.gmra.mrb[64].mxu0 %vm397_vm2, %v12578_v43  ;;  %v14735_v50 = vsel %vm401_vm1, %v2540_v17, 0 }
 0x116   : > { %2333 = vmatpush1.bf16.msra.mxu0 %v2239_v44  ;;  %2364 = vmatprep.mubr.bf16.mxu0 %v17076_v10  ;;  %v2953_v44 = vpop.permute.xlu1 %2952  ;;  %v14795_v11 = vsel %vm401_vm1, %v2967_v35, 0 }
 0x117   : > { %12593 = vmatprep.subr.msk.bf16.mxu0 %vm401_vm1, %v14614_v47  ;;  %v2962_v1 = vsel %vm2954_vm11, %v2953_v44, %v13617_v38 }
 0x118   : > { %v14748_v62 = vpack.c.bf16 %v2962_v1, %v2962_v1 }
 0x119   : > { %12582 = vmatmul.mubr.msk.bf16.vlgmr.msra.gmra.mrb[64].mxu1 %vm397_vm2, %v12578_v43 }
 0x11a   : > { %2374 = vmatpush1.bf16.msra.mxu1 %v2245_v48  ;;  %2405 = vmatprep.mubr.bf16.mxu1 %v17076_v10  ;;  %v2542_v48 = vpack.c.bf16 %v2530_v41, %v2530_v41  ;;  %v2951_v21 = vpop.permute.xlu1 %2950  ;;  %v14766_v22 = vsel %vm401_vm1, %v14748_v62, 0 }
 0x11b   : > { %12595 = vmatprep.subr.msk.bf16.mxu1 %vm401_vm1, %v14386_v49  ;;  %v2955_v26 = vsel %vm2954_vm11, %v2951_v21, %v2953_v44 }
 0x11c   : > { %v14751_v14 = vsel %vm401_vm1, %v2542_v48, 0  ;;  %v14782_v32 = vpack.c.bf16 %v2955_v26, %v2955_v26  ;;  %v12636_v26 = vld [vmem:[%s17068_s2 + $0x1c] sm:$0x3] }
 0x11d   : > { %12584 = vmatmul.mubr.msk.bf16.vlgmr.msra.gmra.mrb[68].mxu0 %vm397_vm2, %v12578_v43 }
 0x11e   : > { %2582 = vmatpush1.bf16.msra.mxu0 %v14629_v51  ;;  %2613 = vmatprep.mubr.bf16.mxu0 %v17076_v10 }
 0x11f   : > { %12597 = vmatprep.subr.msk.bf16.mxu0 %vm401_vm1, %v14638_v6 }
 0x121   : > { %12586 = vmatmul.mubr.msk.bf16.vlgmr.msra.gmra.mrb[68].mxu1 %vm397_vm2, %v12578_v43  ;;  %v2961_v43 = vsel %vm2954_vm11, %v13617_v38, %v13618_v36  ;;  %v2956_v36 = vsel %vm2954_vm11, %v13628_v55, %v2951_v21  ;;  %v12609_v38 = vld [vmem:[%s17068_s2 + $0x16] sm:$0x3]  ;;  %v2984_v21 = vsel %vm401_vm1, %v14755_v63, 0 }
 0x122   : > { %2623 = vmatpush1.bf16.msra.mxu1 %v14646_v59  ;;  %2654 = vmatprep.mubr.bf16.mxu1 %v17076_v10  ;;  %v14739_v53 = vpack.c.bf16 %v2961_v43, %v2961_v43  ;;  %v2969_v39 = vpack.c.bf16 %v2956_v36, %v2956_v36  ;;  %v2770_v43 = vsel %vm401_vm1, %v14720_v40, 0 }
 0x123   : > { %12599 = vmatprep.subr.msk.bf16.mxu1 %vm401_vm1, %v14410_v58 }
 0x124   : > { %v14803_v41 = vsel %vm401_vm1, %v2969_v39, 0 }
 0x125   : > { %12594 = vmatmul.mubr.msk.bf16.vlgmr.msra.gmra.mrb[72].mxu0 %vm397_vm2, %v12588_v12 }
 0x126   : > { %2664 = vmatpush1.bf16.msra.mxu0 %v14664_v9  ;;  %2695 = vmatprep.mubr.bf16.mxu0 %v17076_v10 }
 0x127   : > { %12601 = vmatprep.subr.msk.bf16.mxu0 %vm401_vm1, %v14666_v19 }
 0x129   : > { %12596 = vmatmul.mubr.msk.bf16.vlgmr.msra.gmra.mrb[72].mxu1 %vm397_vm2, %v12588_v12 }
 0x12a   : > { %2705 = vmatpush1.bf16.msra.mxu1 %v14685_v8  ;;  %2736 = vmatprep.mubr.bf16.mxu1 %v17076_v10 }
 0x12b   : > { %12603 = vmatprep.subr.msk.bf16.mxu1 %vm401_vm1, %v14689_v25 }
 0x12d   : > { %12598 = vmatmul.mubr.msk.bf16.vlgmr.msra.gmra.mrb[76].mxu0 %vm397_vm2, %v12588_v12 }
 0x12e   : > { %2773 = vmatpush1.bf16.msra.mxu0 %v14700_v30  ;;  %2804 = vmatprep.mubr.bf16.mxu0 %v17076_v10 }
 0x12f   : > { %12605 = vmatprep.subr.msk.bf16.mxu0 %vm401_vm1, %v14706_v34 }
 0x131   : > { %12600 = vmatmul.mubr.msk.bf16.vlgmr.msra.gmra.mrb[76].mxu1 %vm397_vm2, %v12588_v12  ;;  %v2957_v12 = vsel %vm2954_vm11, %v13627_v57, %v13628_v55  ;;  %v2978_v57 = vsel %vm401_vm1, %v14739_v53, 0 }
 0x132   : > { %2814 = vmatpush1.bf16.msra.mxu1 %v14718_v15  ;;  %2845 = vmatprep.mubr.bf16.mxu1 %v17076_v10  ;;  %v14770_v13 = vpack.c.bf16 %v2957_v12, %v2957_v12 }
 0x133   : > { %12607 = vmatprep.subr.msk.bf16.mxu1 %vm401_vm1, %v14720_v40 }
 0x135   : > { %12602 = vmatmul.mubr.msk.bf16.vlgmr.msra.gmra.mrb[80].mxu0 %vm397_vm2, %v12587_v46 }
 0x136   : > { %2855 = vmatpush1.bf16.msra.mxu0 %v14735_v50  ;;  %2886 = vmatprep.mubr.bf16.mxu0 %v17076_v10 }
 0x137   : > { %12610 = vmatprep.subr.msk.bf16.mxu0 %vm401_vm1, %v14739_v53 }
 0x139   : > { %12604 = vmatmul.mubr.msk.bf16.vlgmr.msra.gmra.mrb[80].mxu1 %vm397_vm2, %v12587_v46 }
 0x13a   : > { %2896 = vmatpush1.bf16.msra.mxu1 %v14751_v14  ;;  %2927 = vmatprep.mubr.bf16.mxu1 %v17076_v10 }
 0x13b   : > { %12612 = vmatprep.subr.msk.bf16.mxu1 %vm401_vm1, %v14755_v63 }
 0x13d   : > { %12606 = vmatmul.mubr.msk.bf16.vlgmr.msra.gmra.mrb[84].mxu0 %vm397_vm2, %v12587_v46 }
 0x13e   : > { %2999 = vmatpush1.bf16.msra.mxu0 %v14766_v22  ;;  %3030 = vmatprep.mubr.bf16.mxu0 %v17076_v10 }
 0x13f   : > { %12614 = vmatprep.subr.msk.bf16.mxu0 %vm401_vm1, %v14770_v13 }
 0x141   : > { %12608 = vmatmul.mubr.msk.bf16.vlgmr.msra.gmra.mrb[84].mxu1 %vm397_vm2, %v12587_v46 }
 0x142   : > { %3040 = vmatpush1.bf16.msra.mxu1 %v14780_v28  ;;  %3071 = vmatprep.mubr.bf16.mxu1 %v17076_v10 }
 0x143   : > { %12616 = vmatprep.subr.msk.bf16.mxu1 %vm401_vm1, %v14782_v32 }
 0x145   : > { %12611 = vmatmul.mubr.msk.bf16.vlgmr.msra.gmra.mrb[88].mxu0 %vm397_vm2, %v12609_v38 }
 0x146   : > { %3081 = vmatpush1.bf16.msra.mxu0 %v14795_v11  ;;  %3112 = vmatprep.mubr.bf16.mxu0 %v17076_v10 }
 0x147   : > { %12619 = vmatprep.subr.msk.bf16.mxu0 %vm401_vm1, %v14704_v31  ;;  %v12618_v31 = vld [vmem:[%s17068_s2 + $0x18] sm:$0x3] }
 0x149   : > { %12613 = vmatmul.mubr.msk.bf16.vlgmr.msra.gmra.mrb[88].mxu1 %vm397_vm2, %v12609_v38 }
 0x14a   : > { %3122 = vmatpush1.bf16.msra.mxu1 %v14803_v41  ;;  %3153 = vmatprep.mubr.bf16.mxu1 %v17076_v10 }
 0x14b   : > { %12621 = vmatprep.subr.msk.bf16.mxu1 %vm401_vm1, %v2540_v17  ;;  %v2764_v17 = vsel %vm401_vm1, %v14706_v34, 0 }
 0x14d   : > { %12615 = vmatmul.mubr.msk.bf16.vlgmr.msra.gmra.mrb[92].mxu0 %vm397_vm2, %v12609_v38 }
 0x14e   : > { %3176 = vmatpush1.bf16.msra.mxu0 %v2752_v42  ;;  %3207 = vmatprep.mubr.bf16.mxu0 %v17076_v10 }
 0x14f   : > { %12623 = vmatprep.subr.msk.bf16.mxu0 %vm401_vm1, %v2542_v48 }
 0x151   : > { %12617 = vmatmul.mubr.msk.bf16.vlgmr.msra.gmra.mrb[92].mxu1 %vm397_vm2, %v12609_v38 }
 0x152   : > { %3217 = vmatpush1.bf16.msra.mxu1 %v2758_v37  ;;  %3248 = vmatprep.mubr.bf16.mxu1 %v17076_v10 }
 0x153   : > { %12625 = vmatprep.subr.msk.bf16.mxu1 %vm401_vm1, %v14681_v24  ;;  %v12627_v24 = vld [vmem:[%s17068_s2 + $0x1a] sm:$0x3] }
 0x155   : > { %12620 = vmatmul.mubr.msk.bf16.vlgmr.msra.gmra.mrb[96].mxu0 %vm397_vm2, %v12618_v31 }
 0x156   : > { %3258 = vmatpush1.bf16.msra.mxu0 %v2764_v17  ;;  %3289 = vmatprep.mubr.bf16.mxu0 %v17076_v10 }
 0x157   : > { %12628 = vmatprep.subr.msk.bf16.mxu0 %vm401_vm1, %v14397_v54 }
 0x159   : > { %12622 = vmatmul.mubr.msk.bf16.vlgmr.msra.gmra.mrb[96].mxu1 %vm397_vm2, %v12618_v31 }
 0x15a   : > { %3299 = vmatpush1.bf16.msra.mxu1 %v2770_v43  ;;  %3330 = vmatprep.mubr.bf16.mxu1 %v17076_v10 }
 0x15b   : > { %12630 = vmatprep.subr.msk.bf16.mxu1 %vm401_vm1, %v14405_v56 }
 0x15d   : > { %12624 = vmatmul.mubr.msk.bf16.vlgmr.msra.gmra.mrb[100].mxu0 %vm397_vm2, %v12618_v31 }
 0x15e   : > { %3353 = vmatpush1.bf16.msra.mxu0 %v14417_v61  ;;  %3384 = vmatprep.mubr.bf16.mxu0 %v17076_v10 }
 0x15f   : > { %12632 = vmatprep.subr.msk.bf16.mxu0 %vm401_vm1, %v14421_v0 }
 0x161   : > { %12626 = vmatmul.mubr.msk.bf16.vlgmr.msra.gmra.mrb[100].mxu1 %vm397_vm2, %v12618_v31 }
 0x162   : > { %3394 = vmatpush1.bf16.msra.mxu1 %v14430_v2  ;;  %3425 = vmatprep.mubr.bf16.mxu1 %v17076_v10 }
 0x163   : > { %12634 = vmatprep.subr.msk.bf16.mxu1 %vm401_vm1, %v14434_v5 }
 0x165   : > { %12629 = vmatmul.mubr.msk.bf16.vlgmr.msra.gmra.mrb[104].mxu0 %vm397_vm2, %v12627_v24 }
 0x166   : > { %3435 = vmatpush1.bf16.msra.mxu0 %v14447_v4  ;;  %3466 = vmatprep.mubr.bf16.mxu0 %v17076_v10 }
 0x167   : > { %12637 = vmatprep.subr.msk.bf16.mxu0 %vm401_vm1, %v2965_v23 }
 0x168   : > { %v460_v44 = vpop.f32.mrb[0].mxu0 }
 0x169   : > { %12631 = vmatmul.mubr.msk.bf16.vlgmr.msra.gmra.mrb[104].mxu1 %vm397_vm2, %v12627_v24  ;;  %v462_v45 = vpop.f32.mrb[1].mxu0 }
 0x16a   : > { %3476 = vmatpush1.bf16.msra.mxu1 %v14459_v29  ;;  %3507 = vmatprep.mubr.bf16.mxu1 %v17076_v10  ;;  %v464_v46 = vpop.f32.mrb[2].mxu0 }
 0x16b   : > { %12639 = vmatprep.subr.msk.bf16.mxu1 %vm401_vm1, %v2967_v35  ;;  %v465_v48 = vpop.f32.mrb[3].mxu0 }
 0x16c   : > { %v501_v1 = vpop.f32.mrb[0].mxu1 }
 0x16d   : > { %v503_v55 = vpop.f32.mrb[1].mxu1  ;;  %12633 = vmatmul.mubr.msk.bf16.vlgmr.msra.gmra.mrb[108].mxu0 %vm397_vm2, %v12627_v24 }
 0x16e   : > { %3530 = vmatpush1.bf16.msra.mxu0 %v2978_v57  ;;  %v505_v60 = vpop.f32.mrb[2].mxu1  ;;  %3561 = vmatprep.mubr.bf16.mxu0 %v17076_v10 }
 0x16f   : > { %12641 = vmatprep.subr.msk.bf16.mxu0 %vm401_vm1, %v2969_v39  ;;  %v506_v3 = vpop.f32.mrb[3].mxu1  ;;  %v2990_v39 = vsel %vm401_vm1, %v14770_v13, 0 }
 0x170   : > { %v542_v12 = vpop.f32.mrb[4].mxu0 }
 0x171   : > { %12635 = vmatmul.mubr.msk.bf16.vlgmr.msra.gmra.mrb[108].mxu1 %vm397_vm2, %v12627_v24  ;;  %v544_v23 = vpop.f32.mrb[5].mxu0 }
 0x172   : > { %3571 = vmatpush1.bf16.msra.mxu1 %v2984_v21  ;;  %v546_v27 = vpop.f32.mrb[6].mxu0  ;;  %3602 = vmatprep.mubr.bf16.mxu1 %v17076_v10 }
 0x173   : > { %12643 = vmatprep.subr.msk.bf16.mxu1 %vm401_vm1, %v14748_v62  ;;  %v547_v35 = vpop.f32.mrb[7].mxu0  ;;  %v2996_v62 = vsel %vm401_vm1, %v14782_v32, 0 }
 0x174   : > { %v583_v36 = vpop.f32.mrb[4].mxu1 }
 0x175   : > { %v585_v38 = vpop.f32.mrb[5].mxu1  ;;  %12638 = vmatmul.mubr.msk.bf16.vlgmr.msra.gmra.mrb[112].mxu0 %vm397_vm2, %v12636_v26 }
 0x176   : > { %3612 = vmatpush1.bf16.msra.mxu0 %v2990_v39  ;;  %v587_v42 = vpop.f32.mrb[6].mxu1  ;;  %3643 = vmatprep.mubr.bf16.mxu0 %v17076_v10 }
 0x177   : > { %12646 = vmatprep.subr.msk.bf16.mxu0 %vm401_vm1, %v14689_v25  ;;  %v588_v37 = vpop.f32.mrb[7].mxu1 }
 0x178   : > { %v651_v31 = vpop.f32.mrb[8].mxu0 }
 0x179   : > { %v652_v17 = vadd.f32 %v651_v31, %v460_v44  ;;  %v653_v43 = vpop.f32.mrb[9].mxu0  ;;  %12640 = vmatmul.mubr.msk.bf16.vlgmr.msra.gmra.mrb[112].mxu1 %vm397_vm2, %v12636_v26 }
 0x17a   : > { %v654_v24 = vadd.f32 %v653_v43, %v462_v45  ;;  %3653 = vmatpush1.bf16.msra.mxu1 %v2996_v62  ;;  %v655_v46 = vpop.f32.mrb[10].mxu0  ;;  %3684 = vmatprep.mubr.bf16.mxu1 %v17076_v10 }
 0x17b   : > { %12648 = vmatprep.subr.msk.bf16.mxu1 %vm401_vm1, %v14706_v34  ;;  %v656_v48 = vpop.f32.mrb[11].mxu0 }
 0x17c   : > { %v692_v57 = vpop.f32.mrb[8].mxu1 }
 0x17d   : > { %v693_v25 = vadd.f32 %v692_v57, %v501_v1  ;;  %v694_v60 = vpop.f32.mrb[9].mxu1  ;;  %12642 = vmatmul.mubr.msk.bf16.vlgmr.msra.gmra.mrb[116].mxu0 %vm397_vm2, %v12636_v26  ;;  %v12645_v1 = vld [vmem:[%s17068_s2 + $0x1e] sm:$0x3] }
 0x17e   : > { %v695_v44 = vadd.f32 %v694_v60, %v503_v55  ;;  %3707 = vmatpush1.bf16.msra.mxu0 %v14718_v15  ;;  %v696_v3 = vpop.f32.mrb[10].mxu1  ;;  %3738 = vmatprep.mubr.bf16.mxu0 %v17076_v10 }
 0x17f   : > { %12650 = vmatprep.subr.msk.bf16.mxu0 %vm401_vm1, %v14720_v40  ;;  %v697_v45 = vpop.f32.mrb[11].mxu1 }
 0x180   : > { %v733_v21 = vpop.f32.mrb[12].mxu0 }
 0x181   : > { %v734_v27 = vadd.f32 %v733_v21, %v542_v12  ;;  %v735_v35 = vpop.f32.mrb[13].mxu0  ;;  %12644 = vmatmul.mubr.msk.bf16.vlgmr.msra.gmra.mrb[116].mxu1 %vm397_vm2, %v12636_v26 }
 0x182   : > { %v736_v34 = vadd.f32 %v735_v35, %v544_v23  ;;  %3748 = vmatpush1.bf16.msra.mxu1 %v14735_v50  ;;  %v737_v15 = vpop.f32.mrb[14].mxu0  ;;  %3779 = vmatprep.mubr.bf16.mxu1 %v17076_v10 }
 0x183   : > { %12652 = vmatprep.subr.msk.bf16.mxu1 %vm401_vm1, %v14666_v19  ;;  %v738_v40 = vpop.f32.mrb[15].mxu0 }
 0x184   : > { %v774_v55 = vpop.f32.mrb[12].mxu1 }
 0x185   : > { %v775_v39 = vadd.f32 %v774_v55, %v583_v36  ;;  %v776_v12 = vpop.f32.mrb[13].mxu1  ;;  %12647 = vmatmul.mubr.msk.bf16.vlgmr.msra.gmra.mrb[120].mxu0 %vm397_vm2, %v12645_v1 }
 0x186   : > { %v777_v26 = vadd.f32 %v776_v12, %v585_v38  ;;  %3789 = vmatpush1.bf16.msra.mxu0 %v14751_v14  ;;  %v778_v50 = vpop.f32.mrb[14].mxu1  ;;  %3820 = vmatprep.mubr.bf16.mxu0 %v17076_v10 }
 0x187   : > { %v779_v23 = vpop.f32.mrb[15].mxu1  ;;  %12655 = vmatprep.subr.msk.bf16.mxu0 %vm401_vm1, %v14386_v49 }
 0x188   : > { %v877_v42 = vpop.f32.mrb[16].mxu0 }
 0x189   : > { %v1007_v37 = vadd.f32 %v877_v42, %v652_v17  ;;  %v879_v31 = vpop.f32.mrb[17].mxu0  ;;  %12649 = vmatmul.mubr.msk.bf16.vlgmr.msra.gmra.mrb[120].mxu1 %vm397_vm2, %v12645_v1 }
 0x18a   : > { %v1008_v19 = vadd.f32 %v879_v31, %v654_v24  ;;  %3830 = vmatpush1.bf16.msra.mxu1 %v14700_v30  ;;  %v881_v36 = vpop.f32.mrb[18].mxu0  ;;  %3861 = vmatprep.mubr.bf16.mxu1 %v17076_v10  ;;  %v12663_v31 = vld [vmem:[%s17068_s2 + $0x22] sm:$0x3] }
 0x18b   : > { %v882_v38 = vpop.f32.mrb[19].mxu0  ;;  %12657 = vmatprep.subr.msk.bf16.mxu1 %vm401_vm1, %v14638_v6 }
 0x18c   : > { %v918_v14 = vpop.f32.mrb[16].mxu1 }
 0x18d   : > { %v1009_v43 = vadd.f32 %v918_v14, %v693_v25  ;;  %v920_v62 = vpop.f32.mrb[17].mxu1  ;;  %12651 = vmatmul.mubr.msk.bf16.vlgmr.msra.gmra.mrb[124].mxu0 %vm397_vm2, %v12645_v1  ;;  %v12654_v25 = vld [vmem:[%s17068_s2 + $0x20] sm:$0x3] }
 0x18e   : > { %v1010_v46 = vadd.f32 %v920_v62, %v695_v44  ;;  %v922_v17 = vpop.f32.mrb[18].mxu1  ;;  %3884 = vmatpush1.bf16.msra.mxu0 %v14646_v59  ;;  %3915 = vmatprep.mubr.bf16.mxu0 %v17076_v10  ;;  %v14948_v62 = vpop.permute.xlu0 %13630 }
 0x18f   : > { %v923_v24 = vpop.f32.mrb[19].mxu1  ;;  %12659 = vmatprep.subr.msk.bf16.mxu0 %vm401_vm1, %v14410_v58 }
 0x190   : > { %v959_v30 = vpop.f32.mrb[20].mxu0  ;;  %v14953_v24 = vpop.permute.xlu1 %13635 }
 0x191   : > { %v1011_v48 = vadd.f32 %v959_v30, %v734_v27  ;;  %v961_v57 = vpop.f32.mrb[21].mxu0  ;;  %12653 = vmatmul.mubr.msk.bf16.vlgmr.msra.gmra.mrb[124].mxu1 %vm397_vm2, %v12645_v1 }
 0x192   : > { %v1012_v60 = vadd.f32 %v961_v57, %v736_v34  ;;  %3925 = vmatpush1.bf16.msra.mxu1 %v14664_v9  ;;  %v963_v44 = vpop.f32.mrb[22].mxu0  ;;  %3956 = vmatprep.mubr.bf16.mxu1 %v17076_v10  ;;  %v14961_v57 = vsel %vm401_vm1, %v14410_v58, 0 }
 0x193   : > { %v964_v59 = vpop.f32.mrb[23].mxu0  ;;  %12661 = vmatprep.subr.msk.bf16.mxu1 %vm401_vm1, %v14614_v47 }
 0x194   : > { %v1000_v3 = vpop.f32.mrb[20].mxu1 }
 0x195   : > { %v1013_v45 = vadd.f32 %v1000_v3, %v775_v39  ;;  %v1002_v21 = vpop.f32.mrb[21].mxu1  ;;  %12656 = vmatmul.mubr.msk.bf16.vlgmr.msra.gmra.mrb[128].mxu0 %vm397_vm2, %v12654_v25 }
 0x196   : > { %v1014_v27 = vadd.f32 %v1002_v21, %v777_v26  ;;  %3966 = vmatpush1.bf16.msra.mxu0 %v14685_v8  ;;  %v1004_v35 = vpop.f32.mrb[22].mxu1  ;;  %3997 = vmatprep.mubr.bf16.mxu0 %v17076_v10  ;;  %v14976_v21 = vsel %vm401_vm1, %v14614_v47, 0  ;;  %v13641_v47 = vpop.permute.xlu1 %13640 }
 0x197   : > { %12664 = vmatprep.subr.msk.bf16.mxu0 %vm401_vm1, %v14755_v63  ;;  %v1005_v9 = vpop.f32.mrb[23].mxu1  ;;  %v13633_v35 = vunpack.i.h.bf16 %v14948_v62 }
 0x198   : > { %v1111_v34 = vpop.f32.mrb[24].mxu0  ;;  %v13632_v9 = vunpack.i.l.bf16 %v14948_v62 }
 0x199   : > { %v1241_v1 = vadd.f32 %v1111_v34, %v1007_v37  ;;  %v1113_v15 = vpop.f32.mrb[25].mxu0  ;;  %12658 = vmatmul.mubr.msk.bf16.vlgmr.msra.gmra.mrb[128].mxu1 %vm397_vm2, %v12654_v25  ;;  %v13637_v34 = vunpack.i.l.bf16 %v14953_v24 }
 0x19a   : > { %v1242_v40 = vadd.f32 %v1113_v15, %v1008_v19  ;;  %4007 = vmatpush1.bf16.msra.mxu1 %v14629_v51  ;;  %v1115_v55 = vpop.f32.mrb[26].mxu0  ;;  %4038 = vmatprep.mubr.bf16.mxu1 %v17076_v10 }
 0x19b   : > { %12666 = vmatprep.subr.msk.bf16.mxu1 %vm401_vm1, %v14770_v13  ;;  %v1116_v8 = vpop.f32.mrb[27].mxu0 }
 0x19c   : > { %v1152_v39 = vpop.f32.mrb[24].mxu1  ;;  %v14993_v8 = vld [vmem:[%s17068_s2 + $0x26] sm:$0x3] }
 0x19d   : > { %v1243_v12 = vadd.f32 %v1152_v39, %v1009_v43  ;;  %v1154_v26 = vpop.f32.mrb[25].mxu1  ;;  %12660 = vmatmul.mubr.msk.bf16.vlgmr.msra.gmra.mrb[132].mxu0 %vm397_vm2, %v12654_v25 }
 0x19e   : > { %v1244_v63 = vadd.f32 %v1154_v26, %v1010_v46  ;;  %4061 = vmatpush1.bf16.msra.mxu0 %v14780_v28  ;;  %v1156_v50 = vpop.f32.mrb[26].mxu1  ;;  %4092 = vmatprep.mubr.bf16.mxu0 %v17076_v10  ;;  %v14999_v26 = vsel %vm401_vm1, %v14386_v49, 0 }
 0x19f   : > { %12668 = vmatprep.subr.msk.bf16.mxu0 %vm401_vm1, %v14782_v32  ;;  %v1157_v51 = vpop.f32.mrb[27].mxu1 }
 0x1a0   : > { %v1193_v23 = vpop.f32.mrb[28].mxu0 }
 0x1a1   : > { %v1245_v42 = vadd.f32 %v1193_v23, %v1011_v48  ;;  %v1195_v37 = vpop.f32.mrb[29].mxu0  ;;  %12662 = vmatmul.mubr.msk.bf16.vlgmr.msra.gmra.mrb[132].mxu1 %vm397_vm2, %v12654_v25  ;;  %v13638_v25 = vunpack.i.h.bf16 %v14953_v24  ;;  %v13643_v23 = vunpack.i.h.bf16 %v13641_v47 }
 0x1a2   : > { %v1246_v13 = vadd.f32 %v1195_v37, %v1012_v60  ;;  %4102 = vmatpush1.bf16.msra.mxu1 %v14795_v11  ;;  %v1197_v28 = vpop.f32.mrb[30].mxu0  ;;  %4133 = vmatprep.mubr.bf16.mxu1 %v17076_v10  ;;  %v4304_v37 = vsel %vm4297_vm12, %v13632_v9, %v13633_v35 }
 0x1a3   : > { %12670 = vmatprep.subr.msk.bf16.mxu1 %vm401_vm1, %v14739_v53  ;;  %v1198_v32 = vpop.f32.mrb[31].mxu0  ;;  %v4299_v51 = vsel %vm4297_vm12, %v13637_v34, %v13638_v25 }
 0x1a4   : > { %v1234_v19 = vpop.f32.mrb[28].mxu1 }
 0x1a5   : > { %v1247_v36 = vadd.f32 %v1234_v19, %v1013_v45  ;;  %v1236_v38 = vpop.f32.mrb[29].mxu1  ;;  %12665 = vmatmul.mubr.msk.bf16.vlgmr.msra.gmra.mrb[136].mxu0 %vm397_vm2, %v12663_v31 }
 0x1a6   : > { %v1248_v14 = vadd.f32 %v1236_v38, %v1014_v27  ;;  %4143 = vmatpush1.bf16.msra.mxu0 %v14803_v41  ;;  %v1238_v11 = vpop.f32.mrb[30].mxu1  ;;  %4174 = vmatprep.mubr.bf16.mxu0 %v17076_v10  ;;  %v15019_v38 = vsel %vm401_vm1, %v14638_v6, 0 }
 0x1a7   : > { %v1239_v43 = vpop.f32.mrb[31].mxu1  ;;  %12675 = vmatprep.subr.msk.bf16.mxu0 %vm401_vm1, %v14623_v16  ;;  %v15023_v11 = vpack.c.bf16 %v4304_v37, %v4304_v37 }
 0x1a8   : > { %v1348_v46 = vpop.f32.mrb[32].mxu0  ;;  %v15025_v43 = vpop.permute.xlu1 %13645 }
 0x1a9   : > { %v14950_v53 = vadd.f32 %v1348_v46, %v1241_v1  ;;  %v1350_v17 = vpop.f32.mrb[33].mxu0  ;;  %12667 = vmatmul.mubr.msk.bf16.vlgmr.msra.gmra.mrb[136].mxu1 %vm397_vm2, %v12663_v31 }
 0x1aa   : > { %v14955_v30 = vadd.f32 %v1350_v17, %v1242_v40  ;;  %4184 = vmatpush1.bf16.msra.mxu1 %v14766_v22  ;;  %v1352_v41 = vpop.f32.mrb[34].mxu0  ;;  %4215 = vmatprep.mubr.bf16.mxu1 %v17076_v10  ;;  %v4296_v22 = vpop.permute.xlu0 %4295 }
 0x1ab   : > { %v1353_v48 = vpop.f32.mrb[35].mxu0  ;;  %12677 = vmatprep.subr.msk.bf16.mxu1 %vm401_vm1, %v14635_v52  ;;  %v4298_v1 = vsel %vm4297_vm12, %v13638_v25, %v4296_v22  ;;  %v4305_v62 = vsel %vm4297_vm12, %v4296_v22, %v13632_v9  ;;  %v13647_v22 = vunpack.i.l.bf16 %v15025_v43 }
 0x1ac   : > { %v1389_v60 = vpop.f32.mrb[32].mxu1  ;;  %v4308_v48 = vpack.c.bf16 %v4305_v62, %v4305_v62 }
 0x1ad   : > { %v14966_v44 = vadd.f32 %v1389_v60, %v1243_v12  ;;  %v1391_v59 = vpop.f32.mrb[33].mxu1  ;;  %12669 = vmatmul.mubr.msk.bf16.vlgmr.msra.gmra.mrb[140].mxu0 %vm397_vm2, %v12663_v31 }
 0x1ae   : > { %v14970_v3 = vadd.f32 %v1391_v59, %v1244_v63  ;;  %v1393_v45 = vpop.f32.mrb[34].mxu1  ;;  %4320 = vmatpush1.bf16.msra.mxu0 %v14961_v57  ;;  %4351 = vmatprep.mubr.bf16.mxu0 %v17076_v10  ;;  %v15001_v63 = vpack.c.bf16 %v4298_v1, %v4298_v1  ;;  %v4290_v32 = vpop.permute.xlu0 %4289 }
 0x1af   : > { %v1394_v58 = vpop.f32.mrb[35].mxu1  ;;  %12679 = vmatprep.subr.msk.bf16.mxu0 %vm401_vm1, %v14652_v7  ;;  %v4691_v1 = vpop.permute.xlu1 %4690 }
 0x1b0   : > { %v1430_v27 = vpop.f32.mrb[36].mxu0  ;;  %v4700_v37 = vsel %vm4692_vm13, %v4691_v1, %v13647_v22 }
 0x1b1   : > { %v14985_v15 = vadd.f32 %v1430_v27, %v1245_v42  ;;  %v1432_v40 = vpop.f32.mrb[37].mxu0  ;;  %12671 = vmatmul.mubr.msk.bf16.vlgmr.msra.gmra.mrb[140].mxu1 %vm397_vm2, %v12663_v31  ;;  %v13642_v42 = vunpack.i.l.bf16 %v13641_v47  ;;  %v15067_v47 = vsel %vm401_vm1, %v4308_v48, 0  ;;  %v15096_v62 = vpack.c.bf16 %v4700_v37, %v4700_v37 }
 0x1b2   : > { %v14988_v55 = vadd.f32 %v1432_v40, %v1246_v13  ;;  %v1434_v39 = vpop.f32.mrb[38].mxu0  ;;  %4361 = vmatpush1.bf16.msra.mxu1 %v14976_v21  ;;  %4392 = vmatprep.mubr.bf16.mxu1 %v17076_v10  ;;  %v15053_v58 = vpop.permute.xlu0 %13650 }
 0x1b3   : > { %v1435_v12 = vpop.f32.mrb[39].mxu0  ;;  %12681 = vmatprep.subr.msk.bf16.mxu1 %vm401_vm1, %v14672_v20  ;;  %v4302_v46 = vsel %vm4297_vm12, %v13642_v42, %v13643_v23  ;;  %v4303_v45 = vsel %vm4297_vm12, %v13633_v35, %v13642_v42  ;;  %v13652_v42 = vunpack.i.l.bf16 %v15053_v58 }
 0x1b4   : > { %v1471_v50 = vpop.f32.mrb[36].mxu1  ;;  %v4310_v12 = vpack.c.bf16 %v4303_v45, %v4303_v45 }
 0x1b5   : > { %v15009_v13 = vadd.f32 %v1471_v50, %v1247_v36  ;;  %v1473_v31 = vpop.f32.mrb[37].mxu1  ;;  %12676 = vmatmul.mubr.msk.bf16.vlgmr.msra.gmra.mrb[144].mxu0 %vm397_vm2, %v14993_v8  ;;  %v4306_v36 = vpack.c.bf16 %v4299_v51, %v4299_v51  ;;  %v13648_v50 = vunpack.i.h.bf16 %v15025_v43  ;;  %v13653_v51 = vunpack.i.h.bf16 %v15053_v58 }
 0x1b6   : > { %v15013_v49 = vadd.f32 %v1473_v31, %v1248_v14  ;;  %v1475_v28 = vpop.f32.mrb[38].mxu1  ;;  %4402 = vmatpush1.bf16.msra.mxu0 %v14999_v26  ;;  %4433 = vmatprep.mubr.bf16.mxu0 %v17076_v10 }
 0x1b7   : > { %v1476_v19 = vpop.f32.mrb[39].mxu1  ;;  %12683 = vmatprep.subr.msk.bf16.mxu0 %vm401_vm1, %v15001_v63  ;;  %v15042_v25 = vsel %vm401_vm1, %v4306_v36, 0  ;;  %v13656_v28 = vpop.permute.xlu0 %13655 }
 0x1b8   : > { %v1582_v14 = vpop.f32.mrb[40].mxu0  ;;  %v12673_v19 = vld [vmem:[%s17068_s2 + $0x24] sm:$0x3] }
 0x1b9   : > { %v15032_v17 = vadd.f32 %v1582_v14, %v14950_v53  ;;  %v1584_v6 = vpop.f32.mrb[41].mxu0  ;;  %12678 = vmatmul.mubr.msk.bf16.vlgmr.msra.gmra.mrb[144].mxu1 %vm397_vm2, %v14993_v8  ;;  %v15046_v53 = vpack.c.bf16 %v4302_v46, %v4302_v46  ;;  %v15094_v14 = vsel %vm401_vm1, %v4310_v12, 0  ;;  %v13658_v46 = vunpack.i.h.bf16 %v13656_v28  ;;  %v4687_v12 = vpop.permute.xlu1 %4686 }
 0x1ba   : > { %v15037_v24 = vadd.f32 %v1584_v6, %v14955_v30  ;;  %v1586_v41 = vpop.f32.mrb[42].mxu0  ;;  %4443 = vmatpush1.bf16.msra.mxu1 %v15019_v38  ;;  %4474 = vmatprep.mubr.bf16.mxu1 %v17076_v10  ;;  %v4300_v30 = vsel %vm4297_vm12, %v4290_v32, %v13637_v34  ;;  %v13657_v6 = vunpack.i.l.bf16 %v13656_v28 }
 0x1bb   : > { %v1587_v60 = vpop.f32.mrb[43].mxu0  ;;  %12685 = vmatprep.subr.msk.bf16.mxu1 %vm401_vm1, %v15023_v11  ;;  %v15071_v39 = vpack.c.bf16 %v4300_v30, %v4300_v30  ;;  %v4698_v41 = vsel %vm4692_vm13, %v13648_v50, %v13652_v42 }
 0x1bc   : > { %v1623_v59 = vpop.f32.mrb[40].mxu1 }
 0x1bd   : > { %v15056_v27 = vadd.f32 %v1623_v59, %v14966_v44  ;;  %v1625_v9 = vpop.f32.mrb[41].mxu1  ;;  %12680 = vmatmul.mubr.msk.bf16.vlgmr.msra.gmra.mrb[148].mxu0 %vm397_vm2, %v14993_v8  ;;  %v4301_v44 = vsel %vm4297_vm12, %v13643_v23, %v4290_v32 }
 0x1be   : > { %v15062_v40 = vadd.f32 %v1625_v9, %v14970_v3  ;;  %v1627_v34 = vpop.f32.mrb[42].mxu1  ;;  %4511 = vmatpush1.bf16.msra.mxu0 %v15042_v25  ;;  %4542 = vmatprep.mubr.bf16.mxu0 %v17076_v10  ;;  %v4312_v43 = vpack.c.bf16 %v4301_v44, %v4301_v44 }
 0x1bf   : > { %v1628_v35 = vpop.f32.mrb[43].mxu1  ;;  %12687 = vmatprep.subr.msk.bf16.mxu0 %vm401_vm1, %v15046_v53  ;;  %v4699_v34 = vsel %vm4692_vm13, %v13647_v22, %v13648_v50 }
 0x1c0   : > { %v1664_v3 = vpop.f32.mrb[44].mxu0  ;;  %v15110_v9 = vsel %vm401_vm1, %v4312_v43, 0  ;;  %v4703_v22 = vpack.c.bf16 %v4699_v34, %v4699_v34 }
 0x1c1   : > { %v15081_v31 = vadd.f32 %v1664_v3, %v14985_v15  ;;  %v1666_v23 = vpop.f32.mrb[45].mxu0  ;;  %12682 = vmatmul.mubr.msk.bf16.vlgmr.msra.gmra.mrb[148].mxu1 %vm397_vm2, %v14993_v8  ;;  %v4693_v8 = vsel %vm4692_vm13, %v13653_v51, %v4691_v1  ;;  %v15114_v1 = vpack.c.bf16 %v4698_v41, %v4698_v41 }
 0x1c2   : > { %v15086_v32 = vadd.f32 %v1666_v23, %v14988_v55  ;;  %v1668_v36 = vpop.f32.mrb[46].mxu0  ;;  %4552 = vmatpush1.bf16.msra.mxu1 %v15067_v47  ;;  %4583 = vmatprep.mubr.bf16.mxu1 %v17076_v10  ;;  %v4701_v58 = vpack.c.bf16 %v4693_v8, %v4693_v8 }
 0x1c3   : > { %v1669_v15 = vpop.f32.mrb[47].mxu0  ;;  %12689 = vmatprep.subr.msk.bf16.mxu1 %vm401_vm1, %v15071_v39  ;;  %v4694_v36 = vsel %vm4692_vm13, %v4687_v12, %v13653_v51 }
 0x1c4   : > { %v1705_v55 = vpop.f32.mrb[44].mxu1  ;;  %v15126_v28 = vsel %vm401_vm1, %v4701_v58, 0  ;;  %v15144_v51 = vpack.c.bf16 %v4694_v36, %v4694_v36  ;;  %v12691_v58 = vld [vmem:[%s17068_s2 + $0x28] sm:$0x3] }
 0x1c5   : > { %v1718_v48 = vadd.f32 %v1705_v55, %v15009_v13  ;;  %v1707_v60 = vpop.f32.mrb[45].mxu1  ;;  %12684 = vmatmul.mubr.msk.bf16.vlgmr.msra.gmra.mrb[152].mxu0 %vm397_vm2, %v12673_v19 }
 0x1c6   : > { %v1719_v59 = vadd.f32 %v1707_v60, %v15013_v49  ;;  %v1709_v30 = vpop.f32.mrb[46].mxu1  ;;  %4593 = vmatpush1.bf16.msra.mxu0 %v15094_v14  ;;  %4624 = vmatprep.mubr.bf16.mxu0 %v17076_v10  ;;  %v4696_v49 = vsel %vm4692_vm13, %v13657_v6, %v13658_v46  ;;  %v15142_v60 = vsel %vm401_vm1, %v4703_v22, 0 }
 0x1c7   : > { %v1710_v45 = vpop.f32.mrb[47].mxu1  ;;  %12692 = vmatprep.subr.msk.bf16.mxu0 %vm401_vm1, %v15096_v62 }
 0x1c8   : > { %v1816_v13 = vpop.f32.mrb[48].mxu0 }
 0x1c9   : > { %v1946_v35 = vadd.f32 %v1816_v13, %v15032_v17  ;;  %v1818_v44 = vpop.f32.mrb[49].mxu0  ;;  %12686 = vmatmul.mubr.msk.bf16.vlgmr.msra.gmra.mrb[152].mxu1 %vm397_vm2, %v12673_v19  ;;  %v15130_v17 = vpack.c.bf16 %v4696_v49, %v4696_v49 }
 0x1ca   : > { %v1947_v3 = vadd.f32 %v1818_v44, %v15037_v24  ;;  %v1820_v37 = vpop.f32.mrb[50].mxu0  ;;  %4634 = vmatpush1.bf16.msra.mxu1 %v15110_v9  ;;  %4665 = vmatprep.mubr.bf16.mxu1 %v17076_v10  ;;  %v4697_v24 = vsel %vm4692_vm13, %v13652_v42, %v13657_v6  ;;  %v4695_v6 = vsel %vm4692_vm13, %v13658_v46, %v4687_v12 }
 0x1cb   : > { %v1821_v23 = vpop.f32.mrb[51].mxu0  ;;  %12694 = vmatprep.subr.msk.bf16.mxu1 %vm401_vm1, %v15114_v1  ;;  %v4707_v49 = vpack.c.bf16 %v4695_v6, %v4695_v6 }
 0x1cc   : > { %v1857_v50 = vpop.f32.mrb[48].mxu1 }
 0x1cd   : > { %v1948_v43 = vadd.f32 %v1857_v50, %v15056_v27  ;;  %v1859_v15 = vpop.f32.mrb[49].mxu1  ;;  %12688 = vmatmul.mubr.msk.bf16.vlgmr.msra.gmra.mrb[156].mxu0 %vm397_vm2, %v12673_v19  ;;  %v4705_v27 = vpack.c.bf16 %v4697_v24, %v4697_v24  ;;  %v15169_v23 = vsel %vm401_vm1, %v4707_v49, 0 }
 0x1ce   : > { %v1949_v55 = vadd.f32 %v1859_v15, %v15062_v40  ;;  %v1861_v8 = vpop.f32.mrb[50].mxu1  ;;  %4737 = vmatpush1.bf16.msra.mxu0 %v15126_v28  ;;  %4768 = vmatprep.mubr.bf16.mxu0 %v17076_v10 }
 0x1cf   : > { %v1862_v41 = vpop.f32.mrb[51].mxu1  ;;  %12696 = vmatprep.subr.msk.bf16.mxu0 %vm401_vm1, %v15130_v17  ;;  %v15159_v46 = vsel %vm401_vm1, %v4705_v27, 0 }
 0x1d0   : > { %v1898_v42 = vpop.f32.mrb[52].mxu0 }
 0x1d1   : > { %v1950_v40 = vadd.f32 %v1898_v42, %v15081_v31  ;;  %v1900_v30 = vpop.f32.mrb[53].mxu0  ;;  %12690 = vmatmul.mubr.msk.bf16.vlgmr.msra.gmra.mrb[156].mxu1 %vm397_vm2, %v12673_v19 }
 0x1d2   : > { %v1951_v45 = vadd.f32 %v1900_v30, %v15086_v32  ;;  %v1902_v13 = vpop.f32.mrb[54].mxu0  ;;  %4778 = vmatpush1.bf16.msra.mxu1 %v15142_v60  ;;  %4809 = vmatprep.mubr.bf16.mxu1 %v17076_v10 }
 0x1d3   : > { %v1903_v34 = vpop.f32.mrb[55].mxu0  ;;  %12698 = vmatprep.subr.msk.bf16.mxu1 %vm401_vm1, %v15144_v51 }
 0x1d4   : > { %v1939_v31 = vpop.f32.mrb[52].mxu1 }
 0x1d5   : > { %v1952_v19 = vadd.f32 %v1939_v31, %v1718_v48  ;;  %v1941_v32 = vpop.f32.mrb[53].mxu1  ;;  %12693 = vmatmul.mubr.msk.bf16.vlgmr.msra.gmra.mrb[160].mxu0 %vm397_vm2, %v12691_v58 }
 0x1d6   : > { %v1953_v44 = vadd.f32 %v1941_v32, %v1719_v59  ;;  %v1943_v12 = vpop.f32.mrb[54].mxu1  ;;  %4819 = vmatpush1.bf16.msra.mxu0 %v15159_v46  ;;  %4850 = vmatprep.mubr.bf16.mxu0 %v17076_v10 }
 0x1d7   : > { %v1944_v37 = vpop.f32.mrb[55].mxu1  ;;  %12701 = vmatprep.subr.msk.bf16.mxu0 %vm401_vm1, %v15023_v11  ;;  %v2463_v12 = vsub.s32 0, %v14362_v33 }
 0x1d8   : > { %v2050_v22 = vpop.f32.mrb[56].mxu0 }
 0x1d9   : > { %v2180_v50 = vadd.f32 %v2050_v22, %v1946_v35  ;;  %v2052_v36 = vpop.f32.mrb[57].mxu0  ;;  %12695 = vmatmul.mubr.msk.bf16.vlgmr.msra.gmra.mrb[160].mxu1 %vm397_vm2, %v12691_v58  ;;  %v313_v22 = vld [vmem:[%s17067_s1] sm:$0xff] }
 0x1da   : > { %v2181_v48 = vadd.f32 %v2052_v36, %v1947_v3  ;;  %4860 = vmatpush1.bf16.msra.mxu1 %v15169_v23  ;;  %v2054_v59 = vpop.f32.mrb[58].mxu0  ;;  %4891 = vmatprep.mubr.bf16.mxu1 %v17076_v10  ;;  %v2471_v36 = vsub.s32 2, %v14362_v33 }
 0x1db   : > { %v2055_v24 = vpop.f32.mrb[59].mxu0  ;;  %12703 = vmatprep.subr.msk.bf16.mxu1 %vm401_vm1, %v15046_v53 }
 0x1dc   : > { %v2091_v15 = vpop.f32.mrb[56].mxu1 }
 0x1dd   : > { %v2182_v8 = vadd.f32 %v2091_v15, %v1948_v43  ;;  %v2093_v41 = vpop.f32.mrb[57].mxu1  ;;  %12697 = vmatmul.mubr.msk.bf16.vlgmr.msra.gmra.mrb[164].mxu0 %vm397_vm2, %v12691_v58  ;;  %v2475_v15 = vsub.s32 3, %v14362_v33 }
 0x1de   : > { %v2183_v27 = vadd.f32 %v2093_v41, %v1949_v55  ;;  %4914 = vmatpush1.bf16.msra.mxu0 %v15067_v47  ;;  %v2095_v35 = vpop.f32.mrb[58].mxu1  ;;  %4945 = vmatprep.mubr.bf16.mxu0 %v17076_v10  ;;  %v15190_v55 = vld [vmem:[%s17068_s2 + $0x2a] sm:$0x3] }
 0x1df   : > { %v2096_v3 = vpop.f32.mrb[59].mxu1  ;;  %12705 = vmatprep.subr.msk.bf16.mxu0 %vm401_vm1, %v15071_v39 }
 0x1e0   : > { %v2132_v42 = vpop.f32.mrb[60].mxu0 }
 0x1e1   : > { %v15181_v6 = vadd.f32 %v2132_v42, %v1950_v40  ;;  %v2134_v30 = vpop.f32.mrb[61].mxu0  ;;  %12699 = vmatmul.mubr.msk.bf16.vlgmr.msra.gmra.mrb[164].mxu1 %vm397_vm2, %v12691_v58  ;;  %v15219_v42 = vrot.slane %v313_v22, %v2463_v12 }
 0x1e2   : > { %v15184_v43 = vadd.f32 %v2134_v30, %v1951_v45  ;;  %4955 = vmatpush1.bf16.msra.mxu1 %v15094_v14  ;;  %v2136_v13 = vpop.f32.mrb[62].mxu0  ;;  %4986 = vmatprep.mubr.bf16.mxu1 %v17076_v10 }
 0x1e3   : > { %12707 = vmatprep.subr.msk.bf16.mxu1 %vm401_vm1, %v15001_v63  ;;  %v2137_v40 = vpop.f32.mrb[63].mxu0  ;;  %v2479_v13 = vsub.s32 4, %v14362_v33 }
 0x1e4   : > { %v2173_v34 = vpop.f32.mrb[60].mxu1 }
 0x1e5   : > { %v15195_v49 = vadd.f32 %v2173_v34, %v1952_v19  ;;  %v2175_v58 = vpop.f32.mrb[61].mxu1  ;;  %12702 = vmatmul.mubr.msk.bf16.vlgmr.msra.gmra.mrb[168].mxu0 %vm397_vm2, %v15190_v55  ;;  %v15206_v19 = vpop.permute.xlu0 %2425 }
 0x1e6   : > { %v15199_v45 = vadd.f32 %v2175_v58, %v1953_v44  ;;  %4996 = vmatpush1.bf16.msra.mxu0 %v15110_v9  ;;  %v2177_v31 = vpop.f32.mrb[62].mxu1  ;;  %5027 = vmatprep.mubr.bf16.mxu0 %v17076_v10  ;;  %v2467_v44 = vsub.s32 1, %v14362_v33  ;;  %v15228_v58 = vrot.slane %v313_v22, %v2471_v36 }
 0x1e7   : > { %v2178_v32 = vpop.f32.mrb[63].mxu1  ;;  %12710 = vmatprep.subr.msk.bf16.mxu0 %vm401_vm1, %v14397_v54  ;;  %v2487_v31 = vsub.s32 6, %v14362_v33 }
 0x1e8   : > { %v2284_v37 = vpop.f32.mrb[64].mxu0  ;;  %v15226_v34 = vrot.slane %v313_v22, %v2467_v44  ;;  %v2491_v44 = vsub.s32 7, %v14362_v33 }
 0x1e9   : > { %v2414_v59 = vadd.f32 %v2284_v37, %v2180_v50  ;;  %v2286_v24 = vpop.f32.mrb[65].mxu0  ;;  %12704 = vmatmul.mubr.msk.bf16.vlgmr.msra.gmra.mrb[168].mxu1 %vm397_vm2, %v15190_v55  ;;  %v2483_v50 = vsub.s32 5, %v14362_v33 }
 0x1ea   : > { %v2415_v41 = vadd.f32 %v2286_v24, %v2181_v48  ;;  %v2288_v35 = vpop.f32.mrb[66].mxu0  ;;  %5037 = vmatpush1.bf16.msra.mxu1 %v15042_v25  ;;  %5068 = vmatprep.mubr.bf16.mxu1 %v17076_v10 }
 0x1eb   : > { %v2428_v3 = vadd.f32 %v15206_v19, %v2414_v59  ;;  %v2289_v30 = vpop.f32.mrb[67].mxu0  ;;  %12712 = vmatprep.subr.msk.bf16.mxu1 %vm401_vm1, %v14405_v56  ;;  %v15231_v59 = vrot.slane %v313_v22, %v2475_v15  ;;  %v15241_v15 = vrot.slane %v313_v22, %v2483_v50 }
 0x1ec   : > { %v2429_v40 = vadd.f32 %v15206_v19, %v2415_v41  ;;  %v2325_v48 = vpop.f32.mrb[64].mxu1 }
 0x1ed   : > { %vm2436_vm14 = vcmp.gt.f32.partialorder %v2428_v3, 0.0  ;;  %v2444_v32 = vmul.f32 0.1, %v2428_v3  ;;  %v2416_v12 = vadd.f32 %v2325_v48, %v2182_v8  ;;  %v2327_v37 = vpop.f32.mrb[65].mxu1  ;;  %12706 = vmatmul.mubr.msk.bf16.vlgmr.msra.gmra.mrb[172].mxu0 %vm397_vm2, %v15190_v55  ;;  %v15239_v48 = vrot.slane %v313_v22, %v2479_v13 }
 0x1ee   : > { %vm2437_vm15 = vcmp.gt.f32.partialorder %v2429_v40, 0.0  ;;  %v2445_v24 = vmul.f32 0.1, %v2429_v40  ;;  %v2417_v35 = vadd.f32 %v2327_v37, %v2183_v27  ;;  %v2329_v41 = vpop.f32.mrb[66].mxu1  ;;  %5091 = vmatpush1.bf16.msra.mxu0 %v14417_v61  ;;  %5122 = vmatprep.mubr.bf16.mxu0 %v17076_v10 }
 0x1ef   : > { %v2452_v36 = vsel %vm2436_vm14, %v2428_v3, %v2444_v32  ;;  %v2430_v30 = vadd.f32 %v15206_v19, %v2416_v12  ;;  %v2330_v8 = vpop.f32.mrb[67].mxu1  ;;  %12714 = vmatprep.subr.msk.bf16.mxu0 %vm401_vm1, %v14421_v0  ;;  %v15246_v41 = vrot.slane %v313_v22, %v2487_v31  ;;  %v15258_v31 = vrot.slane %v313_v22, %v2491_v44  ;;  %v15263_v12 = vld [vmem:[%s17068_s2 + $0x2c] sm:$0x3] }
 0x1f0   : > { %v2453_v54 = vsel %vm2437_vm15, %v2429_v40, %v2445_v24  ;;  %v2431_v27 = vadd.f32 %v15206_v19, %v2417_v35  ;;  %v2366_v37 = vpop.f32.mrb[68].mxu0  ;;  %v15249_v10 = vmul.f32 %v15219_v42, %v2452_v36 }
 0x1f1   : > { %vm2438_vm10 = vcmp.gt.f32.partialorder %v2430_v30, 0.0  ;;  %v2446_v33 = vmul.f32 0.1, %v2430_v30  ;;  %v2418_v3 = vadd.f32 %v2366_v37, %v15181_v6  ;;  %v2368_v13 = vpop.f32.mrb[69].mxu0  ;;  %12708 = vmatmul.mubr.msk.bf16.vlgmr.msra.gmra.mrb[172].mxu1 %vm397_vm2, %v15190_v55  ;;  %v15255_v50 = vmul.f32 %v15226_v34, %v2453_v54 }
 0x1f2   : > { %vm2439_vm11 = vcmp.gt.f32.partialorder %v2431_v27, 0.0  ;;  %v2447_v40 = vmul.f32 0.1, %v2431_v27  ;;  %v2419_v32 = vadd.f32 %v2368_v13, %v15184_v43  ;;  %5132 = vmatpush1.bf16.msra.mxu1 %v14430_v2  ;;  %v17087_v6 = vmov 0   ;;  %v2370_v24 = vpop.f32.mrb[70].mxu0 }
 0x1f3   : > { %5163 = vmatprep.mubr.bf16.mxu1 %v17087_v6  ;;  %v2454_v55 = vsel %vm2438_vm10, %v2430_v30, %v2446_v33  ;;  %v2432_v54 = vadd.f32 %v15206_v19, %v2418_v3  ;;  %v15270_v35 = vpack.i.bf16 %v15255_v50, %v15249_v10  ;;  %12716 = vmatprep.subr.msk.bf16.mxu1 %vm401_vm1, %v14434_v5  ;;  %v2371_v43 = vpop.f32.mrb[71].mxu0 }
 0x1f4   : > { %v15275_v22 = vmul.f32 %v15228_v58, %v2454_v55  ;;  %v2455_v44 = vsel %vm2439_vm11, %v2431_v27, %v2447_v40  ;;  %v2433_v36 = vadd.f32 %v15206_v19, %v2419_v32  ;;  %v2407_v8 = vpop.f32.mrb[68].mxu1 }
 0x1f5   : > { %v15279_v37 = vmul.f32 %v15231_v59, %v2455_v44  ;;  %vm2440_vm12 = vcmp.gt.f32.partialorder %v2432_v54, 0.0  ;;  %v2448_v30 = vmul.f32 0.1, %v2432_v54  ;;  %v2420_v33 = vadd.f32 %v2407_v8, %v15195_v49  ;;  %v2409_v3 = vpop.f32.mrb[69].mxu1  ;;  %13661 = vrot.lane.b32.xlu1 %v15270_v35, %s14036_s11  ;;  %12711 = vmatmul.mubr.msk.bf16.vlgmr.msra.gmra.mrb[176].mxu0 %vm397_vm2, %v15263_v12 }
 0x1f6   : > { %vm2441_vm13 = vcmp.gt.f32.partialorder %v2433_v36, 0.0  ;;  %v2449_v13 = vmul.f32 0.1, %v2433_v36  ;;  %v2421_v27 = vadd.f32 %v2409_v3, %v15199_v45  ;;  %5173 = vmatpush1.bf16.msra.mxu0 %v14447_v4  ;;  %v2411_v40 = vpop.f32.mrb[70].mxu1  ;;  %5204 = vmatprep.mubr.bf16.mxu0 %v17087_v6 }
 0x1f7   : > { %v2456_v32 = vsel %vm2440_vm12, %v2432_v54, %v2448_v30  ;;  %v2434_v24 = vadd.f32 %v15206_v19, %v2420_v33  ;;  %12719 = vmatprep.subr.msk.bf16.mxu0 %vm401_vm1, %v15114_v1  ;;  %v2412_v49 = vpop.f32.mrb[71].mxu1  ;;  %v15294_v55 = vpack.i.bf16 %v15279_v37, %v15275_v22 }
 0x1f8   : > { %v15297_v43 = vmul.f32 %v15239_v48, %v2456_v32  ;;  %v2457_v45 = vsel %vm2441_vm13, %v2433_v36, %v2449_v13  ;;  %v2435_v44 = vadd.f32 %v15206_v19, %v2421_v27  ;;  %v2615_v8 = vpop.f32.mrb[72].mxu0 }
 0x1f9   : > { %v15301_v3 = vmul.f32 %v15241_v15, %v2457_v45  ;;  %vm2442_vm14 = vcmp.gt.f32.partialorder %v2434_v24, 0.0  ;;  %v2450_v54 = vmul.f32 0.1, %v2434_v24  ;;  %13666 = vrot.lane.b32.xlu1 %v15294_v55, %s14036_s11  ;;  %12713 = vmatmul.mubr.msk.bf16.vlgmr.msra.gmra.mrb[176].mxu1 %vm397_vm2, %v15263_v12  ;;  %v2617_v30 = vpop.f32.mrb[73].mxu0 }
 0x1fa   : > { %vm2443_vm15 = vcmp.gt.f32.partialorder %v2435_v44, 0.0  ;;  %v2451_v33 = vmul.f32 0.1, %v2435_v44  ;;  %5214 = vmatpush1.bf16.msra.mxu1 %v14459_v29  ;;  %5245 = vmatprep.mubr.bf16.mxu1 %v17087_v6  ;;  %v2619_v19 = vpop.f32.mrb[74].mxu0 }
 0x1fb   : > { %v2458_v36 = vsel %vm2442_vm14, %v2434_v24, %v2450_v54  ;;  %12721 = vmatprep.subr.msk.bf16.mxu1 %vm401_vm1, %v15130_v17  ;;  %v15313_v13 = vpack.i.bf16 %v15301_v3, %v15297_v43  ;;  %v2620_v27 = vpop.f32.mrb[75].mxu0 }
 0x1fc   : > { %v15316_v40 = vmul.f32 %v15246_v41, %v2458_v36  ;;  %v2459_v32 = vsel %vm2443_vm15, %v2435_v44, %v2451_v33  ;;  %v2656_v49 = vpop.f32.mrb[72].mxu1  ;;  %v12718_v27 = vld [vmem:[%s17068_s2 + $0x2e] sm:$0x3] }
 0x1fd   : > { %v15319_v45 = vmul.f32 %v15258_v31, %v2459_v32  ;;  %13671 = vrot.lane.b32.xlu1 %v15313_v13, %s14036_s11  ;;  %12715 = vmatmul.mubr.msk.bf16.vlgmr.msra.gmra.mrb[180].mxu0 %vm397_vm2, %v15263_v12  ;;  %v2658_v24 = vpop.f32.mrb[73].mxu1 }
 0x1fe   : > { %5268 = vmatpush1.bf16.msra.mxu0 %v15142_v60  ;;  %5299 = vmatprep.mubr.bf16.mxu0 %v17087_v6  ;;  %v2660_v54 = vpop.f32.mrb[74].mxu1  ;;  %v15329_v19 = vpack.i.bf16 %v15316_v40, %v15301_v3 }
 0x1ff   : > { %12723 = vmatprep.subr.msk.bf16.mxu0 %vm401_vm1, %v15144_v51  ;;  %6066 = vrot.lane.b32.xlu0 %v15319_v45, %s14036_s11  ;;  %v2661_v44 = vpop.f32.mrb[75].mxu1 }
 0x200   : > { %v2697_v33 = vpop.f32.mrb[76].mxu0 }
 0x201   : > { %13676 = vrot.lane.b32.xlu1 %v15270_v35, %s14037_s12  ;;  %12717 = vmatmul.mubr.msk.bf16.vlgmr.msra.gmra.mrb[180].mxu1 %vm397_vm2, %v15263_v12  ;;  %v2699_v36 = vpop.f32.mrb[77].mxu0 }
 0x202   : > { %5309 = vmatpush1.bf16.msra.mxu1 %v15159_v46  ;;  %5340 = vmatprep.mubr.bf16.mxu1 %v17087_v6  ;;  %v2701_v32 = vpop.f32.mrb[78].mxu0 }
 0x203   : > { %6064 = vrot.lane.b32.xlu0 %v15316_v40, %s14036_s11  ;;  %12725 = vmatprep.subr.msk.bf16.mxu1 %vm401_vm1, %v15096_v62  ;;  %v2702_v54 = vpop.f32.mrb[79].mxu0 }
 0x204   : > { %v2738_v44 = vpop.f32.mrb[76].mxu1 }
 0x205   : > { %6032 = vrot.lane.b32.xlu1 %v15319_v45, %s14037_s12  ;;  %12720 = vmatmul.mubr.msk.bf16.vlgmr.msra.gmra.mrb[184].mxu0 %vm397_vm2, %v12718_v27  ;;  %v2740_v12 = vpop.f32.mrb[77].mxu1 }
 0x206   : > { %5350 = vmatpush1.bf16.msra.mxu0 %v15169_v23  ;;  %5381 = vmatprep.mubr.bf16.mxu0 %v17087_v6  ;;  %v2742_v4 = vpop.f32.mrb[78].mxu1 }
 0x207   : > { %13681 = vrot.lane.b32.xlu0 %v15294_v55, %s14037_s12  ;;  %12728 = vmatprep.subr.msk.bf16.mxu0 %vm401_vm1, %v15046_v53  ;;  %v2743_v32 = vpop.f32.mrb[79].mxu1 }
 0x208   : > { %v2806_v54 = vpop.f32.mrb[80].mxu0 }
 0x209   : > { %6030 = vrot.lane.b32.xlu1 %v15316_v40, %s14037_s12  ;;  %12722 = vmatmul.mubr.msk.bf16.vlgmr.msra.gmra.mrb[184].mxu1 %vm397_vm2, %v12718_v27  ;;  %v2807_v29 = vadd.f32 %v2806_v54, %v2615_v8  ;;  %v2808_v0 = vpop.f32.mrb[81].mxu0 }
 0x20a   : > { %5391 = vmatpush1.bf16.msra.mxu1 %v15126_v28  ;;  %5422 = vmatprep.mubr.bf16.mxu1 %v17087_v6  ;;  %v2809_v4 = vadd.f32 %v2808_v0, %v2617_v30  ;;  %v2810_v61 = vpop.f32.mrb[82].mxu0 }
 0x20b   : > { %12730 = vmatprep.subr.msk.bf16.mxu1 %vm401_vm1, %v15071_v39  ;;  %13686 = vrot.lane.b32.xlu0 %v15313_v13, %s14037_s12  ;;  %v2811_v53 = vpop.f32.mrb[83].mxu0 }
 0x20c   : > { %v2847_v32 = vpop.f32.mrb[80].mxu1 }
 0x20d   : > { %13696 = vrot.lane.b32.xlu1 %v15294_v55, %s14038_s13  ;;  %12724 = vmatmul.mubr.msk.bf16.vlgmr.msra.gmra.mrb[188].mxu0 %vm397_vm2, %v12718_v27  ;;  %v2848_v8 = vadd.f32 %v2847_v32, %v2656_v49  ;;  %v2849_v54 = vpop.f32.mrb[81].mxu1 }
 0x20e   : > { %5445 = vmatpush1.bf16.msra.mxu0 %v15094_v14  ;;  %5476 = vmatprep.mubr.bf16.mxu0 %v17087_v6  ;;  %v2850_v61 = vadd.f32 %v2849_v54, %v2658_v24  ;;  %v2851_v0 = vpop.f32.mrb[82].mxu1  ;;  %v12727_v14 = vld [vmem:[%s17068_s2 + $0x30] sm:$0x3] }
 0x20f   : > { %12732 = vmatprep.subr.msk.bf16.mxu0 %vm401_vm1, %v15001_v63  ;;  %13691 = vrot.lane.b32.xlu0 %v15270_v35, %s14038_s13  ;;  %v2852_v39 = vpop.f32.mrb[83].mxu1 }
 0x210   : > { %v2888_v30 = vpop.f32.mrb[84].mxu0 }
 0x211   : > { %13701 = vrot.lane.b32.xlu1 %v15313_v13, %s14038_s13  ;;  %12726 = vmatmul.mubr.msk.bf16.vlgmr.msra.gmra.mrb[188].mxu1 %vm397_vm2, %v12718_v27  ;;  %v2889_v49 = vadd.f32 %v2888_v30, %v2697_v33  ;;  %v2890_v53 = vpop.f32.mrb[85].mxu0 }
 0x212   : > { %5486 = vmatpush1.bf16.msra.mxu1 %v15110_v9  ;;  %5517 = vmatprep.mubr.bf16.mxu1 %v17087_v6  ;;  %v2891_v63 = vadd.f32 %v2890_v53, %v2699_v36  ;;  %v2892_v24 = vpop.f32.mrb[86].mxu0 }
 0x213   : > { %12734 = vmatprep.subr.msk.bf16.mxu1 %vm401_vm1, %v15023_v11  ;;  %6482 = vrot.lane.b32.xlu0 %v15319_v45, %s14038_s13  ;;  %v2893_v32 = vpop.f32.mrb[87].mxu0  ;;  %v12672_v24 = vld [vmem:[%s17069_s3 + $0x4] sm:$0xf] }
 0x214   : > { %v2929_v27 = vpop.f32.mrb[84].mxu1 }
 0x215   : > { %13706 = vrot.lane.b32.xlu1 %v15270_v35, %s14039_s14  ;;  %12729 = vmatmul.mubr.msk.bf16.vlgmr.msra.gmra.mrb[192].mxu0 %vm397_vm2, %v12727_v14  ;;  %v2930_v9 = vadd.f32 %v2929_v27, %v2738_v44  ;;  %v2931_v33 = vpop.f32.mrb[85].mxu1 }
 0x216   : > { %5527 = vmatpush1.bf16.msra.mxu0 %v15042_v25  ;;  %v2932_v54 = vadd.f32 %v2931_v33, %v2740_v12  ;;  %v2933_v36 = vpop.f32.mrb[86].mxu1  ;;  %5558 = vmatprep.mubr.bf16.mxu0 %v17087_v6 }
 0x217   : > { %6480 = vrot.lane.b32.xlu0 %v15316_v40, %s14038_s13  ;;  %v2934_v11 = vpop.f32.mrb[87].mxu1  ;;  %12737 = vmatprep.subr.msk.bf16.mxu0 %vm401_vm1, %v14652_v7 }
 0x218   : > { %v3032_v0 = vpop.f32.mrb[88].mxu0 }
 0x219   : > { %6715 = vrot.lane.b32.xlu1 %v15319_v45, %s14039_s14  ;;  %12731 = vmatmul.mubr.msk.bf16.vlgmr.msra.gmra.mrb[192].mxu1 %vm397_vm2, %v12727_v14  ;;  %v3162_v44 = vadd.f32 %v3032_v0, %v2807_v29  ;;  %v3034_v39 = vpop.f32.mrb[89].mxu0 }
 0x21a   : > { %5568 = vmatpush1.bf16.msra.mxu1 %v15067_v47  ;;  %5599 = vmatprep.mubr.bf16.mxu1 %v17087_v6  ;;  %v3163_v25 = vadd.f32 %v3034_v39, %v2809_v4  ;;  %v3036_v12 = vpop.f32.mrb[90].mxu0 }
 0x21b   : > { %13711 = vrot.lane.b32.xlu0 %v15294_v55, %s14039_s14  ;;  %v3037_v30 = vpop.f32.mrb[91].mxu0  ;;  %12739 = vmatprep.subr.msk.bf16.mxu1 %vm401_vm1, %v14672_v20 }
 0x21c   : > { %v3073_v7 = vpop.f32.mrb[88].mxu1 }
 0x21d   : > { %6713 = vrot.lane.b32.xlu1 %v15316_v40, %s14039_s14  ;;  %12733 = vmatmul.mubr.msk.bf16.vlgmr.msra.gmra.mrb[196].mxu0 %vm397_vm2, %v12727_v14  ;;  %v3164_v29 = vadd.f32 %v3073_v7, %v2848_v8  ;;  %v3075_v53 = vpop.f32.mrb[89].mxu1 }
 0x21e   : > { %v3165_v47 = vadd.f32 %v3075_v53, %v2850_v61  ;;  %5622 = vmatpush1.bf16.msra.mxu0 %v14999_v26  ;;  %v3077_v4 = vpop.f32.mrb[90].mxu1  ;;  %5653 = vmatprep.mubr.bf16.mxu0 %v17087_v6 }
 0x21f   : > { %13716 = vrot.lane.b32.xlu0 %v15313_v13, %s14039_s14  ;;  %12741 = vmatprep.subr.msk.bf16.mxu0 %vm401_vm1, %v14623_v16  ;;  %v3078_v20 = vpop.f32.mrb[91].mxu1  ;;  %v12736_v13 = vld [vmem:[%s17068_s2 + $0x32] sm:$0x3] }
 0x220   : > { %v3114_v32 = vpop.f32.mrb[92].mxu0 }
 0x221   : > { %13721 = vrot.lane.b32.xlu1 %v15270_v35, %s14040_s15  ;;  %12735 = vmatmul.mubr.msk.bf16.vlgmr.msra.gmra.mrb[196].mxu1 %vm397_vm2, %v12727_v14  ;;  %v3166_v26 = vadd.f32 %v3114_v32, %v2889_v49  ;;  %v3116_v8 = vpop.f32.mrb[93].mxu0 }
 0x222   : > { %v3167_v61 = vadd.f32 %v3116_v8, %v2891_v63  ;;  %5663 = vmatpush1.bf16.msra.mxu1 %v15019_v38  ;;  %v3118_v16 = vpop.f32.mrb[94].mxu0  ;;  %5694 = vmatprep.mubr.bf16.mxu1 %v17087_v6 }
 0x223   : > { %4236 = vperm.xlu0 %13659, %v12672_v24   ;;  %v3119_v27 = vpop.f32.mrb[95].mxu0  ;;  %12743 = vmatprep.subr.msk.bf16.mxu1 %vm401_vm1, %v14635_v52 }
 0x224   : > { %v3155_v33 = vpop.f32.mrb[92].mxu1 }
 0x225   : > { %7151 = vrot.lane.b32.xlu1 %v15297_v43, %s14040_s15  ;;  %12738 = vmatmul.mubr.msk.bf16.vlgmr.msra.gmra.mrb[200].mxu0 %vm397_vm2, %v12736_v13  ;;  %v3168_v49 = vadd.f32 %v3155_v33, %v2930_v9  ;;  %v3157_v14 = vpop.f32.mrb[93].mxu1 }
 0x226   : > { %5704 = vmatpush1.bf16.msra.mxu0 %v14961_v57  ;;  %v3169_v63 = vadd.f32 %v3157_v14, %v2932_v54  ;;  %v3159_v38 = vpop.f32.mrb[94].mxu1  ;;  %5735 = vmatprep.mubr.bf16.mxu0 %v17087_v6 }
 0x227   : > { %12746 = vmatprep.subr.msk.bf16.mxu0 %vm401_vm1, %v15130_v17  ;;  %13726 = vrot.lane.b32.xlu0 %v15294_v55, %s14040_s15  ;;  %v3160_v52 = vpop.f32.mrb[95].mxu1 }
 0x228   : > { %v3209_v36 = vpop.f32.mrb[96].mxu0 }
 0x229   : > { %v3339_v11 = vadd.f32 %v3209_v36, %v3162_v44  ;;  %v3211_v0 = vpop.f32.mrb[97].mxu0  ;;  %7157 = vrot.lane.b32.xlu1 %v15319_v45, %s14040_s15  ;;  %12740 = vmatmul.mubr.msk.bf16.vlgmr.msra.gmra.mrb[200].mxu1 %vm397_vm2, %v12736_v13 }
 0x22a   : > { %v3340_v57 = vadd.f32 %v3211_v0, %v3163_v25  ;;  %5745 = vmatpush1.bf16.msra.mxu1 %v14976_v21  ;;  %v3213_v9 = vpop.f32.mrb[98].mxu0  ;;  %5776 = vmatprep.mubr.bf16.mxu1 %v17087_v6 }
 0x22b   : > { %12748 = vmatprep.subr.msk.bf16.mxu1 %vm401_vm1, %v15144_v51  ;;  %13731 = vrot.lane.b32.xlu0 %v15329_v19, %s14040_s15  ;;  %v3214_v17 = vpop.f32.mrb[99].mxu0 }
 0x22c   : > { %v3250_v54 = vpop.f32.mrb[96].mxu1 }
 0x22d   : > { %v3341_v44 = vadd.f32 %v3250_v54, %v3164_v29  ;;  %13741 = vrot.lane.b32.xlu1 %v15294_v55, %s14041_s16  ;;  %v3252_v39 = vpop.f32.mrb[97].mxu1  ;;  %12742 = vmatmul.mubr.msk.bf16.vlgmr.msra.gmra.mrb[204].mxu0 %vm397_vm2, %v12736_v13 }
 0x22e   : > { %v3342_v25 = vadd.f32 %v3252_v39, %v3165_v47  ;;  %5799 = vmatpush1.bf16.msra.mxu0 %v15159_v46  ;;  %v3254_v21 = vpop.f32.mrb[98].mxu1  ;;  %5830 = vmatprep.mubr.bf16.mxu0 %v17087_v6  ;;  %v12745_v46 = vld [vmem:[%s17068_s2 + $0x34] sm:$0x3] }
 0x22f   : > { %12750 = vmatprep.subr.msk.bf16.mxu0 %vm401_vm1, %v15096_v62  ;;  %13736 = vrot.lane.b32.xlu0 %v15270_v35, %s14041_s16  ;;  %v3255_v51 = vpop.f32.mrb[99].mxu1 }
 0x230   : > { %v3291_v12 = vpop.f32.mrb[100].mxu0 }
 0x231   : > { %v3343_v30 = vadd.f32 %v3291_v12, %v3166_v26  ;;  %v3293_v7 = vpop.f32.mrb[101].mxu0  ;;  %13746 = vrot.lane.b32.xlu1 %v15329_v19, %s14041_s16  ;;  %12744 = vmatmul.mubr.msk.bf16.vlgmr.msra.gmra.mrb[204].mxu1 %vm397_vm2, %v12736_v13 }
 0x232   : > { %v3344_v29 = vadd.f32 %v3293_v7, %v3167_v61  ;;  %5840 = vmatpush1.bf16.msra.mxu1 %v15169_v23  ;;  %v3295_v62 = vpop.f32.mrb[102].mxu0  ;;  %5871 = vmatprep.mubr.bf16.mxu1 %v17087_v6 }
 0x233   : > { %12752 = vmatprep.subr.msk.bf16.mxu1 %vm401_vm1, %v15114_v1  ;;  %7384 = vrot.lane.b32.xlu0 %v15297_v43, %s14041_s16  ;;  %v3296_v53 = vpop.f32.mrb[103].mxu0 }
 0x234   : > { %v3332_v47 = vpop.f32.mrb[100].mxu1 }
 0x235   : > { %v3345_v4 = vadd.f32 %v3332_v47, %v3168_v49  ;;  %13751 = vrot.lane.b32.xlu1 %v15270_v35, %s14042_s17  ;;  %v3334_v23 = vpop.f32.mrb[101].mxu1  ;;  %12747 = vmatmul.mubr.msk.bf16.vlgmr.msra.gmra.mrb[208].mxu0 %vm397_vm2, %v12745_v46 }
 0x236   : > { %v3346_v20 = vadd.f32 %v3334_v23, %v3169_v63  ;;  %5881 = vmatpush1.bf16.msra.mxu0 %v15126_v28  ;;  %v3336_v24 = vpop.f32.mrb[102].mxu1  ;;  %5912 = vmatprep.mubr.bf16.mxu0 %v17087_v6 }
 0x237   : > { %7390 = vrot.lane.b32.xlu0 %v15319_v45, %s14041_s16  ;;  %v3337_v1 = vpop.f32.mrb[103].mxu1 }
 0x238   : > { %v3386_v32 = vpop.f32.mrb[104].mxu0 }
 0x239   : > { %v3516_v26 = vadd.f32 %v3386_v32, %v3339_v11  ;;  %v3388_v8 = vpop.f32.mrb[105].mxu0  ;;  %7617 = vrot.lane.b32.xlu1 %v15297_v43, %s14042_s17  ;;  %12749 = vmatmul.mubr.msk.bf16.vlgmr.msra.gmra.mrb[208].mxu1 %vm397_vm2, %v12745_v46 }
 0x23a   : > { %v3517_v61 = vadd.f32 %v3388_v8, %v3340_v57  ;;  %5922 = vmatpush1.bf16.msra.mxu1 %v15142_v60  ;;  %v3390_v13 = vpop.f32.mrb[106].mxu0  ;;  %5953 = vmatprep.mubr.bf16.mxu1 %v17087_v6 }
 0x23b   : > { %13756 = vrot.lane.b32.xlu0 %v15294_v55, %s14042_s17  ;;  %v3391_v28 = vpop.f32.mrb[107].mxu0 }
 0x23c   : > { %v3427_v16 = vpop.f32.mrb[104].mxu1 }
 0x23d   : > { %v3518_v27 = vadd.f32 %v3427_v16, %v3341_v44  ;;  %7623 = vrot.lane.b32.xlu1 %v15319_v45, %s14042_s17  ;;  %v3429_v33 = vpop.f32.mrb[105].mxu1  ;;  %12751 = vmatmul.mubr.msk.bf16.vlgmr.msra.gmra.mrb[212].mxu0 %vm397_vm2, %v12745_v46 }
 0x23e   : > { %v3519_v49 = vadd.f32 %v3429_v33, %v3342_v25  ;;  %v3431_v14 = vpop.f32.mrb[106].mxu1  ;;  %6143 = vmatprep.mubr.bf16.mxu0 %v17087_v6 }
 0x23f   : > { %13761 = vrot.lane.b32.xlu0 %v15329_v19, %s14042_s17  ;;  %v3432_v60 = vpop.f32.mrb[107].mxu1 }
 0x240   : > { %v3468_v63 = vpop.f32.mrb[108].mxu0 }
 0x241   : > { %v3520_v38 = vadd.f32 %v3468_v63, %v3343_v30  ;;  %v3470_v52 = vpop.f32.mrb[109].mxu0  ;;  %13771 = vrot.lane.b32.xlu1 %v15294_v55, %s14043_s18  ;;  %12753 = vmatmul.mubr.msk.bf16.vlgmr.msra.gmra.mrb[212].mxu1 %vm397_vm2, %v12745_v46 }
 0x242   : > { %v3521_v36 = vadd.f32 %v3470_v52, %v3344_v29  ;;  %v3472_v11 = vpop.f32.mrb[110].mxu0  ;;  %6184 = vmatprep.mubr.bf16.mxu1 %v17087_v6 }
 0x243   : > { %13766 = vrot.lane.b32.xlu0 %v15270_v35, %s14043_s18  ;;  %v3473_v0 = vpop.f32.mrb[111].mxu0 }
 0x244   : > { %v3509_v57 = vpop.f32.mrb[108].mxu1 }
 0x245   : > { %v3522_v9 = vadd.f32 %v3509_v57, %v3345_v4  ;;  %13776 = vrot.lane.b32.xlu1 %v15329_v19, %s14043_s18  ;;  %v3511_v17 = vpop.f32.mrb[109].mxu1 }
 0x246   : > { %v3523_v54 = vadd.f32 %v3511_v17, %v3346_v20  ;;  %v3513_v44 = vpop.f32.mrb[110].mxu1 }
 0x247   : > { %7850 = vrot.lane.b32.xlu0 %v15297_v43, %s14043_s18  ;;  %v3514_v55 = vpop.f32.mrb[111].mxu1 }
 0x248   : > { %v3563_v39 = vpop.f32.mrb[112].mxu0 }
 0x249   : > { %v3693_v25 = vadd.f32 %v3563_v39, %v3516_v26  ;;  %v3565_v21 = vpop.f32.mrb[113].mxu0 }
 0x24a   : > { %v3694_v51 = vadd.f32 %v3565_v21, %v3517_v61  ;;  %v3567_v12 = vpop.f32.mrb[114].mxu0 }
 0x24b   : > { %7856 = vrot.lane.b32.xlu0 %v15319_v45, %s14043_s18  ;;  %v3568_v35 = vpop.f32.mrb[115].mxu0 }
 0x24c   : > { %v3604_v30 = vpop.f32.mrb[112].mxu1 }
 0x24d   : > { %v3695_v7 = vadd.f32 %v3604_v30, %v3518_v27  ;;  %v3606_v29 = vpop.f32.mrb[113].mxu1 }
 0x24e   : > { %v3696_v19 = vadd.f32 %v3606_v29, %v3519_v49  ;;  %v3608_v46 = vpop.f32.mrb[114].mxu1 }
 0x24f   : > { %v3609_v62 = vpop.f32.mrb[115].mxu1 }
 0x250   : > { %v3645_v53 = vpop.f32.mrb[116].mxu0 }
 0x251   : > { %v3697_v47 = vadd.f32 %v3645_v53, %v3520_v38  ;;  %v3647_v4 = vpop.f32.mrb[117].mxu0 }
 0x252   : > { %v3698_v23 = vadd.f32 %v3647_v4, %v3521_v36  ;;  %v3649_v20 = vpop.f32.mrb[118].mxu0 }
 0x253   : > { %v3650_v24 = vpop.f32.mrb[119].mxu0 }
 0x254   : > { %v3686_v1 = vpop.f32.mrb[116].mxu1 }
 0x255   : > { %v3699_v32 = vadd.f32 %v3686_v1, %v3522_v9  ;;  %v3688_v26 = vpop.f32.mrb[117].mxu1 }
 0x256   : > { %v3700_v8 = vadd.f32 %v3688_v26, %v3523_v54  ;;  %v3690_v61 = vpop.f32.mrb[118].mxu1 }
 0x257   : > { %v3691_v13 = vpop.f32.mrb[119].mxu1 }
 0x258   : > { %v3740_v28 = vpop.f32.mrb[120].mxu0 }
 0x259   : > { %v3870_v16 = vadd.f32 %v3740_v28, %v3693_v25  ;;  %v3742_v33 = vpop.f32.mrb[121].mxu0 }
 0x25a   : > { %v3871_v27 = vadd.f32 %v3742_v33, %v3694_v51  ;;  %v3744_v14 = vpop.f32.mrb[122].mxu0 }
 0x25b   : > { %v3745_v49 = vpop.f32.mrb[123].mxu0 }
 0x25c   : > { %v3781_v60 = vpop.f32.mrb[120].mxu1 }
 0x25d   : > { %v3872_v63 = vadd.f32 %v3781_v60, %v3695_v7  ;;  %v3783_v52 = vpop.f32.mrb[121].mxu1 }
 0x25e   : > { %v3873_v38 = vadd.f32 %v3783_v52, %v3696_v19  ;;  %v3785_v11 = vpop.f32.mrb[122].mxu1 }
 0x25f   : > { %v3786_v36 = vpop.f32.mrb[123].mxu1 }
 0x260   : > { %v3822_v0 = vpop.f32.mrb[124].mxu0 }
 0x261   : > { %v3874_v57 = vadd.f32 %v3822_v0, %v3697_v47  ;;  %v3824_v17 = vpop.f32.mrb[125].mxu0 }
 0x262   : > { %v3875_v9 = vadd.f32 %v3824_v17, %v3698_v23  ;;  %v3826_v44 = vpop.f32.mrb[126].mxu0 }
 0x263   : > { %v3827_v54 = vpop.f32.mrb[127].mxu0 }
 0x264   : > { %v3863_v55 = vpop.f32.mrb[124].mxu1  ;;  %v15524_v54 = vld [vmem:[%s17070_s4 + $0x2] sm:$0x3] }
 0x265   : > { %v3876_v39 = vadd.f32 %v3863_v55, %v3699_v32  ;;  %v3865_v21 = vpop.f32.mrb[125].mxu1 }
 0x266   : > { %v3877_v25 = vadd.f32 %v3865_v21, %v3700_v8  ;;  %v3867_v12 = vpop.f32.mrb[126].mxu1 }
 0x267   : > { %v13662_v51 = vpop.permute.xlu1 %13661  ;;  %v3868_v35 = vpop.f32.mrb[127].mxu1 }
 0x268   : > { %v13664_v30 = vunpack.i.h.bf16 %v13662_v51  ;;  %v13663_v29 = vunpack.i.l.bf16 %v13662_v51  ;;  %v3917_v7 = vpop.f32.mrb[128].mxu0 }
 0x269   : > { %v15498_v46 = vadd.f32 %v3917_v7, %v3870_v16  ;;  %v3919_v19 = vpop.f32.mrb[129].mxu0 }
 0x26a   : > { %v15500_v62 = vadd.f32 %v3919_v19, %v3871_v27  ;;  %v6074_v53 = vsel %vm380_vm0, %v13663_v29, %v13664_v30  ;;  %v3921_v47 = vpop.f32.mrb[130].mxu0 }
 0x26b   : > { %v13667_v4 = vpop.permute.xlu1 %13666  ;;  %v6077_v23 = vpack.c.bf16 %v6074_v53, %v6074_v53  ;;  %v3922_v20 = vpop.f32.mrb[131].mxu0 }
 0x26c   : > { %v13669_v24 = vunpack.i.h.bf16 %v13667_v4  ;;  %v13668_v1 = vunpack.i.l.bf16 %v13667_v4  ;;  %v3958_v32 = vpop.f32.mrb[128].mxu1 }
 0x26d   : > { %v15504_v26 = vadd.f32 %v3958_v32, %v3872_v63  ;;  %v3960_v8 = vpop.f32.mrb[129].mxu1  ;;  %12756 = vmatprep.subr.msk.bf16.mxu0 %vm401_vm1, %v6077_v23 }
 0x26e   : > { %v15507_v61 = vadd.f32 %v3960_v8, %v3873_v38  ;;  %v6072_v13 = vsel %vm380_vm0, %v13668_v1, %v13669_v24  ;;  %v3962_v28 = vpop.f32.mrb[130].mxu1  ;;  %v6073_v16 = vsel %vm380_vm0, %v13664_v30, %v13668_v1 }
 0x26f   : > { %v13672_v33 = vpop.permute.xlu1 %13671  ;;  %v6079_v27 = vpack.c.bf16 %v6072_v13, %v6072_v13  ;;  %v6078_v14 = vpack.c.bf16 %v6073_v16, %v6073_v16  ;;  %v3963_v49 = vpop.f32.mrb[131].mxu1 }
 0x270   : > { %v13674_v60 = vunpack.i.h.bf16 %v13672_v33  ;;  %v13673_v52 = vunpack.i.l.bf16 %v13672_v33  ;;  %v3999_v63 = vpop.f32.mrb[132].mxu0 }
 0x271   : > { %v15513_v11 = vadd.f32 %v3999_v63, %v3874_v57  ;;  %v6067_v36 = vpop.permute.xlu0 %6066  ;;  %v4001_v0 = vpop.f32.mrb[133].mxu0  ;;  %12758 = vmatprep.subr.msk.bf16.mxu1 %vm401_vm1, %v6079_v27  ;;  %v6094_v38 = vsel %vm401_vm1, %v6078_v14, 0 }
 0x272   : > { %v6075_v17 = vsel %vm380_vm0, %v6067_v36, %v13663_v29  ;;  %v15519_v44 = vadd.f32 %v4001_v0, %v3875_v9  ;;  %6153 = vmatpush1.bf16.msra.mxu1 %v6094_v38  ;;  %v4003_v55 = vpop.f32.mrb[134].mxu0  ;;  %v6070_v57 = vsel %vm380_vm0, %v13673_v52, %v13674_v60  ;;  %v6071_v21 = vsel %vm380_vm0, %v13669_v24, %v13673_v52 }
 0x273   : > { %v6076_v12 = vpack.c.bf16 %v6075_v17, %v6075_v17  ;;  %v13677_v51 = vpop.permute.xlu1 %13676  ;;  %v4004_v35 = vpop.f32.mrb[135].mxu0  ;;  %v6081_v4 = vpack.c.bf16 %v6070_v57, %v6070_v57  ;;  %v6080_v23 = vpack.c.bf16 %v6071_v21, %v6071_v21 }
 0x274   : > { %v13679_v30 = vunpack.i.h.bf16 %v13677_v51  ;;  %v13678_v29 = vunpack.i.l.bf16 %v13677_v51  ;;  %v4040_v9 = vpop.f32.mrb[132].mxu1 }
 0x275   : > { %v15530_v7 = vadd.f32 %v4040_v9, %v3876_v39  ;;  %v6065_v19 = vpop.permute.xlu0 %6064  ;;  %v4042_v53 = vpop.f32.mrb[133].mxu1  ;;  %12759 = vmatmul.mubr.msk.bf16.vlgmr.msra.gmra.mrb[216].mxu1 %vm397_vm2, %v15524_v54  ;;  %v6088_v47 = vsel %vm401_vm1, %v6076_v12, 0  ;;  %v6100_v49 = vsel %vm401_vm1, %v6080_v23, 0 }
 0x276   : > { %v6068_v20 = vsel %vm380_vm0, %v6065_v19, %v6067_v36  ;;  %v6069_v24 = vsel %vm380_vm0, %v13674_v60, %v6065_v19  ;;  %v15539_v1 = vadd.f32 %v4042_v53, %v3877_v25  ;;  %6112 = vmatpush1.bf16.msra.mxu0 %v6088_v47  ;;  %v4044_v39 = vpop.f32.mrb[134].mxu1  ;;  %v6040_v32 = vsel %vm345_vm3, %v13678_v29, %v13679_v30 }
 0x277   : > { %v6082_v8 = vpack.c.bf16 %v6069_v24, %v6069_v24  ;;  %v6083_v13 = vpack.c.bf16 %v6068_v20, %v6068_v20  ;;  %v6033_v28 = vpop.permute.xlu1 %6032  ;;  %12760 = vmatprep.subr.msk.bf16.mxu0 %vm401_vm1, %v6081_v4  ;;  %v4045_v16 = vpop.f32.mrb[135].mxu1  ;;  %6266 = vmatprep.mubr.bf16.mxu1 %v17087_v6  ;;  %v6043_v52 = vpack.c.bf16 %v6040_v32, %v6040_v32 }
 0x278   : > { %v4094_v33 = vpop.f32.mrb[136].mxu0  ;;  %v6041_v63 = vsel %vm345_vm3, %v6033_v28, %v13678_v29 }
 0x279   : > { %v15546_v27 = vadd.f32 %v4094_v33, %v15498_v46  ;;  %v15548_v14 = vpop.permute.xlu0 %13681  ;;  %v4096_v25 = vpop.f32.mrb[137].mxu0  ;;  %12757 = vmatmul.mubr.msk.bf16.vlgmr.msra.gmra.mrb[216].mxu0 %vm397_vm2, %v15524_v54  ;;  %12762 = vmatprep.subr.msk.bf16.mxu1 %vm401_vm1, %v6083_v13  ;;  %v6106_v60 = vsel %vm401_vm1, %v6082_v8, 0  ;;  %v6042_v51 = vpack.c.bf16 %v6041_v63, %v6041_v63 }
 0x27a   : > { %v13684_v36 = vunpack.i.h.bf16 %v15548_v14  ;;  %v13683_v46 = vunpack.i.l.bf16 %v15548_v14  ;;  %v15560_v0 = vadd.f32 %v4096_v25, %v15500_v62  ;;  %6194 = vmatpush1.bf16.msra.mxu0 %v6100_v49  ;;  %6235 = vmatpush1.bf16.msra.mxu1 %v6106_v60  ;;  %v4098_v38 = vpop.f32.mrb[138].mxu0 }
 0x27b   : > { %v6031_v17 = vpop.permute.xlu1 %6030  ;;  %12764 = vmatprep.subr.msk.bf16.mxu0 %vm401_vm1, %v6043_v52  ;;  %v4099_v55 = vpop.f32.mrb[139].mxu0  ;;  %6225 = vmatprep.mubr.bf16.mxu0 %v17087_v6  ;;  %v6279_v25 = vsel %vm401_vm1, %v6042_v51, 0 }
 0x27c   : > { %v6034_v57 = vsel %vm345_vm3, %v6031_v17, %v6033_v28  ;;  %v4135_v21 = vpop.f32.mrb[136].mxu1  ;;  %v6038_v12 = vsel %vm345_vm3, %v13683_v46, %v13684_v36  ;;  %v6039_v62 = vsel %vm345_vm3, %v13679_v30, %v13683_v46 }
 0x27d   : > { %v15571_v35 = vadd.f32 %v4135_v21, %v15504_v26  ;;  %v13687_v29 = vpop.permute.xlu0 %13686  ;;  %v4137_v9 = vpop.f32.mrb[137].mxu1  ;;  %12763 = vmatmul.mubr.msk.bf16.vlgmr.msra.gmra.mrb[220].mxu1 %vm397_vm2, %v15524_v54  ;;  %v6045_v19 = vpack.c.bf16 %v6038_v12, %v6038_v12  ;;  %v6044_v53 = vpack.c.bf16 %v6039_v62, %v6039_v62  ;;  %v6049_v30 = vpack.c.bf16 %v6034_v57, %v6034_v57 }
 0x27e   : > { %v13689_v47 = vunpack.i.h.bf16 %v13687_v29  ;;  %v13688_v4 = vunpack.i.l.bf16 %v13687_v29  ;;  %v15576_v23 = vadd.f32 %v4137_v9, %v15507_v61  ;;  %v4139_v20 = vpop.f32.mrb[138].mxu1  ;;  %6375 = vmatprep.mubr.bf16.mxu1 %v17087_v6 }
 0x27f   : > { %v15579_v24 = vpop.permute.xlu1 %13696  ;;  %12766 = vmatprep.subr.msk.bf16.mxu1 %vm401_vm1, %v6045_v19  ;;  %v6285_v26 = vsel %vm401_vm1, %v6044_v53, 0  ;;  %v4140_v39 = vpop.f32.mrb[139].mxu1 }
 0x280   : > { %v13699_v32 = vunpack.i.h.bf16 %v15579_v24  ;;  %v13698_v8 = vunpack.i.l.bf16 %v15579_v24  ;;  %v4176_v13 = vpop.f32.mrb[140].mxu0  ;;  %6344 = vmatpush1.bf16.msra.mxu1 %v6285_v26  ;;  %v6036_v61 = vsel %vm345_vm3, %v13688_v4, %v13689_v47  ;;  %v6035_v28 = vsel %vm345_vm3, %v13689_v47, %v6031_v17 }
 0x281   : > { %v15590_v16 = vadd.f32 %v4176_v13, %v15513_v11  ;;  %v13692_v33 = vpop.permute.xlu0 %13691  ;;  %v4178_v14 = vpop.f32.mrb[141].mxu0  ;;  %12761 = vmatmul.mubr.msk.bf16.vlgmr.msra.gmra.mrb[220].mxu0 %vm397_vm2, %v15524_v54  ;;  %12770 = vmatprep.subr.msk.bf16.mxu1 %vm401_vm1, %v6049_v30  ;;  %v6047_v49 = vpack.c.bf16 %v6036_v61, %v6036_v61  ;;  %v6048_v60 = vpack.c.bf16 %v6035_v28, %v6035_v28  ;;  %v6017_v11 = vld [vmem:[%s17070_s4] sm:$0x3] }
 0x282   : > { %v13694_v52 = vunpack.i.h.bf16 %v13692_v33  ;;  %v13693_v63 = vunpack.i.l.bf16 %v13692_v33  ;;  %v15597_v46 = vadd.f32 %v4178_v14, %v15519_v44  ;;  %6303 = vmatpush1.bf16.msra.mxu0 %v6279_v25  ;;  %v6488_v54 = vsel %vm799_vm4, %v13698_v8, %v13699_v32  ;;  %6334 = vmatprep.mubr.bf16.mxu0 %v17087_v6  ;;  %v4180_v38 = vpop.f32.mrb[142].mxu0 }
 0x283   : > { %12768 = vmatprep.subr.msk.bf16.mxu0 %vm401_vm1, %v6047_v49  ;;  %v6297_v17 = vsel %vm401_vm1, %v6048_v60, 0  ;;  %v6495_v55 = vpack.c.bf16 %v6488_v54, %v6488_v54  ;;  %v6037_v44 = vsel %vm345_vm3, %v13684_v36, %v13688_v4  ;;  %v4181_v57 = vpop.f32.mrb[143].mxu0  ;;  %v13702_v21 = vpop.permute.xlu1 %13701 }
 0x284   : > { %v4217_v12 = vpop.f32.mrb[140].mxu1  ;;  %v6046_v9 = vpack.c.bf16 %v6037_v44, %v6037_v44  ;;  %v6490_v53 = vsel %vm799_vm4, %v13693_v63, %v13694_v52  ;;  %v6489_v36 = vsel %vm799_vm4, %v13694_v52, %v13698_v8  ;;  %v13704_v13 = vunpack.i.h.bf16 %v13702_v21 }
 0x285   : > { %v15612_v62 = vadd.f32 %v4217_v12, %v15530_v7  ;;  %v6483_v51 = vpop.permute.xlu0 %6482  ;;  %v4219_v29 = vpop.f32.mrb[141].mxu1  ;;  %12767 = vmatmul.mubr.msk.bf16.vlgmr.msra.gmra.mrb[216].mxu1 %vm397_vm2, %v6017_v11  ;;  %v6493_v30 = vpack.c.bf16 %v6490_v53, %v6490_v53  ;;  %v6494_v26 = vpack.c.bf16 %v6489_v36, %v6489_v36  ;;  %v13703_v61 = vunpack.i.l.bf16 %v13702_v21 }
 0x286   : > { %v15616_v19 = vadd.f32 %v4219_v29, %v15539_v1  ;;  %6426 = vmatpush1.bf16.msra.mxu1 %v6297_v17  ;;  %6457 = vmatprep.mubr.bf16.mxu1 %v17087_v6  ;;  %v4221_v47 = vpop.f32.mrb[142].mxu1  ;;  %v6291_v1 = vsel %vm401_vm1, %v6046_v9, 0  ;;  %v6491_v8 = vsel %vm799_vm4, %v6483_v51, %v13693_v63 }
 0x287   : > { %12775 = vmatprep.subr.msk.bf16.mxu1 %vm401_vm1, %v6495_v55  ;;  %v4222_v7 = vpop.f32.mrb[143].mxu1  ;;  %v13707_v28 = vpop.permute.xlu1 %13706  ;;  %v6492_v52 = vpack.c.bf16 %v6491_v8, %v6491_v8  ;;  %v6510_v63 = vsel %vm401_vm1, %v6494_v26, 0  ;;  %v6486_v57 = vsel %vm799_vm4, %v13703_v61, %v13704_v13  ;;  %v6487_v47 = vsel %vm799_vm4, %v13699_v32, %v13703_v61 }
 0x288   : > { %v15624_v4 = vpop.f32.mrb[144].mxu0  ;;  %v6497_v36 = vpack.c.bf16 %v6486_v57, %v6486_v57  ;;  %v6496_v26 = vpack.c.bf16 %v6487_v47, %v6487_v47 }
 0x289   : > { %v6481_v20 = vpop.permute.xlu0 %6480  ;;  %12765 = vmatmul.mubr.msk.bf16.vlgmr.msra.gmra.mrb[216].mxu0 %vm397_vm2, %v6017_v11  ;;  %v15628_v39 = vpop.f32.mrb[145].mxu0  ;;  %v6504_v53 = vsel %vm401_vm1, %v6492_v52, 0 }
 0x28a   : > { %v6484_v33 = vsel %vm799_vm4, %v6481_v20, %v6483_v51  ;;  %6385 = vmatpush1.bf16.msra.mxu0 %v6291_v1  ;;  %6416 = vmatprep.mubr.bf16.mxu0 %v17087_v6  ;;  %v4357_v14 = vpop.f32.mrb[146].mxu0  ;;  %v6485_v17 = vsel %vm799_vm4, %v13704_v13, %v6481_v20  ;;  %v13709_v20 = vunpack.i.h.bf16 %v13707_v28  ;;  %v13708_v1 = vunpack.i.l.bf16 %v13707_v28 }
 0x28b   : > { %v6499_v25 = vpack.c.bf16 %v6484_v33, %v6484_v33  ;;  %12773 = vmatprep.subr.msk.bf16.mxu0 %vm401_vm1, %v6493_v30  ;;  %v4358_v49 = vpop.f32.mrb[147].mxu0  ;;  %v6716_v51 = vpop.permute.xlu1 %6715  ;;  %v6498_v9 = vpack.c.bf16 %v6485_v17, %v6485_v17  ;;  %v12772_v30 = vld [vmem:[%s17070_s4 + $0x4] sm:$0x3]  ;;  %v6516_v17 = vsel %vm401_vm1, %v6496_v26, 0 }
 0x28c   : > { %v15636_v60 = vpop.f32.mrb[144].mxu1  ;;  %v6723_v14 = vsel %vm1033_vm5, %v13708_v1, %v13709_v20 }
 0x28d   : > { %v15638_v54 = vpop.permute.xlu0 %13711  ;;  %12771 = vmatmul.mubr.msk.bf16.vlgmr.msra.gmra.mrb[220].mxu1 %vm397_vm2, %v6017_v11  ;;  %v15642_v38 = vpop.f32.mrb[145].mxu1  ;;  %v6522_v61 = vsel %vm401_vm1, %v6498_v9, 0 }
 0x28e   : > { %v13714_v55 = vunpack.i.h.bf16 %v15638_v54  ;;  %v13713_v44 = vunpack.i.l.bf16 %v15638_v54  ;;  %6569 = vmatpush1.bf16.msra.mxu1 %v6510_v63  ;;  %6600 = vmatprep.mubr.bf16.mxu1 %v17087_v6  ;;  %v4398_v21 = vpop.f32.mrb[146].mxu1 }
 0x28f   : > { %12779 = vmatprep.subr.msk.bf16.mxu1 %vm401_vm1, %v6499_v25  ;;  %v4399_v12 = vpop.f32.mrb[147].mxu1  ;;  %v6714_v33 = vpop.permute.xlu1 %6713  ;;  %v6724_v21 = vsel %vm1033_vm5, %v6716_v51, %v13708_v1 }
 0x290   : > { %v15652_v29 = vpop.f32.mrb[148].mxu0  ;;  %v6722_v25 = vsel %vm1033_vm5, %v13709_v20, %v13713_v44  ;;  %v6726_v12 = vpack.c.bf16 %v6723_v14, %v6723_v14  ;;  %v6725_v26 = vpack.c.bf16 %v6724_v21, %v6724_v21 }
 0x291   : > { %12769 = vmatmul.mubr.msk.bf16.vlgmr.msra.gmra.mrb[220].mxu0 %vm397_vm2, %v6017_v11  ;;  %v15660_v7 = vpop.f32.mrb[149].mxu0  ;;  %v6721_v11 = vsel %vm1033_vm5, %v13713_v44, %v13714_v55  ;;  %v13717_v52 = vpop.permute.xlu0 %13716  ;;  %v6727_v9 = vpack.c.bf16 %v6722_v25, %v6722_v25  ;;  %v6717_v44 = vsel %vm1033_vm5, %v6714_v33, %v6716_v51 }
 0x292   : > { %6528 = vmatpush1.bf16.msra.mxu0 %v6504_v53  ;;  %6559 = vmatprep.mubr.bf16.mxu0 %v17087_v6  ;;  %v4439_v24 = vpop.f32.mrb[150].mxu0  ;;  %v6728_v8 = vpack.c.bf16 %v6721_v11, %v6721_v11  ;;  %v13719_v47 = vunpack.i.h.bf16 %v13717_v52  ;;  %v13718_v20 = vunpack.i.l.bf16 %v13717_v52 }
 0x293   : > { %12777 = vmatprep.subr.msk.bf16.mxu0 %vm401_vm1, %v6497_v36  ;;  %v4440_v32 = vpop.f32.mrb[151].mxu0 }
 0x294   : > { %v15671_v13 = vpop.f32.mrb[148].mxu1  ;;  %v6718_v14 = vsel %vm1033_vm5, %v13719_v47, %v6714_v33 }
 0x295   : > { %12776 = vmatmul.mubr.msk.bf16.vlgmr.msra.gmra.mrb[216].mxu1 %vm397_vm2, %v12772_v30  ;;  %v15675_v28 = vpop.f32.mrb[149].mxu1 }
 0x296   : > { %6651 = vmatpush1.bf16.msra.mxu1 %v6522_v61  ;;  %6682 = vmatprep.mubr.bf16.mxu1 %v17087_v6  ;;  %v4480_v49 = vpop.f32.mrb[150].mxu1  ;;  %v6743_v61 = vsel %vm401_vm1, %v6727_v9, 0 }
 0x297   : > { %12784 = vmatprep.subr.msk.bf16.mxu1 %vm401_vm1, %v6728_v8  ;;  %v4481_v63 = vpop.f32.mrb[151].mxu1 }
 0x298   : > { %v4544_v57 = vpop.f32.mrb[152].mxu0 }
 0x299   : > { %12774 = vmatmul.mubr.msk.bf16.vlgmr.msra.gmra.mrb[216].mxu0 %vm397_vm2, %v12772_v30  ;;  %v15688_v53 = vadd.f32 %v4544_v57, %v15624_v4  ;;  %v4546_v36 = vpop.f32.mrb[153].mxu0  ;;  %v6732_v4 = vpack.c.bf16 %v6717_v44, %v6717_v44  ;;  %v6731_v57 = vpack.c.bf16 %v6718_v14, %v6718_v14 }
 0x29a   : > { %6610 = vmatpush1.bf16.msra.mxu0 %v6516_v17  ;;  %6641 = vmatprep.mubr.bf16.mxu0 %v17087_v6  ;;  %v15694_v11 = vadd.f32 %v4546_v36, %v15628_v39  ;;  %v4548_v1 = vpop.f32.mrb[154].mxu0  ;;  %v6719_v39 = vsel %vm1033_vm5, %v13718_v20, %v13719_v47 }
 0x29b   : > { %12782 = vmatprep.subr.msk.bf16.mxu0 %vm401_vm1, %v6726_v12  ;;  %v4549_v24 = vpop.f32.mrb[155].mxu0  ;;  %v6730_v17 = vpack.c.bf16 %v6719_v39, %v6719_v39 }
 0x29c   : > { %v4585_v32 = vpop.f32.mrb[152].mxu1 }
 0x29d   : > { %12780 = vmatmul.mubr.msk.bf16.vlgmr.msra.gmra.mrb[220].mxu1 %vm397_vm2, %v12772_v30  ;;  %v15700_v51 = vadd.f32 %v4585_v32, %v15636_v60  ;;  %v4587_v8 = vpop.f32.mrb[153].mxu1  ;;  %v6737_v60 = vsel %vm401_vm1, %v6725_v26, 0  ;;  %v6936_v26 = vpack.c.bf16 %v15275_v22, %v15275_v22 }
 0x29e   : > { %6802 = vmatpush1.bf16.msra.mxu1 %v6743_v61  ;;  %6833 = vmatprep.mubr.bf16.mxu1 %v17087_v6  ;;  %v15708_v25 = vadd.f32 %v4587_v8, %v15642_v38  ;;  %v4589_v49 = vpop.f32.mrb[154].mxu1  ;;  %v15719_v38 = vld [vmem:[%s17070_s4 + $0x6] sm:$0x3] }
 0x29f   : > { %12788 = vmatprep.subr.msk.bf16.mxu1 %vm401_vm1, %v6732_v4  ;;  %v4590_v52 = vpop.f32.mrb[155].mxu1 }
 0x2a0   : > { %v4626_v63 = vpop.f32.mrb[156].mxu0 }
 0x2a1   : > { %12778 = vmatmul.mubr.msk.bf16.vlgmr.msra.gmra.mrb[220].mxu0 %vm397_vm2, %v12772_v30  ;;  %v15714_v21 = vadd.f32 %v4626_v63, %v15652_v29  ;;  %v4628_v12 = vpop.f32.mrb[157].mxu0  ;;  %v6720_v30 = vsel %vm1033_vm5, %v13714_v55, %v13718_v20  ;;  %v6937_v55 = vpack.c.bf16 %v15279_v37, %v15279_v37 }
 0x2a2   : > { %6761 = vmatpush1.bf16.msra.mxu0 %v6737_v60  ;;  %v4237_v33 = vpop.permute.xlu0 %4236  ;;  %6792 = vmatprep.mubr.bf16.mxu0 %v17087_v6  ;;  %v15727_v9 = vadd.f32 %v4628_v12, %v15660_v7  ;;  %v4630_v29 = vpop.f32.mrb[158].mxu0 }
 0x2a3   : > { %v4239_v36 = vadd.f32 %v4237_v33, %v15546_v27  ;;  %v4240_v44 = vadd.f32 %v4237_v33, %v15560_v0  ;;  %v4241_v47 = vadd.f32 %v4237_v33, %v15571_v35  ;;  %v4242_v1 = vadd.f32 %v4237_v33, %v15576_v23  ;;  %12786 = vmatprep.subr.msk.bf16.mxu0 %vm401_vm1, %v6730_v17  ;;  %v4631_v24 = vpop.f32.mrb[159].mxu0  ;;  %v15759_v60 = vpop.permute.xlu1 %13721 }
 0x2a4   : > { %v4243_v54 = vadd.f32 %v4237_v33, %v15590_v16  ;;  %v4244_v32 = vadd.f32 %v4237_v33, %v15597_v46  ;;  %v15738_v7 = vpop.f32.mrb[156].mxu1  ;;  %v6755_v27 = vsel %vm401_vm1, %v6731_v57, 0  ;;  %v6729_v0 = vpack.c.bf16 %v6720_v30, %v6720_v30 }
 0x2a5   : > { %vm4247_vm10 = vcmp.gt.f32.partialorder %v4239_v36, 0.0  ;;  %12785 = vmatmul.mubr.msk.bf16.vlgmr.msra.gmra.mrb[216].mxu1 %vm397_vm2, %v15719_v38  ;;  %v6935_v35 = vpack.c.bf16 %v15255_v50, %v15255_v50  ;;  %v15745_v23 = vpop.f32.mrb[157].mxu1  ;;  %vm4248_vm11 = vcmp.gt.f32.partialorder %v4240_v44, 0.0  ;;  %vm4249_vm12 = vcmp.gt.f32.partialorder %v4241_v47, 0.0 }
 0x2a6   : > { %vm4250_vm13 = vcmp.gt.f32.partialorder %v4242_v1, 0.0  ;;  %vm4251_vm14 = vcmp.gt.f32.partialorder %v4243_v54, 0.0  ;;  %6884 = vmatpush1.bf16.msra.mxu1 %v6755_v27  ;;  %6915 = vmatprep.mubr.bf16.mxu1 %v17087_v6  ;;  %v4671_v37 = vpop.f32.mrb[158].mxu1  ;;  %v4255_v16 = vmul.f32 0.1, %v4239_v36  ;;  %v4246_v50 = vadd.f32 %v4237_v33, %v15616_v19 }
 0x2a7   : > { %v4256_v46 = vmul.f32 0.1, %v4240_v44  ;;  %v4257_v20 = vmul.f32 0.1, %v4241_v47  ;;  %12793 = vmatprep.subr.msk.bf16.mxu1 %vm401_vm1, %v6937_v55  ;;  %v4258_v4 = vmul.f32 0.1, %v4242_v1  ;;  %v4245_v22 = vadd.f32 %v4237_v33, %v15612_v62 }
 0x2a8   : > { %v4259_v61 = vmul.f32 0.1, %v4243_v54  ;;  %v4260_v8 = vmul.f32 0.1, %v4244_v32  ;;  %vm4252_vm15 = vcmp.gt.f32.partialorder %v4244_v32, 0.0  ;;  %v4263_v39 = vsel %vm4247_vm10, %v4239_v36, %v4255_v16  ;;  %v15757_v52 = vpop.f32.mrb[160].mxu0  ;;  %v15773_v36 = vpop.permute.xlu0 %13726 }
 0x2a9   : > { %v4264_v14 = vsel %vm4248_vm11, %v4240_v44, %v4256_v46  ;;  %12783 = vmatmul.mubr.msk.bf16.vlgmr.msra.gmra.mrb[216].mxu0 %vm397_vm2, %v15719_v38  ;;  %v6749_v49 = vsel %vm401_vm1, %v6729_v0, 0  ;;  %v4672_v63 = vpop.f32.mrb[159].mxu1  ;;  %v4265_v19 = vsel %vm4249_vm12, %v4241_v47, %v4257_v20  ;;  %v4266_v17 = vsel %vm4250_vm13, %v4242_v1, %v4258_v4  ;;  %v15764_v57 = vpop.f32.mrb[161].mxu0 }
 0x2aa   : > { %6843 = vmatpush1.bf16.msra.mxu0 %v6749_v49  ;;  %v4267_v12 = vsel %vm4251_vm14, %v4243_v54, %v4259_v61  ;;  %v15768_v30 = vmul.f32 %v4263_v39, %v15219_v42  ;;  %v15771_v29 = vmul.f32 %v4264_v14, %v15226_v34  ;;  %v4774_v62 = vpop.f32.mrb[162].mxu0  ;;  %v4262_v33 = vmul.f32 0.1, %v4246_v50  ;;  %6874 = vmatprep.mubr.bf16.mxu0 %v17087_v6 }
 0x2ab   : > { %12791 = vmatprep.subr.msk.bf16.mxu0 %vm401_vm1, %v6935_v35  ;;  %v4268_v44 = vsel %vm4252_vm15, %v4244_v32, %v4260_v8  ;;  %v15778_v47 = vmul.f32 %v4265_v19, %v15228_v58  ;;  %v15781_v1 = vmul.f32 %v4266_v17, %v15231_v59  ;;  %v4775_v24 = vpop.f32.mrb[163].mxu0  ;;  %vm4254_vm10 = vcmp.gt.f32.partialorder %v4246_v50, 0.0 }
 0x2ac   : > { %v15784_v54 = vpop.f32.mrb[160].mxu1  ;;  %v6952_v55 = vsel %vm401_vm1, %v6936_v26, 0  ;;  %v6941_v32 = vpack.c.bf16 %v15319_v45, %v15319_v45  ;;  %vm4253_vm11 = vcmp.gt.f32.partialorder %v4245_v22, 0.0  ;;  %v4261_v0 = vmul.f32 0.1, %v4245_v22  ;;  %v15822_v63 = vpop.permute.xlu0 %13731 }
 0x2ad   : > { %12789 = vmatmul.mubr.msk.bf16.vlgmr.msra.gmra.mrb[220].mxu1 %vm397_vm2, %v15719_v38  ;;  %v15791_v27 = vpop.f32.mrb[161].mxu1  ;;  %v15794_v35 = vmul.f32 %v4267_v12, %v15239_v48  ;;  %v6934_v37 = vpack.c.bf16 %v15249_v10, %v15249_v10  ;;  %v15800_v46 = vmul.f32 %v4268_v44, %v15241_v15  ;;  %v13729_v20 = vunpack.i.h.bf16 %v15773_v36  ;;  %v15812_v10 = vpop.permute.xlu1 %7151 }
 0x2ae   : > { %7011 = vmatpush1.bf16.msra.mxu1 %v6952_v55  ;;  %7042 = vmatprep.mubr.bf16.mxu1 %v17087_v6  ;;  %v4815_v16 = vpop.f32.mrb[162].mxu1  ;;  %v15805_v45 = vpack.i.bf16 %v15771_v29, %v15768_v30  ;;  %v15809_v26 = vpack.i.bf16 %v15781_v1, %v15778_v47  ;;  %v4270_v61 = vsel %vm4254_vm10, %v4246_v50, %v4262_v33  ;;  %v13728_v62 = vunpack.i.l.bf16 %v15773_v36 }
 0x2af   : > { %12797 = vmatprep.subr.msk.bf16.mxu1 %vm401_vm1, %v6941_v32  ;;  %v4816_v4 = vpop.f32.mrb[163].mxu1  ;;  %v6940_v39 = vpack.c.bf16 %v15316_v40, %v15316_v40  ;;  %v4269_v49 = vsel %vm4253_vm11, %v4245_v22, %v4261_v0  ;;  %v6946_v50 = vsel %vm401_vm1, %v6934_v37, 0  ;;  %v6939_v19 = vpack.c.bf16 %v15301_v3, %v15301_v3 }
 0x2b0   : > { %v4852_v8 = vpop.f32.mrb[164].mxu0  ;;  %13781 = vrot.lane.b32.xlu1 %v15805_v45, %s14037_s12  ;;  %13786 = vrot.lane.b32.xlu0 %v15809_v26, %s14037_s12  ;;  %v15830_v12 = vmul.f32 %v4270_v61, %v15258_v31  ;;  %v15835_v40 = vpack.i.bf16 %v15800_v46, %v15794_v35  ;;  %v7162_v3 = vsel %vm1504_vm6, %v13729_v20, %v15812_v10  ;;  %v13724_v33 = vunpack.i.h.bf16 %v15759_v60 }
 0x2b1   : > { %v4854_v14 = vpop.f32.mrb[165].mxu0  ;;  %12787 = vmatmul.mubr.msk.bf16.vlgmr.msra.gmra.mrb[220].mxu0 %vm397_vm2, %v15719_v38  ;;  %v15840_v38 = vld [vmem:[%s17070_s4 + $0x8] sm:$0x3]  ;;  %v13723_v36 = vunpack.i.l.bf16 %v15759_v60  ;;  %v15850_v24 = vmul.f32 %v4269_v49, %v15246_v41  ;;  %v6964_v55 = vsel %vm401_vm1, %v6940_v39, 0  ;;  %v6938_v32 = vpack.c.bf16 %v15297_v43, %v15297_v43  ;;  %v7158_v37 = vpop.permute.xlu1 %7157 }
 0x2b2   : > { %v4856_v17 = vpop.f32.mrb[166].mxu0  ;;  %6970 = vmatpush1.bf16.msra.mxu0 %v6946_v50  ;;  %7001 = vmatprep.mubr.bf16.mxu0 %v17087_v6  ;;  %v7170_v60 = vpack.c.bf16 %v7162_v3, %v7162_v3  ;;  %v4668_v16 = vadd.f32 %v15738_v7, %v15671_v13  ;;  %v4670_v4 = vadd.f32 %v15745_v23, %v15675_v28 }
 0x2b3   : > { %v4857_v22 = vpop.f32.mrb[167].mxu0  ;;  %12795 = vmatprep.subr.msk.bf16.mxu0 %vm401_vm1, %v6939_v19  ;;  %v4900_v61 = vadd.f32 %v15757_v52, %v15688_v53  ;;  %v7164_v43 = vsel %vm1504_vm6, %v13724_v33, %v13728_v62  ;;  %v7163_v39 = vsel %vm1504_vm6, %v13728_v62, %v13729_v20  ;;  %v15872_v19 = vpop.permute.xlu0 %13736  ;;  %v7165_v13 = vsel %vm1504_vm6, %v13723_v36, %v13724_v33 }
 0x2b4   : > { %v4893_v44 = vpop.f32.mrb[164].mxu1  ;;  %8089 = vrot.lane.b32.xlu1 %v15830_v12, %s14037_s12  ;;  %13791 = vrot.lane.b32.xlu0 %v15835_v40, %s14037_s12  ;;  %v7166_v53 = vsel %vm1504_vm6, %v7158_v37, %v13723_v36  ;;  %v6958_v7 = vsel %vm401_vm1, %v6938_v32, 0  ;;  %v4901_v23 = vadd.f32 %v15764_v57, %v15694_v11  ;;  %v7168_v20 = vpack.c.bf16 %v7164_v43, %v7164_v43 }
 0x2b5   : > { %v4895_v0 = vpop.f32.mrb[165].mxu1  ;;  %12794 = vmatmul.mubr.msk.bf16.vlgmr.msra.gmra.mrb[216].mxu1 %vm397_vm2, %v15840_v38  ;;  %v7169_v17 = vpack.c.bf16 %v7163_v39, %v7163_v39  ;;  %v4902_v62 = vadd.f32 %v15784_v54, %v15700_v51  ;;  %v4903_v3 = vadd.f32 %v15791_v27, %v15708_v25  ;;  %v13734_v33 = vunpack.i.h.bf16 %v15822_v63 }
 0x2b6   : > { %v4897_v49 = vpop.f32.mrb[166].mxu1  ;;  %7093 = vmatpush1.bf16.msra.mxu1 %v6964_v55  ;;  %7124 = vmatprep.mubr.bf16.mxu1 %v17087_v6  ;;  %v13733_v36 = vunpack.i.l.bf16 %v15822_v63  ;;  %v4904_v11 = vadd.f32 %v4852_v8, %v15714_v21  ;;  %v15896_v55 = vpop.permute.xlu1 %13741  ;;  %v4905_v51 = vadd.f32 %v4854_v14, %v15727_v9  ;;  %v4906_v54 = vadd.f32 %v4893_v44, %v4668_v16 }
 0x2b7   : > { %v4898_v50 = vpop.f32.mrb[167].mxu1  ;;  %12802 = vmatprep.subr.msk.bf16.mxu1 %vm401_vm1, %v7170_v60  ;;  %v7174_v25 = vpack.c.bf16 %v7166_v53, %v7166_v53  ;;  %v7167_v27 = vpack.c.bf16 %v7165_v13, %v7165_v13  ;;  %v15904_v60 = vpop.permute.xlu0 %7384  ;;  %v7185_v21 = vsel %vm401_vm1, %v7169_v17, 0  ;;  %v4907_v8 = vadd.f32 %v4895_v0, %v4670_v4 }
 0x2b8   : > { %v4947_v28 = vpop.f32.mrb[168].mxu0  ;;  %8087 = vrot.lane.b32.xlu1 %v15850_v24, %s14037_s12  ;;  %13796 = vrot.lane.b32.xlu0 %v15805_v45, %s14036_s11  ;;  %v13744_v44 = vunpack.i.h.bf16 %v15896_v55  ;;  %v7160_v16 = vsel %vm1504_vm6, %v13733_v36, %v13734_v33  ;;  %v7159_v49 = vsel %vm1504_vm6, %v13734_v33, %v7158_v37  ;;  %v13743_v17 = vunpack.i.l.bf16 %v15896_v55 }
 0x2b9   : > { %v4949_v52 = vpop.f32.mrb[169].mxu0  ;;  %12792 = vmatmul.mubr.msk.bf16.vlgmr.msra.gmra.mrb[216].mxu0 %vm397_vm2, %v15840_v38  ;;  %v5077_v9 = vadd.f32 %v4947_v28, %v4900_v61  ;;  %v13739_v61 = vunpack.i.h.bf16 %v15872_v19  ;;  %v7179_v37 = vsel %vm401_vm1, %v7167_v27, 0 }
 0x2ba   : > { %v4951_v22 = vpop.f32.mrb[170].mxu0  ;;  %7052 = vmatpush1.bf16.msra.mxu0 %v6958_v7  ;;  %7083 = vmatprep.mubr.bf16.mxu0 %v17087_v6  ;;  %v5078_v39 = vadd.f32 %v4949_v52, %v4901_v23  ;;  %v7395_v13 = vsel %vm1738_vm7, %v13744_v44, %v15904_v60  ;;  %v7172_v7 = vpack.c.bf16 %v7160_v16, %v7160_v16  ;;  %v15946_v33 = vpop.permute.xlu1 %13746 }
 0x2bb   : > { %v4952_v57 = vpop.f32.mrb[171].mxu0  ;;  %12800 = vmatprep.subr.msk.bf16.mxu0 %vm401_vm1, %v7168_v20  ;;  %v7173_v23 = vpack.c.bf16 %v7159_v49, %v7159_v49 }
 0x2bc   : > { %v4988_v32 = vpop.f32.mrb[168].mxu1  ;;  %13801 = vrot.lane.b32.xlu1 %v15809_v26, %s14036_s11  ;;  %8322 = vrot.lane.b32.xlu0 %v15830_v12, %s14036_s11  ;;  %v7403_v57 = vpack.c.bf16 %v7395_v13, %v7395_v13 }
 0x2bd   : > { %v4990_v63 = vpop.f32.mrb[169].mxu1  ;;  %12798 = vmatmul.mubr.msk.bf16.vlgmr.msra.gmra.mrb[220].mxu1 %vm397_vm2, %v15840_v38  ;;  %v15916_v50 = vadd.f32 %v4988_v32, %v4902_v62  ;;  %v15939_v62 = vld [vmem:[%s17070_s4 + $0xa] sm:$0x3] }
 0x2be   : > { %v4992_v14 = vpop.f32.mrb[170].mxu1  ;;  %7244 = vmatpush1.bf16.msra.mxu1 %v7185_v21  ;;  %7275 = vmatprep.mubr.bf16.mxu1 %v17087_v6  ;;  %v15918_v0 = vadd.f32 %v4990_v63, %v4903_v3  ;;  %v7161_v3 = vsel %vm1504_vm6, %v15812_v10, %v13733_v36  ;;  %v7391_v10 = vpop.permute.xlu0 %7390  ;;  %v7197_v36 = vsel %vm401_vm1, %v7173_v23, 0  ;;  %v15963_v63 = vpack.i.bf16 %v15850_v24, %v15800_v46 }
 0x2bf   : > { %v4993_v43 = vpop.f32.mrb[171].mxu1  ;;  %12806 = vmatprep.subr.msk.bf16.mxu1 %vm401_vm1, %v7174_v25  ;;  %v7171_v32 = vpack.c.bf16 %v7161_v3, %v7161_v3  ;;  %v13738_v21 = vunpack.i.l.bf16 %v15872_v19  ;;  %v15985_v23 = vpop.permute.xlu1 %13751 }
 0x2c0   : > { %v5029_v4 = vpop.f32.mrb[172].mxu0  ;;  %13806 = vrot.lane.b32.xlu1 %v15835_v40, %s14036_s11  ;;  %8320 = vrot.lane.b32.xlu0 %v15850_v24, %s14036_s11 }
 0x2c1   : > { %v15929_v28 = vadd.f32 %v5029_v4, %v4904_v11  ;;  %v5031_v53 = vpop.f32.mrb[173].mxu0  ;;  %12796 = vmatmul.mubr.msk.bf16.vlgmr.msra.gmra.mrb[220].mxu0 %vm397_vm2, %v15840_v38  ;;  %v7397_v11 = vsel %vm1738_vm7, %v13739_v61, %v13743_v17 }
 0x2c2   : > { %v15933_v52 = vadd.f32 %v5031_v53, %v4905_v51  ;;  %v5033_v20 = vpop.f32.mrb[174].mxu0  ;;  %7203 = vmatpush1.bf16.msra.mxu0 %v7179_v37  ;;  %7234 = vmatprep.mubr.bf16.mxu0 %v17087_v6  ;;  %v7401_v16 = vpack.c.bf16 %v7397_v11, %v7397_v11  ;;  %v13749_v53 = vunpack.i.h.bf16 %v15946_v33 }
 0x2c3   : > { %v5034_v38 = vpop.f32.mrb[175].mxu0  ;;  %12804 = vmatprep.subr.msk.bf16.mxu0 %vm401_vm1, %v7172_v7  ;;  %v13748_v7 = vunpack.i.l.bf16 %v15946_v33 }
 0x2c4   : > { %v5070_v22 = vpop.f32.mrb[172].mxu1  ;;  %13811 = vrot.lane.b32.xlu1 %v15805_v45, %s14038_s13  ;;  %13816 = vrot.lane.b32.xlu0 %v15809_v26, %s14038_s13 }
 0x2c5   : > { %v15954_v55 = vadd.f32 %v5070_v22, %v4906_v54  ;;  %v5072_v51 = vpop.f32.mrb[173].mxu1  ;;  %12803 = vmatmul.mubr.msk.bf16.vlgmr.msra.gmra.mrb[216].mxu1 %vm397_vm2, %v15939_v62  ;;  %v7396_v54 = vsel %vm1738_vm7, %v13743_v17, %v13744_v44  ;;  %v7191_v44 = vsel %vm401_vm1, %v7171_v32, 0  ;;  %v13757_v17 = vpop.permute.xlu0 %13756 }
 0x2c6   : > { %v15959_v25 = vadd.f32 %v5072_v51, %v4907_v8  ;;  %v5074_v27 = vpop.f32.mrb[174].mxu1  ;;  %7326 = vmatpush1.bf16.msra.mxu1 %v7197_v36  ;;  %7357 = vmatprep.mubr.bf16.mxu1 %v17087_v6  ;;  %v7399_v8 = vsel %vm1738_vm7, %v7391_v10, %v13738_v21  ;;  %v7402_v4 = vpack.c.bf16 %v7396_v54, %v7396_v54  ;;  %v13759_v32 = vunpack.i.h.bf16 %v13757_v17 }
 0x2c7   : > { %v5075_v14 = vpop.f32.mrb[175].mxu1  ;;  %12811 = vmatprep.subr.msk.bf16.mxu1 %vm401_vm1, %v7403_v57  ;;  %v7393_v51 = vsel %vm1738_vm7, %v13748_v7, %v13749_v53  ;;  %v7392_v36 = vsel %vm1738_vm7, %v13749_v53, %v7391_v10  ;;  %v16017_v10 = vpop.permute.xlu1 %7617 }
 0x2c8   : > { %v5124_v49 = vpop.f32.mrb[176].mxu0  ;;  %8555 = vrot.lane.b32.xlu1 %v15830_v12, %s14038_s13  ;;  %13821 = vrot.lane.b32.xlu0 %v15835_v40, %s14038_s13  ;;  %v7405_v54 = vpack.c.bf16 %v7393_v51, %v7393_v51  ;;  %v7406_v14 = vpack.c.bf16 %v7392_v36, %v7392_v36 }
 0x2c9   : > { %v15976_v19 = vadd.f32 %v5124_v49, %v5077_v9  ;;  %v5126_v43 = vpop.f32.mrb[177].mxu0  ;;  %12801 = vmatmul.mubr.msk.bf16.vlgmr.msra.gmra.mrb[216].mxu0 %vm397_vm2, %v15939_v62  ;;  %v7398_v9 = vsel %vm1738_vm7, %v13738_v21, %v13739_v61  ;;  %v7418_v61 = vsel %vm401_vm1, %v7402_v4, 0 }
 0x2ca   : > { %v15981_v13 = vadd.f32 %v5126_v43, %v5078_v39  ;;  %v5128_v37 = vpop.f32.mrb[178].mxu0  ;;  %7285 = vmatpush1.bf16.msra.mxu0 %v7191_v44  ;;  %7316 = vmatprep.mubr.bf16.mxu0 %v17087_v6  ;;  %v7407_v39 = vpack.c.bf16 %v7399_v8, %v7399_v8  ;;  %v7400_v33 = vpack.c.bf16 %v7398_v9, %v7398_v9 }
 0x2cb   : > { %v5129_v20 = vpop.f32.mrb[179].mxu0  ;;  %12809 = vmatprep.subr.msk.bf16.mxu0 %vm401_vm1, %v7401_v16  ;;  %v7394_v43 = vsel %vm1738_vm7, %v15904_v60, %v13748_v7  ;;  %v7628_v44 = vsel %vm1972_vm8, %v13759_v32, %v16017_v10  ;;  %v13754_v60 = vunpack.i.h.bf16 %v15985_v23 }
 0x2cc   : > { %v5165_v3 = vpop.f32.mrb[176].mxu1  ;;  %8553 = vrot.lane.b32.xlu1 %v15850_v24, %s14038_s13  ;;  %13826 = vrot.lane.b32.xlu0 %v15805_v45, %s14039_s14  ;;  %v7412_v16 = vsel %vm401_vm1, %v7400_v33, 0  ;;  %v7404_v9 = vpack.c.bf16 %v7394_v43, %v7394_v43  ;;  %v7636_v20 = vpack.c.bf16 %v7628_v44, %v7628_v44 }
 0x2cd   : > { %v15996_v38 = vadd.f32 %v5165_v3, %v15916_v50  ;;  %v5167_v22 = vpop.f32.mrb[177].mxu1  ;;  %12807 = vmatmul.mubr.msk.bf16.vlgmr.msra.gmra.mrb[220].mxu1 %vm397_vm2, %v15939_v62  ;;  %v7430_v3 = vsel %vm401_vm1, %v7406_v14, 0 }
 0x2ce   : > { %v16002_v11 = vadd.f32 %v5167_v22, %v15918_v0  ;;  %v5169_v57 = vpop.f32.mrb[178].mxu1  ;;  %7477 = vmatpush1.bf16.msra.mxu1 %v7418_v61  ;;  %7508 = vmatprep.mubr.bf16.mxu1 %v17087_v6  ;;  %v13753_v22 = vunpack.i.l.bf16 %v15985_v23 }
 0x2cf   : > { %v5170_v50 = vpop.f32.mrb[179].mxu1  ;;  %12815 = vmatprep.subr.msk.bf16.mxu1 %vm401_vm1, %v7407_v39  ;;  %v7624_v57 = vpop.permute.xlu1 %7623 }
 0x2d0   : > { %v5206_v27 = vpop.f32.mrb[180].mxu0  ;;  %13831 = vrot.lane.b32.xlu1 %v15809_v26, %s14039_s14  ;;  %8788 = vrot.lane.b32.xlu0 %v15830_v12, %s14039_s14  ;;  %v7632_v14 = vsel %vm1972_vm8, %v7624_v57, %v13753_v22 }
 0x2d1   : > { %v16015_v0 = vadd.f32 %v5206_v27, %v15929_v28  ;;  %v5208_v21 = vpop.f32.mrb[181].mxu0  ;;  %12805 = vmatmul.mubr.msk.bf16.vlgmr.msra.gmra.mrb[220].mxu0 %vm397_vm2, %v15939_v62  ;;  %v13758_v28 = vunpack.i.l.bf16 %v13757_v17  ;;  %v16034_v62 = vld [vmem:[%s17070_s4 + $0xc] sm:$0x3]  ;;  %v12754_v17 = vld [vmem:[%s17069_s3 + $0x8] sm:$0xf] }
 0x2d2   : > { %v16023_v49 = vadd.f32 %v5208_v21, %v15933_v52  ;;  %v5210_v8 = vpop.f32.mrb[182].mxu0  ;;  %7436 = vmatpush1.bf16.msra.mxu0 %v7412_v16  ;;  %7467 = vmatprep.mubr.bf16.mxu0 %v17087_v6  ;;  %v16037_v52 = vpop.permute.xlu0 %13761 }
 0x2d3   : > { %v5211_v4 = vpop.f32.mrb[183].mxu0  ;;  %12813 = vmatprep.subr.msk.bf16.mxu0 %vm401_vm1, %v7405_v54  ;;  %v7629_v33 = vsel %vm1972_vm8, %v13758_v28, %v13759_v32  ;;  %v7424_v32 = vsel %vm401_vm1, %v7404_v9, 0  ;;  %v13763_v16 = vunpack.i.l.bf16 %v16037_v52 }
 0x2d4   : > { %v5247_v37 = vpop.f32.mrb[180].mxu1  ;;  %13836 = vrot.lane.b32.xlu1 %v15835_v40, %s14039_s14  ;;  %8786 = vrot.lane.b32.xlu0 %v15850_v24, %s14039_s14  ;;  %v7635_v21 = vpack.c.bf16 %v7629_v33, %v7629_v33  ;;  %v7640_v4 = vpack.c.bf16 %v7632_v14, %v7632_v14 }
 0x2d5   : > { %v16046_v53 = vadd.f32 %v5247_v37, %v15954_v55  ;;  %v5249_v7 = vpop.f32.mrb[181].mxu1  ;;  %12812 = vmatmul.mubr.msk.bf16.vlgmr.msra.gmra.mrb[216].mxu1 %vm397_vm2, %v16034_v62  ;;  %v7630_v55 = vsel %vm1972_vm8, %v13754_v60, %v13758_v28 }
 0x2d6   : > { %v16055_v40 = vadd.f32 %v5249_v7, %v15959_v25  ;;  %v5251_v39 = vpop.f32.mrb[182].mxu1  ;;  %7559 = vmatpush1.bf16.msra.mxu1 %v7430_v3  ;;  %7590 = vmatprep.mubr.bf16.mxu1 %v17087_v6  ;;  %v7634_v36 = vpack.c.bf16 %v7630_v55, %v7630_v55  ;;  %v16069_v50 = vpop.permute.xlu0 %13766 }
 0x2d7   : > { %v5252_v61 = vpop.f32.mrb[183].mxu1  ;;  %12820 = vmatprep.subr.msk.bf16.mxu1 %vm401_vm1, %v7636_v20 }
 0x2d8   : > { %v5301_v51 = vpop.f32.mrb[184].mxu0  ;;  %5974 = vperm.xlu1 %13840, %v12754_v17   ;;  %13842 = vrot.lane.b32.xlu0 %v15805_v45, %s14040_s15 }
 0x2d9   : > { %v16067_v25 = vadd.f32 %v5301_v51, %v15976_v19  ;;  %v5303_v23 = vpop.f32.mrb[185].mxu0  ;;  %12810 = vmatmul.mubr.msk.bf16.vlgmr.msra.gmra.mrb[216].mxu0 %vm397_vm2, %v16034_v62  ;;  %v13764_v19 = vunpack.i.h.bf16 %v16037_v52  ;;  %v13772_v52 = vpop.permute.xlu1 %13771 }
 0x2da   : > { %v16072_v27 = vadd.f32 %v5303_v23, %v15981_v13  ;;  %v5305_v54 = vpop.f32.mrb[186].mxu0  ;;  %7518 = vmatpush1.bf16.msra.mxu0 %v7424_v32  ;;  %7549 = vmatprep.mubr.bf16.mxu0 %v17087_v6  ;;  %v7631_v13 = vsel %vm1972_vm8, %v13753_v22, %v13754_v60  ;;  %v7651_v60 = vsel %vm401_vm1, %v7635_v21, 0  ;;  %v16103_v3 = vpop.permute.xlu0 %7850  ;;  %v13774_v39 = vunpack.i.h.bf16 %v13772_v52 }
 0x2db   : > { %v5306_v8 = vpop.f32.mrb[187].mxu0  ;;  %12818 = vmatprep.subr.msk.bf16.mxu0 %vm401_vm1, %v7634_v36  ;;  %v7633_v7 = vpack.c.bf16 %v7631_v13, %v7631_v13  ;;  %v7626_v20 = vsel %vm1972_vm8, %v13763_v16, %v13764_v19  ;;  %v13773_v36 = vunpack.i.l.bf16 %v13772_v52  ;;  %v13769_v32 = vunpack.i.h.bf16 %v16069_v50 }
 0x2dc   : > { %v5342_v43 = vpop.f32.mrb[184].mxu1  ;;  %13847 = vrot.lane.b32.xlu1 %v15809_v26, %s14040_s15  ;;  %9224 = vrot.lane.b32.xlu0 %v15794_v35, %s14040_s15  ;;  %v7638_v61 = vpack.c.bf16 %v7626_v20, %v7626_v20 }
 0x2dd   : > { %v16090_v28 = vadd.f32 %v5342_v43, %v15996_v38  ;;  %v5344_v44 = vpop.f32.mrb[185].mxu1  ;;  %12816 = vmatmul.mubr.msk.bf16.vlgmr.msra.gmra.mrb[220].mxu1 %vm397_vm2, %v16034_v62  ;;  %v7625_v38 = vsel %vm1972_vm8, %v13764_v19, %v7624_v57  ;;  %v7645_v57 = vsel %vm401_vm1, %v7633_v7, 0  ;;  %v7863_v52 = vsel %vm2206_vm9, %v13769_v32, %v13773_v36 }
 0x2de   : > { %v16093_v37 = vadd.f32 %v5344_v44, %v16002_v11  ;;  %v5346_v9 = vpop.f32.mrb[186].mxu1  ;;  %7710 = vmatpush1.bf16.msra.mxu1 %v7651_v60  ;;  %7741 = vmatprep.mubr.bf16.mxu1 %v17087_v6  ;;  %v7639_v51 = vpack.c.bf16 %v7625_v38, %v7625_v38  ;;  %v13777_v44 = vpop.permute.xlu1 %13776  ;;  %v7867_v20 = vpack.c.bf16 %v7863_v52, %v7863_v52 }
 0x2df   : > { %v5347_v17 = vpop.f32.mrb[187].mxu1  ;;  %12824 = vmatprep.subr.msk.bf16.mxu1 %vm401_vm1, %v7640_v4  ;;  %v13768_v4 = vunpack.i.l.bf16 %v16069_v50  ;;  %v7857_v60 = vpop.permute.xlu0 %7856 }
 0x2e0   : > { %v5383_v11 = vpop.f32.mrb[188].mxu0  ;;  %13852 = vrot.lane.b32.xlu1 %v15963_v63, %s14040_s15  ;;  %9230 = vrot.lane.b32.xlu0 %v15830_v12, %s14040_s15 }
 0x2e1   : > { %v16111_v22 = vadd.f32 %v5383_v11, %v16015_v0  ;;  %v5385_v55 = vpop.f32.mrb[189].mxu0  ;;  %12814 = vmatmul.mubr.msk.bf16.vlgmr.msra.gmra.mrb[220].mxu0 %vm397_vm2, %v16034_v62  ;;  %v7861_v0 = vsel %vm2206_vm9, %v13774_v39, %v16103_v3  ;;  %v7627_v62 = vsel %vm1972_vm8, %v16017_v10, %v13763_v16  ;;  %v7663_v10 = vsel %vm401_vm1, %v7639_v51, 0 }
 0x2e2   : > { %v16114_v33 = vadd.f32 %v5385_v55, %v16023_v49  ;;  %v5387_v23 = vpop.f32.mrb[190].mxu0  ;;  %7669 = vmatpush1.bf16.msra.mxu0 %v7645_v57  ;;  %v16126_v49 = vld [vmem:[%s17070_s4 + $0xe] sm:$0x3]  ;;  %7700 = vmatprep.mubr.bf16.mxu0 %v17087_v6  ;;  %v7869_v8 = vpack.c.bf16 %v7861_v0, %v7861_v0  ;;  %v7637_v16 = vpack.c.bf16 %v7627_v62, %v7627_v62  ;;  %v13779_v55 = vunpack.i.h.bf16 %v13777_v44 }
 0x2e3   : > { %v5388_v21 = vpop.f32.mrb[191].mxu0  ;;  %12822 = vmatprep.subr.msk.bf16.mxu0 %vm401_vm1, %v7638_v61  ;;  %v13778_v61 = vunpack.i.l.bf16 %v13777_v44  ;;  %v7865_v57 = vsel %vm2206_vm9, %v7857_v60, %v13768_v4 }
 0x2e4   : > { %v5424_v54 = vpop.f32.mrb[188].mxu1  ;;  %13857 = vrot.lane.b32.xlu1 %v15805_v45, %s14041_s16  ;;  %13862 = vrot.lane.b32.xlu0 %v15809_v26, %s14041_s16  ;;  %v7657_v38 = vsel %vm401_vm1, %v7637_v16, 0  ;;  %v7873_v0 = vpack.c.bf16 %v7865_v57, %v7865_v57 }
 0x2e5   : > { %v16138_v14 = vadd.f32 %v5424_v54, %v16046_v53  ;;  %v5426_v19 = vpop.f32.mrb[189].mxu1  ;;  %12821 = vmatmul.mubr.msk.bf16.vlgmr.msra.gmra.mrb[216].mxu1 %vm397_vm2, %v16126_v49 }
 0x2e6   : > { %v16141_v13 = vadd.f32 %v5426_v19, %v16055_v40  ;;  %v5428_v43 = vpop.f32.mrb[190].mxu1  ;;  %7792 = vmatpush1.bf16.msra.mxu1 %v7663_v10  ;;  %7823 = vmatprep.mubr.bf16.mxu1 %v17087_v6  ;;  %v7862_v40 = vsel %vm2206_vm9, %v13773_v36, %v13774_v39  ;;  %v7859_v19 = vsel %vm2206_vm9, %v13778_v61, %v13779_v55 }
 0x2e7   : > { %v5429_v53 = vpop.f32.mrb[191].mxu1  ;;  %12829 = vmatprep.subr.msk.bf16.mxu1 %vm401_vm1, %v7869_v8  ;;  %v7868_v11 = vpack.c.bf16 %v7862_v40, %v7862_v40  ;;  %v7858_v8 = vsel %vm2206_vm9, %v13779_v55, %v7857_v60  ;;  %v7871_v43 = vpack.c.bf16 %v7859_v19, %v7859_v19  ;;  %v7860_v40 = vsel %vm2206_vm9, %v16103_v3, %v13778_v61 }
 0x2e8   : > { %v5478_v7 = vpop.f32.mrb[192].mxu0  ;;  %9457 = vrot.lane.b32.xlu1 %v15794_v35, %s14041_s16  ;;  %13867 = vrot.lane.b32.xlu0 %v15963_v63, %s14041_s16  ;;  %v7872_v44 = vpack.c.bf16 %v7858_v8, %v7858_v8 }
 0x2e9   : > { %v16158_v50 = vadd.f32 %v5478_v7, %v16067_v25  ;;  %v5480_v9 = vpop.f32.mrb[193].mxu0  ;;  %12819 = vmatmul.mubr.msk.bf16.vlgmr.msra.gmra.mrb[216].mxu0 %vm397_vm2, %v16126_v49  ;;  %v7870_v7 = vpack.c.bf16 %v7860_v40, %v7860_v40 }
 0x2ea   : > { %v16161_v17 = vadd.f32 %v5480_v9, %v16072_v27  ;;  %v5482_v39 = vpop.f32.mrb[194].mxu0  ;;  %7751 = vmatpush1.bf16.msra.mxu0 %v7657_v38  ;;  %7782 = vmatprep.mubr.bf16.mxu0 %v17087_v6  ;;  %v7864_v27 = vsel %vm2206_vm9, %v13768_v4, %v13769_v32  ;;  %v7884_v32 = vsel %vm401_vm1, %v7868_v11, 0 }
 0x2eb   : > { %v5483_v25 = vpop.f32.mrb[195].mxu0  ;;  %12827 = vmatprep.subr.msk.bf16.mxu0 %vm401_vm1, %v7867_v20  ;;  %v7866_v62 = vpack.c.bf16 %v7864_v27, %v7864_v27  ;;  %v7896_v20 = vsel %vm401_vm1, %v7872_v44, 0  ;;  %v7890_v61 = vsel %vm401_vm1, %v7870_v7, 0 }
 0x2ec   : > { %v5519_v51 = vpop.f32.mrb[192].mxu1  ;;  %9463 = vrot.lane.b32.xlu1 %v15830_v12, %s14041_s16  ;;  %13872 = vrot.lane.b32.xlu0 %v15805_v45, %s14042_s17 }
 0x2ed   : > { %v5610_v23 = vadd.f32 %v5519_v51, %v16090_v28  ;;  %v5521_v36 = vpop.f32.mrb[193].mxu1  ;;  %12825 = vmatmul.mubr.msk.bf16.vlgmr.msra.gmra.mrb[220].mxu1 %vm397_vm2, %v16126_v49  ;;  %v7878_v52 = vsel %vm401_vm1, %v7866_v62, 0 }
 0x2ee   : > { %v5611_v21 = vadd.f32 %v5521_v36, %v16093_v37  ;;  %v5523_v54 = vpop.f32.mrb[194].mxu1  ;;  %7943 = vmatpush1.bf16.msra.mxu1 %v7884_v32  ;;  %7974 = vmatprep.mubr.bf16.mxu1 %v17087_v6 }
 0x2ef   : > { %v5524_v10 = vpop.f32.mrb[195].mxu1  ;;  %12833 = vmatprep.subr.msk.bf16.mxu1 %vm401_vm1, %v7873_v0 }
 0x2f0   : > { %v5560_v28 = vpop.f32.mrb[196].mxu0  ;;  %13877 = vrot.lane.b32.xlu1 %v15809_v26, %s14042_s17  ;;  %9690 = vrot.lane.b32.xlu0 %v15794_v35, %s14042_s17 }
 0x2f1   : > { %v5612_v37 = vadd.f32 %v5560_v28, %v16111_v22  ;;  %v5562_v16 = vpop.f32.mrb[197].mxu0  ;;  %12823 = vmatmul.mubr.msk.bf16.vlgmr.msra.gmra.mrb[220].mxu0 %vm397_vm2, %v16126_v49  ;;  %v12826_v22 = vld [vmem:[%s17070_s4 + $0x10] sm:$0x3] }
 0x2f2   : > { %v5613_v4 = vadd.f32 %v5562_v16, %v16114_v33  ;;  %v5564_v53 = vpop.f32.mrb[198].mxu0  ;;  %7902 = vmatpush1.bf16.msra.mxu0 %v7878_v52  ;;  %7933 = vmatprep.mubr.bf16.mxu0 %v17087_v6 }
 0x2f3   : > { %v5565_v60 = vpop.f32.mrb[199].mxu0  ;;  %12831 = vmatprep.subr.msk.bf16.mxu0 %vm401_vm1, %v7871_v43 }
 0x2f4   : > { %v5601_v33 = vpop.f32.mrb[196].mxu1  ;;  %13882 = vrot.lane.b32.xlu1 %v15963_v63, %s14042_s17  ;;  %9696 = vrot.lane.b32.xlu0 %v15830_v12, %s14042_s17 }
 0x2f5   : > { %v5614_v49 = vadd.f32 %v5601_v33, %v16138_v14  ;;  %v5603_v3 = vpop.f32.mrb[197].mxu1  ;;  %12830 = vmatmul.mubr.msk.bf16.vlgmr.msra.gmra.mrb[216].mxu1 %vm397_vm2, %v12826_v22 }
 0x2f6   : > { %v5615_v9 = vadd.f32 %v5603_v3, %v16141_v13  ;;  %v5605_v38 = vpop.f32.mrb[198].mxu1  ;;  %8025 = vmatpush1.bf16.msra.mxu1 %v7896_v20  ;;  %8056 = vmatprep.mubr.bf16.mxu1 %v17087_v6 }
 0x2f7   : > { %v5606_v11 = vpop.f32.mrb[199].mxu1 }
 0x2f8   : > { %v5655_v39 = vpop.f32.mrb[200].mxu0  ;;  %13887 = vrot.lane.b32.xlu1 %v15805_v45, %s14043_s18  ;;  %13892 = vrot.lane.b32.xlu0 %v15809_v26, %s14043_s18 }
 0x2f9   : > { %v5785_v14 = vadd.f32 %v5655_v39, %v16158_v50  ;;  %v5657_v55 = vpop.f32.mrb[201].mxu0  ;;  %12828 = vmatmul.mubr.msk.bf16.vlgmr.msra.gmra.mrb[216].mxu0 %vm397_vm2, %v12826_v22 }
 0x2fa   : > { %v5786_v13 = vadd.f32 %v5657_v55, %v16161_v17  ;;  %v5659_v57 = vpop.f32.mrb[202].mxu0  ;;  %7984 = vmatpush1.bf16.msra.mxu0 %v7890_v61  ;;  %8015 = vmatprep.mubr.bf16.mxu0 %v17087_v6 }
 0x2fb   : > { %v5660_v25 = vpop.f32.mrb[203].mxu0 }
 0x2fc   : > { %v5696_v27 = vpop.f32.mrb[200].mxu1  ;;  %9923 = vrot.lane.b32.xlu1 %v15794_v35, %s14043_s18  ;;  %13897 = vrot.lane.b32.xlu0 %v15963_v63, %s14043_s18 }
 0x2fd   : > { %v5787_v45 = vadd.f32 %v5696_v27, %v5610_v23  ;;  %v5698_v26 = vpop.f32.mrb[201].mxu1  ;;  %12834 = vmatmul.mubr.msk.bf16.vlgmr.msra.gmra.mrb[220].mxu1 %vm397_vm2, %v12826_v22 }
 0x2fe   : > { %v5788_v50 = vadd.f32 %v5698_v26, %v5611_v21  ;;  %v5700_v17 = vpop.f32.mrb[202].mxu1  ;;  %8207 = vmatprep.mubr.bf16.mxu1 %v17087_v6 }
 0x2ff   : > { %v5701_v51 = vpop.f32.mrb[203].mxu1 }
 0x300   : > { %v5737_v36 = vpop.f32.mrb[204].mxu0  ;;  %9929 = vrot.lane.b32.xlu1 %v15830_v12, %s14043_s18 }
 0x301   : > { %v5789_v0 = vadd.f32 %v5737_v36, %v5612_v37  ;;  %v5739_v32 = vpop.f32.mrb[205].mxu0  ;;  %12832 = vmatmul.mubr.msk.bf16.vlgmr.msra.gmra.mrb[220].mxu0 %vm397_vm2, %v12826_v22 }
 0x302   : > { %v5790_v62 = vadd.f32 %v5739_v32, %v5613_v4  ;;  %v5741_v54 = vpop.f32.mrb[206].mxu0  ;;  %8166 = vmatprep.mubr.bf16.mxu0 %v17087_v6 }
 0x303   : > { %v5742_v63 = vpop.f32.mrb[207].mxu0 }
 0x304   : > { %v5778_v23 = vpop.f32.mrb[204].mxu1 }
 0x305   : > { %v5791_v21 = vadd.f32 %v5778_v23, %v5614_v49  ;;  %v5780_v19 = vpop.f32.mrb[205].mxu1 }
 0x306   : > { %v5792_v8 = vadd.f32 %v5780_v19, %v5615_v9  ;;  %v5782_v10 = vpop.f32.mrb[206].mxu1 }
 0x307   : > { %v5783_v28 = vpop.f32.mrb[207].mxu1 }
 0x308   : > { %v5832_v16 = vpop.f32.mrb[208].mxu0 }
 0x309   : > { %v16232_v43 = vadd.f32 %v5832_v16, %v5785_v14  ;;  %v5834_v44 = vpop.f32.mrb[209].mxu0 }
 0x30a   : > { %v16234_v52 = vadd.f32 %v5834_v44, %v5786_v13  ;;  %v5836_v37 = vpop.f32.mrb[210].mxu0  ;;  %v12835_v44 = vld [vmem:[%s17070_s4 + $0x12] sm:$0x3] }
 0x30b   : > { %v5837_v4 = vpop.f32.mrb[211].mxu0 }
 0x30c   : > { %v5873_v53 = vpop.f32.mrb[208].mxu1 }
 0x30d   : > { %v16236_v40 = vadd.f32 %v5873_v53, %v5787_v45  ;;  %v5875_v22 = vpop.f32.mrb[209].mxu1 }
 0x30e   : > { %v16238_v60 = vadd.f32 %v5875_v22, %v5788_v50  ;;  %v5877_v33 = vpop.f32.mrb[210].mxu1 }
 0x30f   : > { %v5878_v49 = vpop.f32.mrb[211].mxu1 }
 0x310   : > { %v5914_v3 = vpop.f32.mrb[212].mxu0 }
 0x311   : > { %v16240_v7 = vadd.f32 %v5914_v3, %v5789_v0  ;;  %v5916_v9 = vpop.f32.mrb[213].mxu0 }
 0x312   : > { %v16242_v20 = vadd.f32 %v5916_v9, %v5790_v62  ;;  %v5918_v38 = vpop.f32.mrb[214].mxu0 }
 0x313   : > { %v5919_v11 = vpop.f32.mrb[215].mxu0 }
 0x314   : > { %v5955_v39 = vpop.f32.mrb[212].mxu1 }
 0x315   : > { %v16244_v14 = vadd.f32 %v5955_v39, %v5791_v21  ;;  %v5957_v55 = vpop.f32.mrb[213].mxu1 }
 0x316   : > { %v16246_v13 = vadd.f32 %v5957_v55, %v5792_v8  ;;  %v5959_v61 = vpop.f32.mrb[214].mxu1 }
 0x317   : > { %v5960_v57 = vpop.f32.mrb[215].mxu1 }
 0x322   : > { %v13782_v25 = vpop.permute.xlu1 %13781  ;;  %v13787_v27 = vpop.permute.xlu0 %13786 }
 0x323   : > { %v13784_v45 = vunpack.i.h.bf16 %v13782_v25  ;;  %v13783_v26 = vunpack.i.l.bf16 %v13782_v25  ;;  %v13789_v50 = vunpack.i.h.bf16 %v13787_v27  ;;  %v13788_v17 = vunpack.i.l.bf16 %v13787_v27 }
 0x325   : > { %v8097_v51 = vsel %vm345_vm3, %v13783_v26, %v13784_v45  ;;  %v8095_v36 = vsel %vm345_vm3, %v13788_v17, %v13789_v50  ;;  %v8096_v0 = vsel %vm345_vm3, %v13784_v45, %v13788_v17 }
 0x326   : > { %v8100_v32 = vpack.c.bf16 %v8097_v51, %v8097_v51  ;;  %v8102_v62 = vpack.c.bf16 %v8095_v36, %v8095_v36  ;;  %v8090_v54 = vpop.permute.xlu1 %8089  ;;  %v13792_v63 = vpop.permute.xlu0 %13791  ;;  %v8101_v23 = vpack.c.bf16 %v8096_v0, %v8096_v0 }
 0x327   : > { %v8098_v21 = vsel %vm345_vm3, %v8090_v54, %v13783_v26  ;;  %v13794_v19 = vunpack.i.h.bf16 %v13792_v63  ;;  %v13793_v8 = vunpack.i.l.bf16 %v13792_v63 }
 0x328   : > { %v8099_v10 = vpack.c.bf16 %v8098_v21, %v8098_v21  ;;  %12836 = vmatprep.subr.msk.bf16.mxu0 %vm401_vm1, %v8100_v32  ;;  %12838 = vmatprep.subr.msk.bf16.mxu1 %vm401_vm1, %v8102_v62  ;;  %v8117_v28 = vsel %vm401_vm1, %v8101_v23, 0 }
 0x329   : > { %v8093_v16 = vsel %vm345_vm3, %v13793_v8, %v13794_v19  ;;  %8176 = vmatpush1.bf16.msra.mxu1 %v8117_v28  ;;  %v8094_v37 = vsel %vm345_vm3, %v13789_v50, %v13793_v8 }
 0x32a   : > { %v8104_v4 = vpack.c.bf16 %v8093_v16, %v8093_v16  ;;  %v8088_v53 = vpop.permute.xlu1 %8087  ;;  %v13797_v22 = vpop.permute.xlu0 %13796  ;;  %v8111_v33 = vsel %vm401_vm1, %v8099_v10, 0  ;;  %v8103_v49 = vpack.c.bf16 %v8094_v37, %v8094_v37 }
 0x32b   : > { %v8091_v3 = vsel %vm345_vm3, %v8088_v53, %v8090_v54  ;;  %v8092_v9 = vsel %vm345_vm3, %v13794_v19, %v8088_v53  ;;  %v13799_v38 = vunpack.i.h.bf16 %v13797_v22  ;;  %v13798_v11 = vunpack.i.l.bf16 %v13797_v22  ;;  %8135 = vmatpush1.bf16.msra.mxu0 %v8111_v33 }
 0x32c   : > { %v8105_v39 = vpack.c.bf16 %v8092_v9, %v8092_v9  ;;  %v8106_v55 = vpack.c.bf16 %v8091_v3, %v8091_v3  ;;  %12839 = vmatmul.mubr.msk.bf16.vlgmr.msra.gmra.mrb[216].mxu1 %vm397_vm2, %v12835_v44  ;;  %12840 = vmatprep.subr.msk.bf16.mxu0 %vm401_vm1, %v8104_v4  ;;  %v8123_v45 = vsel %vm401_vm1, %v8103_v49, 0 }
 0x32d   : > { %v8330_v61 = vsel %vm380_vm0, %v13798_v11, %v13799_v38  ;;  %8289 = vmatprep.mubr.bf16.mxu1 %v17087_v6 }
 0x32e   : > { %v8333_v57 = vpack.c.bf16 %v8330_v61, %v8330_v61  ;;  %12837 = vmatmul.mubr.msk.bf16.vlgmr.msra.gmra.mrb[216].mxu0 %vm397_vm2, %v12835_v44  ;;  %v13802_v25 = vpop.permute.xlu1 %13801  ;;  %v8323_v27 = vpop.permute.xlu0 %8322  ;;  %12842 = vmatprep.subr.msk.bf16.mxu1 %vm401_vm1, %v8106_v55  ;;  %v8129_v26 = vsel %vm401_vm1, %v8105_v39, 0  ;;  %v12844_v55 = vld [vmem:[%s17070_s4 + $0x14] sm:$0x3] }
 0x32f   : > { %v13804_v50 = vunpack.i.h.bf16 %v13802_v25  ;;  %v13803_v17 = vunpack.i.l.bf16 %v13802_v25  ;;  %v8331_v51 = vsel %vm380_vm0, %v8323_v27, %v13798_v11  ;;  %8217 = vmatpush1.bf16.msra.mxu0 %v8123_v45  ;;  %8258 = vmatpush1.bf16.msra.mxu1 %v8129_v26 }
 0x330   : > { %12845 = vmatprep.subr.msk.bf16.mxu0 %vm401_vm1, %v8333_v57  ;;  %8248 = vmatprep.mubr.bf16.mxu0 %v17087_v6  ;;  %v8332_v62 = vpack.c.bf16 %v8331_v51, %v8331_v51 }
 0x331   : > { %v8328_v36 = vsel %vm380_vm0, %v13803_v17, %v13804_v50  ;;  %v8329_v0 = vsel %vm380_vm0, %v13799_v38, %v13803_v17 }
 0x332   : > { %v8335_v32 = vpack.c.bf16 %v8328_v36, %v8328_v36  ;;  %v13807_v54 = vpop.permute.xlu1 %13806  ;;  %v8321_v63 = vpop.permute.xlu0 %8320  ;;  %v8334_v23 = vpack.c.bf16 %v8329_v0, %v8329_v0  ;;  %v8344_v33 = vsel %vm401_vm1, %v8332_v62, 0 }
 0x333   : > { %v13809_v21 = vunpack.i.h.bf16 %v13807_v54  ;;  %v13808_v19 = vunpack.i.l.bf16 %v13807_v54  ;;  %v8324_v8 = vsel %vm380_vm0, %v8321_v63, %v8323_v27 }
 0x334   : > { %v8339_v10 = vpack.c.bf16 %v8324_v8, %v8324_v8  ;;  %12843 = vmatmul.mubr.msk.bf16.vlgmr.msra.gmra.mrb[220].mxu1 %vm397_vm2, %v12835_v44  ;;  %12847 = vmatprep.subr.msk.bf16.mxu1 %vm401_vm1, %v8335_v32  ;;  %v8350_v28 = vsel %vm401_vm1, %v8334_v23, 0 }
 0x335   : > { %v8326_v16 = vsel %vm380_vm0, %v13808_v19, %v13809_v21  ;;  %v8325_v37 = vsel %vm380_vm0, %v13809_v21, %v8321_v63  ;;  %8409 = vmatpush1.bf16.msra.mxu1 %v8350_v28  ;;  %8440 = vmatprep.mubr.bf16.mxu1 %v17087_v6  ;;  %v8327_v49 = vsel %vm380_vm0, %v13804_v50, %v13808_v19 }
 0x336   : > { %v8337_v4 = vpack.c.bf16 %v8326_v16, %v8326_v16  ;;  %v13812_v53 = vpop.permute.xlu1 %13811  ;;  %v13817_v22 = vpop.permute.xlu0 %13816  ;;  %12841 = vmatmul.mubr.msk.bf16.vlgmr.msra.gmra.mrb[220].mxu0 %vm397_vm2, %v12835_v44  ;;  %12851 = vmatprep.subr.msk.bf16.mxu1 %vm401_vm1, %v8339_v10  ;;  %v8338_v39 = vpack.c.bf16 %v8325_v37, %v8325_v37  ;;  %v8336_v25 = vpack.c.bf16 %v8327_v49, %v8327_v49 }
 0x337   : > { %v13814_v3 = vunpack.i.h.bf16 %v13812_v53  ;;  %v13813_v9 = vunpack.i.l.bf16 %v13812_v53  ;;  %v13819_v38 = vunpack.i.h.bf16 %v13817_v22  ;;  %v13818_v11 = vunpack.i.l.bf16 %v13817_v22  ;;  %8368 = vmatpush1.bf16.msra.mxu0 %v8344_v33  ;;  %8399 = vmatprep.mubr.bf16.mxu0 %v17087_v6 }
 0x338   : > { %12849 = vmatprep.subr.msk.bf16.mxu0 %vm401_vm1, %v8337_v4  ;;  %v8362_v26 = vsel %vm401_vm1, %v8338_v39, 0  ;;  %v8356_v36 = vsel %vm401_vm1, %v8336_v25, 0 }
 0x339   : > { %v8561_v44 = vsel %vm799_vm4, %v13818_v11, %v13819_v38  ;;  %v8563_v27 = vsel %vm799_vm4, %v13813_v9, %v13814_v3  ;;  %v8562_v50 = vsel %vm799_vm4, %v13814_v3, %v13818_v11 }
 0x33a   : > { %v8568_v61 = vpack.c.bf16 %v8561_v44, %v8561_v44  ;;  %v8556_v57 = vpop.permute.xlu1 %8555  ;;  %v13822_v45 = vpop.permute.xlu0 %13821  ;;  %v8566_v17 = vpack.c.bf16 %v8563_v27, %v8563_v27  ;;  %v8567_v54 = vpack.c.bf16 %v8562_v50, %v8562_v50  ;;  %v12853_v44 = vld [vmem:[%s17070_s4 + $0x16] sm:$0x3] }
 0x33b   : > { %v8564_v0 = vsel %vm799_vm4, %v8556_v57, %v13813_v9  ;;  %v13824_v32 = vunpack.i.h.bf16 %v13822_v45  ;;  %v13823_v62 = vunpack.i.l.bf16 %v13822_v45 }
 0x33c   : > { %12848 = vmatmul.mubr.msk.bf16.vlgmr.msra.gmra.mrb[216].mxu1 %vm397_vm2, %v12844_v55  ;;  %v8565_v23 = vpack.c.bf16 %v8564_v0, %v8564_v0  ;;  %v8583_v28 = vsel %vm401_vm1, %v8567_v54, 0 }
 0x33d   : > { %8491 = vmatpush1.bf16.msra.mxu1 %v8362_v26  ;;  %8522 = vmatprep.mubr.bf16.mxu1 %v17087_v6  ;;  %v8559_v8 = vsel %vm799_vm4, %v13823_v62, %v13824_v32  ;;  %v8560_v3 = vsel %vm799_vm4, %v13819_v38, %v13823_v62 }
 0x33e   : > { %12856 = vmatprep.subr.msk.bf16.mxu1 %vm401_vm1, %v8568_v61  ;;  %v8554_v51 = vpop.permute.xlu1 %8553  ;;  %12846 = vmatmul.mubr.msk.bf16.vlgmr.msra.gmra.mrb[216].mxu0 %vm397_vm2, %v12844_v55  ;;  %v13827_v21 = vpop.permute.xlu0 %13826  ;;  %v8570_v53 = vpack.c.bf16 %v8559_v8, %v8559_v8  ;;  %v8577_v22 = vsel %vm401_vm1, %v8565_v23, 0 }
 0x33f   : > { %8450 = vmatpush1.bf16.msra.mxu0 %v8356_v36  ;;  %8481 = vmatprep.mubr.bf16.mxu0 %v17087_v6  ;;  %v8557_v63 = vsel %vm799_vm4, %v8554_v51, %v8556_v57  ;;  %v8558_v16 = vsel %vm799_vm4, %v13824_v32, %v8554_v51  ;;  %v13829_v33 = vunpack.i.h.bf16 %v13827_v21  ;;  %v13828_v49 = vunpack.i.l.bf16 %v13827_v21 }
 0x340   : > { %12854 = vmatprep.subr.msk.bf16.mxu0 %vm401_vm1, %v8566_v17  ;;  %v8572_v10 = vpack.c.bf16 %v8557_v63, %v8557_v63  ;;  %v8571_v9 = vpack.c.bf16 %v8558_v16, %v8558_v16 }
 0x341   : > { %v8796_v61 = vsel %vm1033_vm5, %v13828_v49, %v13829_v33 }
 0x342   : > { %v16326_v19 = vpop.permute.xlu1 %13831  ;;  %v8789_v11 = vpop.permute.xlu0 %8788  ;;  %v8595_v38 = vsel %vm401_vm1, %v8571_v9, 0  ;;  %v8799_v45 = vpack.c.bf16 %v8796_v61, %v8796_v61  ;;  %v12862_v9 = vld [vmem:[%s17070_s4 + $0x18] sm:$0x3] }
 0x343   : > { %v13834_v37 = vunpack.i.h.bf16 %v16326_v19  ;;  %v13833_v4 = vunpack.i.l.bf16 %v16326_v19  ;;  %v8797_v17 = vsel %vm1033_vm5, %v8789_v11, %v13828_v49 }
 0x344   : > { %12852 = vmatmul.mubr.msk.bf16.vlgmr.msra.gmra.mrb[220].mxu1 %vm397_vm2, %v12844_v55  ;;  %v8798_v62 = vpack.c.bf16 %v8797_v17, %v8797_v17 }
 0x345   : > { %8642 = vmatpush1.bf16.msra.mxu1 %v8583_v28  ;;  %8673 = vmatprep.mubr.bf16.mxu1 %v17087_v6  ;;  %v8794_v39 = vsel %vm1033_vm5, %v13833_v4, %v13834_v37  ;;  %v8795_v27 = vsel %vm1033_vm5, %v13829_v33, %v13833_v4 }
 0x346   : > { %12860 = vmatprep.subr.msk.bf16.mxu1 %vm401_vm1, %v8572_v10  ;;  %12850 = vmatmul.mubr.msk.bf16.vlgmr.msra.gmra.mrb[220].mxu0 %vm397_vm2, %v12844_v55  ;;  %v8569_v55 = vpack.c.bf16 %v8560_v3, %v8560_v3  ;;  %v8801_v57 = vpack.c.bf16 %v8794_v39, %v8794_v39  ;;  %v13837_v25 = vpop.permute.xlu1 %13836  ;;  %v8787_v26 = vpop.permute.xlu0 %8786  ;;  %v8800_v0 = vpack.c.bf16 %v8795_v27, %v8795_v27  ;;  %v8810_v10 = vsel %vm401_vm1, %v8798_v62, 0 }
 0x347   : > { %8601 = vmatpush1.bf16.msra.mxu0 %v8577_v22  ;;  %8632 = vmatprep.mubr.bf16.mxu0 %v17087_v6  ;;  %v13839_v51 = vunpack.i.h.bf16 %v13837_v25  ;;  %v13838_v36 = vunpack.i.l.bf16 %v13837_v25  ;;  %v8790_v32 = vsel %vm1033_vm5, %v8787_v26, %v8789_v11 }
 0x348   : > { %12858 = vmatprep.subr.msk.bf16.mxu0 %vm401_vm1, %v8570_v53  ;;  %v8589_v50 = vsel %vm401_vm1, %v8569_v55, 0  ;;  %v8805_v23 = vpack.c.bf16 %v8790_v32, %v8790_v32  ;;  %v8816_v21 = vsel %vm401_vm1, %v8800_v0, 0 }
 0x349   : > { %v8792_v54 = vsel %vm1033_vm5, %v13838_v36, %v13839_v51  ;;  %v8791_v63 = vsel %vm1033_vm5, %v13839_v51, %v8787_v26  ;;  %v8793_v16 = vsel %vm1033_vm5, %v13834_v37, %v13838_v36 }
 0x34a   : > { %v8803_v19 = vpack.c.bf16 %v8792_v54, %v8792_v54  ;;  %v8804_v8 = vpack.c.bf16 %v8791_v63, %v8791_v63  ;;  %v8802_v37 = vpack.c.bf16 %v8793_v16, %v8793_v16  ;;  %v9012_v63 = vpack.c.bf16 %v15800_v46, %v15800_v46  ;;  %v12871_v46 = vld [vmem:[%s17070_s4 + $0x1a] sm:$0x3] }
 0x34c   : > { %12857 = vmatmul.mubr.msk.bf16.vlgmr.msra.gmra.mrb[216].mxu1 %vm397_vm2, %v12853_v44 }
 0x34d   : > { %8724 = vmatpush1.bf16.msra.mxu1 %v8595_v38  ;;  %8755 = vmatprep.mubr.bf16.mxu1 %v17087_v6 }
 0x34e   : > { %12865 = vmatprep.subr.msk.bf16.mxu1 %vm401_vm1, %v8801_v57  ;;  %12855 = vmatmul.mubr.msk.bf16.vlgmr.msra.gmra.mrb[216].mxu0 %vm397_vm2, %v12853_v44 }
 0x34f   : > { %8683 = vmatpush1.bf16.msra.mxu0 %v8589_v50  ;;  %8714 = vmatprep.mubr.bf16.mxu0 %v17087_v6 }
 0x350   : > { %12863 = vmatprep.subr.msk.bf16.mxu0 %vm401_vm1, %v8799_v45  ;;  %v16408_v45 = vpop.permute.xlu0 %13842 }
 0x354   : > { %12861 = vmatmul.mubr.msk.bf16.vlgmr.msra.gmra.mrb[220].mxu1 %vm397_vm2, %v12853_v44 }
 0x355   : > { %8875 = vmatpush1.bf16.msra.mxu1 %v8816_v21  ;;  %8906 = vmatprep.mubr.bf16.mxu1 %v17087_v6 }
 0x356   : > { %12869 = vmatprep.subr.msk.bf16.mxu1 %vm401_vm1, %v8805_v23  ;;  %12859 = vmatmul.mubr.msk.bf16.vlgmr.msra.gmra.mrb[220].mxu0 %vm397_vm2, %v12853_v44  ;;  %v9008_v44 = vpack.c.bf16 %v15771_v29, %v15771_v29 }
 0x357   : > { %8834 = vmatpush1.bf16.msra.mxu0 %v8810_v10  ;;  %v5975_v28 = vpop.permute.xlu1 %5974  ;;  %8865 = vmatprep.mubr.bf16.mxu0 %v17087_v6 }
 0x358   : > { %v5977_v4 = vadd.f32 %v5975_v28, %v16232_v43  ;;  %v5978_v53 = vadd.f32 %v5975_v28, %v16234_v52  ;;  %v5979_v22 = vadd.f32 %v5975_v28, %v16236_v40  ;;  %v5980_v33 = vadd.f32 %v5975_v28, %v16238_v60  ;;  %12867 = vmatprep.subr.msk.bf16.mxu0 %vm401_vm1, %v8803_v19 }
 0x359   : > { %v5981_v49 = vadd.f32 %v5975_v28, %v16240_v7  ;;  %v5982_v3 = vadd.f32 %v5975_v28, %v16242_v20  ;;  %v8828_v43 = vsel %vm401_vm1, %v8804_v8, 0  ;;  %v9010_v7 = vpack.c.bf16 %v15781_v1, %v15781_v1 }
 0x35a   : > { %vm5985_vm12 = vcmp.gt.f32.partialorder %v5977_v4, 0.0  ;;  %vm5986_vm13 = vcmp.gt.f32.partialorder %v5978_v53, 0.0  ;;  %vm5987_vm14 = vcmp.gt.f32.partialorder %v5979_v22, 0.0  ;;  %vm5988_vm15 = vcmp.gt.f32.partialorder %v5980_v33, 0.0 }
 0x35b   : > { %vm5989_vm10 = vcmp.gt.f32.partialorder %v5981_v49, 0.0  ;;  %vm5990_vm11 = vcmp.gt.f32.partialorder %v5982_v3, 0.0  ;;  %v5993_v52 = vmul.f32 0.1, %v5977_v4  ;;  %v5994_v40 = vmul.f32 0.1, %v5978_v53 }
 0x35c   : > { %v5995_v60 = vmul.f32 0.1, %v5979_v22  ;;  %12866 = vmatmul.mubr.msk.bf16.vlgmr.msra.gmra.mrb[216].mxu1 %vm397_vm2, %v12862_v9  ;;  %v5996_v20 = vmul.f32 0.1, %v5980_v33  ;;  %v5997_v11 = vmul.f32 0.1, %v5981_v49  ;;  %v5984_v55 = vadd.f32 %v5975_v28, %v16246_v13 }
 0x35d   : > { %v5998_v39 = vmul.f32 0.1, %v5982_v3  ;;  %8957 = vmatpush1.bf16.msra.mxu1 %v8828_v43  ;;  %8988 = vmatprep.mubr.bf16.mxu1 %v17087_v6  ;;  %v6001_v61 = vsel %vm5985_vm12, %v5977_v4, %v5993_v52  ;;  %v6002_v57 = vsel %vm5986_vm13, %v5978_v53, %v5994_v40  ;;  %v8822_v1 = vsel %vm401_vm1, %v8802_v37, 0 }
 0x35e   : > { %12874 = vmatprep.subr.msk.bf16.mxu1 %vm401_vm1, %v9010_v7  ;;  %12864 = vmatmul.mubr.msk.bf16.vlgmr.msra.gmra.mrb[216].mxu0 %vm397_vm2, %v12862_v9  ;;  %v6003_v25 = vsel %vm5987_vm14, %v5979_v22, %v5995_v60  ;;  %v6004_v38 = vsel %vm5988_vm15, %v5980_v33, %v5996_v20  ;;  %v6005_v29 = vsel %vm5989_vm10, %v5981_v49, %v5997_v11  ;;  %v6000_v0 = vmul.f32 0.1, %v5984_v55 }
 0x35f   : > { %8916 = vmatpush1.bf16.msra.mxu0 %v8822_v1  ;;  %v6006_v27 = vsel %vm5990_vm11, %v5982_v3, %v5998_v39  ;;  %v9009_v13 = vpack.c.bf16 %v15778_v47, %v15778_v47  ;;  %v16411_v26 = vmul.f32 %v6001_v61, %v15219_v42  ;;  %v16414_v50 = vmul.f32 %v6002_v57, %v15226_v34  ;;  %v13848_v47 = vpop.permute.xlu1 %13847 }
 0x360   : > { %12872 = vmatprep.subr.msk.bf16.mxu0 %vm401_vm1, %v9008_v44  ;;  %v16417_v17 = vmul.f32 %v6003_v25, %v15228_v58  ;;  %v16420_v51 = vmul.f32 %v6004_v38, %v15231_v59  ;;  %8947 = vmatprep.mubr.bf16.mxu0 %v17087_v6  ;;  %v5983_v36 = vadd.f32 %v5975_v28, %v16244_v14  ;;  %vm5992_vm12 = vcmp.gt.f32.partialorder %v5984_v55, 0.0 }
 0x361   : > { %v9014_v42 = vpack.c.bf16 %v15830_v12, %v15830_v12  ;;  %v9007_v34 = vpack.c.bf16 %v15768_v30, %v15768_v30  ;;  %v16429_v32 = vmul.f32 %v6005_v29, %v15239_v48  ;;  %v16432_v58 = vmul.f32 %v6006_v27, %v15241_v15  ;;  %v16448_v15 = vpop.permute.xlu0 %9224 }
 0x362   : > { %v16436_v59 = vpack.i.bf16 %v16420_v51, %v16417_v17  ;;  %v9025_v14 = vsel %vm401_vm1, %v9009_v13, 0  ;;  %v13850_v62 = vunpack.i.h.bf16 %v13848_v47  ;;  %v16442_v12 = vpack.i.bf16 %v16414_v50, %v16411_v26 }
 0x363   : > { %v5999_v48 = vmul.f32 0.1, %v5983_v36  ;;  %v6008_v30 = vsel %vm5992_vm12, %v5984_v55, %v6000_v0  ;;  %vm5991_vm13 = vcmp.gt.f32.partialorder %v5983_v36, 0.0  ;;  %v9019_v54 = vsel %vm401_vm1, %v9007_v34, 0  ;;  %v13853_v4 = vpop.permute.xlu1 %13852 }
 0x364   : > { %12870 = vmatmul.mubr.msk.bf16.vlgmr.msra.gmra.mrb[220].mxu1 %vm397_vm2, %v12862_v9  ;;  %13907 = vrot.lane.b32.xlu1 %v16436_v59, %s14037_s12  ;;  %v13849_v23 = vunpack.i.l.bf16 %v13848_v47  ;;  %v16458_v21 = vpack.i.bf16 %v16432_v58, %v16429_v32  ;;  %v9013_v19 = vpack.c.bf16 %v15850_v24, %v15850_v24  ;;  %v16463_v8 = vmul.f32 %v6008_v30, %v15258_v31  ;;  %v12880_v47 = vld [vmem:[%s17070_s4 + $0x1c] sm:$0x3] }
 0x365   : > { %9084 = vmatpush1.bf16.msra.mxu1 %v9025_v14  ;;  %9115 = vmatprep.mubr.bf16.mxu1 %v17087_v6  ;;  %v9235_v10 = vsel %vm1504_vm6, %v13850_v62, %v16448_v15  ;;  %v13845_v28 = vunpack.i.h.bf16 %v16408_v45  ;;  %v6007_v16 = vsel %vm5991_vm13, %v5983_v36, %v5999_v48  ;;  %v13844_v31 = vunpack.i.l.bf16 %v16408_v45  ;;  %v9231_v49 = vpop.permute.xlu0 %9230 }
 0x366   : > { %12878 = vmatprep.subr.msk.bf16.mxu1 %vm401_vm1, %v9014_v42  ;;  %13902 = vrot.lane.b32.xlu0 %v16442_v12, %s14037_s12  ;;  %v9011_v24 = vpack.c.bf16 %v15794_v35, %v15794_v35  ;;  %v9243_v22 = vpack.c.bf16 %v9235_v10, %v9235_v10  ;;  %v9037_v33 = vsel %vm401_vm1, %v9013_v19, 0  ;;  %v16486_v3 = vmul.f32 %v6007_v16, %v15246_v41 }
 0x367   : > { %12868 = vmatmul.mubr.msk.bf16.vlgmr.msra.gmra.mrb[220].mxu0 %vm397_vm2, %v12862_v9  ;;  %v9237_v53 = vsel %vm1504_vm6, %v13845_v28, %v13849_v23  ;;  %v9236_v9 = vsel %vm1504_vm6, %v13849_v23, %v13850_v62  ;;  %v9238_v43 = vsel %vm1504_vm6, %v13844_v31, %v13845_v28  ;;  %v9239_v37 = vsel %vm1504_vm6, %v9231_v49, %v13844_v31  ;;  %v13858_v60 = vpop.permute.xlu1 %13857 }
 0x368   : > { %9043 = vmatpush1.bf16.msra.mxu0 %v9019_v54  ;;  %13912 = vrot.lane.b32.xlu1 %v16458_v21, %s14037_s12  ;;  %v9241_v35 = vpack.c.bf16 %v9237_v53, %v9237_v53  ;;  %v9031_v41 = vsel %vm401_vm1, %v9011_v24, 0  ;;  %v13855_v52 = vunpack.i.h.bf16 %v13853_v4  ;;  %v13854_v40 = vunpack.i.l.bf16 %v13853_v4 }
 0x369   : > { %12876 = vmatprep.subr.msk.bf16.mxu0 %vm401_vm1, %v9012_v63  ;;  %9074 = vmatprep.mubr.bf16.mxu0 %v17087_v6  ;;  %v9242_v7 = vpack.c.bf16 %v9236_v9, %v9236_v9  ;;  %v9247_v20 = vpack.c.bf16 %v9239_v37, %v9239_v37  ;;  %v9240_v11 = vpack.c.bf16 %v9238_v43, %v9238_v43  ;;  %v13863_v39 = vpop.permute.xlu0 %13862  ;;  %v13860_v27 = vunpack.i.h.bf16 %v13858_v60 }
 0x36a   : > { %10162 = vrot.lane.b32.xlu0 %v16463_v8, %s14037_s12  ;;  %v9233_v44 = vsel %vm1504_vm6, %v13854_v40, %v13855_v52  ;;  %v9232_v61 = vsel %vm1504_vm6, %v13855_v52, %v9231_v49  ;;  %v16517_v57 = vpack.i.bf16 %v16486_v3, %v16432_v58  ;;  %v13865_v25 = vunpack.i.h.bf16 %v13863_v39 }
 0x36b   : > { %v9258_v55 = vsel %vm401_vm1, %v9242_v7, 0  ;;  %v16519_v1 = vpop.permute.xlu1 %9457  ;;  %v9245_v38 = vpack.c.bf16 %v9233_v44, %v9233_v44  ;;  %v9252_v29 = vsel %vm401_vm1, %v9240_v11, 0  ;;  %v9246_v13 = vpack.c.bf16 %v9232_v61, %v9232_v61  ;;  %v12889_v7 = vld [vmem:[%s17070_s4 + $0x1e] sm:$0x3] }
 0x36c   : > { %12875 = vmatmul.mubr.msk.bf16.vlgmr.msra.gmra.mrb[216].mxu1 %vm397_vm2, %v12871_v46  ;;  %13917 = vrot.lane.b32.xlu1 %v16442_v12, %s14036_s11  ;;  %v9234_v45 = vsel %vm1504_vm6, %v16448_v15, %v13854_v40  ;;  %v13864_v36 = vunpack.i.l.bf16 %v13863_v39  ;;  %v9468_v0 = vsel %vm1738_vm7, %v13865_v25, %v16519_v1  ;;  %v13859_v42 = vunpack.i.l.bf16 %v13858_v60 }
 0x36d   : > { %9166 = vmatpush1.bf16.msra.mxu1 %v9037_v33  ;;  %9197 = vmatprep.mubr.bf16.mxu1 %v17087_v6  ;;  %v9244_v34 = vpack.c.bf16 %v9234_v45, %v9234_v45  ;;  %v13868_v14 = vpop.permute.xlu0 %13867  ;;  %v9476_v48 = vpack.c.bf16 %v9468_v0, %v9468_v0  ;;  %v9270_v15 = vsel %vm401_vm1, %v9246_v13, 0 }
 0x36e   : > { %12883 = vmatprep.subr.msk.bf16.mxu1 %vm401_vm1, %v9243_v22  ;;  %10160 = vrot.lane.b32.xlu0 %v16486_v3, %s14037_s12  ;;  %v9470_v62 = vsel %vm1738_vm7, %v13860_v27, %v13864_v36  ;;  %v9469_v54 = vsel %vm1738_vm7, %v13864_v36, %v13865_v25  ;;  %v13870_v19 = vunpack.i.h.bf16 %v13868_v14  ;;  %v13869_v10 = vunpack.i.l.bf16 %v13868_v14 }
 0x36f   : > { %12873 = vmatmul.mubr.msk.bf16.vlgmr.msra.gmra.mrb[216].mxu0 %vm397_vm2, %v12871_v46  ;;  %v9464_v30 = vpop.permute.xlu1 %9463  ;;  %v9474_v63 = vpack.c.bf16 %v9470_v62, %v9470_v62  ;;  %v9264_v23 = vsel %vm401_vm1, %v9244_v34, 0  ;;  %v9471_v28 = vsel %vm1738_vm7, %v13859_v42, %v13860_v27 }
 0x370   : > { %9125 = vmatpush1.bf16.msra.mxu0 %v9031_v41  ;;  %9156 = vmatprep.mubr.bf16.mxu0 %v17087_v6  ;;  %v9472_v16 = vsel %vm1738_vm7, %v9464_v30, %v13859_v42  ;;  %v9473_v24 = vpack.c.bf16 %v9471_v28, %v9471_v28  ;;  %v9466_v53 = vsel %vm1738_vm7, %v13869_v10, %v13870_v19 }
 0x371   : > { %12881 = vmatprep.subr.msk.bf16.mxu0 %vm401_vm1, %v9241_v35  ;;  %10395 = vrot.lane.b32.xlu1 %v16463_v8, %s14036_s11  ;;  %v13873_v4 = vpop.permute.xlu0 %13872  ;;  %v9480_v22 = vpack.c.bf16 %v9472_v16, %v9472_v16  ;;  %v9465_v49 = vsel %vm1738_vm7, %v13870_v19, %v9464_v30  ;;  %v9478_v35 = vpack.c.bf16 %v9466_v53, %v9466_v53 }
 0x372   : > { %13922 = vrot.lane.b32.xlu0 %v16436_v59, %s14036_s11  ;;  %v9485_v41 = vsel %vm401_vm1, %v9473_v24, 0  ;;  %v9467_v37 = vsel %vm1738_vm7, %v16519_v1, %v13869_v10  ;;  %v9479_v52 = vpack.c.bf16 %v9465_v49, %v9465_v49  ;;  %v13874_v44 = vunpack.i.l.bf16 %v13873_v4 }
 0x373   : > { %v13878_v31 = vpop.permute.xlu1 %13877  ;;  %v9477_v39 = vpack.c.bf16 %v9467_v37, %v9467_v37 }
 0x374   : > { %12879 = vmatmul.mubr.msk.bf16.vlgmr.msra.gmra.mrb[220].mxu1 %vm397_vm2, %v12871_v46  ;;  %v13880_v9 = vunpack.i.h.bf16 %v13878_v31  ;;  %v13879_v40 = vunpack.i.l.bf16 %v13878_v31  ;;  %v9503_v1 = vsel %vm401_vm1, %v9479_v52, 0 }
 0x375   : > { %9317 = vmatpush1.bf16.msra.mxu1 %v9258_v55  ;;  %9348 = vmatprep.mubr.bf16.mxu1 %v17087_v6  ;;  %v9691_v43 = vpop.permute.xlu0 %9690 }
 0x376   : > { %10393 = vrot.lane.b32.xlu1 %v16486_v3, %s14036_s11  ;;  %12887 = vmatprep.subr.msk.bf16.mxu1 %vm401_vm1, %v9247_v20  ;;  %v9701_v60 = vsel %vm1972_vm8, %v13880_v9, %v9691_v43  ;;  %v13875_v20 = vunpack.i.h.bf16 %v13873_v4  ;;  %v9702_v25 = vsel %vm1972_vm8, %v13879_v40, %v13880_v9  ;;  %v12898_v4 = vld [vmem:[%s17070_s4 + $0x20] sm:$0x3] }
 0x377   : > { %13927 = vrot.lane.b32.xlu0 %v16458_v21, %s14036_s11  ;;  %12877 = vmatmul.mubr.msk.bf16.vlgmr.msra.gmra.mrb[220].mxu0 %vm397_vm2, %v12871_v46  ;;  %v9475_v46 = vpack.c.bf16 %v9469_v54, %v9469_v54  ;;  %v13883_v11 = vpop.permute.xlu1 %13882  ;;  %v9709_v61 = vpack.c.bf16 %v9701_v60, %v9701_v60  ;;  %v9708_v36 = vpack.c.bf16 %v9702_v25, %v9702_v25 }
 0x378   : > { %9276 = vmatpush1.bf16.msra.mxu0 %v9252_v29  ;;  %9307 = vmatprep.mubr.bf16.mxu0 %v17087_v6  ;;  %v9703_v55 = vsel %vm1972_vm8, %v13875_v20, %v13879_v40  ;;  %v9497_v29 = vsel %vm401_vm1, %v9477_v39, 0  ;;  %v13885_v27 = vunpack.i.h.bf16 %v13883_v11  ;;  %v13884_v13 = vunpack.i.l.bf16 %v13883_v11 }
 0x379   : > { %12885 = vmatprep.subr.msk.bf16.mxu0 %vm401_vm1, %v9245_v38  ;;  %v9491_v33 = vsel %vm401_vm1, %v9475_v46, 0  ;;  %v9697_v38 = vpop.permute.xlu0 %9696  ;;  %v9704_v0 = vsel %vm1972_vm8, %v13874_v44, %v13875_v20 }
 0x37a   : > { %13937 = vrot.lane.b32.xlu1 %v16436_v59, %s14038_s13  ;;  %v9706_v42 = vpack.c.bf16 %v9704_v0, %v9704_v0  ;;  %v9699_v62 = vsel %vm1972_vm8, %v13884_v13, %v13885_v27  ;;  %v9698_v30 = vsel %vm1972_vm8, %v13885_v27, %v9697_v38  ;;  %v9700_v46 = vsel %vm1972_vm8, %v9691_v43, %v13884_v13  ;;  %v12234_v13 = vld [vmem:[%s17073_s7] sm:$0xf] }
 0x37b   : > { %13932 = vrot.lane.b32.xlu0 %v16442_v12, %s14038_s13  ;;  %v13888_v45 = vpop.permute.xlu1 %13887  ;;  %v9712_v10 = vpack.c.bf16 %v9698_v30, %v9698_v30  ;;  %v9710_v31 = vpack.c.bf16 %v9700_v46, %v9700_v46 }
 0x37c   : > { %12884 = vmatmul.mubr.msk.bf16.vlgmr.msra.gmra.mrb[216].mxu1 %vm397_vm2, %v12880_v47  ;;  %v13890_v19 = vunpack.i.h.bf16 %v13888_v45  ;;  %v13889_v24 = vunpack.i.l.bf16 %v13888_v45 }
 0x37d   : > { %9399 = vmatpush1.bf16.msra.mxu1 %v9270_v15  ;;  %9430 = vmatprep.mubr.bf16.mxu1 %v17087_v6  ;;  %v13893_v14 = vpop.permute.xlu0 %13892  ;;  %v9730_v43 = vsel %vm401_vm1, %v9710_v31, 0 }
 0x37e   : > { %13942 = vrot.lane.b32.xlu1 %v16458_v21, %s14038_s13  ;;  %12892 = vmatprep.subr.msk.bf16.mxu1 %vm401_vm1, %v9476_v48  ;;  %v9724_v48 = vsel %vm401_vm1, %v9708_v36, 0  ;;  %v13895_v54 = vunpack.i.h.bf16 %v13893_v14  ;;  %v13894_v28 = vunpack.i.l.bf16 %v13893_v14  ;;  %v9937_v60 = vsel %vm2206_vm9, %v13889_v24, %v13890_v19 }
 0x37f   : > { %10628 = vrot.lane.b32.xlu0 %v16463_v8, %s14038_s13  ;;  %12882 = vmatmul.mubr.msk.bf16.vlgmr.msra.gmra.mrb[216].mxu0 %vm397_vm2, %v12880_v47  ;;  %v9924_v15 = vpop.permute.xlu1 %9923  ;;  %v9939_v20 = vpack.c.bf16 %v9937_v60, %v9937_v60 }
 0x380   : > { %9358 = vmatpush1.bf16.msra.mxu0 %v9264_v23  ;;  %9389 = vmatprep.mubr.bf16.mxu0 %v17087_v6  ;;  %v9718_v23 = vsel %vm401_vm1, %v9706_v42, 0  ;;  %v9934_v16 = vsel %vm2206_vm9, %v13895_v54, %v9924_v15  ;;  %v9936_v53 = vsel %vm2206_vm9, %v13890_v19, %v13894_v28  ;;  %v9935_v9 = vsel %vm2206_vm9, %v13894_v28, %v13895_v54 }
 0x381   : > { %12890 = vmatprep.subr.msk.bf16.mxu0 %vm401_vm1, %v9474_v63  ;;  %v9711_v63 = vpack.c.bf16 %v9699_v62, %v9699_v62  ;;  %v13898_v49 = vpop.permute.xlu0 %13897  ;;  %v9941_v40 = vpack.c.bf16 %v9935_v9, %v9935_v9 }
 0x382   : > { %13947 = vrot.lane.b32.xlu1 %v16442_v12, %s14039_s14  ;;  %v13900_v37 = vunpack.i.h.bf16 %v13898_v49  ;;  %v13899_v52 = vunpack.i.l.bf16 %v13898_v49 }
 0x383   : > { %10626 = vrot.lane.b32.xlu0 %v16486_v3, %s14038_s13 }
 0x384   : > { %12888 = vmatmul.mubr.msk.bf16.vlgmr.msra.gmra.mrb[220].mxu1 %vm397_vm2, %v12880_v47  ;;  %v9932_v11 = vsel %vm2206_vm9, %v13899_v52, %v13900_v37  ;;  %v9933_v25 = vsel %vm2206_vm9, %v9924_v15, %v13899_v52 }
 0x385   : > { %9550 = vmatpush1.bf16.msra.mxu1 %v9491_v33  ;;  %9581 = vmatprep.mubr.bf16.mxu1 %v17087_v6  ;;  %v9736_v33 = vsel %vm401_vm1, %v9712_v10, 0 }
 0x386   : > { %10861 = vrot.lane.b32.xlu1 %v16463_v8, %s14039_s14  ;;  %12896 = vmatprep.subr.msk.bf16.mxu1 %vm401_vm1, %v9480_v22  ;;  %v9942_v22 = vpack.c.bf16 %v9934_v16, %v9934_v16 }
 0x387   : > { %13952 = vrot.lane.b32.xlu0 %v16436_v59, %s14039_s14  ;;  %12886 = vmatmul.mubr.msk.bf16.vlgmr.msra.gmra.mrb[220].mxu0 %vm397_vm2, %v12880_v47  ;;  %v9705_v47 = vsel %vm1972_vm8, %v9697_v38, %v13874_v44  ;;  %v9957_v44 = vsel %vm401_vm1, %v9941_v40, 0 }
 0x388   : > { %9509 = vmatpush1.bf16.msra.mxu0 %v9485_v41  ;;  %9540 = vmatprep.mubr.bf16.mxu0 %v17087_v6  ;;  %v9713_v34 = vpack.c.bf16 %v9705_v47, %v9705_v47  ;;  %v9940_v41 = vpack.c.bf16 %v9936_v53, %v9936_v53  ;;  %v12916_v53 = vld [vmem:[%s17070_s4 + $0x24] sm:$0x3] }
 0x389   : > { %12894 = vmatprep.subr.msk.bf16.mxu0 %vm401_vm1, %v9478_v35  ;;  %v9930_v35 = vpop.permute.xlu1 %9929 }
 0x38a   : > { %10859 = vrot.lane.b32.xlu1 %v16486_v3, %s14039_s14 }
 0x38b   : > { %13957 = vrot.lane.b32.xlu0 %v16458_v21, %s14039_s14  ;;  %v9707_v21 = vpack.c.bf16 %v9703_v55, %v9703_v55  ;;  %v9931_v55 = vsel %vm2206_vm9, %v13900_v37, %v9930_v35 }
 0x38c   : > { %12893 = vmatmul.mubr.msk.bf16.vlgmr.msra.gmra.mrb[216].mxu1 %vm397_vm2, %v12889_v7  ;;  %v9945_v38 = vpack.c.bf16 %v9931_v55, %v9931_v55 }
 0x38d   : > { %9632 = vmatpush1.bf16.msra.mxu1 %v9503_v1  ;;  %9663 = vmatprep.mubr.bf16.mxu1 %v17087_v6  ;;  %v9951_v1 = vsel %vm401_vm1, %v9939_v20, 0 }
 0x38e   : > { %13967 = vrot.lane.b32.xlu1 %v16436_v59, %s14040_s15  ;;  %12901 = vmatprep.subr.msk.bf16.mxu1 %vm401_vm1, %v9709_v61  ;;  %v9944_v61 = vpack.c.bf16 %v9932_v11, %v9932_v11  ;;  %v9969_v27 = vsel %vm401_vm1, %v9945_v38, 0 }
 0x38f   : > { %13962 = vrot.lane.b32.xlu0 %v16442_v12, %s14040_s15  ;;  %12891 = vmatmul.mubr.msk.bf16.vlgmr.msra.gmra.mrb[216].mxu0 %vm397_vm2, %v12889_v7 }
 0x390   : > { %9591 = vmatpush1.bf16.msra.mxu0 %v9497_v29  ;;  %9622 = vmatprep.mubr.bf16.mxu0 %v17087_v6  ;;  %v9943_v29 = vpack.c.bf16 %v9933_v25, %v9933_v25 }
 0x391   : > { %12899 = vmatprep.subr.msk.bf16.mxu0 %vm401_vm1, %v9707_v21  ;;  %v12907_v21 = vld [vmem:[%s17070_s4 + $0x22] sm:$0x3] }
 0x392   : > { %13972 = vrot.lane.b32.xlu1 %v16517_v57, %s14040_s15 }
 0x393   : > { %11297 = vrot.lane.b32.xlu0 %v16429_v32, %s14040_s15 }
 0x394   : > { %12897 = vmatmul.mubr.msk.bf16.vlgmr.msra.gmra.mrb[220].mxu1 %vm397_vm2, %v12889_v7 }
 0x395   : > { %9783 = vmatpush1.bf16.msra.mxu1 %v9724_v48  ;;  %9814 = vmatprep.mubr.bf16.mxu1 %v17087_v6 }
 0x396   : > { %13977 = vrot.lane.b32.xlu1 %v16442_v12, %s14041_s16  ;;  %12905 = vmatprep.subr.msk.bf16.mxu1 %vm401_vm1, %v9713_v34 }
 0x397   : > { %11303 = vrot.lane.b32.xlu0 %v16463_v8, %s14040_s15  ;;  %12895 = vmatmul.mubr.msk.bf16.vlgmr.msra.gmra.mrb[220].mxu0 %vm397_vm2, %v12889_v7  ;;  %v9938_v7 = vsel %vm2206_vm9, %v9930_v35, %v13889_v24 }
 0x398   : > { %9742 = vmatpush1.bf16.msra.mxu0 %v9718_v23  ;;  %9773 = vmatprep.mubr.bf16.mxu0 %v17087_v6  ;;  %v9946_v39 = vpack.c.bf16 %v9938_v7, %v9938_v7 }
 0x399   : > { %12903 = vmatprep.subr.msk.bf16.mxu0 %vm401_vm1, %v9711_v63 }
 0x39a   : > { %11530 = vrot.lane.b32.xlu1 %v16429_v32, %s14041_s16 }
 0x39b   : > { %13982 = vrot.lane.b32.xlu0 %v16436_v59, %s14041_s16 }
 0x39c   : > { %12902 = vmatmul.mubr.msk.bf16.vlgmr.msra.gmra.mrb[216].mxu1 %vm397_vm2, %v12898_v4 }
 0x39d   : > { %9865 = vmatpush1.bf16.msra.mxu1 %v9736_v33  ;;  %9896 = vmatprep.mubr.bf16.mxu1 %v17087_v6 }
 0x39e   : > { %11536 = vrot.lane.b32.xlu1 %v16463_v8, %s14041_s16  ;;  %12910 = vmatprep.subr.msk.bf16.mxu1 %vm401_vm1, %v9942_v22 }
 0x39f   : > { %13987 = vrot.lane.b32.xlu0 %v16517_v57, %s14041_s16  ;;  %12900 = vmatmul.mubr.msk.bf16.vlgmr.msra.gmra.mrb[216].mxu0 %vm397_vm2, %v12898_v4 }
 0x3a0   : > { %9824 = vmatpush1.bf16.msra.mxu0 %v9730_v43  ;;  %9855 = vmatprep.mubr.bf16.mxu0 %v17087_v6 }
 0x3a1   : > { %12908 = vmatprep.subr.msk.bf16.mxu0 %vm401_vm1, %v9940_v41 }
 0x3a2   : > { %13997 = vrot.lane.b32.xlu1 %v16436_v59, %s14042_s17 }
 0x3a3   : > { %13992 = vrot.lane.b32.xlu0 %v16442_v12, %s14042_s17 }
 0x3a4   : > { %12906 = vmatmul.mubr.msk.bf16.vlgmr.msra.gmra.mrb[220].mxu1 %vm397_vm2, %v12898_v4 }
 0x3a5   : > { %10016 = vmatpush1.bf16.msra.mxu1 %v9957_v44  ;;  %10047 = vmatprep.mubr.bf16.mxu1 %v17087_v6 }
 0x3a6   : > { %14002 = vrot.lane.b32.xlu1 %v16517_v57, %s14042_s17  ;;  %12914 = vmatprep.subr.msk.bf16.mxu1 %vm401_vm1, %v9946_v39 }
 0x3a7   : > { %11763 = vrot.lane.b32.xlu0 %v16429_v32, %s14042_s17  ;;  %12904 = vmatmul.mubr.msk.bf16.vlgmr.msra.gmra.mrb[220].mxu0 %vm397_vm2, %v12898_v4 }
 0x3a8   : > { %9975 = vmatpush1.bf16.msra.mxu0 %v9951_v1  ;;  %10006 = vmatprep.mubr.bf16.mxu0 %v17087_v6 }
 0x3a9   : > { %12912 = vmatprep.subr.msk.bf16.mxu0 %vm401_vm1, %v9944_v61 }
 0x3aa   : > { %14007 = vrot.lane.b32.xlu1 %v16442_v12, %s14043_s18  ;;  %v9963_v12 = vsel %vm401_vm1, %v9943_v29, 0 }
 0x3ab   : > { %11769 = vrot.lane.b32.xlu0 %v16463_v8, %s14042_s17 }
 0x3ac   : > { %12911 = vmatmul.mubr.msk.bf16.vlgmr.msra.gmra.mrb[216].mxu1 %vm397_vm2, %v12907_v21 }
 0x3ad   : > { %10098 = vmatpush1.bf16.msra.mxu1 %v9969_v27  ;;  %10129 = vmatprep.mubr.bf16.mxu1 %v17087_v6 }
 0x3ae   : > { %11996 = vrot.lane.b32.xlu1 %v16429_v32, %s14043_s18 }
 0x3af   : > { %14012 = vrot.lane.b32.xlu0 %v16436_v59, %s14043_s18  ;;  %12909 = vmatmul.mubr.msk.bf16.vlgmr.msra.gmra.mrb[216].mxu0 %vm397_vm2, %v12907_v21  ;;  %v12219_v59 = vld [vmem:[%s17071_s5] sm:$0xf] }
 0x3b0   : > { %10057 = vmatpush1.bf16.msra.mxu0 %v9963_v12  ;;  %10088 = vmatprep.mubr.bf16.mxu0 %v17087_v6 }
 0x3b2   : > { %12002 = vrot.lane.b32.xlu1 %v16463_v8, %s14043_s18 }
 0x3b3   : > { %14017 = vrot.lane.b32.xlu0 %v16517_v57, %s14043_s18  ;;  %s13008_s18 = sshll.u32 %s17094_s28, 5 }
 0x3b4   : > { %12915 = vmatmul.mubr.msk.bf16.vlgmr.msra.gmra.mrb[220].mxu1 %vm397_vm2, %v12907_v21  ;;  %s305_s25 = scalar_lea.vmem %s17074_s8, %s13008_s18 }
 0x3b5   : > { %10280 = vmatprep.mubr.bf16.mxu1 %v17087_v6 }
 0x3b6   : > { %12237 = vperm.xlu1 %13840, %v12234_v13  }
 0x3b7   : > { %12222 = vperm.xlu0 %13659, %v12219_v59   ;;  %12913 = vmatmul.mubr.msk.bf16.vlgmr.msra.gmra.mrb[220].mxu0 %vm397_vm2, %v12907_v21 }
 0x3b8   : > { %10239 = vmatprep.mubr.bf16.mxu0 %v17087_v6 }
 0x3d6   : > { %v13908_v45 = vpop.permute.xlu1 %13907 }
 0x3d7   : > { %v13910_v57 = vunpack.i.h.bf16 %v13908_v45  ;;  %v13909_v36 = vunpack.i.l.bf16 %v13908_v45 }
 0x3d8   : > { %v13903_v0 = vpop.permute.xlu0 %13902 }
 0x3d9   : > { %v13905_v47 = vunpack.i.h.bf16 %v13903_v0  ;;  %v13904_v42 = vunpack.i.l.bf16 %v13903_v0  ;;  %v10168_v34 = vsel %vm345_vm3, %v13909_v36, %v13910_v57 }
 0x3da   : > { %v10175_v14 = vpack.c.bf16 %v10168_v34, %v10168_v34  ;;  %v13913_v48 = vpop.permute.xlu1 %13912 }
 0x3db   : > { %v10170_v62 = vsel %vm345_vm3, %v13904_v42, %v13905_v47  ;;  %v10169_v30 = vsel %vm345_vm3, %v13905_v47, %v13909_v36  ;;  %v13915_v54 = vunpack.i.h.bf16 %v13913_v48  ;;  %v13914_v63 = vunpack.i.l.bf16 %v13913_v48 }
 0x3dc   : > { %v10173_v15 = vpack.c.bf16 %v10170_v62, %v10170_v62  ;;  %v10163_v23 = vpop.permute.xlu0 %10162  ;;  %v10174_v19 = vpack.c.bf16 %v10169_v30, %v10169_v30  ;;  %12919 = vmatprep.subr.msk.bf16.mxu1 %vm401_vm1, %v10175_v14 }
 0x3dd   : > { %v10171_v10 = vsel %vm345_vm3, %v10163_v23, %v13904_v42  ;;  %v10166_v46 = vsel %vm345_vm3, %v13914_v63, %v13915_v54  ;;  %v10167_v4 = vsel %vm345_vm3, %v13910_v57, %v13914_v63 }
 0x3de   : > { %v10172_v28 = vpack.c.bf16 %v10171_v10, %v10171_v10  ;;  %12917 = vmatprep.subr.msk.bf16.mxu0 %vm401_vm1, %v10173_v15  ;;  %v10190_v16 = vsel %vm401_vm1, %v10174_v19, 0  ;;  %v10177_v31 = vpack.c.bf16 %v10166_v46, %v10166_v46  ;;  %v13918_v24 = vpop.permute.xlu1 %13917  ;;  %v10176_v35 = vpack.c.bf16 %v10167_v4, %v10167_v4  ;;  %v12925_v10 = vld [vmem:[%s17070_s4 + $0x26] sm:$0x3] }
 0x3df   : > { %10249 = vmatpush1.bf16.msra.mxu1 %v10190_v16  ;;  %v13920_v22 = vunpack.i.h.bf16 %v13918_v24  ;;  %v13919_v33 = vunpack.i.l.bf16 %v13918_v24 }
 0x3e0   : > { %v10161_v49 = vpop.permute.xlu0 %10160  ;;  %v10184_v9 = vsel %vm401_vm1, %v10172_v28, 0  ;;  %v10196_v11 = vsel %vm401_vm1, %v10176_v35, 0 }
 0x3e1   : > { %v10164_v41 = vsel %vm345_vm3, %v10161_v49, %v10163_v23  ;;  %v10165_v43 = vsel %vm345_vm3, %v13915_v54, %v10161_v49  ;;  %10208 = vmatpush1.bf16.msra.mxu0 %v10184_v9  ;;  %v10403_v37 = vsel %vm380_vm0, %v13919_v33, %v13920_v22 }
 0x3e2   : > { %v10178_v52 = vpack.c.bf16 %v10165_v43, %v10165_v43  ;;  %v10179_v40 = vpack.c.bf16 %v10164_v41, %v10164_v41  ;;  %12920 = vmatmul.mubr.msk.bf16.vlgmr.msra.gmra.mrb[216].mxu1 %vm397_vm2, %v12916_v53  ;;  %12921 = vmatprep.subr.msk.bf16.mxu0 %vm401_vm1, %v10177_v31  ;;  %v10406_v60 = vpack.c.bf16 %v10403_v37, %v10403_v37 }
 0x3e3   : > { %v10396_v7 = vpop.permute.xlu1 %10395  ;;  %10362 = vmatprep.mubr.bf16.mxu1 %v17087_v6 }
 0x3e4   : > { %v13923_v20 = vpop.permute.xlu0 %13922  ;;  %12918 = vmatmul.mubr.msk.bf16.vlgmr.msra.gmra.mrb[216].mxu0 %vm397_vm2, %v12916_v53  ;;  %12923 = vmatprep.subr.msk.bf16.mxu1 %vm401_vm1, %v10179_v40  ;;  %v10202_v39 = vsel %vm401_vm1, %v10178_v52, 0  ;;  %v10404_v44 = vsel %vm380_vm0, %v10396_v7, %v13919_v33 }
 0x3e5   : > { %v13925_v55 = vunpack.i.h.bf16 %v13923_v20  ;;  %v13924_v61 = vunpack.i.l.bf16 %v13923_v20  ;;  %10290 = vmatpush1.bf16.msra.mxu0 %v10196_v11  ;;  %10331 = vmatpush1.bf16.msra.mxu1 %v10202_v39  ;;  %v10405_v21 = vpack.c.bf16 %v10404_v44, %v10404_v44 }
 0x3e6   : > { %12926 = vmatprep.subr.msk.bf16.mxu0 %vm401_vm1, %v10406_v60  ;;  %10321 = vmatprep.mubr.bf16.mxu0 %v17087_v6 }
 0x3e7   : > { %v10401_v1 = vsel %vm380_vm0, %v13924_v61, %v13925_v55  ;;  %v10402_v38 = vsel %vm380_vm0, %v13920_v22, %v13924_v61  ;;  %v10417_v30 = vsel %vm401_vm1, %v10405_v21, 0 }
 0x3e8   : > { %v10394_v25 = vpop.permute.xlu1 %10393  ;;  %v10408_v29 = vpack.c.bf16 %v10401_v1, %v10401_v1  ;;  %v10407_v13 = vpack.c.bf16 %v10402_v38, %v10402_v38 }
 0x3e9   : > { %v10397_v27 = vsel %vm380_vm0, %v10394_v25, %v10396_v7  ;;  %v13928_v12 = vpop.permute.xlu0 %13927 }
 0x3ea   : > { %v10412_v59 = vpack.c.bf16 %v10397_v27, %v10397_v27  ;;  %v13930_v45 = vunpack.i.h.bf16 %v13928_v12  ;;  %v13929_v57 = vunpack.i.l.bf16 %v13928_v12  ;;  %12924 = vmatmul.mubr.msk.bf16.vlgmr.msra.gmra.mrb[220].mxu1 %vm397_vm2, %v12916_v53  ;;  %12928 = vmatprep.subr.msk.bf16.mxu1 %vm401_vm1, %v10408_v29  ;;  %v10423_v36 = vsel %vm401_vm1, %v10407_v13, 0  ;;  %v12934_v13 = vld [vmem:[%s17070_s4 + $0x28] sm:$0x3] }
 0x3eb   : > { %10482 = vmatpush1.bf16.msra.mxu1 %v10423_v36  ;;  %10513 = vmatprep.mubr.bf16.mxu1 %v17087_v6 }
 0x3ec   : > { %v10399_v0 = vsel %vm380_vm0, %v13929_v57, %v13930_v45  ;;  %v16766_v47 = vpop.permute.xlu1 %13937  ;;  %v10398_v42 = vsel %vm380_vm0, %v13930_v45, %v10394_v25  ;;  %12922 = vmatmul.mubr.msk.bf16.vlgmr.msra.gmra.mrb[220].mxu0 %vm397_vm2, %v12916_v53  ;;  %12932 = vmatprep.subr.msk.bf16.mxu1 %vm401_vm1, %v10412_v59  ;;  %v10400_v63 = vsel %vm380_vm0, %v13925_v55, %v13929_v57 }
 0x3ed   : > { %v10410_v34 = vpack.c.bf16 %v10399_v0, %v10399_v0  ;;  %v13940_v14 = vunpack.i.h.bf16 %v16766_v47  ;;  %v13939_v62 = vunpack.i.l.bf16 %v16766_v47  ;;  %v13933_v48 = vpop.permute.xlu0 %13932  ;;  %10441 = vmatpush1.bf16.msra.mxu0 %v10417_v30  ;;  %10472 = vmatprep.mubr.bf16.mxu0 %v17087_v6  ;;  %v10411_v19 = vpack.c.bf16 %v10398_v42, %v10398_v42 }
 0x3ee   : > { %v13935_v15 = vunpack.i.h.bf16 %v13933_v48  ;;  %v13934_v54 = vunpack.i.l.bf16 %v13933_v48  ;;  %v10409_v16 = vpack.c.bf16 %v10400_v63, %v10400_v63 }
 0x3ef   : > { %v10634_v23 = vsel %vm799_vm4, %v13939_v62, %v13940_v14  ;;  %12930 = vmatprep.subr.msk.bf16.mxu0 %vm401_vm1, %v10410_v34  ;;  %v10435_v24 = vsel %vm401_vm1, %v10411_v19, 0 }
 0x3f0   : > { %v10641_v46 = vpack.c.bf16 %v10634_v23, %v10634_v23  ;;  %v10636_v4 = vsel %vm799_vm4, %v13934_v54, %v13935_v15  ;;  %v13943_v31 = vpop.permute.xlu1 %13942  ;;  %v10635_v53 = vsel %vm799_vm4, %v13935_v15, %v13939_v62  ;;  %v10429_v49 = vsel %vm401_vm1, %v10409_v16, 0 }
 0x3f1   : > { %v10629_v28 = vpop.permute.xlu0 %10628  ;;  %v10639_v22 = vpack.c.bf16 %v10636_v4, %v10636_v4  ;;  %v13945_v9 = vunpack.i.h.bf16 %v13943_v31  ;;  %v13944_v35 = vunpack.i.l.bf16 %v13943_v31  ;;  %v10640_v43 = vpack.c.bf16 %v10635_v53, %v10635_v53 }
 0x3f2   : > { %12929 = vmatmul.mubr.msk.bf16.vlgmr.msra.gmra.mrb[216].mxu1 %vm397_vm2, %v12925_v10  ;;  %v10637_v41 = vsel %vm799_vm4, %v10629_v28, %v13934_v54 }
 0x3f3   : > { %10564 = vmatpush1.bf16.msra.mxu1 %v10435_v24  ;;  %10595 = vmatprep.mubr.bf16.mxu1 %v17087_v6  ;;  %v10638_v52 = vpack.c.bf16 %v10637_v41, %v10637_v41  ;;  %v10632_v7 = vsel %vm799_vm4, %v13944_v35, %v13945_v9  ;;  %v10656_v11 = vsel %vm401_vm1, %v10640_v43, 0  ;;  %v10633_v21 = vsel %vm799_vm4, %v13940_v14, %v13944_v35  ;;  %v12943_v24 = vld [vmem:[%s17070_s4 + $0x2a] sm:$0x3] }
 0x3f4   : > { %12937 = vmatprep.subr.msk.bf16.mxu1 %vm401_vm1, %v10641_v46  ;;  %12927 = vmatmul.mubr.msk.bf16.vlgmr.msra.gmra.mrb[216].mxu0 %vm397_vm2, %v12925_v10  ;;  %v13948_v40 = vpop.permute.xlu1 %13947  ;;  %v10643_v61 = vpack.c.bf16 %v10632_v7, %v10632_v7  ;;  %v10642_v59 = vpack.c.bf16 %v10633_v21, %v10633_v21  ;;  %v11080_v41 = vpack.c.bf16 %v16411_v26, %v16411_v26 }
 0x3f5   : > { %v10627_v33 = vpop.permute.xlu0 %10626  ;;  %10523 = vmatpush1.bf16.msra.mxu0 %v10429_v49  ;;  %10554 = vmatprep.mubr.bf16.mxu0 %v17087_v6  ;;  %v10650_v1 = vsel %vm401_vm1, %v10638_v52, 0  ;;  %v13950_v25 = vunpack.i.h.bf16 %v13948_v40  ;;  %v13949_v38 = vunpack.i.l.bf16 %v13948_v40  ;;  %v11085_v26 = vpack.c.bf16 %v16432_v58, %v16432_v58 }
 0x3f6   : > { %12935 = vmatprep.subr.msk.bf16.mxu0 %vm401_vm1, %v10639_v22  ;;  %v10630_v37 = vsel %vm799_vm4, %v10627_v33, %v10629_v28  ;;  %v10631_v39 = vsel %vm799_vm4, %v13945_v9, %v10627_v33  ;;  %v10662_v14 = vsel %vm401_vm1, %v10642_v59, 0  ;;  %v11083_v33 = vpack.c.bf16 %v16420_v51, %v16420_v51 }
 0x3f7   : > { %v10645_v20 = vpack.c.bf16 %v10630_v37, %v10630_v37  ;;  %v10644_v29 = vpack.c.bf16 %v10631_v39, %v10631_v39  ;;  %v10869_v45 = vsel %vm1033_vm5, %v13949_v38, %v13950_v25  ;;  %v11081_v9 = vpack.c.bf16 %v16414_v50, %v16414_v50 }
 0x3f8   : > { %v10862_v27 = vpop.permute.xlu1 %10861  ;;  %v10872_v42 = vpack.c.bf16 %v10869_v45, %v10869_v45  ;;  %v11082_v51 = vpack.c.bf16 %v16417_v17, %v16417_v17  ;;  %v11087_v50 = vpack.c.bf16 %v16463_v8, %v16463_v8  ;;  %v11092_v17 = vsel %vm401_vm1, %v11080_v41, 0 }
 0x3f9   : > { %v13953_v60 = vpop.permute.xlu0 %13952  ;;  %v10668_v0 = vsel %vm401_vm1, %v10644_v29, 0  ;;  %v10870_v62 = vsel %vm1033_vm5, %v10862_v27, %v13949_v38  ;;  %v11086_v8 = vpack.c.bf16 %v16486_v3, %v16486_v3  ;;  %v11084_v58 = vpack.c.bf16 %v16429_v32, %v16429_v32 }
 0x3fa   : > { %12933 = vmatmul.mubr.msk.bf16.vlgmr.msra.gmra.mrb[220].mxu1 %vm397_vm2, %v12925_v10  ;;  %v13955_v44 = vunpack.i.h.bf16 %v13953_v60  ;;  %v13954_v55 = vunpack.i.l.bf16 %v13953_v60  ;;  %v10871_v63 = vpack.c.bf16 %v10870_v62, %v10870_v62  ;;  %v11098_v37 = vsel %vm401_vm1, %v11082_v51, 0 }
 0x3fb   : > { %10715 = vmatpush1.bf16.msra.mxu1 %v10656_v11  ;;  %10746 = vmatprep.mubr.bf16.mxu1 %v17087_v6  ;;  %v12952_v11 = vld [vmem:[%s17070_s4 + $0x2c] sm:$0x3]  ;;  %v11110_v3 = vsel %vm401_vm1, %v11086_v8, 0  ;;  %v11104_v32 = vsel %vm401_vm1, %v11084_v58, 0 }
 0x3fc   : > { %12941 = vmatprep.subr.msk.bf16.mxu1 %vm401_vm1, %v10645_v20  ;;  %12931 = vmatmul.mubr.msk.bf16.vlgmr.msra.gmra.mrb[220].mxu0 %vm397_vm2, %v12925_v10  ;;  %v10867_v12 = vsel %vm1033_vm5, %v13954_v55, %v13955_v44  ;;  %v10868_v47 = vsel %vm1033_vm5, %v13950_v25, %v13954_v55  ;;  %v10860_v34 = vpop.permute.xlu1 %10859  ;;  %v10883_v16 = vsel %vm401_vm1, %v10871_v63, 0 }
 0x3fd   : > { %10674 = vmatpush1.bf16.msra.mxu0 %v10650_v1  ;;  %10705 = vmatprep.mubr.bf16.mxu0 %v17087_v6  ;;  %v10874_v57 = vpack.c.bf16 %v10867_v12, %v10867_v12  ;;  %v13958_v36 = vpop.permute.xlu0 %13957  ;;  %v10873_v15 = vpack.c.bf16 %v10868_v47, %v10868_v47  ;;  %v10863_v54 = vsel %vm1033_vm5, %v10860_v34, %v10862_v27 }
 0x3fe   : > { %12939 = vmatprep.subr.msk.bf16.mxu0 %vm401_vm1, %v10643_v61  ;;  %v13960_v48 = vunpack.i.h.bf16 %v13958_v36  ;;  %v13959_v30 = vunpack.i.l.bf16 %v13958_v36  ;;  %v10878_v19 = vpack.c.bf16 %v10863_v54, %v10863_v54 }
 0x3ff   : > { %v10889_v10 = vsel %vm401_vm1, %v10873_v15, 0 }
 0x400   : > { %v10865_v23 = vsel %vm1033_vm5, %v13959_v30, %v13960_v48  ;;  %v10864_v46 = vsel %vm1033_vm5, %v13960_v48, %v10860_v34  ;;  %v10866_v4 = vsel %vm1033_vm5, %v13955_v44, %v13959_v30  ;;  %v13968_v43 = vpop.permute.xlu1 %13967 }
 0x401   : > { %v10876_v28 = vpack.c.bf16 %v10865_v23, %v10865_v23  ;;  %v10877_v31 = vpack.c.bf16 %v10864_v46, %v10864_v46  ;;  %v10875_v53 = vpack.c.bf16 %v10866_v4, %v10866_v4  ;;  %v13963_v35 = vpop.permute.xlu0 %13962  ;;  %v13970_v40 = vunpack.i.h.bf16 %v13968_v43 }
 0x402   : > { %12938 = vmatmul.mubr.msk.bf16.vlgmr.msra.gmra.mrb[216].mxu1 %vm397_vm2, %v12934_v13  ;;  %v13969_v60 = vunpack.i.l.bf16 %v13968_v43  ;;  %v13965_v7 = vunpack.i.h.bf16 %v13963_v35  ;;  %v13964_v44 = vunpack.i.l.bf16 %v13963_v35 }
 0x403   : > { %10797 = vmatpush1.bf16.msra.mxu1 %v10668_v0  ;;  %10828 = vmatprep.mubr.bf16.mxu1 %v17087_v6  ;;  %v10901_v22 = vsel %vm401_vm1, %v10877_v31, 0  ;;  %v10895_v49 = vsel %vm401_vm1, %v10875_v53, 0 }
 0x404   : > { %12946 = vmatprep.subr.msk.bf16.mxu1 %vm401_vm1, %v10874_v57  ;;  %12936 = vmatmul.mubr.msk.bf16.vlgmr.msra.gmra.mrb[216].mxu0 %vm397_vm2, %v12934_v13  ;;  %v11310_v39 = vsel %vm1504_vm6, %v13965_v7, %v13969_v60  ;;  %v13973_v55 = vpop.permute.xlu1 %13972  ;;  %v11309_v25 = vsel %vm1504_vm6, %v13969_v60, %v13970_v40  ;;  %v11311_v27 = vsel %vm1504_vm6, %v13964_v44, %v13965_v7 }
 0x405   : > { %10756 = vmatpush1.bf16.msra.mxu0 %v10662_v14  ;;  %10787 = vmatprep.mubr.bf16.mxu0 %v17087_v6  ;;  %v11298_v52 = vpop.permute.xlu0 %11297  ;;  %v11314_v38 = vpack.c.bf16 %v11310_v39, %v11310_v39  ;;  %v13975_v21 = vunpack.i.h.bf16 %v13973_v55  ;;  %v13974_v29 = vunpack.i.l.bf16 %v13973_v55  ;;  %v11315_v12 = vpack.c.bf16 %v11309_v25, %v11309_v25 }
 0x406   : > { %12944 = vmatprep.subr.msk.bf16.mxu0 %vm401_vm1, %v10872_v42  ;;  %v11308_v20 = vsel %vm1504_vm6, %v13970_v40, %v11298_v52  ;;  %v11313_v57 = vpack.c.bf16 %v11311_v27, %v11311_v27 }
 0x407   : > { %v11316_v61 = vpack.c.bf16 %v11308_v20, %v11308_v20  ;;  %v11306_v36 = vsel %vm1504_vm6, %v13974_v29, %v13975_v21  ;;  %v11331_v47 = vsel %vm401_vm1, %v11315_v12, 0  ;;  %v11307_v48 = vsel %vm1504_vm6, %v11298_v52, %v13974_v29 }
 0x408   : > { %v13978_v59 = vpop.permute.xlu1 %13977  ;;  %v11318_v14 = vpack.c.bf16 %v11306_v36, %v11306_v36  ;;  %v11325_v62 = vsel %vm401_vm1, %v11313_v57, 0 }
 0x409   : > { %v11304_v1 = vpop.permute.xlu0 %11303  ;;  %v13980_v63 = vunpack.i.h.bf16 %v13978_v59 }
 0x40a   : > { %12942 = vmatmul.mubr.msk.bf16.vlgmr.msra.gmra.mrb[220].mxu1 %vm397_vm2, %v12934_v13  ;;  %v11305_v42 = vsel %vm1504_vm6, %v13975_v21, %v11304_v1 }
 0x40b   : > { %10948 = vmatpush1.bf16.msra.mxu1 %v10889_v10  ;;  %10979 = vmatprep.mubr.bf16.mxu1 %v17087_v6  ;;  %v11319_v15 = vpack.c.bf16 %v11305_v42, %v11305_v42  ;;  %v11317_v10 = vpack.c.bf16 %v11307_v48, %v11307_v48 }
 0x40c   : > { %12950 = vmatprep.subr.msk.bf16.mxu1 %vm401_vm1, %v10878_v19  ;;  %12940 = vmatmul.mubr.msk.bf16.vlgmr.msra.gmra.mrb[220].mxu0 %vm397_vm2, %v12934_v13  ;;  %v11312_v13 = vsel %vm1504_vm6, %v11304_v1, %v13964_v44  ;;  %v11531_v54 = vpop.permute.xlu1 %11530  ;;  %v12961_v19 = vld [vmem:[%s17070_s4 + $0x2e] sm:$0x3] }
 0x40d   : > { %10907 = vmatpush1.bf16.msra.mxu0 %v10883_v16  ;;  %10938 = vmatprep.mubr.bf16.mxu0 %v17087_v6  ;;  %v13983_v45 = vpop.permute.xlu0 %13982  ;;  %v11320_v0 = vpack.c.bf16 %v11312_v13, %v11312_v13  ;;  %v11343_v31 = vsel %vm401_vm1, %v11319_v15, 0 }
 0x40e   : > { %12948 = vmatprep.subr.msk.bf16.mxu0 %vm401_vm1, %v10876_v28  ;;  %v13985_v34 = vunpack.i.h.bf16 %v13983_v45  ;;  %v13984_v30 = vunpack.i.l.bf16 %v13983_v45  ;;  %v13979_v28 = vunpack.i.l.bf16 %v13978_v59 }
 0x410   : > { %v11541_v23 = vsel %vm1738_vm7, %v13985_v34, %v11531_v54  ;;  %v11543_v16 = vsel %vm1738_vm7, %v13980_v63, %v13984_v30  ;;  %v11544_v35 = vsel %vm1738_vm7, %v13979_v28, %v13980_v63 }
 0x411   : > { %v13988_v46 = vpop.permute.xlu0 %13987  ;;  %v11549_v4 = vpack.c.bf16 %v11541_v23, %v11541_v23  ;;  %v11547_v53 = vpack.c.bf16 %v11543_v16, %v11543_v16 }
 0x412   : > { %12947 = vmatmul.mubr.msk.bf16.vlgmr.msra.gmra.mrb[216].mxu1 %vm397_vm2, %v12943_v24 }
 0x413   : > { %11030 = vmatpush1.bf16.msra.mxu1 %v10901_v22  ;;  %11061 = vmatprep.mubr.bf16.mxu1 %v17087_v6  ;;  %v11537_v22 = vpop.permute.xlu1 %11536 }
 0x414   : > { %12955 = vmatprep.subr.msk.bf16.mxu1 %vm401_vm1, %v11083_v33  ;;  %12945 = vmatmul.mubr.msk.bf16.vlgmr.msra.gmra.mrb[216].mxu0 %vm397_vm2, %v12943_v24  ;;  %v11337_v33 = vsel %vm401_vm1, %v11317_v10, 0  ;;  %v11545_v43 = vsel %vm1738_vm7, %v11537_v22, %v13979_v28 }
 0x415   : > { %10989 = vmatpush1.bf16.msra.mxu0 %v10895_v49  ;;  %11020 = vmatprep.mubr.bf16.mxu0 %v17087_v6  ;;  %v13990_v49 = vunpack.i.h.bf16 %v13988_v46  ;;  %v13993_v51 = vpop.permute.xlu0 %13992  ;;  %v11553_v52 = vpack.c.bf16 %v11545_v43, %v11545_v43 }
 0x416   : > { %12953 = vmatprep.subr.msk.bf16.mxu0 %vm401_vm1, %v11081_v9  ;;  %v13989_v9 = vunpack.i.l.bf16 %v13988_v46  ;;  %v13995_v58 = vunpack.i.h.bf16 %v13993_v51  ;;  %v13994_v25 = vunpack.i.l.bf16 %v13993_v51 }
 0x417   : > { %v11538_v40 = vsel %vm1738_vm7, %v13990_v49, %v11537_v22 }
 0x418   : > { %v11540_v39 = vsel %vm1738_vm7, %v11531_v54, %v13989_v9  ;;  %v11552_v44 = vpack.c.bf16 %v11538_v40, %v11538_v40  ;;  %v11777_v57 = vsel %vm1972_vm8, %v13994_v25, %v13995_v58 }
 0x419   : > { %v11764_v7 = vpop.permute.xlu0 %11763  ;;  %v11550_v1 = vpack.c.bf16 %v11540_v39, %v11540_v39 }
 0x41a   : > { %12951 = vmatmul.mubr.msk.bf16.vlgmr.msra.gmra.mrb[220].mxu1 %vm397_vm2, %v12943_v24  ;;  %v11576_v29 = vsel %vm401_vm1, %v11552_v44, 0  ;;  %v12988_v44 = vld [vmem:[%s17070_s4 + $0x34] sm:$0x3] }
 0x41b   : > { %11157 = vmatpush1.bf16.msra.mxu1 %v11098_v37  ;;  %11188 = vmatprep.mubr.bf16.mxu1 %v17087_v6  ;;  %v11546_v37 = vpack.c.bf16 %v11544_v35, %v11544_v35  ;;  %v11570_v13 = vsel %vm401_vm1, %v11550_v1, 0  ;;  %v17088_v1 = vld [vmem:[#allocation2_spill] sm:$0xff] }
 0x41c   : > { %12959 = vmatprep.subr.msk.bf16.mxu1 %vm401_vm1, %v11087_v50  ;;  %12949 = vmatmul.mubr.msk.bf16.vlgmr.msra.gmra.mrb[220].mxu0 %vm397_vm2, %v12943_v24  ;;  %v11542_v24 = vsel %vm1738_vm7, %v13984_v30, %v13985_v34  ;;  %v11539_v50 = vsel %vm1738_vm7, %v13989_v9, %v13990_v49  ;;  %v11779_v34 = vpack.c.bf16 %v11777_v57, %v11777_v57 }
 0x41d   : > { %11116 = vmatpush1.bf16.msra.mxu0 %v11092_v17  ;;  %11147 = vmatprep.mubr.bf16.mxu0 %v17087_v6  ;;  %v11548_v41 = vpack.c.bf16 %v11542_v24, %v11542_v24  ;;  %v13998_v17 = vpop.permute.xlu1 %13997  ;;  %v11551_v60 = vpack.c.bf16 %v11539_v50, %v11539_v50  ;;  %v11558_v8 = vsel %vm401_vm1, %v11546_v37, 0  ;;  %v11770_v21 = vpop.permute.xlu0 %11769 }
 0x41e   : > { %12957 = vmatprep.subr.msk.bf16.mxu0 %vm401_vm1, %v11085_v26  ;;  %v14000_v20 = vunpack.i.h.bf16 %v13998_v17  ;;  %v11791_v63 = vsel %vm401_vm1, %v11779_v34, 0 }
 0x41f   : > { %v11564_v26 = vsel %vm401_vm1, %v11548_v41, 0 }
 0x420   : > { %v11774_v55 = vsel %vm1972_vm8, %v14000_v20, %v11764_v7 }
 0x421   : > { %v14013_v42 = vpop.permute.xlu0 %14012 }
 0x422   : > { %12956 = vmatmul.mubr.msk.bf16.vlgmr.msra.gmra.mrb[216].mxu1 %vm397_vm2, %v12952_v11  ;;  %v14015_v15 = vunpack.i.h.bf16 %v14013_v42 }
 0x423   : > { %11239 = vmatpush1.bf16.msra.mxu1 %v11110_v3  ;;  %11270 = vmatprep.mubr.bf16.mxu1 %v17087_v6 }
 0x424   : > { %12964 = vmatprep.subr.msk.bf16.mxu1 %vm401_vm1, %v11316_v61  ;;  %12954 = vmatmul.mubr.msk.bf16.vlgmr.msra.gmra.mrb[216].mxu0 %vm397_vm2, %v12952_v11  ;;  %v12970_v61 = vld [vmem:[%s17070_s4 + $0x30] sm:$0x3] }
 0x425   : > { %11198 = vmatpush1.bf16.msra.mxu0 %v11104_v32  ;;  %11229 = vmatprep.mubr.bf16.mxu0 %v17087_v6  ;;  %v11782_v32 = vpack.c.bf16 %v11774_v55, %v11774_v55 }
 0x426   : > { %12962 = vmatprep.subr.msk.bf16.mxu0 %vm401_vm1, %v11314_v38  ;;  %v14003_v38 = vpop.permute.xlu1 %14002 }
 0x427   : > { %v14005_v59 = vunpack.i.h.bf16 %v14003_v38  ;;  %v14004_v45 = vunpack.i.l.bf16 %v14003_v38 }
 0x429   : > { %v11771_v30 = vsel %vm1972_vm8, %v14005_v59, %v11770_v21  ;;  %v11773_v23 = vsel %vm1972_vm8, %v11764_v7, %v14004_v45 }
 0x42a   : > { %12960 = vmatmul.mubr.msk.bf16.vlgmr.msra.gmra.mrb[220].mxu1 %vm397_vm2, %v12952_v11  ;;  %v11785_v10 = vpack.c.bf16 %v11771_v30, %v11771_v30 }
 0x42b   : > { %11390 = vmatpush1.bf16.msra.mxu1 %v11331_v47  ;;  %11421 = vmatprep.mubr.bf16.mxu1 %v17087_v6  ;;  %v14008_v47 = vpop.permute.xlu1 %14007 }
 0x42c   : > { %12968 = vmatprep.subr.msk.bf16.mxu1 %vm401_vm1, %v11320_v0  ;;  %12958 = vmatmul.mubr.msk.bf16.vlgmr.msra.gmra.mrb[220].mxu0 %vm397_vm2, %v12952_v11  ;;  %v13999_v11 = vunpack.i.l.bf16 %v13998_v17  ;;  %v11778_v0 = vsel %vm1972_vm8, %v11770_v21, %v13994_v25  ;;  %v14010_v28 = vunpack.i.h.bf16 %v14008_v47  ;;  %v14009_v24 = vunpack.i.l.bf16 %v14008_v47  ;;  %v12233_v25 = vld [vmem:[%s17072_s6] sm:$0x3] }
 0x42d   : > { %11349 = vmatpush1.bf16.msra.mxu0 %v11325_v62  ;;  %11380 = vmatprep.mubr.bf16.mxu0 %v17087_v6  ;;  %v11786_v62 = vpack.c.bf16 %v11778_v0, %v11778_v0  ;;  %v11809_v49 = vsel %vm401_vm1, %v11785_v10, 0 }
 0x42e   : > { %12966 = vmatprep.subr.msk.bf16.mxu0 %vm401_vm1, %v11318_v14  ;;  %v11776_v3 = vsel %vm1972_vm8, %v13995_v58, %v13999_v11  ;;  %v11775_v27 = vsel %vm1972_vm8, %v13999_v11, %v14000_v20  ;;  %v11772_v14 = vsel %vm1972_vm8, %v14004_v45, %v14005_v59  ;;  %v12010_v50 = vsel %vm2206_vm9, %v14009_v24, %v14010_v28 }
 0x42f   : > { %v11780_v12 = vpack.c.bf16 %v11776_v3, %v11776_v3  ;;  %v11781_v36 = vpack.c.bf16 %v11775_v27, %v11775_v27  ;;  %v11784_v54 = vpack.c.bf16 %v11772_v14, %v11772_v14  ;;  %v11997_v46 = vpop.permute.xlu1 %11996  ;;  %v17089_v3 = vld [vmem:[#allocation3_spill] sm:$0xff] }
 0x430   : > { %v12007_v16 = vsel %vm2206_vm9, %v14015_v15, %v11997_v46 }
 0x431   : > { %v11797_v48 = vsel %vm401_vm1, %v11781_v36, 0  ;;  %v12015_v22 = vpack.c.bf16 %v12007_v16, %v12007_v16 }
 0x432   : > { %12965 = vmatmul.mubr.msk.bf16.vlgmr.msra.gmra.mrb[216].mxu1 %vm397_vm2, %v12961_v19 }
 0x433   : > { %11472 = vmatpush1.bf16.msra.mxu1 %v11343_v31  ;;  %11503 = vmatprep.mubr.bf16.mxu1 %v17087_v6  ;;  %v11783_v31 = vpack.c.bf16 %v11773_v23, %v11773_v23  ;;  %v12003_v51 = vpop.permute.xlu1 %12002 }
 0x434   : > { %12973 = vmatprep.subr.msk.bf16.mxu1 %vm401_vm1, %v11549_v4  ;;  %12963 = vmatmul.mubr.msk.bf16.vlgmr.msra.gmra.mrb[216].mxu0 %vm397_vm2, %v12961_v19  ;;  %v12979_v4 = vld [vmem:[%s17070_s4 + $0x32] sm:$0x3]  ;;  %v12011_v17 = vsel %vm2206_vm9, %v12003_v51, %v14009_v24 }
 0x435   : > { %11431 = vmatpush1.bf16.msra.mxu0 %v11337_v33  ;;  %11462 = vmatprep.mubr.bf16.mxu0 %v17087_v6  ;;  %v14018_v33 = vpop.permute.xlu0 %14017  ;;  %v11803_v41 = vsel %vm401_vm1, %v11783_v31, 0 }
 0x436   : > { %12971 = vmatprep.subr.msk.bf16.mxu0 %vm401_vm1, %v11547_v53  ;;  %v14020_v43 = vunpack.i.h.bf16 %v14018_v33  ;;  %v14019_v37 = vunpack.i.l.bf16 %v14018_v33 }
 0x437   : > { %v12238_v38 = vpop.permute.xlu1 %12237 }
 0x438   : > { %v12005_v40 = vsel %vm2206_vm9, %v14019_v37, %v14020_v43  ;;  %v12006_v58 = vsel %vm2206_vm9, %v11997_v46, %v14019_v37 }
 0x439   : > { %v12017_v20 = vpack.c.bf16 %v12005_v40, %v12005_v40  ;;  %v12016_v55 = vpack.c.bf16 %v12006_v58, %v12006_v58 }
 0x43a   : > { %12969 = vmatmul.mubr.msk.bf16.vlgmr.msra.gmra.mrb[220].mxu1 %vm397_vm2, %v12961_v19 }
 0x43b   : > { %11623 = vmatpush1.bf16.msra.mxu1 %v11564_v26  ;;  %11654 = vmatprep.mubr.bf16.mxu1 %v17087_v6  ;;  %v12012_v26 = vpack.c.bf16 %v12010_v50, %v12010_v50  ;;  %v12036_v18 = vsel %vm401_vm1, %v12016_v55, 0 }
 0x43c   : > { %12977 = vmatprep.subr.msk.bf16.mxu1 %vm401_vm1, %v11553_v52  ;;  %12967 = vmatmul.mubr.msk.bf16.vlgmr.msra.gmra.mrb[220].mxu0 %vm397_vm2, %v12961_v19  ;;  %v14014_v19 = vunpack.i.l.bf16 %v14013_v42 }
 0x43d   : > { %11582 = vmatpush1.bf16.msra.mxu0 %v11558_v8  ;;  %11613 = vmatprep.mubr.bf16.mxu0 %v17087_v6  ;;  %v12004_v8 = vsel %vm2206_vm9, %v14020_v43, %v12003_v51  ;;  %v12024_v11 = vsel %vm401_vm1, %v12012_v26, 0 }
 0x43e   : > { %12975 = vmatprep.subr.msk.bf16.mxu0 %vm401_vm1, %v11551_v60  ;;  %v12009_v53 = vsel %vm2206_vm9, %v14010_v28, %v14014_v19  ;;  %v12008_v9 = vsel %vm2206_vm9, %v14014_v19, %v14015_v15  ;;  %v12019_v60 = vpack.c.bf16 %v12011_v17, %v12011_v17  ;;  %v12018_v39 = vpack.c.bf16 %v12004_v8, %v12004_v8 }
 0x43f   : > { %v12013_v35 = vpack.c.bf16 %v12009_v53, %v12009_v53  ;;  %v12014_v52 = vpack.c.bf16 %v12008_v9, %v12008_v9 }
 0x441   : > { %v12030_v7 = vsel %vm401_vm1, %v12014_v52, 0 }
 0x442   : > { %12974 = vmatmul.mubr.msk.bf16.vlgmr.msra.gmra.mrb[216].mxu1 %vm397_vm2, %v12970_v61 }
 0x443   : > { %11705 = vmatpush1.bf16.msra.mxu1 %v11576_v29  ;;  %11736 = vmatprep.mubr.bf16.mxu1 %v17087_v6 }
 0x444   : > { %12982 = vmatprep.subr.msk.bf16.mxu1 %vm401_vm1, %v11782_v32  ;;  %12972 = vmatmul.mubr.msk.bf16.vlgmr.msra.gmra.mrb[216].mxu0 %vm397_vm2, %v12970_v61  ;;  %v12223_v32 = vpop.permute.xlu0 %12222 }
 0x445   : > { %11664 = vmatpush1.bf16.msra.mxu0 %v11570_v13  ;;  %11695 = vmatprep.mubr.bf16.mxu0 %v17087_v6  ;;  %v13009_v21 = vadd.f32 %v12238_v38, %v12223_v32 }
 0x446   : > { %12980 = vmatprep.subr.msk.bf16.mxu0 %vm401_vm1, %v11780_v12 }
 0x44a   : > { %12978 = vmatmul.mubr.msk.bf16.vlgmr.msra.gmra.mrb[220].mxu1 %vm397_vm2, %v12970_v61 }
 0x44b   : > { %11856 = vmatpush1.bf16.msra.mxu1 %v11797_v48  ;;  %11887 = vmatprep.mubr.bf16.mxu1 %v17087_v6 }
 0x44c   : > { %12986 = vmatprep.subr.msk.bf16.mxu1 %vm401_vm1, %v11786_v62  ;;  %12976 = vmatmul.mubr.msk.bf16.vlgmr.msra.gmra.mrb[220].mxu0 %vm397_vm2, %v12970_v61  ;;  %v12042_v61 = vsel %vm401_vm1, %v12018_v39, 0 }
 0x44d   : > { %11815 = vmatpush1.bf16.msra.mxu0 %v11791_v63  ;;  %11846 = vmatprep.mubr.bf16.mxu0 %v17087_v6 }
 0x44e   : > { %12984 = vmatprep.subr.msk.bf16.mxu0 %vm401_vm1, %v11784_v54 }
 0x452   : > { %12983 = vmatmul.mubr.msk.bf16.vlgmr.msra.gmra.mrb[216].mxu1 %vm397_vm2, %v12979_v4 }
 0x453   : > { %11938 = vmatpush1.bf16.msra.mxu1 %v11809_v49  ;;  %11969 = vmatprep.mubr.bf16.mxu1 %v17087_v6 }
 0x454   : > { %12991 = vmatprep.subr.msk.bf16.mxu1 %vm401_vm1, %v12015_v22  ;;  %12981 = vmatmul.mubr.msk.bf16.vlgmr.msra.gmra.mrb[216].mxu0 %vm397_vm2, %v12979_v4 }
 0x455   : > { %11897 = vmatpush1.bf16.msra.mxu0 %v11803_v41  ;;  %11928 = vmatprep.mubr.bf16.mxu0 %v17087_v6 }
 0x456   : > { %12989 = vmatprep.subr.msk.bf16.mxu0 %vm401_vm1, %v12013_v35 }
 0x45a   : > { %12987 = vmatmul.mubr.msk.bf16.vlgmr.msra.gmra.mrb[220].mxu1 %vm397_vm2, %v12979_v4 }
 0x45b   : > { %12089 = vmatpush1.bf16.msra.mxu1 %v12030_v7  ;;  %12120 = vmatprep.mubr.bf16.mxu1 %v17087_v6 }
 0x45c   : > { %12995 = vmatprep.subr.msk.bf16.mxu1 %vm401_vm1, %v12019_v60  ;;  %12985 = vmatmul.mubr.msk.bf16.vlgmr.msra.gmra.mrb[220].mxu0 %vm397_vm2, %v12979_v4 }
 0x45d   : > { %12048 = vmatpush1.bf16.msra.mxu0 %v12024_v11  ;;  %12079 = vmatprep.mubr.bf16.mxu0 %v17087_v6 }
 0x45e   : > { %12993 = vmatprep.subr.msk.bf16.mxu0 %vm401_vm1, %v12017_v20 }
 0x462   : > { %12992 = vmatmul.mubr.msk.bf16.vlgmr.msra.gmra.mrb[216].mxu1 %vm397_vm2, %v12988_v44 }
 0x463   : > { %12171 = vmatpush1.bf16.msra.mxu1 %v12042_v61  ;;  %12202 = vmatprep.mubr.bf16.mxu1 %v17087_v6 }
 0x464   : > { %12990 = vmatmul.mubr.msk.bf16.vlgmr.msra.gmra.mrb[216].mxu0 %vm397_vm2, %v12988_v44  ;;  %12999 = vmatprep.subr.msk.bf16.mxu1 %vm401_vm1, %v14405_v56  ;;  %v17090_v56 = vld [vmem:[#allocation4_spill] sm:$0xff] }
 0x465   : > { %12130 = vmatpush1.bf16.msra.mxu0 %v12036_v18  ;;  %12161 = vmatprep.mubr.bf16.mxu0 %v17087_v6 }
 0x466   : > { %12997 = vmatprep.subr.msk.bf16.mxu0 %vm401_vm1, %v17088_v1 }
 0x46a   : > { %12996 = vmatmul.mubr.msk.bf16.vlgmr.msra.gmra.mrb[220].mxu1 %vm397_vm2, %v12988_v44 }
 0x46b   : > { %12285 = vmatpush1.bf16.msra.mxu1 %v14430_v2  ;;  %12316 = vmatprep.mubr.bf16.mxu1 %v17087_v6  ;;  %v17091_v2 = vld [vmem:[#allocation6_spill] sm:$0xff] }
 0x46c   : > { %12994 = vmatmul.mubr.msk.bf16.vlgmr.msra.gmra.mrb[220].mxu0 %vm397_vm2, %v12988_v44  ;;  %13003 = vmatprep.subr.msk.bf16.mxu1 %vm401_vm1, %v14434_v5  ;;  %v17092_v5 = vld [vmem:[#allocation5_spill] sm:$0xff] }
 0x46d   : > { %12244 = vmatpush1.bf16.msra.mxu0 %v17089_v3  ;;  %12275 = vmatprep.mubr.bf16.mxu0 %v17087_v6 }
 0x46e   : > { %13001 = vmatprep.subr.msk.bf16.mxu0 %vm401_vm1, %v17090_v56 }
 0x472   : > { %13000 = vmatmul.mubr.msk.bf16.vlgmr.msra.gmra.mrb[216].mxu1 %vm397_vm2, %v12233_v25 }
 0x473   : > { %12367 = vmatpush1.bf16.msra.mxu1 %v17091_v2  ;;  %12398 = vmatprep.mubr.bf16.mxu1 %v17087_v6 }
 0x474   : > { %12998 = vmatmul.mubr.msk.bf16.vlgmr.msra.gmra.mrb[216].mxu0 %vm397_vm2, %v12233_v25 }
 0x475   : > { %12326 = vmatpush1.bf16.msra.mxu0 %v17092_v5  ;;  %12357 = vmatprep.mubr.bf16.mxu0 %v17087_v6 }
 0x47a   : > { %13004 = vmatmul.mubr.msk.bf16.vlgmr.msra.gmra.mrb[220].mxu1 %vm397_vm2, %v12233_v25 }
 0x47c   : > { %13002 = vmatmul.mubr.msk.bf16.vlgmr.msra.gmra.mrb[220].mxu0 %vm397_vm2, %v12233_v25 }
 0x545   : > { %v12318_v29 = vpop.f32.mrb[216].mxu1 }
 0x546   : > { %v13014_v27 = vadd.f32 %v13009_v21, %v12318_v29  ;;  %v12320_v12 = vpop.f32.mrb[217].mxu1 }
 0x547   : > { %v13016_v13 = vadd.f32 %v13009_v21, %v12320_v12  ;;  %v12277_v59 = vpop.f32.mrb[216].mxu0  ;;  %v12322_v45 = vpop.f32.mrb[218].mxu1 }
 0x548   : > { %v12417_v57 = vmax.f32 %v13014_v27, 0.0  ;;  %v13010_v36 = vadd.f32 %v13009_v21, %v12277_v59  ;;  %v12279_v0 = vpop.f32.mrb[217].mxu0  ;;  %v12323_v47 = vpop.f32.mrb[219].mxu1 }
 0x549   : > { %v12418_v42 = vmax.f32 %v13016_v13, 0.0  ;;  %v13012_v6 = vadd.f32 %v13009_v21, %v12279_v0  ;;  %v12281_v34 = vpop.f32.mrb[218].mxu0 }
 0x54a   : > { %v12415_v14 = vmax.f32 %v13010_v36, 0.0  ;;  %v12282_v62 = vpop.f32.mrb[219].mxu0 }
 0x54b   : > { %v12432_v48 = vcombine.low %v12417_v57, %v12418_v42  ;;  %v12416_v30 = vmax.f32 %v13012_v6, 0.0 }
 0x54d   : > { %12440 = vst [vmem:[%s305_s25 + $0x8] sm:$0xff] %v12432_v48  ;;  %v12431_v15 = vcombine.low %v12415_v14, %v12416_v30  ;;  %v12400_v54 = vpop.f32.mrb[220].mxu1 }
 0x54e   : > { %v13022_v63 = vadd.f32 %v13009_v21, %v12400_v54  ;;  %v12402_v23 = vpop.f32.mrb[221].mxu1 }
 0x54f   : > { %12439 = vst [vmem:[%s305_s25] sm:$0xff] %v12431_v15  ;;  %v13024_v19 = vadd.f32 %v13009_v21, %v12402_v23  ;;  %v12359_v10 = vpop.f32.mrb[220].mxu0  ;;  %v12404_v46 = vpop.f32.mrb[222].mxu1 }
 0x550   : > { %v12421_v28 = vmax.f32 %v13022_v63, 0.0  ;;  %v13018_v16 = vadd.f32 %v13009_v21, %v12359_v10  ;;  %v12361_v4 = vpop.f32.mrb[221].mxu0  ;;  %v12405_v31 = vpop.f32.mrb[223].mxu1 }
 0x551   : > { %v12422_v24 = vmax.f32 %v13024_v19, 0.0  ;;  %v13020_v53 = vadd.f32 %v13009_v21, %v12361_v4  ;;  %v12363_v22 = vpop.f32.mrb[222].mxu0 }
 0x552   : > { %v12419_v33 = vmax.f32 %v13018_v16, 0.0  ;;  %v12364_v49 = vpop.f32.mrb[223].mxu0 }
 0x553   : > { %v12434_v9 = vcombine.low %v12421_v28, %v12422_v24  ;;  %v12420_v35 = vmax.f32 %v13020_v53, 0.0 }
 0x555   : > { %12442 = vst [vmem:[%s305_s25 + $0x18] sm:$0xff] %v12434_v9  ;;  %v12433_v51 = vcombine.low %v12419_v33, %v12420_v35 }
 0x557   : > { %12441 = vst [vmem:[%s305_s25 + $0x10] sm:$0xff] %v12433_v51 }
 0x558 PF: > { %s18_s27 = sadd.s32 1, %s14033_s27  }
 0x559   : > { %p15_p4 = scmp.ge.s32.totalorder %s18_s27, 4  }
 0x55b   :  { %17 = sbr.rel (!%p15_p4) target bundleno = 1 (0x1), region = 136 }

</bundles_post_ra>
